<compile_context>
chip_gen: v7x
topology: tpu7x:2x2x1
jax: 0.10.0
libtpu: 0.0.40
codegen_flags: <defaults>
</compile_context>

<pallas_src>
import jax
import jax.numpy as jnp
from jax import lax
from jax.experimental import pallas as pl
from jax.experimental.pallas import tpu as pltpu


# -----------------------------------------------------------------------------
# Fused encoder kernel: 3x(conv3x3 + folded BN) + residual + ReLU + mean-over-H
# One grid step = one batch element; everything stays in VMEM.
# -----------------------------------------------------------------------------
def _conv3x3_fused(x_hwc, pad_ref, w_ref, b_ref, relu):
    """3x3 / stride-1 / pad-1 conv with BN folded into (w, b), via in-VMEM im2col."""
    Hh, Ww, Cc = x_hwc.shape
    # zero-padded copy of the activation in a VMEM scratch (borders stay 0)
    pad_ref[...] = jnp.zeros(pad_ref.shape, pad_ref.dtype)
    pad_ref[1:Hh + 1, 1:Ww + 1, :] = x_hwc
    xp = pad_ref[...]
    # im2col built from 9 shifted views -- never touches HBM
    patches = [
        xp[dh:dh + Hh, dw:dw + Ww, :].reshape(Hh * Ww, Cc)
        for dh in range(3) for dw in range(3)
    ]
    cols = jnp.concatenate(patches, axis=-1).astype(jnp.bfloat16)   # (H*W, 9C)
    y = jnp.dot(cols, w_ref[...], preferred_element_type=jnp.float32)
    y = y + b_ref[...]                                              # bias (BN folded)
    if relu:
        y = jnp.maximum(y, 0.0)
    return y.reshape(Hh, Ww, w_ref.shape[1])


def _encoder_kernel(x_ref, w1_ref, b1_ref, w2_ref, b2_ref, w3_ref, b3_ref,
                    feats_ref, pad_s, pad_m):
    x = x_ref[0]                                            # (H, W, Cin)
    h1 = _conv3x3_fused(x, pad_s, w1_ref, b1_ref, relu=True)
    r = _conv3x3_fused(h1, pad_m, w2_ref, b2_ref, relu=True)
    r = _conv3x3_fused(r, pad_m, w3_ref, b3_ref, relu=False)
    h2 = jnp.maximum(r + h1, 0.0)                           # residual + ReLU (fused)
    feats_ref[0] = jnp.mean(h2, axis=0)                     # mean over H -> (W=T, C)


def encoder_forward(x_nhwc, p):
    B, H, W, Cin = x_nhwc.shape
    Cmid = p["conv1_w"].shape[1]
    return pl.pallas_call(
        _encoder_kernel,
        out_shape=jax.ShapeDtypeStruct((B, W, Cmid), jnp.float32),
        grid=(B,),
        in_specs=[
            pl.BlockSpec((1, H, W, Cin), lambda b: (b, 0, 0, 0)),
            pl.BlockSpec((9 * Cin, Cmid), lambda b: (0, 0)),
            pl.BlockSpec((1, Cmid), lambda b: (0, 0)),
            pl.BlockSpec((9 * Cmid, Cmid), lambda b: (0, 0)),
            pl.BlockSpec((1, Cmid), lambda b: (0, 0)),
            pl.BlockSpec((9 * Cmid, Cmid), lambda b: (0, 0)),
            pl.BlockSpec((1, Cmid), lambda b: (0, 0)),
        ],
        out_specs=pl.BlockSpec((1, W, Cmid), lambda b: (b, 0, 0)),
        scratch_shapes=[
            pltpu.VMEM((H + 2, W + 2, Cin), jnp.float32),
            pltpu.VMEM((H + 2, W + 2, Cmid), jnp.float32),
        ],
        compiler_params=pltpu.CompilerParams(
            dimension_semantics=("parallel",),        # v7x: batch split across 2 TCs
            vmem_limit_bytes=32 * 1024 * 1024,
        ),
    )(x_nhwc, p["conv1_w"], p["conv1_b"], p["conv2_w"], p["conv2_b"],
      p["conv3_w"], p["conv3_b"])


# -----------------------------------------------------------------------------
# Fused BiLSTM + classifier kernel.
#   * input projection hoisted: gx = X @ [Wih_f | Wih_b] + [b_f | b_b]  (one matmul)
#   * fwd & bwd directions interleaved in ONE unrolled loop (PyTorch gate order i,f,g,o)
#   * FC fused into epilogue; output stored pre-permuted as (B, n_classes, T)
# -----------------------------------------------------------------------------
def _bilstm_head_kernel(x_ref, wih_ref, bih_ref, whhf_ref, whhb_ref,
                        fcw_ref, fcb_ref, o_ref, gx_sc, hf_sc, hb_sc):
    T, B, D = x_ref.shape
    H = whhf_ref.shape[0]
    G = 4 * H

    # --- hoisted input projection for both directions (bf16 MXU, f32 acc) ---
    xf = x_ref[...].reshape(T * B, D).astype(jnp.bfloat16)
    gx = jnp.dot(xf, wih_ref[...], preferred_element_type=jnp.float32) + bih_ref[...]
    gx_sc[...] = gx.reshape(T, B, 2 * G)

    whh_f = whhf_ref[...]
    whh_b = whhb_ref[...]

    h0 = jnp.zeros((B, H), jnp.float32)
    c0 = jnp.zeros((2 * B, H), jnp.float32)

    def step(t, carry):
        h_f, h_b, c2 = carry
        tt = T - 1 - t
        gt = gx_sc[t]                        # (B, 8H) gates-from-x, time t (fwd)
        gtt = gx_sc[tt]                      # (B, 8H) gates-from-x, time T-1-t (bwd)
        gf = gt[:, :G] + jnp.dot(h_f.astype(jnp.bfloat16), whh_f,
                                 preferred_element_type=jnp.float32)
        gb = gtt[:, G:] + jnp.dot(h_b.astype(jnp.bfloat16), whh_b,
                                  preferred_element_type=jnp.float32)
        g2 = jnp.concatenate([gf, gb], axis=0)          # (2B, 4H): both directions
        i = jax.nn.sigmoid(g2[:, 0 * H:1 * H])
        f = jax.nn.sigmoid(g2[:, 1 * H:2 * H])
        g = jnp.tanh(g2[:, 2 * H:3 * H])
        o = jax.nn.sigmoid(g2[:, 3 * H:4 * H])
        c2n = f * c2 + i * g
        h2 = o * jnp.tanh(c2n)
        h_fn = h2[:B]
        h_bn = h2[B:]
        hf_sc[t] = h_fn
        hb_sc[tt] = h_bn
        return (h_fn, h_bn, c2n)

    lax.fori_loop(0, T, step, (h0, h0, c0), unroll=True)

    # --- fused classifier; write logits already permuted as (B, n_classes, T) ---
    hf_all = hf_sc[...]                       # (T, B, H)
    hb_all = hb_sc[...]
    fcw = fcw_ref[...]                        # (nc, 2H)  (pre-transposed at init)
    fcb = fcb_ref[...]                        # (nc, 1)
    for b in range(B):                        # B is small & static
        hcat_b = jnp.concatenate([hf_all[:, b, :], hb_all[:, b, :]], axis=-1)  # (T, 2H)
        logits_b = lax.dot_general(            # (nc, 2H) x (T, 2H)^T -> (nc, T)
            fcw, hcat_b, (((1,), (1,)), ((), ())),
            preferred_element_type=jnp.float32)
        o_ref[b] = logits_b + fcb


def bilstm_head_forward(x_tbd, p):
    T, B, D = x_tbd.shape
    H = p["whh_f"].shape[0]
    nc = p["fc_wT"].shape[0]
    vmem = pl.BlockSpec(memory_space=pltpu.MemorySpace.VMEM)
    return pl.pallas_call(
        _bilstm_head_kernel,
        out_shape=jax.ShapeDtypeStruct((B, nc, T), jnp.float32),
        in_specs=[vmem] * 7,
        out_specs=vmem,
        scratch_shapes=[
            pltpu.VMEM((T, B, 8 * H), jnp.float32),   # hoisted x-gates
            pltpu.VMEM((T, B, H), jnp.float32),       # forward hidden states
            pltpu.VMEM((T, B, H), jnp.float32),       # backward hidden states
        ],
        compiler_params=pltpu.CompilerParams(vmem_limit_bytes=32 * 1024 * 1024),
    )(x_tbd, p["wih"], p["bih"], p["whh_f"], p["whh_b"], p["fc_wT"], p["fc_bT"])


# -----------------------------------------------------------------------------
# Deterministic parameter init (synthetic) with constant folding:
#   BN (eval mode, mean=0, var=1) and conv bias folded into (w, b); LSTM input
#   weights/biases packed [fwd | bwd]; FC weight pre-transposed for the fused
#   (B, n_classes, T) epilogue.  MXU operands stored as bf16.
# -----------------------------------------------------------------------------
def init_params(key, c_in=4, c_mid=32, hidden=32, n_classes=8):
    ks = jax.random.split(key, 16)

    def w(k, shape, s=0.1):
        return (s * jax.random.normal(k, shape)).astype(jnp.float32)

    eps = 1e-5

    def bn(kg, kb, n):
        gamma = 1.0 + w(kg, (1, n))
        beta = w(kb, (1, n))
        return gamma / jnp.sqrt(1.0 + eps), beta     # scale, shift

    def fold_conv(wc, bc, scale, shift):
        # ((x@w)+b)*scale + shift  ==  x@(w*scale) + (b*scale + shift)
        return (wc * scale).astype(jnp.bfloat16), bc * scale + shift

    p = {}
    s1, t1 = bn(ks[2], ks[3], c_mid)
    p["conv1_w"], p["conv1_b"] = fold_conv(w(ks[0], (9 * c_in, c_mid)),
                                           w(ks[1], (1, c_mid)), s1, t1)
    s2, t2 = bn(ks[6], ks[7], c_mid)
    p["conv2_w"], p["conv2_b"] = fold_conv(w(ks[4], (9 * c_mid, c_mid)),
                                           w(ks[5], (1, c_mid)), s2, t2)
    s3, t3 = bn(ks[10], ks[11], c_mid)
    p["conv3_w"], p["conv3_b"] = fold_conv(w(ks[8], (9 * c_mid, c_mid)),
                                           w(ks[9], (1, c_mid)), s3, t3)

    lk = jax.random.split(ks[12], 6)
    wih_f = w(lk[0], (c_mid, 4 * hidden))
    whh_f = w(lk[1], (hidden, 4 * hidden))
    b_f = w(lk[2], (1, 4 * hidden))
    wih_b = w(lk[3], (c_mid, 4 * hidden))
    whh_b = w(lk[4], (hidden, 4 * hidden))
    b_b = w(lk[5], (1, 4 * hidden))
    p["wih"] = jnp.concatenate([wih_f, wih_b], axis=1).astype(jnp.bfloat16)  # (D, 8H)
    p["bih"] = jnp.concatenate([b_f, b_b], axis=1)                           # (1, 8H)
    p["whh_f"] = whh_f.astype(jnp.bfloat16)
    p["whh_b"] = whh_b.astype(jnp.bfloat16)

    fc_w = w(ks[13], (2 * hidden, n_classes))
    fc_b = w(ks[14], (1, n_classes))
    p["fc_wT"] = fc_w.T                               # (nc, 2H)
    p["fc_bT"] = fc_b.reshape(n_classes, 1)           # (nc, 1)
    return p


# -----------------------------------------------------------------------------
# Full forward: encoder -> BiLSTM head -> (B, n_classes, T)
# Only two pallas_calls; remaining XLA ops are two tiny transposes (<=2 KiB).
# -----------------------------------------------------------------------------
@jax.jit
def resnet_bilstm_forward(x_nchw, params):
    x = jnp.transpose(x_nchw, (0, 2, 3, 1)).astype(jnp.float32)   # NCHW -> NHWC
    feats = encoder_forward(x, params)                # (B, T=W, D)
    x_tbd = jnp.transpose(feats, (1, 0, 2))           # (T, B, D) -- tiny
    return bilstm_head_forward(x_tbd, params)         # (B, n_classes, T)


if __name__ == "__main__":
    key = jax.random.PRNGKey(0)
    k_x, k_p = jax.random.split(key)
    B, C_in, H, W = 2, 4, 16, 16
    x = jax.random.normal(k_x, (B, C_in, H, W), jnp.float32)      # NCHW input
    params = init_params(k_p, c_in=C_in, c_mid=32, hidden=32, n_classes=8)

    out = resnet_bilstm_forward(x, params)
    out = jax.block_until_ready(out)
    assert out.shape == (B, 8, W), out.shape
    assert jnp.all(jnp.isfinite(out))
    print("KERNEL_OK")
</pallas_src>

<mosaic_0001>
module attributes {stable_mosaic.version = 11 : i64} {
  func.func @_encoder_kernel(%arg0: i32, %arg1: memref<1x16x16x4xf32, #tpu.memory_space<vmem>>, %arg2: memref<36x32xbf16, #tpu.memory_space<vmem>>, %arg3: memref<1x32xf32, #tpu.memory_space<vmem>>, %arg4: memref<288x32xbf16, #tpu.memory_space<vmem>>, %arg5: memref<1x32xf32, #tpu.memory_space<vmem>>, %arg6: memref<288x32xbf16, #tpu.memory_space<vmem>>, %arg7: memref<1x32xf32, #tpu.memory_space<vmem>>, %arg8: memref<1x16x32xf32, #tpu.memory_space<vmem>>, %arg9: memref<18x18x4xf32, #tpu.memory_space<vmem>>, %arg10: memref<18x18x32xf32, #tpu.memory_space<vmem>>) attributes {dimension_semantics = [#tpu.dimension_semantics<parallel>], iteration_bounds = array<i64: 2>, scalar_prefetch = 0 : i64, scratch_operands = 2 : i64, tpu.core_type = #tpu.core_type<tc>, window_params = [{transform_indices = @transform_0, window_bounds = array<i64: 1, 16, 16, 4>}, {pipeline_mode = #tpu.pipeline_mode<synchronous>, transform_indices = @transform_1, window_bounds = array<i64: 36, 32>}, {pipeline_mode = #tpu.pipeline_mode<synchronous>, transform_indices = @transform_2, window_bounds = array<i64: 1, 32>}, {pipeline_mode = #tpu.pipeline_mode<synchronous>, transform_indices = @transform_3, window_bounds = array<i64: 288, 32>}, {pipeline_mode = #tpu.pipeline_mode<synchronous>, transform_indices = @transform_4, window_bounds = array<i64: 1, 32>}, {pipeline_mode = #tpu.pipeline_mode<synchronous>, transform_indices = @transform_5, window_bounds = array<i64: 288, 32>}, {pipeline_mode = #tpu.pipeline_mode<synchronous>, transform_indices = @transform_6, window_bounds = array<i64: 1, 32>}, {transform_indices = @transform_7, window_bounds = array<i64: 1, 16, 32>}]} {
    %c0 = arith.constant 0 : index
    %c0_0 = arith.constant 0 : index
    %c0_1 = arith.constant 0 : index
    %c0_2 = arith.constant 0 : index
    %0 = vector.load %arg1[%c0, %c0_0, %c0_1, %c0_2] : memref<1x16x16x4xf32, #tpu.memory_space<vmem>>, vector<1x16x16x4xf32>
    %1 = vector.shape_cast %0 : vector<1x16x16x4xf32> to vector<16x16x4xf32>
    %cst = arith.constant 0.000000e+00 : f32
    %2 = vector.broadcast %cst : f32 to vector<18x18x4xf32>
    %c0_3 = arith.constant 0 : index
    %c0_4 = arith.constant 0 : index
    %c0_5 = arith.constant 0 : index
    %3 = vector.load %arg9[%c0_3, %c0_4, %c0_5] : memref<18x18x4xf32, #tpu.memory_space<vmem>>, vector<18x18x4xf32>
    tpu.vector_store %arg9[%c0_3, %c0_4, %c0_5], %2 {strides = array<i32>} : memref<18x18x4xf32, #tpu.memory_space<vmem>>, vector<18x18x4xf32>,
    %c1 = arith.constant 1 : index
    %c1_6 = arith.constant 1 : index
    %c0_7 = arith.constant 0 : index
    %4 = vector.load %arg9[%c1, %c1_6, %c0_7] : memref<18x18x4xf32, #tpu.memory_space<vmem>>, vector<16x16x4xf32>
    tpu.vector_store %arg9[%c1, %c1_6, %c0_7], %1 {strides = array<i32>} : memref<18x18x4xf32, #tpu.memory_space<vmem>>, vector<16x16x4xf32>,
    %c0_8 = arith.constant 0 : index
    %c0_9 = arith.constant 0 : index
    %c0_10 = arith.constant 0 : index
    %5 = vector.load %arg9[%c0_8, %c0_9, %c0_10] : memref<18x18x4xf32, #tpu.memory_space<vmem>>, vector<18x18x4xf32>
    %6 = vector.extract_strided_slice %5 {offsets = [0, 0, 0], sizes = [16, 16, 4], strides = [1, 1, 1]} : vector<18x18x4xf32> to vector<16x16x4xf32>
    %7 = vector.shape_cast %6 : vector<16x16x4xf32> to vector<256x4xf32>
    %8 = vector.extract_strided_slice %5 {offsets = [0, 1, 0], sizes = [16, 16, 4], strides = [1, 1, 1]} : vector<18x18x4xf32> to vector<16x16x4xf32>
    %9 = vector.shape_cast %8 : vector<16x16x4xf32> to vector<256x4xf32>
    %10 = vector.extract_strided_slice %5 {offsets = [0, 2, 0], sizes = [16, 16, 4], strides = [1, 1, 1]} : vector<18x18x4xf32> to vector<16x16x4xf32>
    %11 = vector.shape_cast %10 : vector<16x16x4xf32> to vector<256x4xf32>
    %12 = vector.extract_strided_slice %5 {offsets = [1, 0, 0], sizes = [16, 16, 4], strides = [1, 1, 1]} : vector<18x18x4xf32> to vector<16x16x4xf32>
    %13 = vector.shape_cast %12 : vector<16x16x4xf32> to vector<256x4xf32>
    %14 = vector.extract_strided_slice %5 {offsets = [1, 1, 0], sizes = [16, 16, 4], strides = [1, 1, 1]} : vector<18x18x4xf32> to vector<16x16x4xf32>
    %15 = vector.shape_cast %14 : vector<16x16x4xf32> to vector<256x4xf32>
    %16 = vector.extract_strided_slice %5 {offsets = [1, 2, 0], sizes = [16, 16, 4], strides = [1, 1, 1]} : vector<18x18x4xf32> to vector<16x16x4xf32>
    %17 = vector.shape_cast %16 : vector<16x16x4xf32> to vector<256x4xf32>
    %18 = vector.extract_strided_slice %5 {offsets = [2, 0, 0], sizes = [16, 16, 4], strides = [1, 1, 1]} : vector<18x18x4xf32> to vector<16x16x4xf32>
    %19 = vector.shape_cast %18 : vector<16x16x4xf32> to vector<256x4xf32>
    %20 = vector.extract_strided_slice %5 {offsets = [2, 1, 0], sizes = [16, 16, 4], strides = [1, 1, 1]} : vector<18x18x4xf32> to vector<16x16x4xf32>
    %21 = vector.shape_cast %20 : vector<16x16x4xf32> to vector<256x4xf32>
    %22 = vector.extract_strided_slice %5 {offsets = [2, 2, 0], sizes = [16, 16, 4], strides = [1, 1, 1]} : vector<18x18x4xf32> to vector<16x16x4xf32>
    %23 = vector.shape_cast %22 : vector<16x16x4xf32> to vector<256x4xf32>
    %24 = tpu.concatenate %7, %9, %11, %13, %15, %17, %19, %21, %23 in 1 : vector<256x4xf32>, vector<256x4xf32>, vector<256x4xf32>, vector<256x4xf32>, vector<256x4xf32>, vector<256x4xf32>, vector<256x4xf32>, vector<256x4xf32>, vector<256x4xf32> -> vector<256x36xf32>
    %25 = arith.truncf %24 : vector<256x36xf32> to vector<256x36xbf16>
    %c0_11 = arith.constant 0 : index
    %c0_12 = arith.constant 0 : index
    %26 = vector.load %arg2[%c0_11, %c0_12] : memref<36x32xbf16, #tpu.memory_space<vmem>>, vector<36x32xbf16>
    %cst_13 = arith.constant dense<0.000000e+00> : vector<256x32xf32>
    %27 = tpu.matmul %25, %26, %cst_13 {dimension_numbers = #tpu.dot_dimension_numbers<[1], [0], [0], [1], [0, 0, 1, 1], [], []>} : vector<256x36xbf16>, vector<36x32xbf16>, vector<256x32xf32> -> vector<256x32xf32>
    %c0_14 = arith.constant 0 : index
    %c0_15 = arith.constant 0 : index
    %28 = vector.load %arg3[%c0_14, %c0_15] : memref<1x32xf32, #tpu.memory_space<vmem>>, vector<1x32xf32>
    %29 = vector.broadcast %28 : vector<1x32xf32> to vector<256x32xf32>
    %30 = arith.addf %27, %29 : vector<256x32xf32>
    %cst_16 = arith.constant 0.000000e+00 : f32
    %31 = vector.broadcast %cst_16 : f32 to vector<256x32xf32>
    %32 = arith.maximumf %30, %31 : vector<256x32xf32>
    %33 = vector.shape_cast %32 : vector<256x32xf32> to vector<16x16x32xf32>
    %cst_17 = arith.constant 0.000000e+00 : f32
    %34 = vector.broadcast %cst_17 : f32 to vector<18x18x32xf32>
    %c0_18 = arith.constant 0 : index
    %c0_19 = arith.constant 0 : index
    %c0_20 = arith.constant 0 : index
    %35 = vector.load %arg10[%c0_18, %c0_19, %c0_20] : memref<18x18x32xf32, #tpu.memory_space<vmem>>, vector<18x18x32xf32>
    tpu.vector_store %arg10[%c0_18, %c0_19, %c0_20], %34 {strides = array<i32>} : memref<18x18x32xf32, #tpu.memory_space<vmem>>, vector<18x18x32xf32>,
    %c1_21 = arith.constant 1 : index
    %c1_22 = arith.constant 1 : index
    %c0_23 = arith.constant 0 : index
    %36 = vector.load %arg10[%c1_21, %c1_22, %c0_23] : memref<18x18x32xf32, #tpu.memory_space<vmem>>, vector<16x16x32xf32>
    tpu.vector_store %arg10[%c1_21, %c1_22, %c0_23], %33 {strides = array<i32>} : memref<18x18x32xf32, #tpu.memory_space<vmem>>, vector<16x16x32xf32>,
    %c0_24 = arith.constant 0 : index
    %c0_25 = arith.constant 0 : index
    %c0_26 = arith.constant 0 : index
    %37 = vector.load %arg10[%c0_24, %c0_25, %c0_26] : memref<18x18x32xf32, #tpu.memory_space<vmem>>, vector<18x18x32xf32>
    %38 = vector.extract_strided_slice %37 {offsets = [0, 0, 0], sizes = [16, 16, 32], strides = [1, 1, 1]} : vector<18x18x32xf32> to vector<16x16x32xf32>
    %39 = vector.shape_cast %38 : vector<16x16x32xf32> to vector<256x32xf32>
    %40 = vector.extract_strided_slice %37 {offsets = [0, 1, 0], sizes = [16, 16, 32], strides = [1, 1, 1]} : vector<18x18x32xf32> to vector<16x16x32xf32>
    %41 = vector.shape_cast %40 : vector<16x16x32xf32> to vector<256x32xf32>
    %42 = vector.extract_strided_slice %37 {offsets = [0, 2, 0], sizes = [16, 16, 32], strides = [1, 1, 1]} : vector<18x18x32xf32> to vector<16x16x32xf32>
    %43 = vector.shape_cast %42 : vector<16x16x32xf32> to vector<256x32xf32>
    %44 = vector.extract_strided_slice %37 {offsets = [1, 0, 0], sizes = [16, 16, 32], strides = [1, 1, 1]} : vector<18x18x32xf32> to vector<16x16x32xf32>
    %45 = vector.shape_cast %44 : vector<16x16x32xf32> to vector<256x32xf32>
    %46 = vector.extract_strided_slice %37 {offsets = [1, 1, 0], sizes = [16, 16, 32], strides = [1, 1, 1]} : vector<18x18x32xf32> to vector<16x16x32xf32>
    %47 = vector.shape_cast %46 : vector<16x16x32xf32> to vector<256x32xf32>
    %48 = vector.extract_strided_slice %37 {offsets = [1, 2, 0], sizes = [16, 16, 32], strides = [1, 1, 1]} : vector<18x18x32xf32> to vector<16x16x32xf32>
    %49 = vector.shape_cast %48 : vector<16x16x32xf32> to vector<256x32xf32>
    %50 = vector.extract_strided_slice %37 {offsets = [2, 0, 0], sizes = [16, 16, 32], strides = [1, 1, 1]} : vector<18x18x32xf32> to vector<16x16x32xf32>
    %51 = vector.shape_cast %50 : vector<16x16x32xf32> to vector<256x32xf32>
    %52 = vector.extract_strided_slice %37 {offsets = [2, 1, 0], sizes = [16, 16, 32], strides = [1, 1, 1]} : vector<18x18x32xf32> to vector<16x16x32xf32>
    %53 = vector.shape_cast %52 : vector<16x16x32xf32> to vector<256x32xf32>
    %54 = vector.extract_strided_slice %37 {offsets = [2, 2, 0], sizes = [16, 16, 32], strides = [1, 1, 1]} : vector<18x18x32xf32> to vector<16x16x32xf32>
    %55 = vector.shape_cast %54 : vector<16x16x32xf32> to vector<256x32xf32>
    %56 = tpu.concatenate %39, %41, %43, %45, %47, %49, %51, %53, %55 in 1 : vector<256x32xf32>, vector<256x32xf32>, vector<256x32xf32>, vector<256x32xf32>, vector<256x32xf32>, vector<256x32xf32>, vector<256x32xf32>, vector<256x32xf32>, vector<256x32xf32> -> vector<256x288xf32>
    %57 = arith.truncf %56 : vector<256x288xf32> to vector<256x288xbf16>
    %c0_27 = arith.constant 0 : index
    %c0_28 = arith.constant 0 : index
    %58 = vector.load %arg4[%c0_27, %c0_28] : memref<288x32xbf16, #tpu.memory_space<vmem>>, vector<288x32xbf16>
    %cst_29 = arith.constant dense<0.000000e+00> : vector<256x32xf32>
    %59 = tpu.matmul %57, %58, %cst_29 {dimension_numbers = #tpu.dot_dimension_numbers<[1], [0], [0], [1], [0, 0, 1, 1], [], []>} : vector<256x288xbf16>, vector<288x32xbf16>, vector<256x32xf32> -> vector<256x32xf32>
    %c0_30 = arith.constant 0 : index
    %c0_31 = arith.constant 0 : index
    %60 = vector.load %arg5[%c0_30, %c0_31] : memref<1x32xf32, #tpu.memory_space<vmem>>, vector<1x32xf32>
    %61 = vector.broadcast %60 : vector<1x32xf32> to vector<256x32xf32>
    %62 = arith.addf %59, %61 : vector<256x32xf32>
    %cst_32 = arith.constant 0.000000e+00 : f32
    %63 = vector.broadcast %cst_32 : f32 to vector<256x32xf32>
    %64 = arith.maximumf %62, %63 : vector<256x32xf32>
    %65 = vector.shape_cast %64 : vector<256x32xf32> to vector<16x16x32xf32>
    %cst_33 = arith.constant 0.000000e+00 : f32
    %66 = vector.broadcast %cst_33 : f32 to vector<18x18x32xf32>
    %c0_34 = arith.constant 0 : index
    %c0_35 = arith.constant 0 : index
    %c0_36 = arith.constant 0 : index
    %67 = vector.load %arg10[%c0_34, %c0_35, %c0_36] : memref<18x18x32xf32, #tpu.memory_space<vmem>>, vector<18x18x32xf32>
    tpu.vector_store %arg10[%c0_34, %c0_35, %c0_36], %66 {strides = array<i32>} : memref<18x18x32xf32, #tpu.memory_space<vmem>>, vector<18x18x32xf32>,
    %c1_37 = arith.constant 1 : index
    %c1_38 = arith.constant 1 : index
    %c0_39 = arith.constant 0 : index
    %68 = vector.load %arg10[%c1_37, %c1_38, %c0_39] : memref<18x18x32xf32, #tpu.memory_space<vmem>>, vector<16x16x32xf32>
    tpu.vector_store %arg10[%c1_37, %c1_38, %c0_39], %65 {strides = array<i32>} : memref<18x18x32xf32, #tpu.memory_space<vmem>>, vector<16x16x32xf32>,
    %c0_40 = arith.constant 0 : index
    %c0_41 = arith.constant 0 : index
    %c0_42 = arith.constant 0 : index
    %69 = vector.load %arg10[%c0_40, %c0_41, %c0_42] : memref<18x18x32xf32, #tpu.memory_space<vmem>>, vector<18x18x32xf32>
    %70 = vector.extract_strided_slice %69 {offsets = [0, 0, 0], sizes = [16, 16, 32], strides = [1, 1, 1]} : vector<18x18x32xf32> to vector<16x16x32xf32>
    %71 = vector.shape_cast %70 : vector<16x16x32xf32> to vector<256x32xf32>
    %72 = vector.extract_strided_slice %69 {offsets = [0, 1, 0], sizes = [16, 16, 32], strides = [1, 1, 1]} : vector<18x18x32xf32> to vector<16x16x32xf32>
    %73 = vector.shape_cast %72 : vector<16x16x32xf32> to vector<256x32xf32>
    %74 = vector.extract_strided_slice %69 {offsets = [0, 2, 0], sizes = [16, 16, 32], strides = [1, 1, 1]} : vector<18x18x32xf32> to vector<16x16x32xf32>
    %75 = vector.shape_cast %74 : vector<16x16x32xf32> to vector<256x32xf32>
    %76 = vector.extract_strided_slice %69 {offsets = [1, 0, 0], sizes = [16, 16, 32], strides = [1, 1, 1]} : vector<18x18x32xf32> to vector<16x16x32xf32>
    %77 = vector.shape_cast %76 : vector<16x16x32xf32> to vector<256x32xf32>
    %78 = vector.extract_strided_slice %69 {offsets = [1, 1, 0], sizes = [16, 16, 32], strides = [1, 1, 1]} : vector<18x18x32xf32> to vector<16x16x32xf32>
    %79 = vector.shape_cast %78 : vector<16x16x32xf32> to vector<256x32xf32>
    %80 = vector.extract_strided_slice %69 {offsets = [1, 2, 0], sizes = [16, 16, 32], strides = [1, 1, 1]} : vector<18x18x32xf32> to vector<16x16x32xf32>
    %81 = vector.shape_cast %80 : vector<16x16x32xf32> to vector<256x32xf32>
    %82 = vector.extract_strided_slice %69 {offsets = [2, 0, 0], sizes = [16, 16, 32], strides = [1, 1, 1]} : vector<18x18x32xf32> to vector<16x16x32xf32>
    %83 = vector.shape_cast %82 : vector<16x16x32xf32> to vector<256x32xf32>
    %84 = vector.extract_strided_slice %69 {offsets = [2, 1, 0], sizes = [16, 16, 32], strides = [1, 1, 1]} : vector<18x18x32xf32> to vector<16x16x32xf32>
    %85 = vector.shape_cast %84 : vector<16x16x32xf32> to vector<256x32xf32>
    %86 = vector.extract_strided_slice %69 {offsets = [2, 2, 0], sizes = [16, 16, 32], strides = [1, 1, 1]} : vector<18x18x32xf32> to vector<16x16x32xf32>
    %87 = vector.shape_cast %86 : vector<16x16x32xf32> to vector<256x32xf32>
    %88 = tpu.concatenate %71, %73, %75, %77, %79, %81, %83, %85, %87 in 1 : vector<256x32xf32>, vector<256x32xf32>, vector<256x32xf32>, vector<256x32xf32>, vector<256x32xf32>, vector<256x32xf32>, vector<256x32xf32>, vector<256x32xf32>, vector<256x32xf32> -> vector<256x288xf32>
    %89 = arith.truncf %88 : vector<256x288xf32> to vector<256x288xbf16>
    %c0_43 = arith.constant 0 : index
    %c0_44 = arith.constant 0 : index
    %90 = vector.load %arg6[%c0_43, %c0_44] : memref<288x32xbf16, #tpu.memory_space<vmem>>, vector<288x32xbf16>
    %cst_45 = arith.constant dense<0.000000e+00> : vector<256x32xf32>
    %91 = tpu.matmul %89, %90, %cst_45 {dimension_numbers = #tpu.dot_dimension_numbers<[1], [0], [0], [1], [0, 0, 1, 1], [], []>} : vector<256x288xbf16>, vector<288x32xbf16>, vector<256x32xf32> -> vector<256x32xf32>
    %c0_46 = arith.constant 0 : index
    %c0_47 = arith.constant 0 : index
    %92 = vector.load %arg7[%c0_46, %c0_47] : memref<1x32xf32, #tpu.memory_space<vmem>>, vector<1x32xf32>
    %93 = vector.broadcast %92 : vector<1x32xf32> to vector<256x32xf32>
    %94 = arith.addf %91, %93 : vector<256x32xf32>
    %95 = vector.shape_cast %94 : vector<256x32xf32> to vector<16x16x32xf32>
    %96 = arith.addf %95, %33 : vector<16x16x32xf32>
    %cst_48 = arith.constant 0.000000e+00 : f32
    %97 = vector.broadcast %cst_48 : f32 to vector<16x16x32xf32>
    %98 = arith.maximumf %96, %97 : vector<16x16x32xf32>
    %cst_49 = arith.constant dense<0.000000e+00> : vector<16x32xf32>
    %99 = vector.multi_reduction <add>, %98, %cst_49 [0] : vector<16x16x32xf32> to vector<16x32xf32>
    %cst_50 = arith.constant 1.600000e+01 : f32
    %100 = vector.broadcast %cst_50 : f32 to vector<16x32xf32>
    %101 = arith.divf %99, %100 : vector<16x32xf32>
    %c0_51 = arith.constant 0 : index
    %c0_52 = arith.constant 0 : index
    %c0_53 = arith.constant 0 : index
    %102 = vector.load %arg8[%c0_51, %c0_52, %c0_53] : memref<1x16x32xf32, #tpu.memory_space<vmem>>, vector<1x16x32xf32>
    %103 = vector.shape_cast %102 : vector<1x16x32xf32> to vector<16x32xf32>
    %104 = vector.shape_cast %101 : vector<16x32xf32> to vector<1x16x32xf32>
    tpu.vector_store %arg8[%c0_51, %c0_52, %c0_53], %104 {strides = array<i32>} : memref<1x16x32xf32, #tpu.memory_space<vmem>>, vector<1x16x32xf32>,
    return
  }
  func.func @transform_0(%arg0: i32) -> (i32, i32, i32, i32) {
    %c0_i32 = arith.constant 0 : i32
    %c0_i32_0 = arith.constant 0 : i32
    %c0_i32_1 = arith.constant 0 : i32
    %c0_i32_2 = arith.constant 0 : i32
    return %arg0, %c0_i32, %c0_i32_0, %c0_i32_1 : i32, i32, i32, i32
  }
  func.func @transform_1(%arg0: i32) -> (i32, i32) {
    %c0_i32 = arith.constant 0 : i32
    %c0_i32_0 = arith.constant 0 : i32
    %c0_i32_1 = arith.constant 0 : i32
    return %c0_i32, %c0_i32_0 : i32, i32
  }
  func.func @transform_2(%arg0: i32) -> (i32, i32) {
    %c0_i32 = arith.constant 0 : i32
    %c0_i32_0 = arith.constant 0 : i32
    %c0_i32_1 = arith.constant 0 : i32
    return %c0_i32, %c0_i32_0 : i32, i32
  }
  func.func @transform_3(%arg0: i32) -> (i32, i32) {
    %c0_i32 = arith.constant 0 : i32
    %c0_i32_0 = arith.constant 0 : i32
    %c0_i32_1 = arith.constant 0 : i32
    return %c0_i32, %c0_i32_0 : i32, i32
  }
  func.func @transform_4(%arg0: i32) -> (i32, i32) {
    %c0_i32 = arith.constant 0 : i32
    %c0_i32_0 = arith.constant 0 : i32
    %c0_i32_1 = arith.constant 0 : i32
    return %c0_i32, %c0_i32_0 : i32, i32
  }
  func.func @transform_5(%arg0: i32) -> (i32, i32) {
    %c0_i32 = arith.constant 0 : i32
    %c0_i32_0 = arith.constant 0 : i32
    %c0_i32_1 = arith.constant 0 : i32
    return %c0_i32, %c0_i32_0 : i32, i32
  }
  func.func @transform_6(%arg0: i32) -> (i32, i32) {
    %c0_i32 = arith.constant 0 : i32
    %c0_i32_0 = arith.constant 0 : i32
    %c0_i32_1 = arith.constant 0 : i32
    return %c0_i32, %c0_i32_0 : i32, i32
  }
  func.func @transform_7(%arg0: i32) -> (i32, i32, i32) {
    %c0_i32 = arith.constant 0 : i32
    %c0_i32_0 = arith.constant 0 : i32
    %c0_i32_1 = arith.constant 0 : i32
    return %arg0, %c0_i32, %c0_i32_0 : i32, i32, i32
  }
}

module attributes {stable_mosaic.version = 11 : i64} {
  func.func @_bilstm_head_kernel(%arg0: memref<16x2x32xf32, #tpu.memory_space<vmem>>, %arg1: memref<32x256xbf16, #tpu.memory_space<vmem>>, %arg2: memref<1x256xf32, #tpu.memory_space<vmem>>, %arg3: memref<32x128xbf16, #tpu.memory_space<vmem>>, %arg4: memref<32x128xbf16, #tpu.memory_space<vmem>>, %arg5: memref<8x64xf32, #tpu.memory_space<vmem>>, %arg6: memref<8x1xf32, #tpu.memory_space<vmem>>, %arg7: memref<2x8x16xf32, #tpu.memory_space<vmem>>, %arg8: memref<16x2x256xf32, #tpu.memory_space<vmem>>, %arg9: memref<16x2x32xf32, #tpu.memory_space<vmem>>, %arg10: memref<16x2x32xf32, #tpu.memory_space<vmem>>) attributes {dimension_semantics = [], scalar_prefetch = 0 : i64, scratch_operands = 3 : i64, tpu.core_type = #tpu.core_type<tc>} {
    %c0 = arith.constant 0 : index
    %c0_0 = arith.constant 0 : index
    %c0_1 = arith.constant 0 : index
    %0 = vector.load %arg0[%c0, %c0_0, %c0_1] : memref<16x2x32xf32, #tpu.memory_space<vmem>>, vector<16x2x32xf32>
    %1 = vector.shape_cast %0 : vector<16x2x32xf32> to vector<32x32xf32>
    %2 = arith.truncf %1 : vector<32x32xf32> to vector<32x32xbf16>
    %c0_2 = arith.constant 0 : index
    %c0_3 = arith.constant 0 : index
    %3 = vector.load %arg1[%c0_2, %c0_3] : memref<32x256xbf16, #tpu.memory_space<vmem>>, vector<32x256xbf16>
    %cst = arith.constant dense<0.000000e+00> : vector<32x256xf32>
    %4 = tpu.matmul %2, %3, %cst {dimension_numbers = #tpu.dot_dimension_numbers<[1], [0], [0], [1], [0, 0, 1, 1], [], []>} : vector<32x32xbf16>, vector<32x256xbf16>, vector<32x256xf32> -> vector<32x256xf32>
    %c0_4 = arith.constant 0 : index
    %c0_5 = arith.constant 0 : index
    %5 = vector.load %arg2[%c0_4, %c0_5] : memref<1x256xf32, #tpu.memory_space<vmem>>, vector<1x256xf32>
    %6 = vector.broadcast %5 : vector<1x256xf32> to vector<32x256xf32>
    %7 = arith.addf %4, %6 : vector<32x256xf32>
    %8 = vector.shape_cast %7 : vector<32x256xf32> to vector<16x2x256xf32>
    %c0_6 = arith.constant 0 : index
    %c0_7 = arith.constant 0 : index
    %c0_8 = arith.constant 0 : index
    %9 = vector.load %arg8[%c0_6, %c0_7, %c0_8] : memref<16x2x256xf32, #tpu.memory_space<vmem>>, vector<16x2x256xf32>
    tpu.vector_store %arg8[%c0_6, %c0_7, %c0_8], %8 {strides = array<i32>} : memref<16x2x256xf32, #tpu.memory_space<vmem>>, vector<16x2x256xf32>,
    %c0_9 = arith.constant 0 : index
    %c0_10 = arith.constant 0 : index
    %10 = vector.load %arg3[%c0_9, %c0_10] : memref<32x128xbf16, #tpu.memory_space<vmem>>, vector<32x128xbf16>
    %c0_11 = arith.constant 0 : index
    %c0_12 = arith.constant 0 : index
    %11 = vector.load %arg4[%c0_11, %c0_12] : memref<32x128xbf16, #tpu.memory_space<vmem>>, vector<32x128xbf16>
    %cst_13 = arith.constant 0.000000e+00 : f32
    %12 = vector.broadcast %cst_13 : f32 to vector<2x32xf32>
    %cst_14 = arith.constant 0.000000e+00 : f32
    %13 = vector.broadcast %cst_14 : f32 to vector<4x32xf32>
    %c0_i32 = arith.constant 0 : i32
    %c15_i32 = arith.constant 15 : i32
    %14 = arith.subi %c15_i32, %c0_i32 : i32
    %15 = arith.index_cast %c0_i32 : i32 to index
    %c0_15 = arith.constant 0 : index
    %c0_16 = arith.constant 0 : index
    %16 = vector.load %arg8[%15, %c0_15, %c0_16] : memref<16x2x256xf32, #tpu.memory_space<vmem>>, vector<1x2x256xf32>
    %17 = vector.shape_cast %16 : vector<1x2x256xf32> to vector<2x256xf32>
    %18 = arith.index_cast %14 : i32 to index
    %c0_17 = arith.constant 0 : index
    %c0_18 = arith.constant 0 : index
    %19 = vector.load %arg8[%18, %c0_17, %c0_18] : memref<16x2x256xf32, #tpu.memory_space<vmem>>, vector<1x2x256xf32>
    %20 = vector.shape_cast %19 : vector<1x2x256xf32> to vector<2x256xf32>
    %21 = vector.extract_strided_slice %17 {offsets = [0, 0], sizes = [2, 128], strides = [1, 1]} : vector<2x256xf32> to vector<2x128xf32>
    %22 = arith.truncf %12 : vector<2x32xf32> to vector<2x32xbf16>
    %cst_19 = arith.constant dense<0.000000e+00> : vector<2x128xf32>
    %23 = tpu.matmul %22, %10, %cst_19 {dimension_numbers = #tpu.dot_dimension_numbers<[1], [0], [0], [1], [0, 0, 1, 1], [], []>} : vector<2x32xbf16>, vector<32x128xbf16>, vector<2x128xf32> -> vector<2x128xf32>
    %24 = arith.addf %21, %23 : vector<2x128xf32>
    %25 = vector.extract_strided_slice %20 {offsets = [0, 128], sizes = [2, 128], strides = [1, 1]} : vector<2x256xf32> to vector<2x128xf32>
    %26 = arith.truncf %12 : vector<2x32xf32> to vector<2x32xbf16>
    %cst_20 = arith.constant dense<0.000000e+00> : vector<2x128xf32>
    %27 = tpu.matmul %26, %11, %cst_20 {dimension_numbers = #tpu.dot_dimension_numbers<[1], [0], [0], [1], [0, 0, 1, 1], [], []>} : vector<2x32xbf16>, vector<32x128xbf16>, vector<2x128xf32> -> vector<2x128xf32>
    %28 = arith.addf %25, %27 : vector<2x128xf32>
    %29 = tpu.concatenate %24, %28 in 0 : vector<2x128xf32>, vector<2x128xf32> -> vector<4x128xf32>
    %30 = vector.extract_strided_slice %29 {offsets = [0, 0], sizes = [4, 32], strides = [1, 1]} : vector<4x128xf32> to vector<4x32xf32>
    %31 = arith.negf %30 : vector<4x32xf32>
    %32 = math.exp %31 : vector<4x32xf32>
    %cst_21 = arith.constant 1.000000e+00 : f32
    %33 = vector.broadcast %cst_21 : f32 to vector<4x32xf32>
    %34 = arith.addf %33, %32 : vector<4x32xf32>
    %35 = arith.divf %33, %34 : vector<4x32xf32>
    %36 = vector.extract_strided_slice %29 {offsets = [0, 32], sizes = [4, 32], strides = [1, 1]} : vector<4x128xf32> to vector<4x32xf32>
    %37 = arith.negf %36 : vector<4x32xf32>
    %38 = math.exp %37 : vector<4x32xf32>
    %cst_22 = arith.constant 1.000000e+00 : f32
    %39 = vector.broadcast %cst_22 : f32 to vector<4x32xf32>
    %40 = arith.addf %39, %38 : vector<4x32xf32>
    %41 = arith.divf %39, %40 : vector<4x32xf32>
    %42 = vector.extract_strided_slice %29 {offsets = [0, 64], sizes = [4, 32], strides = [1, 1]} : vector<4x128xf32> to vector<4x32xf32>
    %43 = math.tanh %42 : vector<4x32xf32>
    %44 = vector.extract_strided_slice %29 {offsets = [0, 96], sizes = [4, 32], strides = [1, 1]} : vector<4x128xf32> to vector<4x32xf32>
    %45 = arith.negf %44 : vector<4x32xf32>
    %46 = math.exp %45 : vector<4x32xf32>
    %cst_23 = arith.constant 1.000000e+00 : f32
    %47 = vector.broadcast %cst_23 : f32 to vector<4x32xf32>
    %48 = arith.addf %47, %46 : vector<4x32xf32>
    %49 = arith.divf %47, %48 : vector<4x32xf32>
    %50 = arith.mulf %41, %13 : vector<4x32xf32>
    %51 = arith.mulf %35, %43 : vector<4x32xf32>
    %52 = arith.addf %50, %51 : vector<4x32xf32>
    %53 = math.tanh %52 : vector<4x32xf32>
    %54 = arith.mulf %49, %53 : vector<4x32xf32>
    %55 = vector.extract_strided_slice %54 {offsets = [0, 0], sizes = [2, 32], strides = [1, 1]} : vector<4x32xf32> to vector<2x32xf32>
    %56 = vector.extract_strided_slice %54 {offsets = [2, 0], sizes = [2, 32], strides = [1, 1]} : vector<4x32xf32> to vector<2x32xf32>
    %57 = arith.index_cast %c0_i32 : i32 to index
    %c0_24 = arith.constant 0 : index
    %c0_25 = arith.constant 0 : index
    %58 = vector.load %arg9[%57, %c0_24, %c0_25] : memref<16x2x32xf32, #tpu.memory_space<vmem>>, vector<1x2x32xf32>
    %59 = vector.shape_cast %58 : vector<1x2x32xf32> to vector<2x32xf32>
    %60 = vector.shape_cast %55 : vector<2x32xf32> to vector<1x2x32xf32>
    tpu.vector_store %arg9[%57, %c0_24, %c0_25], %60 {strides = array<i32>} : memref<16x2x32xf32, #tpu.memory_space<vmem>>, vector<1x2x32xf32>,
    %61 = arith.index_cast %14 : i32 to index
    %c0_26 = arith.constant 0 : index
    %c0_27 = arith.constant 0 : index
    %62 = vector.load %arg10[%61, %c0_26, %c0_27] : memref<16x2x32xf32, #tpu.memory_space<vmem>>, vector<1x2x32xf32>
    %63 = vector.shape_cast %62 : vector<1x2x32xf32> to vector<2x32xf32>
    %64 = vector.shape_cast %56 : vector<2x32xf32> to vector<1x2x32xf32>
    tpu.vector_store %arg10[%61, %c0_26, %c0_27], %64 {strides = array<i32>} : memref<16x2x32xf32, #tpu.memory_space<vmem>>, vector<1x2x32xf32>,
    %c1_i32 = arith.constant 1 : i32
    %c15_i32_28 = arith.constant 15 : i32
    %65 = arith.subi %c15_i32_28, %c1_i32 : i32
    %66 = arith.index_cast %c1_i32 : i32 to index
    %c0_29 = arith.constant 0 : index
    %c0_30 = arith.constant 0 : index
    %67 = vector.load %arg8[%66, %c0_29, %c0_30] : memref<16x2x256xf32, #tpu.memory_space<vmem>>, vector<1x2x256xf32>
    %68 = vector.shape_cast %67 : vector<1x2x256xf32> to vector<2x256xf32>
    %69 = arith.index_cast %65 : i32 to index
    %c0_31 = arith.constant 0 : index
    %c0_32 = arith.constant 0 : index
    %70 = vector.load %arg8[%69, %c0_31, %c0_32] : memref<16x2x256xf32, #tpu.memory_space<vmem>>, vector<1x2x256xf32>
    %71 = vector.shape_cast %70 : vector<1x2x256xf32> to vector<2x256xf32>
    %72 = vector.extract_strided_slice %68 {offsets = [0, 0], sizes = [2, 128], strides = [1, 1]} : vector<2x256xf32> to vector<2x128xf32>
    %73 = arith.truncf %55 : vector<2x32xf32> to vector<2x32xbf16>
    %cst_33 = arith.constant dense<0.000000e+00> : vector<2x128xf32>
    %74 = tpu.matmul %73, %10, %cst_33 {dimension_numbers = #tpu.dot_dimension_numbers<[1], [0], [0], [1], [0, 0, 1, 1], [], []>} : vector<2x32xbf16>, vector<32x128xbf16>, vector<2x128xf32> -> vector<2x128xf32>
    %75 = arith.addf %72, %74 : vector<2x128xf32>
    %76 = vector.extract_strided_slice %71 {offsets = [0, 128], sizes = [2, 128], strides = [1, 1]} : vector<2x256xf32> to vector<2x128xf32>
    %77 = arith.truncf %56 : vector<2x32xf32> to vector<2x32xbf16>
    %cst_34 = arith.constant dense<0.000000e+00> : vector<2x128xf32>
    %78 = tpu.matmul %77, %11, %cst_34 {dimension_numbers = #tpu.dot_dimension_numbers<[1], [0], [0], [1], [0, 0, 1, 1], [], []>} : vector<2x32xbf16>, vector<32x128xbf16>, vector<2x128xf32> -> vector<2x128xf32>
    %79 = arith.addf %76, %78 : vector<2x128xf32>
    %80 = tpu.concatenate %75, %79 in 0 : vector<2x128xf32>, vector<2x128xf32> -> vector<4x128xf32>
    %81 = vector.extract_strided_slice %80 {offsets = [0, 0], sizes = [4, 32], strides = [1, 1]} : vector<4x128xf32> to vector<4x32xf32>
    %82 = arith.negf %81 : vector<4x32xf32>
    %83 = math.exp %82 : vector<4x32xf32>
    %cst_35 = arith.constant 1.000000e+00 : f32
    %84 = vector.broadcast %cst_35 : f32 to vector<4x32xf32>
    %85 = arith.addf %84, %83 : vector<4x32xf32>
    %86 = arith.divf %84, %85 : vector<4x32xf32>
    %87 = vector.extract_strided_slice %80 {offsets = [0, 32], sizes = [4, 32], strides = [1, 1]} : vector<4x128xf32> to vector<4x32xf32>
    %88 = arith.negf %87 : vector<4x32xf32>
    %89 = math.exp %88 : vector<4x32xf32>
    %cst_36 = arith.constant 1.000000e+00 : f32
    %90 = vector.broadcast %cst_36 : f32 to vector<4x32xf32>
    %91 = arith.addf %90, %89 : vector<4x32xf32>
    %92 = arith.divf %90, %91 : vector<4x32xf32>
    %93 = vector.extract_strided_slice %80 {offsets = [0, 64], sizes = [4, 32], strides = [1, 1]} : vector<4x128xf32> to vector<4x32xf32>
    %94 = math.tanh %93 : vector<4x32xf32>
    %95 = vector.extract_strided_slice %80 {offsets = [0, 96], sizes = [4, 32], strides = [1, 1]} : vector<4x128xf32> to vector<4x32xf32>
    %96 = arith.negf %95 : vector<4x32xf32>
    %97 = math.exp %96 : vector<4x32xf32>
    %cst_37 = arith.constant 1.000000e+00 : f32
    %98 = vector.broadcast %cst_37 : f32 to vector<4x32xf32>
    %99 = arith.addf %98, %97 : vector<4x32xf32>
    %100 = arith.divf %98, %99 : vector<4x32xf32>
    %101 = arith.mulf %92, %52 : vector<4x32xf32>
    %102 = arith.mulf %86, %94 : vector<4x32xf32>
    %103 = arith.addf %101, %102 : vector<4x32xf32>
    %104 = math.tanh %103 : vector<4x32xf32>
    %105 = arith.mulf %100, %104 : vector<4x32xf32>
    %106 = vector.extract_strided_slice %105 {offsets = [0, 0], sizes = [2, 32], strides = [1, 1]} : vector<4x32xf32> to vector<2x32xf32>
    %107 = vector.extract_strided_slice %105 {offsets = [2, 0], sizes = [2, 32], strides = [1, 1]} : vector<4x32xf32> to vector<2x32xf32>
    %108 = arith.index_cast %c1_i32 : i32 to index
    %c0_38 = arith.constant 0 : index
    %c0_39 = arith.constant 0 : index
    %109 = vector.load %arg9[%108, %c0_38, %c0_39] : memref<16x2x32xf32, #tpu.memory_space<vmem>>, vector<1x2x32xf32>
    %110 = vector.shape_cast %109 : vector<1x2x32xf32> to vector<2x32xf32>
    %111 = vector.shape_cast %106 : vector<2x32xf32> to vector<1x2x32xf32>
    tpu.vector_store %arg9[%108, %c0_38, %c0_39], %111 {strides = array<i32>} : memref<16x2x32xf32, #tpu.memory_space<vmem>>, vector<1x2x32xf32>,
    %112 = arith.index_cast %65 : i32 to index
    %c0_40 = arith.constant 0 : index
    %c0_41 = arith.constant 0 : index
    %113 = vector.load %arg10[%112, %c0_40, %c0_41] : memref<16x2x32xf32, #tpu.memory_space<vmem>>, vector<1x2x32xf32>
    %114 = vector.shape_cast %113 : vector<1x2x32xf32> to vector<2x32xf32>
    %115 = vector.shape_cast %107 : vector<2x32xf32> to vector<1x2x32xf32>
    tpu.vector_store %arg10[%112, %c0_40, %c0_41], %115 {strides = array<i32>} : memref<16x2x32xf32, #tpu.memory_space<vmem>>, vector<1x2x32xf32>,
    %c2_i32 = arith.constant 2 : i32
    %c15_i32_42 = arith.constant 15 : i32
    %116 = arith.subi %c15_i32_42, %c2_i32 : i32
    %117 = arith.index_cast %c2_i32 : i32 to index
    %c0_43 = arith.constant 0 : index
    %c0_44 = arith.constant 0 : index
    %118 = vector.load %arg8[%117, %c0_43, %c0_44] : memref<16x2x256xf32, #tpu.memory_space<vmem>>, vector<1x2x256xf32>
    %119 = vector.shape_cast %118 : vector<1x2x256xf32> to vector<2x256xf32>
    %120 = arith.index_cast %116 : i32 to index
    %c0_45 = arith.constant 0 : index
    %c0_46 = arith.constant 0 : index
    %121 = vector.load %arg8[%120, %c0_45, %c0_46] : memref<16x2x256xf32, #tpu.memory_space<vmem>>, vector<1x2x256xf32>
    %122 = vector.shape_cast %121 : vector<1x2x256xf32> to vector<2x256xf32>
    %123 = vector.extract_strided_slice %119 {offsets = [0, 0], sizes = [2, 128], strides = [1, 1]} : vector<2x256xf32> to vector<2x128xf32>
    %124 = arith.truncf %106 : vector<2x32xf32> to vector<2x32xbf16>
    %cst_47 = arith.constant dense<0.000000e+00> : vector<2x128xf32>
    %125 = tpu.matmul %124, %10, %cst_47 {dimension_numbers = #tpu.dot_dimension_numbers<[1], [0], [0], [1], [0, 0, 1, 1], [], []>} : vector<2x32xbf16>, vector<32x128xbf16>, vector<2x128xf32> -> vector<2x128xf32>
    %126 = arith.addf %123, %125 : vector<2x128xf32>
    %127 = vector.extract_strided_slice %122 {offsets = [0, 128], sizes = [2, 128], strides = [1, 1]} : vector<2x256xf32> to vector<2x128xf32>
    %128 = arith.truncf %107 : vector<2x32xf32> to vector<2x32xbf16>
    %cst_48 = arith.constant dense<0.000000e+00> : vector<2x128xf32>
    %129 = tpu.matmul %128, %11, %cst_48 {dimension_numbers = #tpu.dot_dimension_numbers<[1], [0], [0], [1], [0, 0, 1, 1], [], []>} : vector<2x32xbf16>, vector<32x128xbf16>, vector<2x128xf32> -> vector<2x128xf32>
    %130 = arith.addf %127, %129 : vector<2x128xf32>
    %131 = tpu.concatenate %126, %130 in 0 : vector<2x128xf32>, vector<2x128xf32> -> vector<4x128xf32>
    %132 = vector.extract_strided_slice %131 {offsets = [0, 0], sizes = [4, 32], strides = [1, 1]} : vector<4x128xf32> to vector<4x32xf32>
    %133 = arith.negf %132 : vector<4x32xf32>
    %134 = math.exp %133 : vector<4x32xf32>
    %cst_49 = arith.constant 1.000000e+00 : f32
    %135 = vector.broadcast %cst_49 : f32 to vector<4x32xf32>
    %136 = arith.addf %135, %134 : vector<4x32xf32>
    %137 = arith.divf %135, %136 : vector<4x32xf32>
    %138 = vector.extract_strided_slice %131 {offsets = [0, 32], sizes = [4, 32], strides = [1, 1]} : vector<4x128xf32> to vector<4x32xf32>
    %139 = arith.negf %138 : vector<4x32xf32>
    %140 = math.exp %139 : vector<4x32xf32>
    %cst_50 = arith.constant 1.000000e+00 : f32
    %141 = vector.broadcast %cst_50 : f32 to vector<4x32xf32>
    %142 = arith.addf %141, %140 : vector<4x32xf32>
    %143 = arith.divf %141, %142 : vector<4x32xf32>
    %144 = vector.extract_strided_slice %131 {offsets = [0, 64], sizes = [4, 32], strides = [1, 1]} : vector<4x128xf32> to vector<4x32xf32>
    %145 = math.tanh %144 : vector<4x32xf32>
    %146 = vector.extract_strided_slice %131 {offsets = [0, 96], sizes = [4, 32], strides = [1, 1]} : vector<4x128xf32> to vector<4x32xf32>
    %147 = arith.negf %146 : vector<4x32xf32>
    %148 = math.exp %147 : vector<4x32xf32>
    %cst_51 = arith.constant 1.000000e+00 : f32
    %149 = vector.broadcast %cst_51 : f32 to vector<4x32xf32>
    %150 = arith.addf %149, %148 : vector<4x32xf32>
    %151 = arith.divf %149, %150 : vector<4x32xf32>
    %152 = arith.mulf %143, %103 : vector<4x32xf32>
    %153 = arith.mulf %137, %145 : vector<4x32xf32>
    %154 = arith.addf %152, %153 : vector<4x32xf32>
    %155 = math.tanh %154 : vector<4x32xf32>
    %156 = arith.mulf %151, %155 : vector<4x32xf32>
    %157 = vector.extract_strided_slice %156 {offsets = [0, 0], sizes = [2, 32], strides = [1, 1]} : vector<4x32xf32> to vector<2x32xf32>
    %158 = vector.extract_strided_slice %156 {offsets = [2, 0], sizes = [2, 32], strides = [1, 1]} : vector<4x32xf32> to vector<2x32xf32>
    %159 = arith.index_cast %c2_i32 : i32 to index
    %c0_52 = arith.constant 0 : index
    %c0_53 = arith.constant 0 : index
    %160 = vector.load %arg9[%159, %c0_52, %c0_53] : memref<16x2x32xf32, #tpu.memory_space<vmem>>, vector<1x2x32xf32>
    %161 = vector.shape_cast %160 : vector<1x2x32xf32> to vector<2x32xf32>
    %162 = vector.shape_cast %157 : vector<2x32xf32> to vector<1x2x32xf32>
    tpu.vector_store %arg9[%159, %c0_52, %c0_53], %162 {strides = array<i32>} : memref<16x2x32xf32, #tpu.memory_space<vmem>>, vector<1x2x32xf32>,
    %163 = arith.index_cast %116 : i32 to index
    %c0_54 = arith.constant 0 : index
    %c0_55 = arith.constant 0 : index
    %164 = vector.load %arg10[%163, %c0_54, %c0_55] : memref<16x2x32xf32, #tpu.memory_space<vmem>>, vector<1x2x32xf32>
    %165 = vector.shape_cast %164 : vector<1x2x32xf32> to vector<2x32xf32>
    %166 = vector.shape_cast %158 : vector<2x32xf32> to vector<1x2x32xf32>
    tpu.vector_store %arg10[%163, %c0_54, %c0_55], %166 {strides = array<i32>} : memref<16x2x32xf32, #tpu.memory_space<vmem>>, vector<1x2x32xf32>,
    %c3_i32 = arith.constant 3 : i32
    %c15_i32_56 = arith.constant 15 : i32
    %167 = arith.subi %c15_i32_56, %c3_i32 : i32
    %168 = arith.index_cast %c3_i32 : i32 to index
    %c0_57 = arith.constant 0 : index
    %c0_58 = arith.constant 0 : index
    %169 = vector.load %arg8[%168, %c0_57, %c0_58] : memref<16x2x256xf32, #tpu.memory_space<vmem>>, vector<1x2x256xf32>
    %170 = vector.shape_cast %169 : vector<1x2x256xf32> to vector<2x256xf32>
    %171 = arith.index_cast %167 : i32 to index
    %c0_59 = arith.constant 0 : index
    %c0_60 = arith.constant 0 : index
    %172 = vector.load %arg8[%171, %c0_59, %c0_60] : memref<16x2x256xf32, #tpu.memory_space<vmem>>, vector<1x2x256xf32>
    %173 = vector.shape_cast %172 : vector<1x2x256xf32> to vector<2x256xf32>
    %174 = vector.extract_strided_slice %170 {offsets = [0, 0], sizes = [2, 128], strides = [1, 1]} : vector<2x256xf32> to vector<2x128xf32>
    %175 = arith.truncf %157 : vector<2x32xf32> to vector<2x32xbf16>
    %cst_61 = arith.constant dense<0.000000e+00> : vector<2x128xf32>
    %176 = tpu.matmul %175, %10, %cst_61 {dimension_numbers = #tpu.dot_dimension_numbers<[1], [0], [0], [1], [0, 0, 1, 1], [], []>} : vector<2x32xbf16>, vector<32x128xbf16>, vector<2x128xf32> -> vector<2x128xf32>
    %177 = arith.addf %174, %176 : vector<2x128xf32>
    %178 = vector.extract_strided_slice %173 {offsets = [0, 128], sizes = [2, 128], strides = [1, 1]} : vector<2x256xf32> to vector<2x128xf32>
    %179 = arith.truncf %158 : vector<2x32xf32> to vector<2x32xbf16>
    %cst_62 = arith.constant dense<0.000000e+00> : vector<2x128xf32>
    %180 = tpu.matmul %179, %11, %cst_62 {dimension_numbers = #tpu.dot_dimension_numbers<[1], [0], [0], [1], [0, 0, 1, 1], [], []>} : vector<2x32xbf16>, vector<32x128xbf16>, vector<2x128xf32> -> vector<2x128xf32>
    %181 = arith.addf %178, %180 : vector<2x128xf32>
    %182 = tpu.concatenate %177, %181 in 0 : vector<2x128xf32>, vector<2x128xf32> -> vector<4x128xf32>
    %183 = vector.extract_strided_slice %182 {offsets = [0, 0], sizes = [4, 32], strides = [1, 1]} : vector<4x128xf32> to vector<4x32xf32>
    %184 = arith.negf %183 : vector<4x32xf32>
    %185 = math.exp %184 : vector<4x32xf32>
    %cst_63 = arith.constant 1.000000e+00 : f32
    %186 = vector.broadcast %cst_63 : f32 to vector<4x32xf32>
    %187 = arith.addf %186, %185 : vector<4x32xf32>
    %188 = arith.divf %186, %187 : vector<4x32xf32>
    %189 = vector.extract_strided_slice %182 {offsets = [0, 32], sizes = [4, 32], strides = [1, 1]} : vector<4x128xf32> to vector<4x32xf32>
    %190 = arith.negf %189 : vector<4x32xf32>
    %191 = math.exp %190 : vector<4x32xf32>
    %cst_64 = arith.constant 1.000000e+00 : f32
    %192 = vector.broadcast %cst_64 : f32 to vector<4x32xf32>
    %193 = arith.addf %192, %191 : vector<4x32xf32>
    %194 = arith.divf %192, %193 : vector<4x32xf32>
    %195 = vector.extract_strided_slice %182 {offsets = [0, 64], sizes = [4, 32], strides = [1, 1]} : vector<4x128xf32> to vector<4x32xf32>
    %196 = math.tanh %195 : vector<4x32xf32>
    %197 = vector.extract_strided_slice %182 {offsets = [0, 96], sizes = [4, 32], strides = [1, 1]} : vector<4x128xf32> to vector<4x32xf32>
    %198 = arith.negf %197 : vector<4x32xf32>
    %199 = math.exp %198 : vector<4x32xf32>
    %cst_65 = arith.constant 1.000000e+00 : f32
    %200 = vector.broadcast %cst_65 : f32 to vector<4x32xf32>
    %201 = arith.addf %200, %199 : vector<4x32xf32>
    %202 = arith.divf %200, %201 : vector<4x32xf32>
    %203 = arith.mulf %194, %154 : vector<4x32xf32>
    %204 = arith.mulf %188, %196 : vector<4x32xf32>
    %205 = arith.addf %203, %204 : vector<4x32xf32>
    %206 = math.tanh %205 : vector<4x32xf32>
    %207 = arith.mulf %202, %206 : vector<4x32xf32>
    %208 = vector.extract_strided_slice %207 {offsets = [0, 0], sizes = [2, 32], strides = [1, 1]} : vector<4x32xf32> to vector<2x32xf32>
    %209 = vector.extract_strided_slice %207 {offsets = [2, 0], sizes = [2, 32], strides = [1, 1]} : vector<4x32xf32> to vector<2x32xf32>
    %210 = arith.index_cast %c3_i32 : i32 to index
    %c0_66 = arith.constant 0 : index
    %c0_67 = arith.constant 0 : index
    %211 = vector.load %arg9[%210, %c0_66, %c0_67] : memref<16x2x32xf32, #tpu.memory_space<vmem>>, vector<1x2x32xf32>
    %212 = vector.shape_cast %211 : vector<1x2x32xf32> to vector<2x32xf32>
    %213 = vector.shape_cast %208 : vector<2x32xf32> to vector<1x2x32xf32>
    tpu.vector_store %arg9[%210, %c0_66, %c0_67], %213 {strides = array<i32>} : memref<16x2x32xf32, #tpu.memory_space<vmem>>, vector<1x2x32xf32>,
    %214 = arith.index_cast %167 : i32 to index
    %c0_68 = arith.constant 0 : index
    %c0_69 = arith.constant 0 : index
    %215 = vector.load %arg10[%214, %c0_68, %c0_69] : memref<16x2x32xf32, #tpu.memory_space<vmem>>, vector<1x2x32xf32>
    %216 = vector.shape_cast %215 : vector<1x2x32xf32> to vector<2x32xf32>
    %217 = vector.shape_cast %209 : vector<2x32xf32> to vector<1x2x32xf32>
    tpu.vector_store %arg10[%214, %c0_68, %c0_69], %217 {strides = array<i32>} : memref<16x2x32xf32, #tpu.memory_space<vmem>>, vector<1x2x32xf32>,
    %c4_i32 = arith.constant 4 : i32
    %c15_i32_70 = arith.constant 15 : i32
    %218 = arith.subi %c15_i32_70, %c4_i32 : i32
    %219 = arith.index_cast %c4_i32 : i32 to index
    %c0_71 = arith.constant 0 : index
    %c0_72 = arith.constant 0 : index
    %220 = vector.load %arg8[%219, %c0_71, %c0_72] : memref<16x2x256xf32, #tpu.memory_space<vmem>>, vector<1x2x256xf32>
    %221 = vector.shape_cast %220 : vector<1x2x256xf32> to vector<2x256xf32>
    %222 = arith.index_cast %218 : i32 to index
    %c0_73 = arith.constant 0 : index
    %c0_74 = arith.constant 0 : index
    %223 = vector.load %arg8[%222, %c0_73, %c0_74] : memref<16x2x256xf32, #tpu.memory_space<vmem>>, vector<1x2x256xf32>
    %224 = vector.shape_cast %223 : vector<1x2x256xf32> to vector<2x256xf32>
    %225 = vector.extract_strided_slice %221 {offsets = [0, 0], sizes = [2, 128], strides = [1, 1]} : vector<2x256xf32> to vector<2x128xf32>
    %226 = arith.truncf %208 : vector<2x32xf32> to vector<2x32xbf16>
    %cst_75 = arith.constant dense<0.000000e+00> : vector<2x128xf32>
    %227 = tpu.matmul %226, %10, %cst_75 {dimension_numbers = #tpu.dot_dimension_numbers<[1], [0], [0], [1], [0, 0, 1, 1], [], []>} : vector<2x32xbf16>, vector<32x128xbf16>, vector<2x128xf32> -> vector<2x128xf32>
    %228 = arith.addf %225, %227 : vector<2x128xf32>
    %229 = vector.extract_strided_slice %224 {offsets = [0, 128], sizes = [2, 128], strides = [1, 1]} : vector<2x256xf32> to vector<2x128xf32>
    %230 = arith.truncf %209 : vector<2x32xf32> to vector<2x32xbf16>
    %cst_76 = arith.constant dense<0.000000e+00> : vector<2x128xf32>
    %231 = tpu.matmul %230, %11, %cst_76 {dimension_numbers = #tpu.dot_dimension_numbers<[1], [0], [0], [1], [0, 0, 1, 1], [], []>} : vector<2x32xbf16>, vector<32x128xbf16>, vector<2x128xf32> -> vector<2x128xf32>
    %232 = arith.addf %229, %231 : vector<2x128xf32>
    %233 = tpu.concatenate %228, %232 in 0 : vector<2x128xf32>, vector<2x128xf32> -> vector<4x128xf32>
    %234 = vector.extract_strided_slice %233 {offsets = [0, 0], sizes = [4, 32], strides = [1, 1]} : vector<4x128xf32> to vector<4x32xf32>
    %235 = arith.negf %234 : vector<4x32xf32>
    %236 = math.exp %235 : vector<4x32xf32>
    %cst_77 = arith.constant 1.000000e+00 : f32
    %237 = vector.broadcast %cst_77 : f32 to vector<4x32xf32>
    %238 = arith.addf %237, %236 : vector<4x32xf32>
    %239 = arith.divf %237, %238 : vector<4x32xf32>
    %240 = vector.extract_strided_slice %233 {offsets = [0, 32], sizes = [4, 32], strides = [1, 1]} : vector<4x128xf32> to vector<4x32xf32>
    %241 = arith.negf %240 : vector<4x32xf32>
    %242 = math.exp %241 : vector<4x32xf32>
    %cst_78 = arith.constant 1.000000e+00 : f32
    %243 = vector.broadcast %cst_78 : f32 to vector<4x32xf32>
    %244 = arith.addf %243, %242 : vector<4x32xf32>
    %245 = arith.divf %243, %244 : vector<4x32xf32>
    %246 = vector.extract_strided_slice %233 {offsets = [0, 64], sizes = [4, 32], strides = [1, 1]} : vector<4x128xf32> to vector<4x32xf32>
    %247 = math.tanh %246 : vector<4x32xf32>
    %248 = vector.extract_strided_slice %233 {offsets = [0, 96], sizes = [4, 32], strides = [1, 1]} : vector<4x128xf32> to vector<4x32xf32>
    %249 = arith.negf %248 : vector<4x32xf32>
    %250 = math.exp %249 : vector<4x32xf32>
    %cst_79 = arith.constant 1.000000e+00 : f32
    %251 = vector.broadcast %cst_79 : f32 to vector<4x32xf32>
    %252 = arith.addf %251, %250 : vector<4x32xf32>
    %253 = arith.divf %251, %252 : vector<4x32xf32>
    %254 = arith.mulf %245, %205 : vector<4x32xf32>
    %255 = arith.mulf %239, %247 : vector<4x32xf32>
    %256 = arith.addf %254, %255 : vector<4x32xf32>
    %257 = math.tanh %256 : vector<4x32xf32>
    %258 = arith.mulf %253, %257 : vector<4x32xf32>
    %259 = vector.extract_strided_slice %258 {offsets = [0, 0], sizes = [2, 32], strides = [1, 1]} : vector<4x32xf32> to vector<2x32xf32>
    %260 = vector.extract_strided_slice %258 {offsets = [2, 0], sizes = [2, 32], strides = [1, 1]} : vector<4x32xf32> to vector<2x32xf32>
    %261 = arith.index_cast %c4_i32 : i32 to index
    %c0_80 = arith.constant 0 : index
    %c0_81 = arith.constant 0 : index
    %262 = vector.load %arg9[%261, %c0_80, %c0_81] : memref<16x2x32xf32, #tpu.memory_space<vmem>>, vector<1x2x32xf32>
    %263 = vector.shape_cast %262 : vector<1x2x32xf32> to vector<2x32xf32>
    %264 = vector.shape_cast %259 : vector<2x32xf32> to vector<1x2x32xf32>
    tpu.vector_store %arg9[%261, %c0_80, %c0_81], %264 {strides = array<i32>} : memref<16x2x32xf32, #tpu.memory_space<vmem>>, vector<1x2x32xf32>,
    %265 = arith.index_cast %218 : i32 to index
    %c0_82 = arith.constant 0 : index
    %c0_83 = arith.constant 0 : index
    %266 = vector.load %arg10[%265, %c0_82, %c0_83] : memref<16x2x32xf32, #tpu.memory_space<vmem>>, vector<1x2x32xf32>
    %267 = vector.shape_cast %266 : vector<1x2x32xf32> to vector<2x32xf32>
    %268 = vector.shape_cast %260 : vector<2x32xf32> to vector<1x2x32xf32>
    tpu.vector_store %arg10[%265, %c0_82, %c0_83], %268 {strides = array<i32>} : memref<16x2x32xf32, #tpu.memory_space<vmem>>, vector<1x2x32xf32>,
    %c5_i32 = arith.constant 5 : i32
    %c15_i32_84 = arith.constant 15 : i32
    %269 = arith.subi %c15_i32_84, %c5_i32 : i32
    %270 = arith.index_cast %c5_i32 : i32 to index
    %c0_85 = arith.constant 0 : index
    %c0_86 = arith.constant 0 : index
    %271 = vector.load %arg8[%270, %c0_85, %c0_86] : memref<16x2x256xf32, #tpu.memory_space<vmem>>, vector<1x2x256xf32>
    %272 = vector.shape_cast %271 : vector<1x2x256xf32> to vector<2x256xf32>
    %273 = arith.index_cast %269 : i32 to index
    %c0_87 = arith.constant 0 : index
    %c0_88 = arith.constant 0 : index
    %274 = vector.load %arg8[%273, %c0_87, %c0_88] : memref<16x2x256xf32, #tpu.memory_space<vmem>>, vector<1x2x256xf32>
    %275 = vector.shape_cast %274 : vector<1x2x256xf32> to vector<2x256xf32>
    %276 = vector.extract_strided_slice %272 {offsets = [0, 0], sizes = [2, 128], strides = [1, 1]} : vector<2x256xf32> to vector<2x128xf32>
    %277 = arith.truncf %259 : vector<2x32xf32> to vector<2x32xbf16>
    %cst_89 = arith.constant dense<0.000000e+00> : vector<2x128xf32>
    %278 = tpu.matmul %277, %10, %cst_89 {dimension_numbers = #tpu.dot_dimension_numbers<[1], [0], [0], [1], [0, 0, 1, 1], [], []>} : vector<2x32xbf16>, vector<32x128xbf16>, vector<2x128xf32> -> vector<2x128xf32>
    %279 = arith.addf %276, %278 : vector<2x128xf32>
    %280 = vector.extract_strided_slice %275 {offsets = [0, 128], sizes = [2, 128], strides = [1, 1]} : vector<2x256xf32> to vector<2x128xf32>
    %281 = arith.truncf %260 : vector<2x32xf32> to vector<2x32xbf16>
    %cst_90 = arith.constant dense<0.000000e+00> : vector<2x128xf32>
    %282 = tpu.matmul %281, %11, %cst_90 {dimension_numbers = #tpu.dot_dimension_numbers<[1], [0], [0], [1], [0, 0, 1, 1], [], []>} : vector<2x32xbf16>, vector<32x128xbf16>, vector<2x128xf32> -> vector<2x128xf32>
    %283 = arith.addf %280, %282 : vector<2x128xf32>
    %284 = tpu.concatenate %279, %283 in 0 : vector<2x128xf32>, vector<2x128xf32> -> vector<4x128xf32>
    %285 = vector.extract_strided_slice %284 {offsets = [0, 0], sizes = [4, 32], strides = [1, 1]} : vector<4x128xf32> to vector<4x32xf32>
    %286 = arith.negf %285 : vector<4x32xf32>
    %287 = math.exp %286 : vector<4x32xf32>
    %cst_91 = arith.constant 1.000000e+00 : f32
    %288 = vector.broadcast %cst_91 : f32 to vector<4x32xf32>
    %289 = arith.addf %288, %287 : vector<4x32xf32>
    %290 = arith.divf %288, %289 : vector<4x32xf32>
    %291 = vector.extract_strided_slice %284 {offsets = [0, 32], sizes = [4, 32], strides = [1, 1]} : vector<4x128xf32> to vector<4x32xf32>
    %292 = arith.negf %291 : vector<4x32xf32>
    %293 = math.exp %292 : vector<4x32xf32>
    %cst_92 = arith.constant 1.000000e+00 : f32
    %294 = vector.broadcast %cst_92 : f32 to vector<4x32xf32>
    %295 = arith.addf %294, %293 : vector<4x32xf32>
    %296 = arith.divf %294, %295 : vector<4x32xf32>
    %297 = vector.extract_strided_slice %284 {offsets = [0, 64], sizes = [4, 32], strides = [1, 1]} : vector<4x128xf32> to vector<4x32xf32>
    %298 = math.tanh %297 : vector<4x32xf32>
    %299 = vector.extract_strided_slice %284 {offsets = [0, 96], sizes = [4, 32], strides = [1, 1]} : vector<4x128xf32> to vector<4x32xf32>
    %300 = arith.negf %299 : vector<4x32xf32>
    %301 = math.exp %300 : vector<4x32xf32>
    %cst_93 = arith.constant 1.000000e+00 : f32
    %302 = vector.broadcast %cst_93 : f32 to vector<4x32xf32>
    %303 = arith.addf %302, %301 : vector<4x32xf32>
    %304 = arith.divf %302, %303 : vector<4x32xf32>
    %305 = arith.mulf %296, %256 : vector<4x32xf32>
    %306 = arith.mulf %290, %298 : vector<4x32xf32>
    %307 = arith.addf %305, %306 : vector<4x32xf32>
    %308 = math.tanh %307 : vector<4x32xf32>
    %309 = arith.mulf %304, %308 : vector<4x32xf32>
    %310 = vector.extract_strided_slice %309 {offsets = [0, 0], sizes = [2, 32], strides = [1, 1]} : vector<4x32xf32> to vector<2x32xf32>
    %311 = vector.extract_strided_slice %309 {offsets = [2, 0], sizes = [2, 32], strides = [1, 1]} : vector<4x32xf32> to vector<2x32xf32>
    %312 = arith.index_cast %c5_i32 : i32 to index
    %c0_94 = arith.constant 0 : index
    %c0_95 = arith.constant 0 : index
    %313 = vector.load %arg9[%312, %c0_94, %c0_95] : memref<16x2x32xf32, #tpu.memory_space<vmem>>, vector<1x2x32xf32>
    %314 = vector.shape_cast %313 : vector<1x2x32xf32> to vector<2x32xf32>
    %315 = vector.shape_cast %310 : vector<2x32xf32> to vector<1x2x32xf32>
    tpu.vector_store %arg9[%312, %c0_94, %c0_95], %315 {strides = array<i32>} : memref<16x2x32xf32, #tpu.memory_space<vmem>>, vector<1x2x32xf32>,
    %316 = arith.index_cast %269 : i32 to index
    %c0_96 = arith.constant 0 : index
    %c0_97 = arith.constant 0 : index
    %317 = vector.load %arg10[%316, %c0_96, %c0_97] : memref<16x2x32xf32, #tpu.memory_space<vmem>>, vector<1x2x32xf32>
    %318 = vector.shape_cast %317 : vector<1x2x32xf32> to vector<2x32xf32>
    %319 = vector.shape_cast %311 : vector<2x32xf32> to vector<1x2x32xf32>
    tpu.vector_store %arg10[%316, %c0_96, %c0_97], %319 {strides = array<i32>} : memref<16x2x32xf32, #tpu.memory_space<vmem>>, vector<1x2x32xf32>,
    %c6_i32 = arith.constant 6 : i32
    %c15_i32_98 = arith.constant 15 : i32
    %320 = arith.subi %c15_i32_98, %c6_i32 : i32
    %321 = arith.index_cast %c6_i32 : i32 to index
    %c0_99 = arith.constant 0 : index
    %c0_100 = arith.constant 0 : index
    %322 = vector.load %arg8[%321, %c0_99, %c0_100] : memref<16x2x256xf32, #tpu.memory_space<vmem>>, vector<1x2x256xf32>
    %323 = vector.shape_cast %322 : vector<1x2x256xf32> to vector<2x256xf32>
    %324 = arith.index_cast %320 : i32 to index
    %c0_101 = arith.constant 0 : index
    %c0_102 = arith.constant 0 : index
    %325 = vector.load %arg8[%324, %c0_101, %c0_102] : memref<16x2x256xf32, #tpu.memory_space<vmem>>, vector<1x2x256xf32>
    %326 = vector.shape_cast %325 : vector<1x2x256xf32> to vector<2x256xf32>
    %327 = vector.extract_strided_slice %323 {offsets = [0, 0], sizes = [2, 128], strides = [1, 1]} : vector<2x256xf32> to vector<2x128xf32>
    %328 = arith.truncf %310 : vector<2x32xf32> to vector<2x32xbf16>
    %cst_103 = arith.constant dense<0.000000e+00> : vector<2x128xf32>
    %329 = tpu.matmul %328, %10, %cst_103 {dimension_numbers = #tpu.dot_dimension_numbers<[1], [0], [0], [1], [0, 0, 1, 1], [], []>} : vector<2x32xbf16>, vector<32x128xbf16>, vector<2x128xf32> -> vector<2x128xf32>
    %330 = arith.addf %327, %329 : vector<2x128xf32>
    %331 = vector.extract_strided_slice %326 {offsets = [0, 128], sizes = [2, 128], strides = [1, 1]} : vector<2x256xf32> to vector<2x128xf32>
    %332 = arith.truncf %311 : vector<2x32xf32> to vector<2x32xbf16>
    %cst_104 = arith.constant dense<0.000000e+00> : vector<2x128xf32>
    %333 = tpu.matmul %332, %11, %cst_104 {dimension_numbers = #tpu.dot_dimension_numbers<[1], [0], [0], [1], [0, 0, 1, 1], [], []>} : vector<2x32xbf16>, vector<32x128xbf16>, vector<2x128xf32> -> vector<2x128xf32>
    %334 = arith.addf %331, %333 : vector<2x128xf32>
    %335 = tpu.concatenate %330, %334 in 0 : vector<2x128xf32>, vector<2x128xf32> -> vector<4x128xf32>
    %336 = vector.extract_strided_slice %335 {offsets = [0, 0], sizes = [4, 32], strides = [1, 1]} : vector<4x128xf32> to vector<4x32xf32>
    %337 = arith.negf %336 : vector<4x32xf32>
    %338 = math.exp %337 : vector<4x32xf32>
    %cst_105 = arith.constant 1.000000e+00 : f32
    %339 = vector.broadcast %cst_105 : f32 to vector<4x32xf32>
    %340 = arith.addf %339, %338 : vector<4x32xf32>
    %341 = arith.divf %339, %340 : vector<4x32xf32>
    %342 = vector.extract_strided_slice %335 {offsets = [0, 32], sizes = [4, 32], strides = [1, 1]} : vector<4x128xf32> to vector<4x32xf32>
    %343 = arith.negf %342 : vector<4x32xf32>
    %344 = math.exp %343 : vector<4x32xf32>
    %cst_106 = arith.constant 1.000000e+00 : f32
    %345 = vector.broadcast %cst_106 : f32 to vector<4x32xf32>
    %346 = arith.addf %345, %344 : vector<4x32xf32>
    %347 = arith.divf %345, %346 : vector<4x32xf32>
    %348 = vector.extract_strided_slice %335 {offsets = [0, 64], sizes = [4, 32], strides = [1, 1]} : vector<4x128xf32> to vector<4x32xf32>
    %349 = math.tanh %348 : vector<4x32xf32>
    %350 = vector.extract_strided_slice %335 {offsets = [0, 96], sizes = [4, 32], strides = [1, 1]} : vector<4x128xf32> to vector<4x32xf32>
    %351 = arith.negf %350 : vector<4x32xf32>
    %352 = math.exp %351 : vector<4x32xf32>
    %cst_107 = arith.constant 1.000000e+00 : f32
    %353 = vector.broadcast %cst_107 : f32 to vector<4x32xf32>
    %354 = arith.addf %353, %352 : vector<4x32xf32>
    %355 = arith.divf %353, %354 : vector<4x32xf32>
    %356 = arith.mulf %347, %307 : vector<4x32xf32>
    %357 = arith.mulf %341, %349 : vector<4x32xf32>
    %358 = arith.addf %356, %357 : vector<4x32xf32>
    %359 = math.tanh %358 : vector<4x32xf32>
    %360 = arith.mulf %355, %359 : vector<4x32xf32>
    %361 = vector.extract_strided_slice %360 {offsets = [0, 0], sizes = [2, 32], strides = [1, 1]} : vector<4x32xf32> to vector<2x32xf32>
    %362 = vector.extract_strided_slice %360 {offsets = [2, 0], sizes = [2, 32], strides = [1, 1]} : vector<4x32xf32> to vector<2x32xf32>
    %363 = arith.index_cast %c6_i32 : i32 to index
    %c0_108 = arith.constant 0 : index
    %c0_109 = arith.constant 0 : index
    %364 = vector.load %arg9[%363, %c0_108, %c0_109] : memref<16x2x32xf32, #tpu.memory_space<vmem>>, vector<1x2x32xf32>
    %365 = vector.shape_cast %364 : vector<1x2x32xf32> to vector<2x32xf32>
    %366 = vector.shape_cast %361 : vector<2x32xf32> to vector<1x2x32xf32>
    tpu.vector_store %arg9[%363, %c0_108, %c0_109], %366 {strides = array<i32>} : memref<16x2x32xf32, #tpu.memory_space<vmem>>, vector<1x2x32xf32>,
    %367 = arith.index_cast %320 : i32 to index
    %c0_110 = arith.constant 0 : index
    %c0_111 = arith.constant 0 : index
    %368 = vector.load %arg10[%367, %c0_110, %c0_111] : memref<16x2x32xf32, #tpu.memory_space<vmem>>, vector<1x2x32xf32>
    %369 = vector.shape_cast %368 : vector<1x2x32xf32> to vector<2x32xf32>
    %370 = vector.shape_cast %362 : vector<2x32xf32> to vector<1x2x32xf32>
    tpu.vector_store %arg10[%367, %c0_110, %c0_111], %370 {strides = array<i32>} : memref<16x2x32xf32, #tpu.memory_space<vmem>>, vector<1x2x32xf32>,
    %c7_i32 = arith.constant 7 : i32
    %c15_i32_112 = arith.constant 15 : i32
    %371 = arith.subi %c15_i32_112, %c7_i32 : i32
    %372 = arith.index_cast %c7_i32 : i32 to index
    %c0_113 = arith.constant 0 : index
    %c0_114 = arith.constant 0 : index
    %373 = vector.load %arg8[%372, %c0_113, %c0_114] : memref<16x2x256xf32, #tpu.memory_space<vmem>>, vector<1x2x256xf32>
    %374 = vector.shape_cast %373 : vector<1x2x256xf32> to vector<2x256xf32>
    %375 = arith.index_cast %371 : i32 to index
    %c0_115 = arith.constant 0 : index
    %c0_116 = arith.constant 0 : index
    %376 = vector.load %arg8[%375, %c0_115, %c0_116] : memref<16x2x256xf32, #tpu.memory_space<vmem>>, vector<1x2x256xf32>
    %377 = vector.shape_cast %376 : vector<1x2x256xf32> to vector<2x256xf32>
    %378 = vector.extract_strided_slice %374 {offsets = [0, 0], sizes = [2, 128], strides = [1, 1]} : vector<2x256xf32> to vector<2x128xf32>
    %379 = arith.truncf %361 : vector<2x32xf32> to vector<2x32xbf16>
    %cst_117 = arith.constant dense<0.000000e+00> : vector<2x128xf32>
    %380 = tpu.matmul %379, %10, %cst_117 {dimension_numbers = #tpu.dot_dimension_numbers<[1], [0], [0], [1], [0, 0, 1, 1], [], []>} : vector<2x32xbf16>, vector<32x128xbf16>, vector<2x128xf32> -> vector<2x128xf32>
    %381 = arith.addf %378, %380 : vector<2x128xf32>
    %382 = vector.extract_strided_slice %377 {offsets = [0, 128], sizes = [2, 128], strides = [1, 1]} : vector<2x256xf32> to vector<2x128xf32>
    %383 = arith.truncf %362 : vector<2x32xf32> to vector<2x32xbf16>
    %cst_118 = arith.constant dense<0.000000e+00> : vector<2x128xf32>
    %384 = tpu.matmul %383, %11, %cst_118 {dimension_numbers = #tpu.dot_dimension_numbers<[1], [0], [0], [1], [0, 0, 1, 1], [], []>} : vector<2x32xbf16>, vector<32x128xbf16>, vector<2x128xf32> -> vector<2x128xf32>
    %385 = arith.addf %382, %384 : vector<2x128xf32>
    %386 = tpu.concatenate %381, %385 in 0 : vector<2x128xf32>, vector<2x128xf32> -> vector<4x128xf32>
    %387 = vector.extract_strided_slice %386 {offsets = [0, 0], sizes = [4, 32], strides = [1, 1]} : vector<4x128xf32> to vector<4x32xf32>
    %388 = arith.negf %387 : vector<4x32xf32>
    %389 = math.exp %388 : vector<4x32xf32>
    %cst_119 = arith.constant 1.000000e+00 : f32
    %390 = vector.broadcast %cst_119 : f32 to vector<4x32xf32>
    %391 = arith.addf %390, %389 : vector<4x32xf32>
    %392 = arith.divf %390, %391 : vector<4x32xf32>
    %393 = vector.extract_strided_slice %386 {offsets = [0, 32], sizes = [4, 32], strides = [1, 1]} : vector<4x128xf32> to vector<4x32xf32>
    %394 = arith.negf %393 : vector<4x32xf32>
    %395 = math.exp %394 : vector<4x32xf32>
    %cst_120 = arith.constant 1.000000e+00 : f32
    %396 = vector.broadcast %cst_120 : f32 to vector<4x32xf32>
    %397 = arith.addf %396, %395 : vector<4x32xf32>
    %398 = arith.divf %396, %397 : vector<4x32xf32>
    %399 = vector.extract_strided_slice %386 {offsets = [0, 64], sizes = [4, 32], strides = [1, 1]} : vector<4x128xf32> to vector<4x32xf32>
    %400 = math.tanh %399 : vector<4x32xf32>
    %401 = vector.extract_strided_slice %386 {offsets = [0, 96], sizes = [4, 32], strides = [1, 1]} : vector<4x128xf32> to vector<4x32xf32>
    %402 = arith.negf %401 : vector<4x32xf32>
    %403 = math.exp %402 : vector<4x32xf32>
    %cst_121 = arith.constant 1.000000e+00 : f32
    %404 = vector.broadcast %cst_121 : f32 to vector<4x32xf32>
    %405 = arith.addf %404, %403 : vector<4x32xf32>
    %406 = arith.divf %404, %405 : vector<4x32xf32>
    %407 = arith.mulf %398, %358 : vector<4x32xf32>
    %408 = arith.mulf %392, %400 : vector<4x32xf32>
    %409 = arith.addf %407, %408 : vector<4x32xf32>
    %410 = math.tanh %409 : vector<4x32xf32>
    %411 = arith.mulf %406, %410 : vector<4x32xf32>
    %412 = vector.extract_strided_slice %411 {offsets = [0, 0], sizes = [2, 32], strides = [1, 1]} : vector<4x32xf32> to vector<2x32xf32>
    %413 = vector.extract_strided_slice %411 {offsets = [2, 0], sizes = [2, 32], strides = [1, 1]} : vector<4x32xf32> to vector<2x32xf32>
    %414 = arith.index_cast %c7_i32 : i32 to index
    %c0_122 = arith.constant 0 : index
    %c0_123 = arith.constant 0 : index
    %415 = vector.load %arg9[%414, %c0_122, %c0_123] : memref<16x2x32xf32, #tpu.memory_space<vmem>>, vector<1x2x32xf32>
    %416 = vector.shape_cast %415 : vector<1x2x32xf32> to vector<2x32xf32>
    %417 = vector.shape_cast %412 : vector<2x32xf32> to vector<1x2x32xf32>
    tpu.vector_store %arg9[%414, %c0_122, %c0_123], %417 {strides = array<i32>} : memref<16x2x32xf32, #tpu.memory_space<vmem>>, vector<1x2x32xf32>,
    %418 = arith.index_cast %371 : i32 to index
    %c0_124 = arith.constant 0 : index
    %c0_125 = arith.constant 0 : index
    %419 = vector.load %arg10[%418, %c0_124, %c0_125] : memref<16x2x32xf32, #tpu.memory_space<vmem>>, vector<1x2x32xf32>
    %420 = vector.shape_cast %419 : vector<1x2x32xf32> to vector<2x32xf32>
    %421 = vector.shape_cast %413 : vector<2x32xf32> to vector<1x2x32xf32>
    tpu.vector_store %arg10[%418, %c0_124, %c0_125], %421 {strides = array<i32>} : memref<16x2x32xf32, #tpu.memory_space<vmem>>, vector<1x2x32xf32>,
    %c8_i32 = arith.constant 8 : i32
    %c15_i32_126 = arith.constant 15 : i32
    %422 = arith.subi %c15_i32_126, %c8_i32 : i32
    %423 = arith.index_cast %c8_i32 : i32 to index
    %c0_127 = arith.constant 0 : index
    %c0_128 = arith.constant 0 : index
    %424 = vector.load %arg8[%423, %c0_127, %c0_128] : memref<16x2x256xf32, #tpu.memory_space<vmem>>, vector<1x2x256xf32>
    %425 = vector.shape_cast %424 : vector<1x2x256xf32> to vector<2x256xf32>
    %426 = arith.index_cast %422 : i32 to index
    %c0_129 = arith.constant 0 : index
    %c0_130 = arith.constant 0 : index
    %427 = vector.load %arg8[%426, %c0_129, %c0_130] : memref<16x2x256xf32, #tpu.memory_space<vmem>>, vector<1x2x256xf32>
    %428 = vector.shape_cast %427 : vector<1x2x256xf32> to vector<2x256xf32>
    %429 = vector.extract_strided_slice %425 {offsets = [0, 0], sizes = [2, 128], strides = [1, 1]} : vector<2x256xf32> to vector<2x128xf32>
    %430 = arith.truncf %412 : vector<2x32xf32> to vector<2x32xbf16>
    %cst_131 = arith.constant dense<0.000000e+00> : vector<2x128xf32>
    %431 = tpu.matmul %430, %10, %cst_131 {dimension_numbers = #tpu.dot_dimension_numbers<[1], [0], [0], [1], [0, 0, 1, 1], [], []>} : vector<2x32xbf16>, vector<32x128xbf16>, vector<2x128xf32> -> vector<2x128xf32>
    %432 = arith.addf %429, %431 : vector<2x128xf32>
    %433 = vector.extract_strided_slice %428 {offsets = [0, 128], sizes = [2, 128], strides = [1, 1]} : vector<2x256xf32> to vector<2x128xf32>
    %434 = arith.truncf %413 : vector<2x32xf32> to vector<2x32xbf16>
    %cst_132 = arith.constant dense<0.000000e+00> : vector<2x128xf32>
    %435 = tpu.matmul %434, %11, %cst_132 {dimension_numbers = #tpu.dot_dimension_numbers<[1], [0], [0], [1], [0, 0, 1, 1], [], []>} : vector<2x32xbf16>, vector<32x128xbf16>, vector<2x128xf32> -> vector<2x128xf32>
    %436 = arith.addf %433, %435 : vector<2x128xf32>
    %437 = tpu.concatenate %432, %436 in 0 : vector<2x128xf32>, vector<2x128xf32> -> vector<4x128xf32>
    %438 = vector.extract_strided_slice %437 {offsets = [0, 0], sizes = [4, 32], strides = [1, 1]} : vector<4x128xf32> to vector<4x32xf32>
    %439 = arith.negf %438 : vector<4x32xf32>
    %440 = math.exp %439 : vector<4x32xf32>
    %cst_133 = arith.constant 1.000000e+00 : f32
    %441 = vector.broadcast %cst_133 : f32 to vector<4x32xf32>
    %442 = arith.addf %441, %440 : vector<4x32xf32>
    %443 = arith.divf %441, %442 : vector<4x32xf32>
    %444 = vector.extract_strided_slice %437 {offsets = [0, 32], sizes = [4, 32], strides = [1, 1]} : vector<4x128xf32> to vector<4x32xf32>
    %445 = arith.negf %444 : vector<4x32xf32>
    %446 = math.exp %445 : vector<4x32xf32>
    %cst_134 = arith.constant 1.000000e+00 : f32
    %447 = vector.broadcast %cst_134 : f32 to vector<4x32xf32>
    %448 = arith.addf %447, %446 : vector<4x32xf32>
    %449 = arith.divf %447, %448 : vector<4x32xf32>
    %450 = vector.extract_strided_slice %437 {offsets = [0, 64], sizes = [4, 32], strides = [1, 1]} : vector<4x128xf32> to vector<4x32xf32>
    %451 = math.tanh %450 : vector<4x32xf32>
    %452 = vector.extract_strided_slice %437 {offsets = [0, 96], sizes = [4, 32], strides = [1, 1]} : vector<4x128xf32> to vector<4x32xf32>
    %453 = arith.negf %452 : vector<4x32xf32>
    %454 = math.exp %453 : vector<4x32xf32>
    %cst_135 = arith.constant 1.000000e+00 : f32
    %455 = vector.broadcast %cst_135 : f32 to vector<4x32xf32>
    %456 = arith.addf %455, %454 : vector<4x32xf32>
    %457 = arith.divf %455, %456 : vector<4x32xf32>
    %458 = arith.mulf %449, %409 : vector<4x32xf32>
    %459 = arith.mulf %443, %451 : vector<4x32xf32>
    %460 = arith.addf %458, %459 : vector<4x32xf32>
    %461 = math.tanh %460 : vector<4x32xf32>
    %462 = arith.mulf %457, %461 : vector<4x32xf32>
    %463 = vector.extract_strided_slice %462 {offsets = [0, 0], sizes = [2, 32], strides = [1, 1]} : vector<4x32xf32> to vector<2x32xf32>
    %464 = vector.extract_strided_slice %462 {offsets = [2, 0], sizes = [2, 32], strides = [1, 1]} : vector<4x32xf32> to vector<2x32xf32>
    %465 = arith.index_cast %c8_i32 : i32 to index
    %c0_136 = arith.constant 0 : index
    %c0_137 = arith.constant 0 : index
    %466 = vector.load %arg9[%465, %c0_136, %c0_137] : memref<16x2x32xf32, #tpu.memory_space<vmem>>, vector<1x2x32xf32>
    %467 = vector.shape_cast %466 : vector<1x2x32xf32> to vector<2x32xf32>
    %468 = vector.shape_cast %463 : vector<2x32xf32> to vector<1x2x32xf32>
    tpu.vector_store %arg9[%465, %c0_136, %c0_137], %468 {strides = array<i32>} : memref<16x2x32xf32, #tpu.memory_space<vmem>>, vector<1x2x32xf32>,
    %469 = arith.index_cast %422 : i32 to index
    %c0_138 = arith.constant 0 : index
    %c0_139 = arith.constant 0 : index
    %470 = vector.load %arg10[%469, %c0_138, %c0_139] : memref<16x2x32xf32, #tpu.memory_space<vmem>>, vector<1x2x32xf32>
    %471 = vector.shape_cast %470 : vector<1x2x32xf32> to vector<2x32xf32>
    %472 = vector.shape_cast %464 : vector<2x32xf32> to vector<1x2x32xf32>
    tpu.vector_store %arg10[%469, %c0_138, %c0_139], %472 {strides = array<i32>} : memref<16x2x32xf32, #tpu.memory_space<vmem>>, vector<1x2x32xf32>,
    %c9_i32 = arith.constant 9 : i32
    %c15_i32_140 = arith.constant 15 : i32
    %473 = arith.subi %c15_i32_140, %c9_i32 : i32
    %474 = arith.index_cast %c9_i32 : i32 to index
    %c0_141 = arith.constant 0 : index
    %c0_142 = arith.constant 0 : index
    %475 = vector.load %arg8[%474, %c0_141, %c0_142] : memref<16x2x256xf32, #tpu.memory_space<vmem>>, vector<1x2x256xf32>
    %476 = vector.shape_cast %475 : vector<1x2x256xf32> to vector<2x256xf32>
    %477 = arith.index_cast %473 : i32 to index
    %c0_143 = arith.constant 0 : index
    %c0_144 = arith.constant 0 : index
    %478 = vector.load %arg8[%477, %c0_143, %c0_144] : memref<16x2x256xf32, #tpu.memory_space<vmem>>, vector<1x2x256xf32>
    %479 = vector.shape_cast %478 : vector<1x2x256xf32> to vector<2x256xf32>
    %480 = vector.extract_strided_slice %476 {offsets = [0, 0], sizes = [2, 128], strides = [1, 1]} : vector<2x256xf32> to vector<2x128xf32>
    %481 = arith.truncf %463 : vector<2x32xf32> to vector<2x32xbf16>
    %cst_145 = arith.constant dense<0.000000e+00> : vector<2x128xf32>
    %482 = tpu.matmul %481, %10, %cst_145 {dimension_numbers = #tpu.dot_dimension_numbers<[1], [0], [0], [1], [0, 0, 1, 1], [], []>} : vector<2x32xbf16>, vector<32x128xbf16>, vector<2x128xf32> -> vector<2x128xf32>
    %483 = arith.addf %480, %482 : vector<2x128xf32>
    %484 = vector.extract_strided_slice %479 {offsets = [0, 128], sizes = [2, 128], strides = [1, 1]} : vector<2x256xf32> to vector<2x128xf32>
    %485 = arith.truncf %464 : vector<2x32xf32> to vector<2x32xbf16>
    %cst_146 = arith.constant dense<0.000000e+00> : vector<2x128xf32>
    %486 = tpu.matmul %485, %11, %cst_146 {dimension_numbers = #tpu.dot_dimension_numbers<[1], [0], [0], [1], [0, 0, 1, 1], [], []>} : vector<2x32xbf16>, vector<32x128xbf16>, vector<2x128xf32> -> vector<2x128xf32>
    %487 = arith.addf %484, %486 : vector<2x128xf32>
    %488 = tpu.concatenate %483, %487 in 0 : vector<2x128xf32>, vector<2x128xf32> -> vector<4x128xf32>
    %489 = vector.extract_strided_slice %488 {offsets = [0, 0], sizes = [4, 32], strides = [1, 1]} : vector<4x128xf32> to vector<4x32xf32>
    %490 = arith.negf %489 : vector<4x32xf32>
    %491 = math.exp %490 : vector<4x32xf32>
    %cst_147 = arith.constant 1.000000e+00 : f32
    %492 = vector.broadcast %cst_147 : f32 to vector<4x32xf32>
    %493 = arith.addf %492, %491 : vector<4x32xf32>
    %494 = arith.divf %492, %493 : vector<4x32xf32>
    %495 = vector.extract_strided_slice %488 {offsets = [0, 32], sizes = [4, 32], strides = [1, 1]} : vector<4x128xf32> to vector<4x32xf32>
    %496 = arith.negf %495 : vector<4x32xf32>
    %497 = math.exp %496 : vector<4x32xf32>
    %cst_148 = arith.constant 1.000000e+00 : f32
    %498 = vector.broadcast %cst_148 : f32 to vector<4x32xf32>
    %499 = arith.addf %498, %497 : vector<4x32xf32>
    %500 = arith.divf %498, %499 : vector<4x32xf32>
    %501 = vector.extract_strided_slice %488 {offsets = [0, 64], sizes = [4, 32], strides = [1, 1]} : vector<4x128xf32> to vector<4x32xf32>
    %502 = math.tanh %501 : vector<4x32xf32>
    %503 = vector.extract_strided_slice %488 {offsets = [0, 96], sizes = [4, 32], strides = [1, 1]} : vector<4x128xf32> to vector<4x32xf32>
    %504 = arith.negf %503 : vector<4x32xf32>
    %505 = math.exp %504 : vector<4x32xf32>
    %cst_149 = arith.constant 1.000000e+00 : f32
    %506 = vector.broadcast %cst_149 : f32 to vector<4x32xf32>
    %507 = arith.addf %506, %505 : vector<4x32xf32>
    %508 = arith.divf %506, %507 : vector<4x32xf32>
    %509 = arith.mulf %500, %460 : vector<4x32xf32>
    %510 = arith.mulf %494, %502 : vector<4x32xf32>
    %511 = arith.addf %509, %510 : vector<4x32xf32>
    %512 = math.tanh %511 : vector<4x32xf32>
    %513 = arith.mulf %508, %512 : vector<4x32xf32>
    %514 = vector.extract_strided_slice %513 {offsets = [0, 0], sizes = [2, 32], strides = [1, 1]} : vector<4x32xf32> to vector<2x32xf32>
    %515 = vector.extract_strided_slice %513 {offsets = [2, 0], sizes = [2, 32], strides = [1, 1]} : vector<4x32xf32> to vector<2x32xf32>
    %516 = arith.index_cast %c9_i32 : i32 to index
    %c0_150 = arith.constant 0 : index
    %c0_151 = arith.constant 0 : index
    %517 = vector.load %arg9[%516, %c0_150, %c0_151] : memref<16x2x32xf32, #tpu.memory_space<vmem>>, vector<1x2x32xf32>
    %518 = vector.shape_cast %517 : vector<1x2x32xf32> to vector<2x32xf32>
    %519 = vector.shape_cast %514 : vector<2x32xf32> to vector<1x2x32xf32>
    tpu.vector_store %arg9[%516, %c0_150, %c0_151], %519 {strides = array<i32>} : memref<16x2x32xf32, #tpu.memory_space<vmem>>, vector<1x2x32xf32>,
    %520 = arith.index_cast %473 : i32 to index
    %c0_152 = arith.constant 0 : index
    %c0_153 = arith.constant 0 : index
    %521 = vector.load %arg10[%520, %c0_152, %c0_153] : memref<16x2x32xf32, #tpu.memory_space<vmem>>, vector<1x2x32xf32>
    %522 = vector.shape_cast %521 : vector<1x2x32xf32> to vector<2x32xf32>
    %523 = vector.shape_cast %515 : vector<2x32xf32> to vector<1x2x32xf32>
    tpu.vector_store %arg10[%520, %c0_152, %c0_153], %523 {strides = array<i32>} : memref<16x2x32xf32, #tpu.memory_space<vmem>>, vector<1x2x32xf32>,
    %c10_i32 = arith.constant 10 : i32
    %c15_i32_154 = arith.constant 15 : i32
    %524 = arith.subi %c15_i32_154, %c10_i32 : i32
    %525 = arith.index_cast %c10_i32 : i32 to index
    %c0_155 = arith.constant 0 : index
    %c0_156 = arith.constant 0 : index
    %526 = vector.load %arg8[%525, %c0_155, %c0_156] : memref<16x2x256xf32, #tpu.memory_space<vmem>>, vector<1x2x256xf32>
    %527 = vector.shape_cast %526 : vector<1x2x256xf32> to vector<2x256xf32>
    %528 = arith.index_cast %524 : i32 to index
    %c0_157 = arith.constant 0 : index
    %c0_158 = arith.constant 0 : index
    %529 = vector.load %arg8[%528, %c0_157, %c0_158] : memref<16x2x256xf32, #tpu.memory_space<vmem>>, vector<1x2x256xf32>
    %530 = vector.shape_cast %529 : vector<1x2x256xf32> to vector<2x256xf32>
    %531 = vector.extract_strided_slice %527 {offsets = [0, 0], sizes = [2, 128], strides = [1, 1]} : vector<2x256xf32> to vector<2x128xf32>
    %532 = arith.truncf %514 : vector<2x32xf32> to vector<2x32xbf16>
    %cst_159 = arith.constant dense<0.000000e+00> : vector<2x128xf32>
    %533 = tpu.matmul %532, %10, %cst_159 {dimension_numbers = #tpu.dot_dimension_numbers<[1], [0], [0], [1], [0, 0, 1, 1], [], []>} : vector<2x32xbf16>, vector<32x128xbf16>, vector<2x128xf32> -> vector<2x128xf32>
    %534 = arith.addf %531, %533 : vector<2x128xf32>
    %535 = vector.extract_strided_slice %530 {offsets = [0, 128], sizes = [2, 128], strides = [1, 1]} : vector<2x256xf32> to vector<2x128xf32>
    %536 = arith.truncf %515 : vector<2x32xf32> to vector<2x32xbf16>
    %cst_160 = arith.constant dense<0.000000e+00> : vector<2x128xf32>
    %537 = tpu.matmul %536, %11, %cst_160 {dimension_numbers = #tpu.dot_dimension_numbers<[1], [0], [0], [1], [0, 0, 1, 1], [], []>} : vector<2x32xbf16>, vector<32x128xbf16>, vector<2x128xf32> -> vector<2x128xf32>
    %538 = arith.addf %535, %537 : vector<2x128xf32>
    %539 = tpu.concatenate %534, %538 in 0 : vector<2x128xf32>, vector<2x128xf32> -> vector<4x128xf32>
    %540 = vector.extract_strided_slice %539 {offsets = [0, 0], sizes = [4, 32], strides = [1, 1]} : vector<4x128xf32> to vector<4x32xf32>
    %541 = arith.negf %540 : vector<4x32xf32>
    %542 = math.exp %541 : vector<4x32xf32>
    %cst_161 = arith.constant 1.000000e+00 : f32
    %543 = vector.broadcast %cst_161 : f32 to vector<4x32xf32>
    %544 = arith.addf %543, %542 : vector<4x32xf32>
    %545 = arith.divf %543, %544 : vector<4x32xf32>
    %546 = vector.extract_strided_slice %539 {offsets = [0, 32], sizes = [4, 32], strides = [1, 1]} : vector<4x128xf32> to vector<4x32xf32>
    %547 = arith.negf %546 : vector<4x32xf32>
    %548 = math.exp %547 : vector<4x32xf32>
    %cst_162 = arith.constant 1.000000e+00 : f32
    %549 = vector.broadcast %cst_162 : f32 to vector<4x32xf32>
    %550 = arith.addf %549, %548 : vector<4x32xf32>
    %551 = arith.divf %549, %550 : vector<4x32xf32>
    %552 = vector.extract_strided_slice %539 {offsets = [0, 64], sizes = [4, 32], strides = [1, 1]} : vector<4x128xf32> to vector<4x32xf32>
    %553 = math.tanh %552 : vector<4x32xf32>
    %554 = vector.extract_strided_slice %539 {offsets = [0, 96], sizes = [4, 32], strides = [1, 1]} : vector<4x128xf32> to vector<4x32xf32>
    %555 = arith.negf %554 : vector<4x32xf32>
    %556 = math.exp %555 : vector<4x32xf32>
    %cst_163 = arith.constant 1.000000e+00 : f32
    %557 = vector.broadcast %cst_163 : f32 to vector<4x32xf32>
    %558 = arith.addf %557, %556 : vector<4x32xf32>
    %559 = arith.divf %557, %558 : vector<4x32xf32>
    %560 = arith.mulf %551, %511 : vector<4x32xf32>
    %561 = arith.mulf %545, %553 : vector<4x32xf32>
    %562 = arith.addf %560, %561 : vector<4x32xf32>
    %563 = math.tanh %562 : vector<4x32xf32>
    %564 = arith.mulf %559, %563 : vector<4x32xf32>
    %565 = vector.extract_strided_slice %564 {offsets = [0, 0], sizes = [2, 32], strides = [1, 1]} : vector<4x32xf32> to vector<2x32xf32>
    %566 = vector.extract_strided_slice %564 {offsets = [2, 0], sizes = [2, 32], strides = [1, 1]} : vector<4x32xf32> to vector<2x32xf32>
    %567 = arith.index_cast %c10_i32 : i32 to index
    %c0_164 = arith.constant 0 : index
    %c0_165 = arith.constant 0 : index
    %568 = vector.load %arg9[%567, %c0_164, %c0_165] : memref<16x2x32xf32, #tpu.memory_space<vmem>>, vector<1x2x32xf32>
    %569 = vector.shape_cast %568 : vector<1x2x32xf32> to vector<2x32xf32>
    %570 = vector.shape_cast %565 : vector<2x32xf32> to vector<1x2x32xf32>
    tpu.vector_store %arg9[%567, %c0_164, %c0_165], %570 {strides = array<i32>} : memref<16x2x32xf32, #tpu.memory_space<vmem>>, vector<1x2x32xf32>,
    %571 = arith.index_cast %524 : i32 to index
    %c0_166 = arith.constant 0 : index
    %c0_167 = arith.constant 0 : index
    %572 = vector.load %arg10[%571, %c0_166, %c0_167] : memref<16x2x32xf32, #tpu.memory_space<vmem>>, vector<1x2x32xf32>
    %573 = vector.shape_cast %572 : vector<1x2x32xf32> to vector<2x32xf32>
    %574 = vector.shape_cast %566 : vector<2x32xf32> to vector<1x2x32xf32>
    tpu.vector_store %arg10[%571, %c0_166, %c0_167], %574 {strides = array<i32>} : memref<16x2x32xf32, #tpu.memory_space<vmem>>, vector<1x2x32xf32>,
    %c11_i32 = arith.constant 11 : i32
    %c15_i32_168 = arith.constant 15 : i32
    %575 = arith.subi %c15_i32_168, %c11_i32 : i32
    %576 = arith.index_cast %c11_i32 : i32 to index
    %c0_169 = arith.constant 0 : index
    %c0_170 = arith.constant 0 : index
    %577 = vector.load %arg8[%576, %c0_169, %c0_170] : memref<16x2x256xf32, #tpu.memory_space<vmem>>, vector<1x2x256xf32>
    %578 = vector.shape_cast %577 : vector<1x2x256xf32> to vector<2x256xf32>
    %579 = arith.index_cast %575 : i32 to index
    %c0_171 = arith.constant 0 : index
    %c0_172 = arith.constant 0 : index
    %580 = vector.load %arg8[%579, %c0_171, %c0_172] : memref<16x2x256xf32, #tpu.memory_space<vmem>>, vector<1x2x256xf32>
    %581 = vector.shape_cast %580 : vector<1x2x256xf32> to vector<2x256xf32>
    %582 = vector.extract_strided_slice %578 {offsets = [0, 0], sizes = [2, 128], strides = [1, 1]} : vector<2x256xf32> to vector<2x128xf32>
    %583 = arith.truncf %565 : vector<2x32xf32> to vector<2x32xbf16>
    %cst_173 = arith.constant dense<0.000000e+00> : vector<2x128xf32>
    %584 = tpu.matmul %583, %10, %cst_173 {dimension_numbers = #tpu.dot_dimension_numbers<[1], [0], [0], [1], [0, 0, 1, 1], [], []>} : vector<2x32xbf16>, vector<32x128xbf16>, vector<2x128xf32> -> vector<2x128xf32>
    %585 = arith.addf %582, %584 : vector<2x128xf32>
    %586 = vector.extract_strided_slice %581 {offsets = [0, 128], sizes = [2, 128], strides = [1, 1]} : vector<2x256xf32> to vector<2x128xf32>
    %587 = arith.truncf %566 : vector<2x32xf32> to vector<2x32xbf16>
    %cst_174 = arith.constant dense<0.000000e+00> : vector<2x128xf32>
    %588 = tpu.matmul %587, %11, %cst_174 {dimension_numbers = #tpu.dot_dimension_numbers<[1], [0], [0], [1], [0, 0, 1, 1], [], []>} : vector<2x32xbf16>, vector<32x128xbf16>, vector<2x128xf32> -> vector<2x128xf32>
    %589 = arith.addf %586, %588 : vector<2x128xf32>
    %590 = tpu.concatenate %585, %589 in 0 : vector<2x128xf32>, vector<2x128xf32> -> vector<4x128xf32>
    %591 = vector.extract_strided_slice %590 {offsets = [0, 0], sizes = [4, 32], strides = [1, 1]} : vector<4x128xf32> to vector<4x32xf32>
    %592 = arith.negf %591 : vector<4x32xf32>
    %593 = math.exp %592 : vector<4x32xf32>
    %cst_175 = arith.constant 1.000000e+00 : f32
    %594 = vector.broadcast %cst_175 : f32 to vector<4x32xf32>
    %595 = arith.addf %594, %593 : vector<4x32xf32>
    %596 = arith.divf %594, %595 : vector<4x32xf32>
    %597 = vector.extract_strided_slice %590 {offsets = [0, 32], sizes = [4, 32], strides = [1, 1]} : vector<4x128xf32> to vector<4x32xf32>
    %598 = arith.negf %597 : vector<4x32xf32>
    %599 = math.exp %598 : vector<4x32xf32>
    %cst_176 = arith.constant 1.000000e+00 : f32
    %600 = vector.broadcast %cst_176 : f32 to vector<4x32xf32>
    %601 = arith.addf %600, %599 : vector<4x32xf32>
    %602 = arith.divf %600, %601 : vector<4x32xf32>
    %603 = vector.extract_strided_slice %590 {offsets = [0, 64], sizes = [4, 32], strides = [1, 1]} : vector<4x128xf32> to vector<4x32xf32>
    %604 = math.tanh %603 : vector<4x32xf32>
    %605 = vector.extract_strided_slice %590 {offsets = [0, 96], sizes = [4, 32], strides = [1, 1]} : vector<4x128xf32> to vector<4x32xf32>
    %606 = arith.negf %605 : vector<4x32xf32>
    %607 = math.exp %606 : vector<4x32xf32>
    %cst_177 = arith.constant 1.000000e+00 : f32
    %608 = vector.broadcast %cst_177 : f32 to vector<4x32xf32>
    %609 = arith.addf %608, %607 : vector<4x32xf32>
    %610 = arith.divf %608, %609 : vector<4x32xf32>
    %611 = arith.mulf %602, %562 : vector<4x32xf32>
    %612 = arith.mulf %596, %604 : vector<4x32xf32>
    %613 = arith.addf %611, %612 : vector<4x32xf32>
    %614 = math.tanh %613 : vector<4x32xf32>
    %615 = arith.mulf %610, %614 : vector<4x32xf32>
    %616 = vector.extract_strided_slice %615 {offsets = [0, 0], sizes = [2, 32], strides = [1, 1]} : vector<4x32xf32> to vector<2x32xf32>
    %617 = vector.extract_strided_slice %615 {offsets = [2, 0], sizes = [2, 32], strides = [1, 1]} : vector<4x32xf32> to vector<2x32xf32>
    %618 = arith.index_cast %c11_i32 : i32 to index
    %c0_178 = arith.constant 0 : index
    %c0_179 = arith.constant 0 : index
    %619 = vector.load %arg9[%618, %c0_178, %c0_179] : memref<16x2x32xf32, #tpu.memory_space<vmem>>, vector<1x2x32xf32>
    %620 = vector.shape_cast %619 : vector<1x2x32xf32> to vector<2x32xf32>
    %621 = vector.shape_cast %616 : vector<2x32xf32> to vector<1x2x32xf32>
    tpu.vector_store %arg9[%618, %c0_178, %c0_179], %621 {strides = array<i32>} : memref<16x2x32xf32, #tpu.memory_space<vmem>>, vector<1x2x32xf32>,
    %622 = arith.index_cast %575 : i32 to index
    %c0_180 = arith.constant 0 : index
    %c0_181 = arith.constant 0 : index
    %623 = vector.load %arg10[%622, %c0_180, %c0_181] : memref<16x2x32xf32, #tpu.memory_space<vmem>>, vector<1x2x32xf32>
    %624 = vector.shape_cast %623 : vector<1x2x32xf32> to vector<2x32xf32>
    %625 = vector.shape_cast %617 : vector<2x32xf32> to vector<1x2x32xf32>
    tpu.vector_store %arg10[%622, %c0_180, %c0_181], %625 {strides = array<i32>} : memref<16x2x32xf32, #tpu.memory_space<vmem>>, vector<1x2x32xf32>,
    %c12_i32 = arith.constant 12 : i32
    %c15_i32_182 = arith.constant 15 : i32
    %626 = arith.subi %c15_i32_182, %c12_i32 : i32
    %627 = arith.index_cast %c12_i32 : i32 to index
    %c0_183 = arith.constant 0 : index
    %c0_184 = arith.constant 0 : index
    %628 = vector.load %arg8[%627, %c0_183, %c0_184] : memref<16x2x256xf32, #tpu.memory_space<vmem>>, vector<1x2x256xf32>
    %629 = vector.shape_cast %628 : vector<1x2x256xf32> to vector<2x256xf32>
    %630 = arith.index_cast %626 : i32 to index
    %c0_185 = arith.constant 0 : index
    %c0_186 = arith.constant 0 : index
    %631 = vector.load %arg8[%630, %c0_185, %c0_186] : memref<16x2x256xf32, #tpu.memory_space<vmem>>, vector<1x2x256xf32>
    %632 = vector.shape_cast %631 : vector<1x2x256xf32> to vector<2x256xf32>
    %633 = vector.extract_strided_slice %629 {offsets = [0, 0], sizes = [2, 128], strides = [1, 1]} : vector<2x256xf32> to vector<2x128xf32>
    %634 = arith.truncf %616 : vector<2x32xf32> to vector<2x32xbf16>
    %cst_187 = arith.constant dense<0.000000e+00> : vector<2x128xf32>
    %635 = tpu.matmul %634, %10, %cst_187 {dimension_numbers = #tpu.dot_dimension_numbers<[1], [0], [0], [1], [0, 0, 1, 1], [], []>} : vector<2x32xbf16>, vector<32x128xbf16>, vector<2x128xf32> -> vector<2x128xf32>
    %636 = arith.addf %633, %635 : vector<2x128xf32>
    %637 = vector.extract_strided_slice %632 {offsets = [0, 128], sizes = [2, 128], strides = [1, 1]} : vector<2x256xf32> to vector<2x128xf32>
    %638 = arith.truncf %617 : vector<2x32xf32> to vector<2x32xbf16>
    %cst_188 = arith.constant dense<0.000000e+00> : vector<2x128xf32>
    %639 = tpu.matmul %638, %11, %cst_188 {dimension_numbers = #tpu.dot_dimension_numbers<[1], [0], [0], [1], [0, 0, 1, 1], [], []>} : vector<2x32xbf16>, vector<32x128xbf16>, vector<2x128xf32> -> vector<2x128xf32>
    %640 = arith.addf %637, %639 : vector<2x128xf32>
    %641 = tpu.concatenate %636, %640 in 0 : vector<2x128xf32>, vector<2x128xf32> -> vector<4x128xf32>
    %642 = vector.extract_strided_slice %641 {offsets = [0, 0], sizes = [4, 32], strides = [1, 1]} : vector<4x128xf32> to vector<4x32xf32>
    %643 = arith.negf %642 : vector<4x32xf32>
    %644 = math.exp %643 : vector<4x32xf32>
    %cst_189 = arith.constant 1.000000e+00 : f32
    %645 = vector.broadcast %cst_189 : f32 to vector<4x32xf32>
    %646 = arith.addf %645, %644 : vector<4x32xf32>
    %647 = arith.divf %645, %646 : vector<4x32xf32>
    %648 = vector.extract_strided_slice %641 {offsets = [0, 32], sizes = [4, 32], strides = [1, 1]} : vector<4x128xf32> to vector<4x32xf32>
    %649 = arith.negf %648 : vector<4x32xf32>
    %650 = math.exp %649 : vector<4x32xf32>
    %cst_190 = arith.constant 1.000000e+00 : f32
    %651 = vector.broadcast %cst_190 : f32 to vector<4x32xf32>
    %652 = arith.addf %651, %650 : vector<4x32xf32>
    %653 = arith.divf %651, %652 : vector<4x32xf32>
    %654 = vector.extract_strided_slice %641 {offsets = [0, 64], sizes = [4, 32], strides = [1, 1]} : vector<4x128xf32> to vector<4x32xf32>
    %655 = math.tanh %654 : vector<4x32xf32>
    %656 = vector.extract_strided_slice %641 {offsets = [0, 96], sizes = [4, 32], strides = [1, 1]} : vector<4x128xf32> to vector<4x32xf32>
    %657 = arith.negf %656 : vector<4x32xf32>
    %658 = math.exp %657 : vector<4x32xf32>
    %cst_191 = arith.constant 1.000000e+00 : f32
    %659 = vector.broadcast %cst_191 : f32 to vector<4x32xf32>
    %660 = arith.addf %659, %658 : vector<4x32xf32>
    %661 = arith.divf %659, %660 : vector<4x32xf32>
    %662 = arith.mulf %653, %613 : vector<4x32xf32>
    %663 = arith.mulf %647, %655 : vector<4x32xf32>
    %664 = arith.addf %662, %663 : vector<4x32xf32>
    %665 = math.tanh %664 : vector<4x32xf32>
    %666 = arith.mulf %661, %665 : vector<4x32xf32>
    %667 = vector.extract_strided_slice %666 {offsets = [0, 0], sizes = [2, 32], strides = [1, 1]} : vector<4x32xf32> to vector<2x32xf32>
    %668 = vector.extract_strided_slice %666 {offsets = [2, 0], sizes = [2, 32], strides = [1, 1]} : vector<4x32xf32> to vector<2x32xf32>
    %669 = arith.index_cast %c12_i32 : i32 to index
    %c0_192 = arith.constant 0 : index
    %c0_193 = arith.constant 0 : index
    %670 = vector.load %arg9[%669, %c0_192, %c0_193] : memref<16x2x32xf32, #tpu.memory_space<vmem>>, vector<1x2x32xf32>
    %671 = vector.shape_cast %670 : vector<1x2x32xf32> to vector<2x32xf32>
    %672 = vector.shape_cast %667 : vector<2x32xf32> to vector<1x2x32xf32>
    tpu.vector_store %arg9[%669, %c0_192, %c0_193], %672 {strides = array<i32>} : memref<16x2x32xf32, #tpu.memory_space<vmem>>, vector<1x2x32xf32>,
    %673 = arith.index_cast %626 : i32 to index
    %c0_194 = arith.constant 0 : index
    %c0_195 = arith.constant 0 : index
    %674 = vector.load %arg10[%673, %c0_194, %c0_195] : memref<16x2x32xf32, #tpu.memory_space<vmem>>, vector<1x2x32xf32>
    %675 = vector.shape_cast %674 : vector<1x2x32xf32> to vector<2x32xf32>
    %676 = vector.shape_cast %668 : vector<2x32xf32> to vector<1x2x32xf32>
    tpu.vector_store %arg10[%673, %c0_194, %c0_195], %676 {strides = array<i32>} : memref<16x2x32xf32, #tpu.memory_space<vmem>>, vector<1x2x32xf32>,
    %c13_i32 = arith.constant 13 : i32
    %c15_i32_196 = arith.constant 15 : i32
    %677 = arith.subi %c15_i32_196, %c13_i32 : i32
    %678 = arith.index_cast %c13_i32 : i32 to index
    %c0_197 = arith.constant 0 : index
    %c0_198 = arith.constant 0 : index
    %679 = vector.load %arg8[%678, %c0_197, %c0_198] : memref<16x2x256xf32, #tpu.memory_space<vmem>>, vector<1x2x256xf32>
    %680 = vector.shape_cast %679 : vector<1x2x256xf32> to vector<2x256xf32>
    %681 = arith.index_cast %677 : i32 to index
    %c0_199 = arith.constant 0 : index
    %c0_200 = arith.constant 0 : index
    %682 = vector.load %arg8[%681, %c0_199, %c0_200] : memref<16x2x256xf32, #tpu.memory_space<vmem>>, vector<1x2x256xf32>
    %683 = vector.shape_cast %682 : vector<1x2x256xf32> to vector<2x256xf32>
    %684 = vector.extract_strided_slice %680 {offsets = [0, 0], sizes = [2, 128], strides = [1, 1]} : vector<2x256xf32> to vector<2x128xf32>
    %685 = arith.truncf %667 : vector<2x32xf32> to vector<2x32xbf16>
    %cst_201 = arith.constant dense<0.000000e+00> : vector<2x128xf32>
    %686 = tpu.matmul %685, %10, %cst_201 {dimension_numbers = #tpu.dot_dimension_numbers<[1], [0], [0], [1], [0, 0, 1, 1], [], []>} : vector<2x32xbf16>, vector<32x128xbf16>, vector<2x128xf32> -> vector<2x128xf32>
    %687 = arith.addf %684, %686 : vector<2x128xf32>
    %688 = vector.extract_strided_slice %683 {offsets = [0, 128], sizes = [2, 128], strides = [1, 1]} : vector<2x256xf32> to vector<2x128xf32>
    %689 = arith.truncf %668 : vector<2x32xf32> to vector<2x32xbf16>
    %cst_202 = arith.constant dense<0.000000e+00> : vector<2x128xf32>
    %690 = tpu.matmul %689, %11, %cst_202 {dimension_numbers = #tpu.dot_dimension_numbers<[1], [0], [0], [1], [0, 0, 1, 1], [], []>} : vector<2x32xbf16>, vector<32x128xbf16>, vector<2x128xf32> -> vector<2x128xf32>
    %691 = arith.addf %688, %690 : vector<2x128xf32>
    %692 = tpu.concatenate %687, %691 in 0 : vector<2x128xf32>, vector<2x128xf32> -> vector<4x128xf32>
    %693 = vector.extract_strided_slice %692 {offsets = [0, 0], sizes = [4, 32], strides = [1, 1]} : vector<4x128xf32> to vector<4x32xf32>
    %694 = arith.negf %693 : vector<4x32xf32>
    %695 = math.exp %694 : vector<4x32xf32>
    %cst_203 = arith.constant 1.000000e+00 : f32
    %696 = vector.broadcast %cst_203 : f32 to vector<4x32xf32>
    %697 = arith.addf %696, %695 : vector<4x32xf32>
    %698 = arith.divf %696, %697 : vector<4x32xf32>
    %699 = vector.extract_strided_slice %692 {offsets = [0, 32], sizes = [4, 32], strides = [1, 1]} : vector<4x128xf32> to vector<4x32xf32>
    %700 = arith.negf %699 : vector<4x32xf32>
    %701 = math.exp %700 : vector<4x32xf32>
    %cst_204 = arith.constant 1.000000e+00 : f32
    %702 = vector.broadcast %cst_204 : f32 to vector<4x32xf32>
    %703 = arith.addf %702, %701 : vector<4x32xf32>
    %704 = arith.divf %702, %703 : vector<4x32xf32>
    %705 = vector.extract_strided_slice %692 {offsets = [0, 64], sizes = [4, 32], strides = [1, 1]} : vector<4x128xf32> to vector<4x32xf32>
    %706 = math.tanh %705 : vector<4x32xf32>
    %707 = vector.extract_strided_slice %692 {offsets = [0, 96], sizes = [4, 32], strides = [1, 1]} : vector<4x128xf32> to vector<4x32xf32>
    %708 = arith.negf %707 : vector<4x32xf32>
    %709 = math.exp %708 : vector<4x32xf32>
    %cst_205 = arith.constant 1.000000e+00 : f32
    %710 = vector.broadcast %cst_205 : f32 to vector<4x32xf32>
    %711 = arith.addf %710, %709 : vector<4x32xf32>
    %712 = arith.divf %710, %711 : vector<4x32xf32>
    %713 = arith.mulf %704, %664 : vector<4x32xf32>
    %714 = arith.mulf %698, %706 : vector<4x32xf32>
    %715 = arith.addf %713, %714 : vector<4x32xf32>
    %716 = math.tanh %715 : vector<4x32xf32>
    %717 = arith.mulf %712, %716 : vector<4x32xf32>
    %718 = vector.extract_strided_slice %717 {offsets = [0, 0], sizes = [2, 32], strides = [1, 1]} : vector<4x32xf32> to vector<2x32xf32>
    %719 = vector.extract_strided_slice %717 {offsets = [2, 0], sizes = [2, 32], strides = [1, 1]} : vector<4x32xf32> to vector<2x32xf32>
    %720 = arith.index_cast %c13_i32 : i32 to index
    %c0_206 = arith.constant 0 : index
    %c0_207 = arith.constant 0 : index
    %721 = vector.load %arg9[%720, %c0_206, %c0_207] : memref<16x2x32xf32, #tpu.memory_space<vmem>>, vector<1x2x32xf32>
    %722 = vector.shape_cast %721 : vector<1x2x32xf32> to vector<2x32xf32>
    %723 = vector.shape_cast %718 : vector<2x32xf32> to vector<1x2x32xf32>
    tpu.vector_store %arg9[%720, %c0_206, %c0_207], %723 {strides = array<i32>} : memref<16x2x32xf32, #tpu.memory_space<vmem>>, vector<1x2x32xf32>,
    %724 = arith.index_cast %677 : i32 to index
    %c0_208 = arith.constant 0 : index
    %c0_209 = arith.constant 0 : index
    %725 = vector.load %arg10[%724, %c0_208, %c0_209] : memref<16x2x32xf32, #tpu.memory_space<vmem>>, vector<1x2x32xf32>
    %726 = vector.shape_cast %725 : vector<1x2x32xf32> to vector<2x32xf32>
    %727 = vector.shape_cast %719 : vector<2x32xf32> to vector<1x2x32xf32>
    tpu.vector_store %arg10[%724, %c0_208, %c0_209], %727 {strides = array<i32>} : memref<16x2x32xf32, #tpu.memory_space<vmem>>, vector<1x2x32xf32>,
    %c14_i32 = arith.constant 14 : i32
    %c15_i32_210 = arith.constant 15 : i32
    %728 = arith.subi %c15_i32_210, %c14_i32 : i32
    %729 = arith.index_cast %c14_i32 : i32 to index
    %c0_211 = arith.constant 0 : index
    %c0_212 = arith.constant 0 : index
    %730 = vector.load %arg8[%729, %c0_211, %c0_212] : memref<16x2x256xf32, #tpu.memory_space<vmem>>, vector<1x2x256xf32>
    %731 = vector.shape_cast %730 : vector<1x2x256xf32> to vector<2x256xf32>
    %732 = arith.index_cast %728 : i32 to index
    %c0_213 = arith.constant 0 : index
    %c0_214 = arith.constant 0 : index
    %733 = vector.load %arg8[%732, %c0_213, %c0_214] : memref<16x2x256xf32, #tpu.memory_space<vmem>>, vector<1x2x256xf32>
    %734 = vector.shape_cast %733 : vector<1x2x256xf32> to vector<2x256xf32>
    %735 = vector.extract_strided_slice %731 {offsets = [0, 0], sizes = [2, 128], strides = [1, 1]} : vector<2x256xf32> to vector<2x128xf32>
    %736 = arith.truncf %718 : vector<2x32xf32> to vector<2x32xbf16>
    %cst_215 = arith.constant dense<0.000000e+00> : vector<2x128xf32>
    %737 = tpu.matmul %736, %10, %cst_215 {dimension_numbers = #tpu.dot_dimension_numbers<[1], [0], [0], [1], [0, 0, 1, 1], [], []>} : vector<2x32xbf16>, vector<32x128xbf16>, vector<2x128xf32> -> vector<2x128xf32>
    %738 = arith.addf %735, %737 : vector<2x128xf32>
    %739 = vector.extract_strided_slice %734 {offsets = [0, 128], sizes = [2, 128], strides = [1, 1]} : vector<2x256xf32> to vector<2x128xf32>
    %740 = arith.truncf %719 : vector<2x32xf32> to vector<2x32xbf16>
    %cst_216 = arith.constant dense<0.000000e+00> : vector<2x128xf32>
    %741 = tpu.matmul %740, %11, %cst_216 {dimension_numbers = #tpu.dot_dimension_numbers<[1], [0], [0], [1], [0, 0, 1, 1], [], []>} : vector<2x32xbf16>, vector<32x128xbf16>, vector<2x128xf32> -> vector<2x128xf32>
    %742 = arith.addf %739, %741 : vector<2x128xf32>
    %743 = tpu.concatenate %738, %742 in 0 : vector<2x128xf32>, vector<2x128xf32> -> vector<4x128xf32>
    %744 = vector.extract_strided_slice %743 {offsets = [0, 0], sizes = [4, 32], strides = [1, 1]} : vector<4x128xf32> to vector<4x32xf32>
    %745 = arith.negf %744 : vector<4x32xf32>
    %746 = math.exp %745 : vector<4x32xf32>
    %cst_217 = arith.constant 1.000000e+00 : f32
    %747 = vector.broadcast %cst_217 : f32 to vector<4x32xf32>
    %748 = arith.addf %747, %746 : vector<4x32xf32>
    %749 = arith.divf %747, %748 : vector<4x32xf32>
    %750 = vector.extract_strided_slice %743 {offsets = [0, 32], sizes = [4, 32], strides = [1, 1]} : vector<4x128xf32> to vector<4x32xf32>
    %751 = arith.negf %750 : vector<4x32xf32>
    %752 = math.exp %751 : vector<4x32xf32>
    %cst_218 = arith.constant 1.000000e+00 : f32
    %753 = vector.broadcast %cst_218 : f32 to vector<4x32xf32>
    %754 = arith.addf %753, %752 : vector<4x32xf32>
    %755 = arith.divf %753, %754 : vector<4x32xf32>
    %756 = vector.extract_strided_slice %743 {offsets = [0, 64], sizes = [4, 32], strides = [1, 1]} : vector<4x128xf32> to vector<4x32xf32>
    %757 = math.tanh %756 : vector<4x32xf32>
    %758 = vector.extract_strided_slice %743 {offsets = [0, 96], sizes = [4, 32], strides = [1, 1]} : vector<4x128xf32> to vector<4x32xf32>
    %759 = arith.negf %758 : vector<4x32xf32>
    %760 = math.exp %759 : vector<4x32xf32>
    %cst_219 = arith.constant 1.000000e+00 : f32
    %761 = vector.broadcast %cst_219 : f32 to vector<4x32xf32>
    %762 = arith.addf %761, %760 : vector<4x32xf32>
    %763 = arith.divf %761, %762 : vector<4x32xf32>
    %764 = arith.mulf %755, %715 : vector<4x32xf32>
    %765 = arith.mulf %749, %757 : vector<4x32xf32>
    %766 = arith.addf %764, %765 : vector<4x32xf32>
    %767 = math.tanh %766 : vector<4x32xf32>
    %768 = arith.mulf %763, %767 : vector<4x32xf32>
    %769 = vector.extract_strided_slice %768 {offsets = [0, 0], sizes = [2, 32], strides = [1, 1]} : vector<4x32xf32> to vector<2x32xf32>
    %770 = vector.extract_strided_slice %768 {offsets = [2, 0], sizes = [2, 32], strides = [1, 1]} : vector<4x32xf32> to vector<2x32xf32>
    %771 = arith.index_cast %c14_i32 : i32 to index
    %c0_220 = arith.constant 0 : index
    %c0_221 = arith.constant 0 : index
    %772 = vector.load %arg9[%771, %c0_220, %c0_221] : memref<16x2x32xf32, #tpu.memory_space<vmem>>, vector<1x2x32xf32>
    %773 = vector.shape_cast %772 : vector<1x2x32xf32> to vector<2x32xf32>
    %774 = vector.shape_cast %769 : vector<2x32xf32> to vector<1x2x32xf32>
    tpu.vector_store %arg9[%771, %c0_220, %c0_221], %774 {strides = array<i32>} : memref<16x2x32xf32, #tpu.memory_space<vmem>>, vector<1x2x32xf32>,
    %775 = arith.index_cast %728 : i32 to index
    %c0_222 = arith.constant 0 : index
    %c0_223 = arith.constant 0 : index
    %776 = vector.load %arg10[%775, %c0_222, %c0_223] : memref<16x2x32xf32, #tpu.memory_space<vmem>>, vector<1x2x32xf32>
    %777 = vector.shape_cast %776 : vector<1x2x32xf32> to vector<2x32xf32>
    %778 = vector.shape_cast %770 : vector<2x32xf32> to vector<1x2x32xf32>
    tpu.vector_store %arg10[%775, %c0_222, %c0_223], %778 {strides = array<i32>} : memref<16x2x32xf32, #tpu.memory_space<vmem>>, vector<1x2x32xf32>,
    %c15_i32_224 = arith.constant 15 : i32
    %c15_i32_225 = arith.constant 15 : i32
    %779 = arith.subi %c15_i32_225, %c15_i32_224 : i32
    %780 = arith.index_cast %c15_i32_224 : i32 to index
    %c0_226 = arith.constant 0 : index
    %c0_227 = arith.constant 0 : index
    %781 = vector.load %arg8[%780, %c0_226, %c0_227] : memref<16x2x256xf32, #tpu.memory_space<vmem>>, vector<1x2x256xf32>
    %782 = vector.shape_cast %781 : vector<1x2x256xf32> to vector<2x256xf32>
    %783 = arith.index_cast %779 : i32 to index
    %c0_228 = arith.constant 0 : index
    %c0_229 = arith.constant 0 : index
    %784 = vector.load %arg8[%783, %c0_228, %c0_229] : memref<16x2x256xf32, #tpu.memory_space<vmem>>, vector<1x2x256xf32>
    %785 = vector.shape_cast %784 : vector<1x2x256xf32> to vector<2x256xf32>
    %786 = vector.extract_strided_slice %782 {offsets = [0, 0], sizes = [2, 128], strides = [1, 1]} : vector<2x256xf32> to vector<2x128xf32>
    %787 = arith.truncf %769 : vector<2x32xf32> to vector<2x32xbf16>
    %cst_230 = arith.constant dense<0.000000e+00> : vector<2x128xf32>
    %788 = tpu.matmul %787, %10, %cst_230 {dimension_numbers = #tpu.dot_dimension_numbers<[1], [0], [0], [1], [0, 0, 1, 1], [], []>} : vector<2x32xbf16>, vector<32x128xbf16>, vector<2x128xf32> -> vector<2x128xf32>
    %789 = arith.addf %786, %788 : vector<2x128xf32>
    %790 = vector.extract_strided_slice %785 {offsets = [0, 128], sizes = [2, 128], strides = [1, 1]} : vector<2x256xf32> to vector<2x128xf32>
    %791 = arith.truncf %770 : vector<2x32xf32> to vector<2x32xbf16>
    %cst_231 = arith.constant dense<0.000000e+00> : vector<2x128xf32>
    %792 = tpu.matmul %791, %11, %cst_231 {dimension_numbers = #tpu.dot_dimension_numbers<[1], [0], [0], [1], [0, 0, 1, 1], [], []>} : vector<2x32xbf16>, vector<32x128xbf16>, vector<2x128xf32> -> vector<2x128xf32>
    %793 = arith.addf %790, %792 : vector<2x128xf32>
    %794 = tpu.concatenate %789, %793 in 0 : vector<2x128xf32>, vector<2x128xf32> -> vector<4x128xf32>
    %795 = vector.extract_strided_slice %794 {offsets = [0, 0], sizes = [4, 32], strides = [1, 1]} : vector<4x128xf32> to vector<4x32xf32>
    %796 = arith.negf %795 : vector<4x32xf32>
    %797 = math.exp %796 : vector<4x32xf32>
    %cst_232 = arith.constant 1.000000e+00 : f32
    %798 = vector.broadcast %cst_232 : f32 to vector<4x32xf32>
    %799 = arith.addf %798, %797 : vector<4x32xf32>
    %800 = arith.divf %798, %799 : vector<4x32xf32>
    %801 = vector.extract_strided_slice %794 {offsets = [0, 32], sizes = [4, 32], strides = [1, 1]} : vector<4x128xf32> to vector<4x32xf32>
    %802 = arith.negf %801 : vector<4x32xf32>
    %803 = math.exp %802 : vector<4x32xf32>
    %cst_233 = arith.constant 1.000000e+00 : f32
    %804 = vector.broadcast %cst_233 : f32 to vector<4x32xf32>
    %805 = arith.addf %804, %803 : vector<4x32xf32>
    %806 = arith.divf %804, %805 : vector<4x32xf32>
    %807 = vector.extract_strided_slice %794 {offsets = [0, 64], sizes = [4, 32], strides = [1, 1]} : vector<4x128xf32> to vector<4x32xf32>
    %808 = math.tanh %807 : vector<4x32xf32>
    %809 = vector.extract_strided_slice %794 {offsets = [0, 96], sizes = [4, 32], strides = [1, 1]} : vector<4x128xf32> to vector<4x32xf32>
    %810 = arith.negf %809 : vector<4x32xf32>
    %811 = math.exp %810 : vector<4x32xf32>
    %cst_234 = arith.constant 1.000000e+00 : f32
    %812 = vector.broadcast %cst_234 : f32 to vector<4x32xf32>
    %813 = arith.addf %812, %811 : vector<4x32xf32>
    %814 = arith.divf %812, %813 : vector<4x32xf32>
    %815 = arith.mulf %806, %766 : vector<4x32xf32>
    %816 = arith.mulf %800, %808 : vector<4x32xf32>
    %817 = arith.addf %815, %816 : vector<4x32xf32>
    %818 = math.tanh %817 : vector<4x32xf32>
    %819 = arith.mulf %814, %818 : vector<4x32xf32>
    %820 = vector.extract_strided_slice %819 {offsets = [0, 0], sizes = [2, 32], strides = [1, 1]} : vector<4x32xf32> to vector<2x32xf32>
    %821 = vector.extract_strided_slice %819 {offsets = [2, 0], sizes = [2, 32], strides = [1, 1]} : vector<4x32xf32> to vector<2x32xf32>
    %822 = arith.index_cast %c15_i32_224 : i32 to index
    %c0_235 = arith.constant 0 : index
    %c0_236 = arith.constant 0 : index
    %823 = vector.load %arg9[%822, %c0_235, %c0_236] : memref<16x2x32xf32, #tpu.memory_space<vmem>>, vector<1x2x32xf32>
    %824 = vector.shape_cast %823 : vector<1x2x32xf32> to vector<2x32xf32>
    %825 = vector.shape_cast %820 : vector<2x32xf32> to vector<1x2x32xf32>
    tpu.vector_store %arg9[%822, %c0_235, %c0_236], %825 {strides = array<i32>} : memref<16x2x32xf32, #tpu.memory_space<vmem>>, vector<1x2x32xf32>,
    %826 = arith.index_cast %779 : i32 to index
    %c0_237 = arith.constant 0 : index
    %c0_238 = arith.constant 0 : index
    %827 = vector.load %arg10[%826, %c0_237, %c0_238] : memref<16x2x32xf32, #tpu.memory_space<vmem>>, vector<1x2x32xf32>
    %828 = vector.shape_cast %827 : vector<1x2x32xf32> to vector<2x32xf32>
    %829 = vector.shape_cast %821 : vector<2x32xf32> to vector<1x2x32xf32>
    tpu.vector_store %arg10[%826, %c0_237, %c0_238], %829 {strides = array<i32>} : memref<16x2x32xf32, #tpu.memory_space<vmem>>, vector<1x2x32xf32>,
    %c16_i32 = arith.constant 16 : i32
    %c0_239 = arith.constant 0 : index
    %c0_240 = arith.constant 0 : index
    %c0_241 = arith.constant 0 : index
    %830 = vector.load %arg9[%c0_239, %c0_240, %c0_241] : memref<16x2x32xf32, #tpu.memory_space<vmem>>, vector<16x2x32xf32>
    %c0_242 = arith.constant 0 : index
    %c0_243 = arith.constant 0 : index
    %c0_244 = arith.constant 0 : index
    %831 = vector.load %arg10[%c0_242, %c0_243, %c0_244] : memref<16x2x32xf32, #tpu.memory_space<vmem>>, vector<16x2x32xf32>
    %c0_245 = arith.constant 0 : index
    %c0_246 = arith.constant 0 : index
    %832 = vector.load %arg5[%c0_245, %c0_246] : memref<8x64xf32, #tpu.memory_space<vmem>>, vector<8x64xf32>
    %c0_247 = arith.constant 0 : index
    %c0_248 = arith.constant 0 : index
    %833 = vector.load %arg6[%c0_247, %c0_248] : memref<8x1xf32, #tpu.memory_space<vmem>>, vector<8x1xf32>
    %834 = vector.extract_strided_slice %830 {offsets = [0, 0, 0], sizes = [16, 1, 32], strides = [1, 1, 1]} : vector<16x2x32xf32> to vector<16x1x32xf32>
    %835 = vector.shape_cast %834 : vector<16x1x32xf32> to vector<16x32xf32>
    %836 = vector.extract_strided_slice %831 {offsets = [0, 0, 0], sizes = [16, 1, 32], strides = [1, 1, 1]} : vector<16x2x32xf32> to vector<16x1x32xf32>
    %837 = vector.shape_cast %836 : vector<16x1x32xf32> to vector<16x32xf32>
    %838 = tpu.concatenate %835, %837 in 1 : vector<16x32xf32>, vector<16x32xf32> -> vector<16x64xf32>
    %cst_249 = arith.constant dense<0.000000e+00> : vector<8x16xf32>
    %839 = tpu.matmul %832, %838, %cst_249 {dimension_numbers = #tpu.dot_dimension_numbers<[1], [1], [0], [0], [0, 0, 1, 0], [], []>} : vector<8x64xf32>, vector<16x64xf32>, vector<8x16xf32> -> vector<8x16xf32>
    %840 = vector.broadcast %833 : vector<8x1xf32> to vector<8x16xf32>
    %841 = arith.addf %839, %840 : vector<8x16xf32>
    %c0_250 = arith.constant 0 : index
    %c0_251 = arith.constant 0 : index
    %c0_252 = arith.constant 0 : index
    %842 = vector.load %arg7[%c0_250, %c0_251, %c0_252] : memref<2x8x16xf32, #tpu.memory_space<vmem>>, vector<1x8x16xf32>
    %843 = vector.shape_cast %842 : vector<1x8x16xf32> to vector<8x16xf32>
    %844 = vector.shape_cast %841 : vector<8x16xf32> to vector<1x8x16xf32>
    tpu.vector_store %arg7[%c0_250, %c0_251, %c0_252], %844 {strides = array<i32>} : memref<2x8x16xf32, #tpu.memory_space<vmem>>, vector<1x8x16xf32>,
    %845 = vector.extract_strided_slice %830 {offsets = [0, 1, 0], sizes = [16, 1, 32], strides = [1, 1, 1]} : vector<16x2x32xf32> to vector<16x1x32xf32>
    %846 = vector.shape_cast %845 : vector<16x1x32xf32> to vector<16x32xf32>
    %847 = vector.extract_strided_slice %831 {offsets = [0, 1, 0], sizes = [16, 1, 32], strides = [1, 1, 1]} : vector<16x2x32xf32> to vector<16x1x32xf32>
    %848 = vector.shape_cast %847 : vector<16x1x32xf32> to vector<16x32xf32>
    %849 = tpu.concatenate %846, %848 in 1 : vector<16x32xf32>, vector<16x32xf32> -> vector<16x64xf32>
    %cst_253 = arith.constant dense<0.000000e+00> : vector<8x16xf32>
    %850 = tpu.matmul %832, %849, %cst_253 {dimension_numbers = #tpu.dot_dimension_numbers<[1], [1], [0], [0], [0, 0, 1, 0], [], []>} : vector<8x64xf32>, vector<16x64xf32>, vector<8x16xf32> -> vector<8x16xf32>
    %851 = vector.broadcast %833 : vector<8x1xf32> to vector<8x16xf32>
    %852 = arith.addf %850, %851 : vector<8x16xf32>
    %c1 = arith.constant 1 : index
    %c0_254 = arith.constant 0 : index
    %c0_255 = arith.constant 0 : index
    %853 = vector.load %arg7[%c1, %c0_254, %c0_255] : memref<2x8x16xf32, #tpu.memory_space<vmem>>, vector<1x8x16xf32>
    %854 = vector.shape_cast %853 : vector<1x8x16xf32> to vector<8x16xf32>
    %855 = vector.shape_cast %852 : vector<8x16xf32> to vector<1x8x16xf32>
    tpu.vector_store %arg7[%c1, %c0_254, %c0_255], %855 {strides = array<i32>} : memref<2x8x16xf32, #tpu.memory_space<vmem>>, vector<1x8x16xf32>,
    return
  }
}

</mosaic_0001>

<bundles_post_ra>
// kernel: resnet_bilstm_forward.3
= control target key start
LH: loop header
LB: loop body
LE: loop exit
PB: predicated region body
PF: predicated region fallthrough
CT: control target
= control target key end

     0   :  { %v3674_v2 = vmov 0   ;;  %v65_v3 = vlaneseq  ;;  %v3675_v7 = vmov 1983009808   ;;  %v3676_v22 = vmov 0.0   ;;  %s4414_s0 = inlined_call_operand.vmem [shape: f32[16,2,32], index: 0, kind: input, shape index: {}]   ;;  %s4415_s1 = inlined_call_operand.vmem [shape: bf16[32,256], index: 1, kind: input, shape index: {}]   ;;  %s4416_s2 = inlined_call_operand.vmem [shape: f32[1,256], index: 2, kind: input, shape index: {}]   ;;  %s4417_s3 = inlined_call_operand.vmem [shape: bf16[32,128], index: 3, kind: input, shape index: {}]   ;;  %s4418_s4 = inlined_call_operand.vmem [shape: bf16[32,128], index: 4, kind: input, shape index: {}]   ;;  %s4419_s5 = inlined_call_operand.vmem [shape: f32[8,64], index: 5, kind: input, shape index: {}]   ;;  %s4420_s6 = inlined_call_operand.vmem [shape: f32[8,1], index: 6, kind: input, shape index: {}]   ;;  %s4421_s7 = inlined_call_operand.hbm [shape: f32[2,8,16], index: 7, kind: output, shape index: {}]  }
   0x1   :  { %v3508_v0 = vld [vmem:[%s4415_s1 + $0x4] ss:$8 sps:$4 sm:$0xff]   ;;  %v3510_v1 = vld [vmem:[%s4415_s1] ss:$8 sps:$4 sm:$0xff]   ;;  %209 = vmatprep.mubr.bf16.mxu0 %v3674_v2  ;;  %3506 = vset.pattern.permute.xlu1 %v3674_v2  ;;  %v3511_v4 = vld [vmem:[%s4415_s1 + $0x14] ss:$8 sps:$4 sm:$0xff]   ;;  %v63_v8 = vunpack.c.l.s4 %v3675_v7 }
   0x2   :  { %177 = vmatprep.subr.bf16.mxu0 %v3508_v0  ;;  %v3513_v5 = vld [vmem:[%s4415_s1 + $0x10] ss:$8 sps:$4 sm:$0xff]   ;;  %v28_v6 = vld [vmem:[%s4414_s0] sm:$0x3]  ;;  %3507 = vset.pattern.permute.xlu0 %v3674_v2  ;;  %v29_v9 = vld [vmem:[%s4414_s0 + $0x2] sm:$0x3] }
   0x3   :  { %178 = vmatpush1.bf16.msra.mxu0 %v3510_v1  ;;  %v30_v10 = vld [vmem:[%s4414_s0 + $0x4] sm:$0x3]  ;;  %v31_v11 = vld [vmem:[%s4414_s0 + $0x6] sm:$0x3]  ;;  %v32_v12 = vld [vmem:[%s4414_s0 + $0x8] sm:$0x3]  ;;  %v60_v15 = vcombine.low %v28_v6, %v29_v9  ;;  %v64_v16 = vunpack.c.0.s8 %v63_v8  ;;  %3208 = vmatprep.subr.bf16.mxu1 %v3676_v22 }
   0x4   :  { %179 = vmatprep.subr.bf16.mxu0 %v3511_v4  ;;  %v33_v13 = vld [vmem:[%s4414_s0 + $0xa] sm:$0x3]  ;;  %v34_v14 = vld [vmem:[%s4414_s0 + $0xc] sm:$0x3]  ;;  %v35_v17 = vld [vmem:[%s4414_s0 + $0xe] sm:$0x3]  ;;  %v61_v18 = vcombine.low %v30_v10, %v31_v11 }
   0x5   :  { %v3763_v19 = vshrl.u32 %v65_v3, 7  ;;  %v77_v20 = vcombine.low %v32_v12, %v33_v13  ;;  %v78_v21 = vcombine.low %v34_v14, %v35_v17  ;;  %v3769_v23 = vld [vmem:[%s4417_s3] sm:$0xff]   ;;  %v36_v24 = vld [vmem:[%s4414_s0 + $0x10] sm:$0x3]  ;;  %v37_v26 = vld [vmem:[%s4414_s0 + $0x12] sm:$0x3] }
   0x6   :  { %v38_v27 = vld [vmem:[%s4414_s0 + $0x14] sm:$0x3]  ;;  %v39_v28 = vld [vmem:[%s4414_s0 + $0x16] sm:$0x3]  ;;  %vm3677_vm0 = vmmov 0   ;;  %3209 = vmatpush3.bf16.msra.mxu1 %v3769_v23  ;;  %v94_v32 = vcombine.low %v36_v24, %v37_v26  ;;  %v3810_v41 = vld [vmem:[%s4417_s3 + $0x8] sm:$0xff]  }
   0x7   :  { %180 = vmatpush1.bf16.msra.mxu0 %v3513_v5  ;;  %v3775_v25 = vsub.s32 %v64_v16, %v3763_v19  ;;  %3212 = vmatprep.mubr.msk.bf16.mxu1 %vm3677_vm0, %v3676_v22  ;;  %v40_v29 = vld [vmem:[%s4414_s0 + $0x18] sm:$0x3]  ;;  %v41_v30 = vld [vmem:[%s4414_s0 + $0x1a] sm:$0x3]  ;;  %v42_v31 = vld [vmem:[%s4414_s0 + $0x1c] sm:$0x3]  ;;  %v95_v33 = vcombine.low %v38_v27, %v39_v28 }
   0x8   :  { %3224 = vmatprep.subr.bf16.mxu0 %v3676_v22  ;;  %v43_v38 = vld [vmem:[%s4414_s0 + $0x1e] sm:$0x3]  ;;  %3210 = vmatprep.subr.bf16.mxu1 %v3676_v22  ;;  %v111_v39 = vcombine.low %v40_v29, %v41_v30  ;;  %vm170_vm1 = vcmask 261120   ;;  %v3820_v48 = vld [vmem:[%s4418_s4] sm:$0xff]  }
   0x9   :  { %v68_v34 = vrot.slane %v60_v15, %v3775_v25  ;;  %v75_v35 = vrot.slane %v61_v18, %v3775_v25  ;;  %v85_v36 = vrot.slane %v77_v20, %v3775_v25  ;;  %v92_v37 = vrot.slane %v78_v21, %v3775_v25 }
   0xa   :  { %v112_v40 = vcombine.low %v42_v31, %v43_v38  ;;  %v102_v44 = vrot.slane %v94_v32, %v3775_v25  ;;  %v109_v45 = vrot.slane %v95_v33, %v3775_v25  ;;  %v119_v46 = vrot.slane %v111_v39, %v3775_v25  ;;  %3211 = vmatpush3.bf16.msra.mxu1 %v3810_v41 }
   0xb   :  { %v76_v42 = vcombine.low %v68_v34, %v75_v35  ;;  %v93_v43 = vcombine.low %v85_v36, %v92_v37 }
   0xc   :  { %v126_v47 = vrot.slane %v112_v40, %v3775_v25 }
   0xd   :  { %12 = vsyncpa [#allocation6], 0  ;;  %v132_v49 = vpack.c.bf16 %v93_v43, %v76_v42  ;;  %3216 = vmatprep.subr.bf16.mxu1 %v3676_v22  ;;  %v110_v50 = vcombine.low %v102_v44, %v109_v45  ;;  %3213 = vmatmul.mubr.bf16.vlgmr.msra.gmra.mrb[0].mxu1 %v3674_v2  ;;  %v3830_v52 = vld [vmem:[%s4418_s4 + $0x8] sm:$0xff]   ;;  %v142_v54 = vsub.s32 0, %v3763_v19  ;;  %v138_v55 = vld [vmem:[%s4416_s2] sm:$0x3] }
   0xe   :  { %v127_v51 = vcombine.low %v119_v46, %v126_v47  ;;  %3217 = vmatpush3.bf16.msra.mxu1 %v3820_v48  ;;  %3220 = vmatprep.mubr.msk.bf16.mxu1 %vm3677_vm0, %v3676_v22  ;;  %v146_v56 = vsub.s32 1, %v3763_v19  ;;  %vm475_vm2 = vcmask 1041408   ;;  %s3678_s2 = smov 64   ;;  %s3679_s25 = smov 32   ;;  %vm505_vm3 = vcmask 254976  }
   0xf   :  { %3040 = vmatmul.mubr.msk.bf16.vlgmr.msra.gmra.mrb[0].mxu0 %vm170_vm1, %v132_v49  ;;  %3218 = vmatprep.subr.bf16.mxu1 %v3676_v22  ;;  %v143_v57 = vrot.slane %v138_v55, %v142_v54  ;;  %vm508_vm4 = vcmask 257026   ;;  %vm2719_vm5 = vcmask 1041409   ;;  %vm2722_vm6 = vcmask 1042434   ;;  %s3681_s12 = smov [#allocation5]  }
  0x10   :  { %219 = vmatprep.mubr.bf16.mxu0 %v3674_v2  ;;  %3225 = vmatpush3.bf16.msra.mxu0 %v3769_v23  ;;  %v133_v53 = vpack.c.bf16 %v127_v51, %v110_v50  ;;  %v147_v58 = vrot.slane %v138_v55, %v146_v56  ;;  %vm2725_vm7 = vcmask 1043459   ;;  %vm2728_vm8 = vcmask 1044484   ;;  %s3025_s13 = sshll.u32 %s3681_s12, 4  ;;  %s3026_s13 = int_to_ptr.vmem [resolvable:$true] %s3025_s13 }
  0x11   :  { %3226 = vmatprep.subr.bf16.mxu0 %v3676_v22  ;;  %vm2731_vm9 = vcmask 1045509   ;;  %vm2734_vm10 = vcmask 1046534   ;;  %vm2737_vm11 = vcmask 1047559   ;;  %vm2938_vm12 = vcmask 1046528   ;;  %s3650_s14 = scalar_lea.vmem %s3026_s13, 256  ;;  %p3655_p1 = scmp.lt.s32.totalorder %s3026_s13, %s3026_s13 }
  0x12   :  { %3219 = vmatpush3.bf16.msra.mxu1 %v3830_v52  ;;  %vm2812_vm13 = vcmask 523264   ;;  %vm2892_vm15 = vcmask 130048   ;;  %p3651_p0 = scmp.ne.s32.totalorder %s3026_s13, %s3650_s14  ;;  %p3656_p2 = scmp.lt.s32.totalorder %s3650_s14, %s3650_s14 }
  0x13   :  { %3232 = vmatprep.subr.bf16.mxu1 %v3676_v22  ;;  %vm3480_vm14 = vmpackc.low %vm2812_vm13, %vm2812_vm13 }
  0x14   :  { %3227 = vmatpush3.bf16.msra.mxu0 %v3810_v41  ;;  %p3657_p3 = por %p3656_p2, %p3655_p1 }
  0x15   :  { %3221 = vmatmul.mubr.bf16.vlgmr.msra.gmra.mrb[4].mxu1 %v3674_v2  ;;  %3240 = vmatprep.subr.bf16.mxu0 %v3676_v22 }
  0x16   :  { %3233 = vmatpush3.bf16.msra.mxu1 %v3820_v48  ;;  %3236 = vmatprep.mubr.msk.bf16.mxu1 %vm3677_vm0, %v3676_v22  ;;  %p3658_p4 = pnand %p3657_p3, %p3651_p0 }
  0x17   :  { %3041 = vmatmul.mubr.msk.bf16.gmra.mrb[4].mxu0 %vm170_vm1, %v133_v53  ;;  %3234 = vmatprep.subr.bf16.mxu1 %v3676_v22 }
  0x18   :  { %3228 = vmatprep.mubr.msk.bf16.mxu0 %vm3677_vm0, %v3676_v22 }
  0x1a   :  { %3235 = vmatpush3.bf16.msra.mxu1 %v3830_v52 }
  0x1b   :  { %3248 = vmatprep.subr.bf16.mxu1 %v3676_v22 }
  0xe0   :  { %v3856_v60 = vpop.f32.mrb[0].mxu1 }
  0xe1   :  { %v3214_v63 = vpop.f32.mrb[1].mxu1 }
  0xe2   :  { %v211_v59 = vpop.f32.mrb[0].mxu0  ;;  %v405_v2 = vpop.f32.mrb[2].mxu1 }
  0xe3   :  { %v212_v61 = vadd.f32 %v211_v59, %v143_v57  ;;  %v213_v62 = vpop.f32.mrb[1].mxu0  ;;  %v3215_v5 = vpop.f32.mrb[3].mxu1 }
  0xe4   :  { %v214_v0 = vadd.f32 %v213_v62, %v147_v58  ;;  %v215_v1 = vpop.f32.mrb[2].mxu0 }
  0xe5   :  { %v216_v3 = vadd.f32 %v215_v1, %v143_v57  ;;  %v217_v4 = vpop.f32.mrb[3].mxu0 }
  0xe6   :  { %v238_v6 = vcombine.low %v212_v61, %v214_v0  ;;  %v239_v7 = vcombine.high %v212_v61, %v214_v0  ;;  %v218_v8 = vadd.f32 %v217_v4, %v147_v58 }
  0xe8   :  { %v246_v9 = vrot.slane %v238_v6, %v3775_v25  ;;  %v253_v10 = vrot.slane %v239_v7, %v3775_v25  ;;  %3042 = vst.sshfl [vmem:[#allocation2] sm:$0x33 pattern:$0x76325410] %v238_v6  ;;  %v256_v11 = vcombine.low %v216_v3, %v218_v8  ;;  %v257_v12 = vcombine.high %v216_v3, %v218_v8  ;;  %v455_v18 = vpop.f32.mrb[4].mxu1 }
  0xe9   :  { %3043 = vst.sshfl [vmem:[#allocation2 + $0x8] sm:$0x33 pattern:$0x76325410] %v239_v7  ;;  %v3222_v21 = vpop.f32.mrb[5].mxu1 }
  0xea   :  { %v254_v13 = vcombine.high %v246_v9, %v246_v9  ;;  %v255_v14 = vcombine.high %v253_v10, %v253_v10  ;;  %v264_v15 = vrot.slane %v256_v11, %v3775_v25  ;;  %v271_v16 = vrot.slane %v257_v12, %v3775_v25  ;;  %3044 = vst.sshfl [vmem:[#allocation2 + $0x10] sm:$0x33 pattern:$0x76325410] %v256_v11  ;;  %v221_v17 = vpop.f32.mrb[4].mxu0  ;;  %v458_v29 = vpop.f32.mrb[6].mxu1 }
  0xeb   :  { %3045 = vst.sshfl [vmem:[#allocation2 + $0x18] sm:$0x33 pattern:$0x76325410] %v257_v12  ;;  %v222_v19 = vadd.f32 %v221_v17, %v143_v57  ;;  %v223_v20 = vpop.f32.mrb[5].mxu0  ;;  %v3223_v32 = vpop.f32.mrb[7].mxu1 }
  0xec   :  { %327 = vst [vmem:[#allocation2 + $0x4] sm:$0xf] %v254_v13  ;;  %329 = vst [vmem:[#allocation2 + $0xc] sm:$0xf] %v255_v14  ;;  %v272_v24 = vcombine.high %v264_v15, %v264_v15  ;;  %v273_v26 = vcombine.high %v271_v16, %v271_v16  ;;  %v224_v27 = vadd.f32 %v223_v20, %v147_v58  ;;  %v225_v28 = vpop.f32.mrb[6].mxu0 }
  0xed   :  { %v226_v30 = vadd.f32 %v225_v28, %v143_v57  ;;  %v227_v31 = vpop.f32.mrb[7].mxu0 }
  0xee   :  { %331 = vst [vmem:[#allocation2 + $0x14] sm:$0xf] %v272_v24  ;;  %333 = vst [vmem:[#allocation2 + $0x1c] sm:$0xf] %v273_v26  ;;  %v274_v33 = vcombine.low %v222_v19, %v224_v27  ;;  %v275_v34 = vcombine.high %v222_v19, %v224_v27  ;;  %v228_v35 = vadd.f32 %v227_v31, %v147_v58 }
  0xef   :  { %v350_v51 = vld [vmem:[#allocation2] sm:$0xf] }
  0xf0   :  { %v282_v36 = vrot.slane %v274_v33, %v3775_v25  ;;  %v289_v37 = vrot.slane %v275_v34, %v3775_v25  ;;  %3046 = vst.sshfl [vmem:[#allocation2 + $0x20] sm:$0x33 pattern:$0x76325410] %v274_v33  ;;  %v292_v38 = vcombine.low %v226_v30, %v228_v35  ;;  %v293_v39 = vcombine.high %v226_v30, %v228_v35 }
  0xf1   :  { %3047 = vst.sshfl [vmem:[#allocation2 + $0x28] sm:$0x33 pattern:$0x76325410] %v275_v34  ;;  %v408_v54 = vadd.f32 %v3856_v60, %v350_v51 }
  0xf2   :  { %v290_v40 = vcombine.high %v282_v36, %v282_v36  ;;  %v291_v42 = vcombine.high %v289_v37, %v289_v37  ;;  %v300_v43 = vrot.slane %v292_v38, %v3775_v25  ;;  %v307_v44 = vrot.slane %v293_v39, %v3775_v25  ;;  %3048 = vst.sshfl [vmem:[#allocation2 + $0x30] sm:$0x33 pattern:$0x76325410] %v292_v38 }
  0xf3   :  { %3049 = vst.sshfl [vmem:[#allocation2 + $0x38] sm:$0x33 pattern:$0x76325410] %v293_v39  ;;  %v511_v24 = vld [vmem:[#allocation2 + $0x4] sm:$0xf] }
  0xf4   :  { %335 = vst [vmem:[#allocation2 + $0x24] sm:$0xf] %v290_v40  ;;  %337 = vst [vmem:[#allocation2 + $0x2c] sm:$0xf] %v291_v42  ;;  %v308_v45 = vcombine.high %v300_v43, %v300_v43  ;;  %v309_v46 = vcombine.high %v307_v44, %v307_v44 }
  0xf6   :  { %339 = vst [vmem:[#allocation2 + $0x34] sm:$0xf] %v308_v45  ;;  %341 = vst [vmem:[#allocation2 + $0x3c] sm:$0xf] %v309_v46 }
  0xfa   :  { %v513_v10 = vld [vmem:[#allocation2 + $0x38] sm:$0xf] }
  0xfb   :  { %v609_v13 = vrot.slane %v513_v10, 2 }
  0xfd   :  { %v352_v47 = vld [vmem:[#allocation2 + $0x3c] sm:$0xf] }
  0xfe   :  { %v462_v49 = vrot.slane %v352_v47, 2  ;;  %v658_v47 = vld [vmem:[#allocation2 + $0x34] sm:$0xf] }
  0xff   :  { %v754_v51 = vrot.slane %v658_v47, 2 }
 0x100   :  { %v464_v50 = vadd.f32 %v462_v49, %v455_v18 }
 0x102   :  { %v466_v53 = vcombine.low %v464_v50, %v464_v50 }
 0x104   :  { %v473_v55 = vrot.slane %v466_v53, %v3775_v25 }
 0x106   :  { %v476_v56 = vsel %vm475_vm2, %v408_v54, %v473_v55 }
 0x107   :  { %3518 = vtanh.f32 %v476_v56  ;;  %v3054_v58 = vmul.f32 -1.442695, %v476_v56 }
 0x109   :  { %3520 = vpow2.f32 %v3054_v58 }
 0x111   :  { %v3519_v57 = vpop.eup %3518 }
 0x112   :  { %486 = vrot.lane.b32.xlu0 %v3519_v57, %s3678_s2 }
 0x113   :  { %v3521_v59 = vpop.eup %3520 }
 0x114   :  { %v480_v61 = vadd.f32 1.0, %v3521_v59 }
 0x116   :  { %3522 = vrcp.f32 %v480_v61 }
 0x120   :  { %v3523_v62 = vpop.eup %3522 }
 0x121   :  { %v484_v60 = vmul.f32 0.0, %v3523_v62 }
 0x184   :  { %v487_v63 = vpop.permute.xlu0 %486 }
 0x185   :  { %v489_v0 = vmul.f32 %v3523_v62, %v487_v63 }
 0x187   :  { %491 = vrot.lane.b32.xlu0 %v489_v0, %s3679_s25 }
 0x1f9   :  { %v492_v1 = vpop.permute.xlu0 %491 }
 0x1fa   :  { %v494_v2 = vadd.f32 %v492_v1, %v484_v60 }
 0x1fc   :  { %3524 = vtanh.f32 %v494_v2 }
 0x206   :  { %v3525_v3 = vpop.eup %3524 }
 0x207   :  { %497 = vrot.lane.b32.xlu1 %v3525_v3, %s3678_s2 }
 0x279   :  { %v498_v4 = vpop.permute.xlu1 %497 }
 0x27a   :  { %v3872_v5 = vmul.f32 %v3523_v62, %v498_v4  ;;  %v656_v62 = vld [vmem:[#allocation2 + $0x8] sm:$0xf] }
 0x27c   :  { %v514_v6 = vpack.c.bf16 %v3872_v5, %v3872_v5 }
 0x27e   :  { %516 = vrot.lane.b32.xlu0 %v514_v6, %s3679_s25  ;;  %v562_v7 = vrot.slane %v514_v6, 1 }
 0x280   :  { %563 = vrot.lane.b32.xlu1 %v562_v7, %s3679_s25 }
 0x2f0   :  { %v517_v8 = vpop.permute.xlu0 %516 }
 0x2f1   :  { %3229 = vmatmul.mubr.msk.bf16.vlgmr.msra.gmra.mrb[8].mxu0 %vm170_vm1, %v517_v8 }
 0x2f2   :  { %v564_v9 = vpop.permute.xlu1 %563  ;;  %3241 = vmatpush3.bf16.msra.mxu0 %v3769_v23  ;;  %3244 = vmatprep.mubr.msk.bf16.mxu0 %vm3677_vm0, %v3676_v22 }
 0x2f3   :  { %3237 = vmatmul.mubr.msk.bf16.vlgmr.msra.gmra.mrb[8].mxu1 %vm170_vm1, %v564_v9  ;;  %3242 = vmatprep.subr.bf16.mxu0 %v3676_v22 }
 0x2f4   :  { %3249 = vmatpush3.bf16.msra.mxu1 %v3820_v48  ;;  %3252 = vmatprep.mubr.msk.bf16.mxu1 %vm3677_vm0, %v3676_v22 }
 0x2f5   :  { %3250 = vmatprep.subr.bf16.mxu1 %v3676_v22 }
 0x2f6   :  { %3243 = vmatpush3.bf16.msra.mxu0 %v3810_v41 }
 0x2f7   :  { %3256 = vmatprep.subr.bf16.mxu0 %v3676_v22 }
 0x2f8   :  { %3251 = vmatpush3.bf16.msra.mxu1 %v3830_v52 }
 0x2f9   :  { %3264 = vmatprep.subr.bf16.mxu1 %v3676_v22 }
 0x3c4   :  { %v555_v11 = vpop.f32.mrb[8].mxu0 }
 0x3c5   :  { %v3230_v12 = vpop.f32.mrb[9].mxu0  ;;  %v561_v26 = vadd.f32 %v555_v11, %v511_v24 }
 0x3c6   :  { %v558_v14 = vpop.f32.mrb[10].mxu0  ;;  %v602_v15 = vpop.f32.mrb[8].mxu1 }
 0x3c7   :  { %v611_v16 = vadd.f32 %v609_v13, %v602_v15  ;;  %v3231_v17 = vpop.f32.mrb[11].mxu0  ;;  %v3238_v18 = vpop.f32.mrb[9].mxu1 }
 0x3c8   :  { %v605_v19 = vpop.f32.mrb[10].mxu1 }
 0x3c9   :  { %v613_v20 = vcombine.low %v611_v16, %v611_v16  ;;  %v3239_v21 = vpop.f32.mrb[11].mxu1  ;;  %v803_v19 = vld [vmem:[#allocation2 + $0x30] sm:$0xf] }
 0x3ca   :  { %v899_v24 = vrot.slane %v803_v19, 2 }
 0x3cb   :  { %v620_v27 = vrot.slane %v613_v20, %v3775_v25 }
 0x3cd   :  { %v622_v28 = vsel %vm475_vm2, %v561_v26, %v620_v27 }
 0x3ce   :  { %3526 = vtanh.f32 %v622_v28  ;;  %v3057_v30 = vmul.f32 -1.442695, %v622_v28 }
 0x3d0   :  { %3528 = vpow2.f32 %v3057_v30 }
 0x3d8   :  { %v3527_v29 = vpop.eup %3526 }
 0x3d9   :  { %632 = vrot.lane.b32.xlu1 %v3527_v29, %s3678_s2 }
 0x3da   :  { %v3529_v31 = vpop.eup %3528 }
 0x3db   :  { %v626_v32 = vadd.f32 1.0, %v3529_v31 }
 0x3dd   :  { %3530 = vrcp.f32 %v626_v32 }
 0x3e7   :  { %v3531_v33 = vpop.eup %3530 }
 0x3e8   :  { %v630_v36 = vmul.f32 %v3531_v33, %v494_v2 }
 0x44b   :  { %v633_v34 = vpop.permute.xlu1 %632 }
 0x44c   :  { %v635_v35 = vmul.f32 %v3531_v33, %v633_v34  ;;  %v801_v34 = vld [vmem:[#allocation2 + $0xc] sm:$0xf] }
 0x44e   :  { %637 = vrot.lane.b32.xlu0 %v635_v35, %s3679_s25 }
 0x4c0   :  { %v638_v37 = vpop.permute.xlu0 %637 }
 0x4c1   :  { %v640_v38 = vadd.f32 %v638_v37, %v630_v36 }
 0x4c3   :  { %3532 = vtanh.f32 %v640_v38 }
 0x4cd   :  { %v3533_v39 = vpop.eup %3532 }
 0x4ce   :  { %643 = vrot.lane.b32.xlu1 %v3533_v39, %s3678_s2 }
 0x540   :  { %v644_v40 = vpop.permute.xlu1 %643 }
 0x541   :  { %v3897_v42 = vmul.f32 %v3531_v33, %v644_v40 }
 0x543   :  { %v659_v43 = vpack.c.bf16 %v3897_v42, %v3897_v42 }
 0x545   :  { %661 = vrot.lane.b32.xlu1 %v659_v43, %s3679_s25  ;;  %v707_v44 = vrot.slane %v659_v43, 1 }
 0x547   :  { %708 = vrot.lane.b32.xlu0 %v707_v44, %s3679_s25 }
 0x5b7   :  { %v662_v45 = vpop.permute.xlu1 %661 }
 0x5b8   :  { %3245 = vmatmul.mubr.msk.bf16.vlgmr.msra.gmra.mrb[12].mxu0 %vm170_vm1, %v662_v45 }
 0x5b9   :  { %v709_v46 = vpop.permute.xlu0 %708  ;;  %3257 = vmatpush3.bf16.msra.mxu0 %v3769_v23  ;;  %3260 = vmatprep.mubr.msk.bf16.mxu0 %vm3677_vm0, %v3676_v22 }
 0x5ba   :  { %3253 = vmatmul.mubr.msk.bf16.vlgmr.msra.gmra.mrb[12].mxu1 %vm170_vm1, %v709_v46  ;;  %3258 = vmatprep.subr.bf16.mxu0 %v3676_v22 }
 0x5bb   :  { %3265 = vmatpush3.bf16.msra.mxu1 %v3820_v48  ;;  %3268 = vmatprep.mubr.msk.bf16.mxu1 %vm3677_vm0, %v3676_v22 }
 0x5bc   :  { %3266 = vmatprep.subr.bf16.mxu1 %v3676_v22 }
 0x5bd   :  { %3259 = vmatpush3.bf16.msra.mxu0 %v3810_v41 }
 0x5be   :  { %3272 = vmatprep.subr.bf16.mxu0 %v3676_v22 }
 0x5bf   :  { %3267 = vmatpush3.bf16.msra.mxu1 %v3830_v52 }
 0x5c0   :  { %3280 = vmatprep.subr.bf16.mxu1 %v3676_v22 }
 0x68b   :  { %v700_v49 = vpop.f32.mrb[12].mxu0 }
 0x68c   :  { %v3246_v50 = vpop.f32.mrb[13].mxu0  ;;  %v706_v63 = vadd.f32 %v700_v49, %v656_v62 }
 0x68d   :  { %v703_v53 = vpop.f32.mrb[14].mxu0  ;;  %v747_v54 = vpop.f32.mrb[12].mxu1 }
 0x68e   :  { %v756_v55 = vadd.f32 %v754_v51, %v747_v54  ;;  %v3247_v56 = vpop.f32.mrb[15].mxu0  ;;  %v3254_v57 = vpop.f32.mrb[13].mxu1 }
 0x68f   :  { %v750_v58 = vpop.f32.mrb[14].mxu1 }
 0x690   :  { %v758_v59 = vcombine.low %v756_v55, %v756_v55  ;;  %v3255_v61 = vpop.f32.mrb[15].mxu1 }
 0x692   :  { %v765_v0 = vrot.slane %v758_v59, %v3775_v25  ;;  %v948_v59 = vld [vmem:[#allocation2 + $0x2c] sm:$0xf] }
 0x694   :  { %v767_v60 = vsel %vm475_vm2, %v706_v63, %v765_v0  ;;  %v1044_v63 = vrot.slane %v948_v59, 2 }
 0x695   :  { %3534 = vtanh.f32 %v767_v60  ;;  %v3060_v2 = vmul.f32 -1.442695, %v767_v60 }
 0x697   :  { %3536 = vpow2.f32 %v3060_v2 }
 0x69f   :  { %v3535_v1 = vpop.eup %3534 }
 0x6a0   :  { %777 = vrot.lane.b32.xlu0 %v3535_v1, %s3678_s2 }
 0x6a1   :  { %v3537_v3 = vpop.eup %3536 }
 0x6a2   :  { %v771_v4 = vadd.f32 1.0, %v3537_v3 }
 0x6a4   :  { %3538 = vrcp.f32 %v771_v4 }
 0x6ae   :  { %v3539_v6 = vpop.eup %3538 }
 0x6af   :  { %v775_v9 = vmul.f32 %v3539_v6, %v640_v38 }
 0x712   :  { %v778_v7 = vpop.permute.xlu0 %777 }
 0x713   :  { %v780_v8 = vmul.f32 %v3539_v6, %v778_v7 }
 0x715   :  { %782 = vrot.lane.b32.xlu1 %v780_v8, %s3679_s25  ;;  %v946_v8 = vld [vmem:[#allocation2 + $0x10] sm:$0xf] }
 0x787   :  { %v783_v10 = vpop.permute.xlu1 %782 }
 0x788   :  { %v785_v11 = vadd.f32 %v783_v10, %v775_v9 }
 0x78a   :  { %3540 = vtanh.f32 %v785_v11 }
 0x794   :  { %v3541_v12 = vpop.eup %3540 }
 0x795   :  { %788 = vrot.lane.b32.xlu0 %v3541_v12, %s3678_s2 }
 0x807   :  { %v789_v13 = vpop.permute.xlu0 %788 }
 0x808   :  { %v3922_v14 = vmul.f32 %v3539_v6, %v789_v13 }
 0x80a   :  { %v804_v15 = vpack.c.bf16 %v3922_v14, %v3922_v14 }
 0x80c   :  { %806 = vrot.lane.b32.xlu0 %v804_v15, %s3679_s25  ;;  %v852_v16 = vrot.slane %v804_v15, 1 }
 0x80e   :  { %853 = vrot.lane.b32.xlu1 %v852_v16, %s3679_s25 }
 0x87e   :  { %v807_v17 = vpop.permute.xlu0 %806 }
 0x87f   :  { %3261 = vmatmul.mubr.msk.bf16.vlgmr.msra.gmra.mrb[16].mxu0 %vm170_vm1, %v807_v17 }
 0x880   :  { %v854_v18 = vpop.permute.xlu1 %853  ;;  %3273 = vmatpush3.bf16.msra.mxu0 %v3769_v23  ;;  %3276 = vmatprep.mubr.msk.bf16.mxu0 %vm3677_vm0, %v3676_v22 }
 0x881   :  { %3269 = vmatmul.mubr.msk.bf16.vlgmr.msra.gmra.mrb[16].mxu1 %vm170_vm1, %v854_v18  ;;  %3274 = vmatprep.subr.bf16.mxu0 %v3676_v22 }
 0x882   :  { %3281 = vmatpush3.bf16.msra.mxu1 %v3820_v48  ;;  %3284 = vmatprep.mubr.msk.bf16.mxu1 %vm3677_vm0, %v3676_v22 }
 0x883   :  { %3282 = vmatprep.subr.bf16.mxu1 %v3676_v22 }
 0x884   :  { %3275 = vmatpush3.bf16.msra.mxu0 %v3810_v41 }
 0x885   :  { %3288 = vmatprep.subr.bf16.mxu0 %v3676_v22 }
 0x886   :  { %3283 = vmatpush3.bf16.msra.mxu1 %v3830_v52 }
 0x887   :  { %3296 = vmatprep.subr.bf16.mxu1 %v3676_v22 }
 0x952   :  { %v845_v20 = vpop.f32.mrb[16].mxu0 }
 0x953   :  { %v3262_v21 = vpop.f32.mrb[17].mxu0  ;;  %v851_v35 = vadd.f32 %v845_v20, %v801_v34 }
 0x954   :  { %v848_v26 = vpop.f32.mrb[18].mxu0  ;;  %v892_v27 = vpop.f32.mrb[16].mxu1 }
 0x955   :  { %v901_v28 = vadd.f32 %v899_v24, %v892_v27  ;;  %v3263_v29 = vpop.f32.mrb[19].mxu0  ;;  %v3270_v30 = vpop.f32.mrb[17].mxu1 }
 0x956   :  { %v895_v31 = vpop.f32.mrb[18].mxu1 }
 0x957   :  { %v903_v32 = vcombine.low %v901_v28, %v901_v28  ;;  %v3271_v33 = vpop.f32.mrb[19].mxu1 }
 0x958   :  { %v1093_v33 = vld [vmem:[#allocation2 + $0x28] sm:$0xf] }
 0x959   :  { %v910_v36 = vrot.slane %v903_v32, %v3775_v25 }
 0x95b   :  { %v912_v37 = vsel %vm475_vm2, %v851_v35, %v910_v36  ;;  %v1189_v36 = vrot.slane %v1093_v33, 2 }
 0x95c   :  { %3542 = vtanh.f32 %v912_v37  ;;  %v3063_v39 = vmul.f32 -1.442695, %v912_v37 }
 0x95e   :  { %3544 = vpow2.f32 %v3063_v39 }
 0x966   :  { %v3543_v38 = vpop.eup %3542 }
 0x967   :  { %922 = vrot.lane.b32.xlu1 %v3543_v38, %s3678_s2 }
 0x968   :  { %v3545_v40 = vpop.eup %3544 }
 0x969   :  { %v916_v43 = vadd.f32 1.0, %v3545_v40 }
 0x96b   :  { %3546 = vrcp.f32 %v916_v43 }
 0x975   :  { %v3547_v44 = vpop.eup %3546 }
 0x976   :  { %v920_v47 = vmul.f32 %v3547_v44, %v785_v11 }
 0x9d9   :  { %v923_v45 = vpop.permute.xlu1 %922 }
 0x9da   :  { %v925_v46 = vmul.f32 %v3547_v44, %v923_v45 }
 0x9dc   :  { %927 = vrot.lane.b32.xlu0 %v925_v46, %s3679_s25 }
 0xa4e   :  { %v928_v49 = vpop.permute.xlu0 %927 }
 0xa4f   :  { %v930_v50 = vadd.f32 %v928_v49, %v920_v47  ;;  %v1091_v47 = vld [vmem:[#allocation2 + $0x14] sm:$0xf] }
 0xa51   :  { %3548 = vtanh.f32 %v930_v50 }
 0xa5b   :  { %v3549_v51 = vpop.eup %3548 }
 0xa5c   :  { %933 = vrot.lane.b32.xlu1 %v3549_v51, %s3678_s2 }
 0xace   :  { %v934_v53 = vpop.permute.xlu1 %933 }
 0xacf   :  { %v3947_v54 = vmul.f32 %v3547_v44, %v934_v53 }
 0xad1   :  { %v949_v55 = vpack.c.bf16 %v3947_v54, %v3947_v54 }
 0xad3   :  { %951 = vrot.lane.b32.xlu1 %v949_v55, %s3679_s25  ;;  %v997_v56 = vrot.slane %v949_v55, 1 }
 0xad5   :  { %998 = vrot.lane.b32.xlu0 %v997_v56, %s3679_s25 }
 0xb45   :  { %v952_v57 = vpop.permute.xlu1 %951 }
 0xb46   :  { %3277 = vmatmul.mubr.msk.bf16.vlgmr.msra.gmra.mrb[20].mxu0 %vm170_vm1, %v952_v57 }
 0xb47   :  { %v999_v58 = vpop.permute.xlu0 %998  ;;  %3289 = vmatpush3.bf16.msra.mxu0 %v3769_v23  ;;  %3292 = vmatprep.mubr.msk.bf16.mxu0 %vm3677_vm0, %v3676_v22 }
 0xb48   :  { %3285 = vmatmul.mubr.msk.bf16.vlgmr.msra.gmra.mrb[20].mxu1 %vm170_vm1, %v999_v58  ;;  %3290 = vmatprep.subr.bf16.mxu0 %v3676_v22 }
 0xb49   :  { %3297 = vmatpush3.bf16.msra.mxu1 %v3820_v48  ;;  %3300 = vmatprep.mubr.msk.bf16.mxu1 %vm3677_vm0, %v3676_v22 }
 0xb4a   :  { %3298 = vmatprep.subr.bf16.mxu1 %v3676_v22 }
 0xb4b   :  { %3291 = vmatpush3.bf16.msra.mxu0 %v3810_v41 }
 0xb4c   :  { %3304 = vmatprep.subr.bf16.mxu0 %v3676_v22 }
 0xb4d   :  { %3299 = vmatpush3.bf16.msra.mxu1 %v3830_v52 }
 0xb4e   :  { %3312 = vmatprep.subr.bf16.mxu1 %v3676_v22 }
 0xc19   :  { %v990_v61 = vpop.f32.mrb[20].mxu0 }
 0xc1a   :  { %v3278_v62 = vpop.f32.mrb[21].mxu0  ;;  %v996_v9 = vadd.f32 %v990_v61, %v946_v8  ;;  %v1238_v8 = vld [vmem:[#allocation2 + $0x24] sm:$0xf] }
 0xc1b   :  { %v993_v0 = vpop.f32.mrb[22].mxu0  ;;  %v1037_v60 = vpop.f32.mrb[20].mxu1 }
 0xc1c   :  { %v1046_v1 = vadd.f32 %v1044_v63, %v1037_v60  ;;  %v3279_v2 = vpop.f32.mrb[23].mxu0  ;;  %v3286_v3 = vpop.f32.mrb[21].mxu1 }
 0xc1d   :  { %v1040_v4 = vpop.f32.mrb[22].mxu1 }
 0xc1e   :  { %v1048_v6 = vcombine.low %v1046_v1, %v1046_v1  ;;  %v3287_v7 = vpop.f32.mrb[23].mxu1 }
 0xc20   :  { %v1055_v10 = vrot.slane %v1048_v6, %v3775_v25 }
 0xc22   :  { %v1057_v11 = vsel %vm475_vm2, %v996_v9, %v1055_v10 }
 0xc23   :  { %3550 = vtanh.f32 %v1057_v11  ;;  %v3066_v13 = vmul.f32 -1.442695, %v1057_v11  ;;  %v1334_v11 = vrot.slane %v1238_v8, 2 }
 0xc25   :  { %3552 = vpow2.f32 %v3066_v13 }
 0xc2d   :  { %v3551_v12 = vpop.eup %3550 }
 0xc2e   :  { %1067 = vrot.lane.b32.xlu0 %v3551_v12, %s3678_s2 }
 0xc2f   :  { %v3553_v15 = vpop.eup %3552 }
 0xc30   :  { %v1061_v16 = vadd.f32 1.0, %v3553_v15 }
 0xc32   :  { %3554 = vrcp.f32 %v1061_v16 }
 0xc3c   :  { %v3555_v17 = vpop.eup %3554 }
 0xc3d   :  { %v1065_v20 = vmul.f32 %v3555_v17, %v930_v50 }
 0xca0   :  { %v1068_v18 = vpop.permute.xlu0 %1067 }
 0xca1   :  { %v1070_v19 = vmul.f32 %v3555_v17, %v1068_v18 }
 0xca3   :  { %1072 = vrot.lane.b32.xlu1 %v1070_v19, %s3679_s25 }
 0xd15   :  { %v1073_v21 = vpop.permute.xlu1 %1072 }
 0xd16   :  { %v1075_v24 = vadd.f32 %v1073_v21, %v1065_v20  ;;  %v1236_v21 = vld [vmem:[#allocation2 + $0x18] sm:$0xf] }
 0xd18   :  { %3556 = vtanh.f32 %v1075_v24 }
 0xd22   :  { %v3557_v26 = vpop.eup %3556 }
 0xd23   :  { %1078 = vrot.lane.b32.xlu0 %v3557_v26, %s3678_s2 }
 0xd95   :  { %v1079_v27 = vpop.permute.xlu0 %1078 }
 0xd96   :  { %v3972_v28 = vmul.f32 %v3555_v17, %v1079_v27 }
 0xd98   :  { %v1094_v29 = vpack.c.bf16 %v3972_v28, %v3972_v28 }
 0xd9a   :  { %1096 = vrot.lane.b32.xlu0 %v1094_v29, %s3679_s25  ;;  %v1142_v30 = vrot.slane %v1094_v29, 1 }
 0xd9c   :  { %1143 = vrot.lane.b32.xlu1 %v1142_v30, %s3679_s25 }
 0xe0c   :  { %v1097_v31 = vpop.permute.xlu0 %1096 }
 0xe0d   :  { %3293 = vmatmul.mubr.msk.bf16.vlgmr.msra.gmra.mrb[24].mxu0 %vm170_vm1, %v1097_v31 }
 0xe0e   :  { %v1144_v32 = vpop.permute.xlu1 %1143  ;;  %3305 = vmatpush3.bf16.msra.mxu0 %v3769_v23  ;;  %3308 = vmatprep.mubr.msk.bf16.mxu0 %vm3677_vm0, %v3676_v22 }
 0xe0f   :  { %3301 = vmatmul.mubr.msk.bf16.vlgmr.msra.gmra.mrb[24].mxu1 %vm170_vm1, %v1144_v32  ;;  %3306 = vmatprep.subr.bf16.mxu0 %v3676_v22 }
 0xe10   :  { %3313 = vmatpush3.bf16.msra.mxu1 %v3820_v48  ;;  %3316 = vmatprep.mubr.msk.bf16.mxu1 %vm3677_vm0, %v3676_v22 }
 0xe11   :  { %3314 = vmatprep.subr.bf16.mxu1 %v3676_v22 }
 0xe12   :  { %3307 = vmatpush3.bf16.msra.mxu0 %v3810_v41 }
 0xe13   :  { %3320 = vmatprep.subr.bf16.mxu0 %v3676_v22 }
 0xe14   :  { %3315 = vmatpush3.bf16.msra.mxu1 %v3830_v52 }
 0xe15   :  { %3328 = vmatprep.subr.bf16.mxu1 %v3676_v22 }
 0xee0   :  { %v1135_v34 = vpop.f32.mrb[24].mxu0 }
 0xee1   :  { %v3294_v35 = vpop.f32.mrb[25].mxu0  ;;  %v1141_v49 = vadd.f32 %v1135_v34, %v1091_v47 }
 0xee2   :  { %v1138_v37 = vpop.f32.mrb[26].mxu0  ;;  %v1182_v38 = vpop.f32.mrb[24].mxu1 }
 0xee3   :  { %v1191_v39 = vadd.f32 %v1189_v36, %v1182_v38  ;;  %v3295_v40 = vpop.f32.mrb[27].mxu0  ;;  %v3302_v43 = vpop.f32.mrb[25].mxu1 }
 0xee4   :  { %v1185_v44 = vpop.f32.mrb[26].mxu1 }
 0xee5   :  { %v1193_v45 = vcombine.low %v1191_v39, %v1191_v39  ;;  %v3303_v46 = vpop.f32.mrb[27].mxu1 }
 0xee7   :  { %v1200_v50 = vrot.slane %v1193_v45, %v3775_v25 }
 0xee9   :  { %v1202_v51 = vsel %vm475_vm2, %v1141_v49, %v1200_v50 }
 0xeea   :  { %3558 = vtanh.f32 %v1202_v51  ;;  %v3069_v55 = vmul.f32 -1.442695, %v1202_v51 }
 0xeec   :  { %3560 = vpow2.f32 %v3069_v55 }
 0xef4   :  { %v3559_v53 = vpop.eup %3558 }
 0xef5   :  { %1212 = vrot.lane.b32.xlu1 %v3559_v53, %s3678_s2 }
 0xef6   :  { %v3561_v56 = vpop.eup %3560 }
 0xef7   :  { %v1206_v57 = vadd.f32 1.0, %v3561_v56 }
 0xef9   :  { %3562 = vrcp.f32 %v1206_v57 }
 0xf03   :  { %v3563_v58 = vpop.eup %3562 }
 0xf04   :  { %v1210_v62 = vmul.f32 %v3563_v58, %v1075_v24 }
 0xf67   :  { %v1213_v59 = vpop.permute.xlu1 %1212 }
 0xf68   :  { %v1215_v61 = vmul.f32 %v3563_v58, %v1213_v59 }
 0xf6a   :  { %1217 = vrot.lane.b32.xlu0 %v1215_v61, %s3679_s25 }
 0xfdc   :  { %v1218_v63 = vpop.permute.xlu0 %1217 }
 0xfdd   :  { %v1220_v0 = vadd.f32 %v1218_v63, %v1210_v62  ;;  %v1381_v62 = vld [vmem:[#allocation2 + $0x1c] sm:$0xf] }
 0xfdf   :  { %3564 = vtanh.f32 %v1220_v0 }
 0xfe9   :  { %v3565_v60 = vpop.eup %3564 }
 0xfea   :  { %1223 = vrot.lane.b32.xlu1 %v3565_v60, %s3678_s2 }
0x105c   :  { %v1224_v1 = vpop.permute.xlu1 %1223 }
0x105d   :  { %v3997_v2 = vmul.f32 %v3563_v58, %v1224_v1 }
0x105f   :  { %v1239_v3 = vpack.c.bf16 %v3997_v2, %v3997_v2 }
0x1061   :  { %1241 = vrot.lane.b32.xlu1 %v1239_v3, %s3679_s25  ;;  %v1287_v4 = vrot.slane %v1239_v3, 1 }
0x1063   :  { %1288 = vrot.lane.b32.xlu0 %v1287_v4, %s3679_s25 }
0x10d3   :  { %v1242_v6 = vpop.permute.xlu1 %1241 }
0x10d4   :  { %3309 = vmatmul.mubr.msk.bf16.vlgmr.msra.gmra.mrb[28].mxu0 %vm170_vm1, %v1242_v6 }
0x10d5   :  { %v1289_v7 = vpop.permute.xlu0 %1288  ;;  %3321 = vmatpush3.bf16.msra.mxu0 %v3769_v23  ;;  %3324 = vmatprep.mubr.msk.bf16.mxu0 %vm3677_vm0, %v3676_v22 }
0x10d6   :  { %3317 = vmatmul.mubr.msk.bf16.vlgmr.msra.gmra.mrb[28].mxu1 %vm170_vm1, %v1289_v7  ;;  %3322 = vmatprep.subr.bf16.mxu0 %v3676_v22 }
0x10d7   :  { %3329 = vmatpush3.bf16.msra.mxu1 %v3820_v48  ;;  %3332 = vmatprep.mubr.msk.bf16.mxu1 %vm3677_vm0, %v3676_v22 }
0x10d8   :  { %3330 = vmatprep.subr.bf16.mxu1 %v3676_v22 }
0x10d9   :  { %3323 = vmatpush3.bf16.msra.mxu0 %v3810_v41 }
0x10da   :  { %3336 = vmatprep.subr.bf16.mxu0 %v3676_v22 }
0x10db   :  { %3331 = vmatpush3.bf16.msra.mxu1 %v3830_v52 }
0x10dc   :  { %3344 = vmatprep.subr.bf16.mxu1 %v3676_v22 }
0x11a7   :  { %v1280_v9 = vpop.f32.mrb[28].mxu0 }
0x11a8   :  { %v3310_v10 = vpop.f32.mrb[29].mxu0  ;;  %v1286_v24 = vadd.f32 %v1280_v9, %v1236_v21  ;;  %v4076_v21 = vld [vmem:[%s4417_s3 + $0x8] sm:$0xff]  }
0x11a9   :  { %v1283_v12 = vpop.f32.mrb[30].mxu0  ;;  %v1327_v13 = vpop.f32.mrb[28].mxu1 }
0x11aa   :  { %v1336_v15 = vadd.f32 %v1334_v11, %v1327_v13  ;;  %v3311_v16 = vpop.f32.mrb[31].mxu0  ;;  %v3318_v17 = vpop.f32.mrb[29].mxu1 }
0x11ab   :  { %v1330_v18 = vpop.f32.mrb[30].mxu1 }
0x11ac   :  { %v1338_v19 = vcombine.low %v1336_v15, %v1336_v15  ;;  %v3319_v20 = vpop.f32.mrb[31].mxu1 }
0x11ad   :  { %v4067_v20 = vld [vmem:[%s4418_s4] sm:$0xff]  }
0x11ae   :  { %v1345_v26 = vrot.slane %v1338_v19, %v3775_v25  ;;  %v4057_v19 = vld [vmem:[%s4417_s3] sm:$0xff]  }
0x11b0   :  { %v1347_v27 = vsel %vm475_vm2, %v1286_v24, %v1345_v26  ;;  %v4083_v24 = vld [vmem:[%s4418_s4 + $0x8] sm:$0xff]   ;;  %v1526_v26 = vld [vmem:[#allocation2 + $0x1c] sm:$0xf] }
0x11b1   :  { %3566 = vtanh.f32 %v1347_v27  ;;  %v3072_v30 = vmul.f32 -1.442695, %v1347_v27 }
0x11b3   :  { %3568 = vpow2.f32 %v3072_v30  ;;  %v1622_v30 = vrot.slane %v1526_v26, 2 }
0x11bb   :  { %v3567_v29 = vpop.eup %3566 }
0x11bc   :  { %1357 = vrot.lane.b32.xlu0 %v3567_v29, %s3678_s2 }
0x11bd   :  { %v3569_v31 = vpop.eup %3568 }
0x11be   :  { %v1351_v32 = vadd.f32 1.0, %v3569_v31 }
0x11c0   :  { %3570 = vrcp.f32 %v1351_v32 }
0x11ca   :  { %v3571_v33 = vpop.eup %3570 }
0x11cb   :  { %v1355_v36 = vmul.f32 %v3571_v33, %v1220_v0 }
0x122e   :  { %v1358_v34 = vpop.permute.xlu0 %1357 }
0x122f   :  { %v1360_v35 = vmul.f32 %v3571_v33, %v1358_v34 }
0x1231   :  { %1362 = vrot.lane.b32.xlu1 %v1360_v35, %s3679_s25 }
0x12a3   :  { %v1363_v37 = vpop.permute.xlu1 %1362 }
0x12a4   :  { %v1365_v38 = vadd.f32 %v1363_v37, %v1355_v36 }
0x12a6   :  { %3572 = vtanh.f32 %v1365_v38 }
0x12b0   :  { %v3573_v39 = vpop.eup %3572 }
0x12b1   :  { %1368 = vrot.lane.b32.xlu0 %v3573_v39, %s3678_s2  ;;  %v1525_v39 = vld [vmem:[#allocation2 + $0x20] sm:$0xf] }
0x1323   :  { %v1369_v40 = vpop.permute.xlu0 %1368 }
0x1324   :  { %v4022_v43 = vmul.f32 %v3571_v33, %v1369_v40 }
0x1326   :  { %v1384_v44 = vpack.c.bf16 %v4022_v43, %v4022_v43 }
0x1328   :  { %1386 = vrot.lane.b32.xlu0 %v1384_v44, %s3679_s25  ;;  %v1432_v45 = vrot.slane %v1384_v44, 1 }
0x132a   :  { %1433 = vrot.lane.b32.xlu1 %v1432_v45, %s3679_s25 }
0x139a   :  { %v1387_v46 = vpop.permute.xlu0 %1386 }
0x139b   :  { %3325 = vmatmul.mubr.msk.bf16.vlgmr.msra.gmra.mrb[32].mxu0 %vm170_vm1, %v1387_v46 }
0x139c   :  { %v1434_v47 = vpop.permute.xlu1 %1433  ;;  %3337 = vmatpush3.bf16.msra.mxu0 %v3769_v23  ;;  %3340 = vmatprep.mubr.msk.bf16.mxu0 %vm3677_vm0, %v3676_v22  ;;  %v1383_v23 = vld [vmem:[#allocation2 + $0x20] sm:$0xf] }
0x139d   :  { %3333 = vmatmul.mubr.msk.bf16.vlgmr.msra.gmra.mrb[32].mxu1 %vm170_vm1, %v1434_v47  ;;  %3338 = vmatprep.subr.bf16.mxu0 %v3676_v22  ;;  %v1479_v51 = vrot.slane %v1383_v23, 2 }
0x139e   :  { %3345 = vmatpush3.bf16.msra.mxu1 %v3820_v48  ;;  %3348 = vmatprep.mubr.msk.bf16.mxu1 %vm3677_vm0, %v3676_v22 }
0x139f   :  { %3346 = vmatprep.subr.bf16.mxu1 %v3676_v22 }
0x13a0   :  { %3339 = vmatpush3.bf16.msra.mxu0 %v3810_v41 }
0x13a1   :  { %3352 = vmatprep.subr.bf16.mxu0 %v3676_v22 }
0x13a2   :  { %3347 = vmatpush3.bf16.msra.mxu1 %v3830_v52 }
0x13a3   :  { %3360 = vmatprep.subr.bf16.mxu1 %v3676_v22 }
0x146e   :  { %v1425_v49 = vpop.f32.mrb[32].mxu0 }
0x146f   :  { %v3326_v50 = vpop.f32.mrb[33].mxu0  ;;  %v1431_v41 = vadd.f32 %v1425_v49, %v1381_v62 }
0x1470   :  { %v1428_v53 = vpop.f32.mrb[34].mxu0  ;;  %v1472_v55 = vpop.f32.mrb[32].mxu1 }
0x1471   :  { %v1481_v48 = vadd.f32 %v1479_v51, %v1472_v55  ;;  %v3327_v56 = vpop.f32.mrb[35].mxu0  ;;  %v3334_v57 = vpop.f32.mrb[33].mxu1 }
0x1472   :  { %v1475_v58 = vpop.f32.mrb[34].mxu1 }
0x1473   :  { %v1483_v59 = vcombine.low %v1481_v48, %v1481_v48  ;;  %v3335_v61 = vpop.f32.mrb[35].mxu1 }
0x1475   :  { %v1490_v63 = vrot.slane %v1483_v59, %v3775_v25 }
0x1477   :  { %v1492_v52 = vsel %vm475_vm2, %v1431_v41, %v1490_v63 }
0x1478   :  { %3574 = vtanh.f32 %v1492_v52  ;;  %v3075_v60 = vmul.f32 -1.442695, %v1492_v52  ;;  %v1669_v52 = vld [vmem:[#allocation2 + $0x18] sm:$0xf] }
0x147a   :  { %3576 = vpow2.f32 %v3075_v60 }
0x1482   :  { %v3575_v0 = vpop.eup %3574 }
0x1483   :  { %1502 = vrot.lane.b32.xlu1 %v3575_v0, %s3678_s2 }
0x1484   :  { %v3577_v1 = vpop.eup %3576 }
0x1485   :  { %v1496_v3 = vadd.f32 1.0, %v3577_v1  ;;  %v1765_v1 = vrot.slane %v1669_v52, 2 }
0x1487   :  { %3578 = vrcp.f32 %v1496_v3 }
0x1491   :  { %v3579_v4 = vpop.eup %3578 }
0x1492   :  { %v1500_v8 = vmul.f32 %v3579_v4, %v1365_v38 }
0x14f5   :  { %v1503_v6 = vpop.permute.xlu1 %1502 }
0x14f6   :  { %v1505_v7 = vmul.f32 %v3579_v4, %v1503_v6 }
0x14f8   :  { %1507 = vrot.lane.b32.xlu0 %v1505_v7, %s3679_s25 }
0x156a   :  { %v1508_v9 = vpop.permute.xlu0 %1507 }
0x156b   :  { %v1510_v10 = vadd.f32 %v1508_v9, %v1500_v8 }
0x156d   :  { %3580 = vtanh.f32 %v1510_v10 }
0x1577   :  { %v3581_v11 = vpop.eup %3580 }
0x1578   :  { %1513 = vrot.lane.b32.xlu1 %v3581_v11, %s3678_s2 }
0x15ea   :  { %v1514_v12 = vpop.permute.xlu1 %1513 }
0x15eb   :  { %v4047_v13 = vmul.f32 %v3579_v4, %v1514_v12  ;;  %v1668_v12 = vld [vmem:[#allocation2 + $0x24] sm:$0xf] }
0x15ed   :  { %v1527_v15 = vpack.c.bf16 %v4047_v13, %v4047_v13 }
0x15ef   :  { %1529 = vrot.lane.b32.xlu1 %v1527_v15, %s3679_s25  ;;  %v1575_v16 = vrot.slane %v1527_v15, 1 }
0x15f1   :  { %1576 = vrot.lane.b32.xlu0 %v1575_v16, %s3679_s25 }
0x1661   :  { %v1530_v17 = vpop.permute.xlu1 %1529 }
0x1662   :  { %3341 = vmatmul.mubr.msk.bf16.vlgmr.msra.gmra.mrb[36].mxu0 %vm170_vm1, %v1530_v17 }
0x1663   :  { %v1577_v18 = vpop.permute.xlu0 %1576  ;;  %3353 = vmatpush3.bf16.msra.mxu0 %v4057_v19  ;;  %3356 = vmatprep.mubr.msk.bf16.mxu0 %vm3677_vm0, %v3676_v22 }
0x1664   :  { %3349 = vmatmul.mubr.msk.bf16.vlgmr.msra.gmra.mrb[36].mxu1 %vm170_vm1, %v1577_v18  ;;  %3354 = vmatprep.subr.bf16.mxu0 %v3676_v22 }
0x1665   :  { %3361 = vmatpush3.bf16.msra.mxu1 %v4067_v20  ;;  %3364 = vmatprep.mubr.msk.bf16.mxu1 %vm3677_vm0, %v3676_v22 }
0x1666   :  { %3362 = vmatprep.subr.bf16.mxu1 %v3676_v22 }
0x1667   :  { %3355 = vmatpush3.bf16.msra.mxu0 %v4076_v21 }
0x1668   :  { %3368 = vmatprep.subr.bf16.mxu0 %v3676_v22 }
0x1669   :  { %3363 = vmatpush3.bf16.msra.mxu1 %v4083_v24 }
0x166a   :  { %3376 = vmatprep.subr.bf16.mxu1 %v3676_v22 }
0x1735   :  { %v1568_v27 = vpop.f32.mrb[36].mxu0 }
0x1736   :  { %v3342_v29 = vpop.f32.mrb[37].mxu0  ;;  %v1574_v40 = vadd.f32 %v1568_v27, %v1525_v39 }
0x1737   :  { %v1571_v31 = vpop.f32.mrb[38].mxu0  ;;  %v1615_v32 = vpop.f32.mrb[36].mxu1 }
0x1738   :  { %v1624_v33 = vadd.f32 %v1622_v30, %v1615_v32  ;;  %v3343_v34 = vpop.f32.mrb[39].mxu0  ;;  %v3350_v35 = vpop.f32.mrb[37].mxu1 }
0x1739   :  { %v1618_v36 = vpop.f32.mrb[38].mxu1 }
0x173a   :  { %v1626_v37 = vcombine.low %v1624_v33, %v1624_v33  ;;  %v3351_v38 = vpop.f32.mrb[39].mxu1 }
0x173c   :  { %v1633_v44 = vrot.slane %v1626_v37, %v3775_v25 }
0x173e   :  { %v1635_v45 = vsel %vm475_vm2, %v1574_v40, %v1633_v44 }
0x173f   :  { %3582 = vtanh.f32 %v1635_v45  ;;  %v3078_v47 = vmul.f32 -1.442695, %v1635_v45 }
0x1741   :  { %3584 = vpow2.f32 %v3078_v47 }
0x1749   :  { %v3583_v46 = vpop.eup %3582 }
0x174a   :  { %1645 = vrot.lane.b32.xlu0 %v3583_v46, %s3678_s2  ;;  %v1812_v46 = vld [vmem:[#allocation2 + $0x14] sm:$0xf] }
0x174b   :  { %v3585_v23 = vpop.eup %3584 }
0x174c   :  { %v1639_v49 = vadd.f32 1.0, %v3585_v23 }
0x174e   :  { %3586 = vrcp.f32 %v1639_v49  ;;  %v1908_v49 = vrot.slane %v1812_v46, 2 }
0x1758   :  { %v3587_v50 = vpop.eup %3586 }
0x1759   :  { %v1643_v55 = vmul.f32 %v3587_v50, %v1510_v10 }
0x17bc   :  { %v1646_v51 = vpop.permute.xlu0 %1645 }
0x17bd   :  { %v1648_v53 = vmul.f32 %v3587_v50, %v1646_v51 }
0x17bf   :  { %1650 = vrot.lane.b32.xlu1 %v1648_v53, %s3679_s25 }
0x1831   :  { %v1651_v48 = vpop.permute.xlu1 %1650 }
0x1832   :  { %v1653_v56 = vadd.f32 %v1651_v48, %v1643_v55 }
0x1834   :  { %3588 = vtanh.f32 %v1653_v56 }
0x183e   :  { %v3589_v57 = vpop.eup %3588 }
0x183f   :  { %1656 = vrot.lane.b32.xlu0 %v3589_v57, %s3678_s2 }
0x18b1   :  { %v1657_v58 = vpop.permute.xlu0 %1656 }
0x18b2   :  { %v4092_v59 = vmul.f32 %v3587_v50, %v1657_v58 }
0x18b4   :  { %v1670_v61 = vpack.c.bf16 %v4092_v59, %v4092_v59 }
0x18b6   :  { %1672 = vrot.lane.b32.xlu0 %v1670_v61, %s3679_s25  ;;  %v1718_v62 = vrot.slane %v1670_v61, 1  ;;  %v1811_v61 = vld [vmem:[#allocation2 + $0x28] sm:$0xf] }
0x18b8   :  { %1719 = vrot.lane.b32.xlu1 %v1718_v62, %s3679_s25 }
0x1928   :  { %v1673_v41 = vpop.permute.xlu0 %1672 }
0x1929   :  { %3357 = vmatmul.mubr.msk.bf16.vlgmr.msra.gmra.mrb[40].mxu0 %vm170_vm1, %v1673_v41 }
0x192a   :  { %v1720_v63 = vpop.permute.xlu1 %1719  ;;  %3369 = vmatpush3.bf16.msra.mxu0 %v4057_v19  ;;  %3372 = vmatprep.mubr.msk.bf16.mxu0 %vm3677_vm0, %v3676_v22 }
0x192b   :  { %3365 = vmatmul.mubr.msk.bf16.vlgmr.msra.gmra.mrb[40].mxu1 %vm170_vm1, %v1720_v63  ;;  %3370 = vmatprep.subr.bf16.mxu0 %v3676_v22 }
0x192c   :  { %3377 = vmatpush3.bf16.msra.mxu1 %v4067_v20  ;;  %3380 = vmatprep.mubr.msk.bf16.mxu1 %vm3677_vm0, %v3676_v22 }
0x192d   :  { %3378 = vmatprep.subr.bf16.mxu1 %v3676_v22 }
0x192e   :  { %3371 = vmatpush3.bf16.msra.mxu0 %v4076_v21 }
0x192f   :  { %3384 = vmatprep.subr.bf16.mxu0 %v3676_v22 }
0x1930   :  { %3379 = vmatpush3.bf16.msra.mxu1 %v4083_v24 }
0x1931   :  { %3392 = vmatprep.subr.bf16.mxu1 %v3676_v22 }
0x19fc   :  { %v1711_v0 = vpop.f32.mrb[40].mxu0 }
0x19fd   :  { %v3358_v60 = vpop.f32.mrb[41].mxu0  ;;  %v1717_v15 = vadd.f32 %v1711_v0, %v1668_v12 }
0x19fe   :  { %v1714_v3 = vpop.f32.mrb[42].mxu0  ;;  %v1758_v4 = vpop.f32.mrb[40].mxu1 }
0x19ff   :  { %v1767_v6 = vadd.f32 %v1765_v1, %v1758_v4  ;;  %v3359_v7 = vpop.f32.mrb[43].mxu0  ;;  %v3366_v8 = vpop.f32.mrb[41].mxu1 }
0x1a00   :  { %v1761_v9 = vpop.f32.mrb[42].mxu1 }
0x1a01   :  { %v1769_v10 = vcombine.low %v1767_v6, %v1767_v6  ;;  %v3367_v11 = vpop.f32.mrb[43].mxu1 }
0x1a03   :  { %v1776_v16 = vrot.slane %v1769_v10, %v3775_v25 }
0x1a05   :  { %v1778_v17 = vsel %vm475_vm2, %v1717_v15, %v1776_v16 }
0x1a06   :  { %3590 = vtanh.f32 %v1778_v17  ;;  %v3081_v26 = vmul.f32 -1.442695, %v1778_v17 }
0x1a08   :  { %3592 = vpow2.f32 %v3081_v26  ;;  %v1955_v26 = vld [vmem:[#allocation2 + $0x10] sm:$0xf] }
0x1a10   :  { %v3591_v18 = vpop.eup %3590 }
0x1a11   :  { %1788 = vrot.lane.b32.xlu1 %v3591_v18, %s3678_s2 }
0x1a12   :  { %v3593_v27 = vpop.eup %3592 }
0x1a13   :  { %v1782_v29 = vadd.f32 1.0, %v3593_v27 }
0x1a15   :  { %3594 = vrcp.f32 %v1782_v29 }
0x1a1f   :  { %v3595_v30 = vpop.eup %3594 }
0x1a20   :  { %v1786_v33 = vmul.f32 %v3595_v30, %v1653_v56 }
0x1a83   :  { %v1789_v31 = vpop.permute.xlu1 %1788 }
0x1a84   :  { %v1791_v32 = vmul.f32 %v3595_v30, %v1789_v31 }
0x1a86   :  { %1793 = vrot.lane.b32.xlu0 %v1791_v32, %s3679_s25 }
0x1af8   :  { %v1794_v34 = vpop.permute.xlu0 %1793 }
0x1af9   :  { %v1796_v35 = vadd.f32 %v1794_v34, %v1786_v33 }
0x1afb   :  { %3596 = vtanh.f32 %v1796_v35 }
0x1b05   :  { %v3597_v36 = vpop.eup %3596 }
0x1b06   :  { %1799 = vrot.lane.b32.xlu1 %v3597_v36, %s3678_s2 }
0x1b78   :  { %v1800_v37 = vpop.permute.xlu1 %1799 }
0x1b79   :  { %v4117_v38 = vmul.f32 %v3595_v30, %v1800_v37  ;;  %v2051_v30 = vrot.slane %v1955_v26, 2 }
0x1b7b   :  { %v1813_v39 = vpack.c.bf16 %v4117_v38, %v4117_v38 }
0x1b7d   :  { %1815 = vrot.lane.b32.xlu1 %v1813_v39, %s3679_s25  ;;  %v1861_v40 = vrot.slane %v1813_v39, 1 }
0x1b7f   :  { %1862 = vrot.lane.b32.xlu0 %v1861_v40, %s3679_s25  ;;  %v1954_v40 = vld [vmem:[#allocation2 + $0x2c] sm:$0xf] }
0x1bef   :  { %v1816_v44 = vpop.permute.xlu1 %1815 }
0x1bf0   :  { %3373 = vmatmul.mubr.msk.bf16.vlgmr.msra.gmra.mrb[44].mxu0 %vm170_vm1, %v1816_v44 }
0x1bf1   :  { %v1863_v45 = vpop.permute.xlu0 %1862  ;;  %3385 = vmatpush3.bf16.msra.mxu0 %v4057_v19  ;;  %3388 = vmatprep.mubr.msk.bf16.mxu0 %vm3677_vm0, %v3676_v22 }
0x1bf2   :  { %3381 = vmatmul.mubr.msk.bf16.vlgmr.msra.gmra.mrb[44].mxu1 %vm170_vm1, %v1863_v45  ;;  %3386 = vmatprep.subr.bf16.mxu0 %v3676_v22 }
0x1bf3   :  { %3393 = vmatpush3.bf16.msra.mxu1 %v4067_v20  ;;  %3396 = vmatprep.mubr.msk.bf16.mxu1 %vm3677_vm0, %v3676_v22 }
0x1bf4   :  { %3394 = vmatprep.subr.bf16.mxu1 %v3676_v22 }
0x1bf5   :  { %3387 = vmatpush3.bf16.msra.mxu0 %v4076_v21 }
0x1bf6   :  { %3400 = vmatprep.subr.bf16.mxu0 %v3676_v22 }
0x1bf7   :  { %3395 = vmatpush3.bf16.msra.mxu1 %v4083_v24 }
0x1bf8   :  { %3408 = vmatprep.subr.bf16.mxu1 %v3676_v22 }
0x1cc3   :  { %v1854_v47 = vpop.f32.mrb[44].mxu0 }
0x1cc4   :  { %v3374_v23 = vpop.f32.mrb[45].mxu0  ;;  %v1860_v62 = vadd.f32 %v1854_v47, %v1811_v61 }
0x1cc5   :  { %v1857_v50 = vpop.f32.mrb[46].mxu0  ;;  %v1901_v51 = vpop.f32.mrb[44].mxu1 }
0x1cc6   :  { %v1910_v53 = vadd.f32 %v1908_v49, %v1901_v51  ;;  %v3375_v55 = vpop.f32.mrb[47].mxu0  ;;  %v3382_v48 = vpop.f32.mrb[45].mxu1 }
0x1cc7   :  { %v1904_v56 = vpop.f32.mrb[46].mxu1 }
0x1cc8   :  { %v1912_v57 = vcombine.low %v1910_v53, %v1910_v53  ;;  %v3383_v58 = vpop.f32.mrb[47].mxu1 }
0x1cca   :  { %v1919_v41 = vrot.slane %v1912_v57, %v3775_v25 }
0x1ccc   :  { %v1921_v63 = vsel %vm475_vm2, %v1860_v62, %v1919_v41 }
0x1ccd   :  { %3598 = vtanh.f32 %v1921_v63  ;;  %v3084_v0 = vmul.f32 -1.442695, %v1921_v63 }
0x1ccf   :  { %3600 = vpow2.f32 %v3084_v0 }
0x1cd7   :  { %v3599_v52 = vpop.eup %3598 }
0x1cd8   :  { %1931 = vrot.lane.b32.xlu0 %v3599_v52, %s3678_s2 }
0x1cd9   :  { %v3601_v60 = vpop.eup %3600 }
0x1cda   :  { %v1925_v1 = vadd.f32 1.0, %v3601_v60  ;;  %v2098_v60 = vld [vmem:[#allocation2 + $0xc] sm:$0xf] }
0x1cdc   :  { %3602 = vrcp.f32 %v1925_v1 }
0x1ce6   :  { %v3603_v3 = vpop.eup %3602 }
0x1ce7   :  { %v1929_v7 = vmul.f32 %v3603_v3, %v1796_v35 }
0x1d4a   :  { %v1932_v4 = vpop.permute.xlu0 %1931 }
0x1d4b   :  { %v1934_v6 = vmul.f32 %v3603_v3, %v1932_v4  ;;  %v2194_v4 = vrot.slane %v2098_v60, 2 }
0x1d4d   :  { %1936 = vrot.lane.b32.xlu1 %v1934_v6, %s3679_s25 }
0x1dbf   :  { %v1937_v8 = vpop.permute.xlu1 %1936 }
0x1dc0   :  { %v1939_v9 = vadd.f32 %v1937_v8, %v1929_v7 }
0x1dc2   :  { %3604 = vtanh.f32 %v1939_v9 }
0x1dcc   :  { %v3605_v10 = vpop.eup %3604 }
0x1dcd   :  { %1942 = vrot.lane.b32.xlu0 %v3605_v10, %s3678_s2 }
0x1e3f   :  { %v1943_v11 = vpop.permute.xlu0 %1942 }
0x1e40   :  { %v4142_v12 = vmul.f32 %v3603_v3, %v1943_v11 }
0x1e42   :  { %v1956_v15 = vpack.c.bf16 %v4142_v12, %v4142_v12 }
0x1e44   :  { %1958 = vrot.lane.b32.xlu0 %v1956_v15, %s3679_s25  ;;  %v2004_v16 = vrot.slane %v1956_v15, 1 }
0x1e46   :  { %2005 = vrot.lane.b32.xlu1 %v2004_v16, %s3679_s25 }
0x1eb6   :  { %v1959_v17 = vpop.permute.xlu0 %1958 }
0x1eb7   :  { %3389 = vmatmul.mubr.msk.bf16.vlgmr.msra.gmra.mrb[48].mxu0 %vm170_vm1, %v1959_v17  ;;  %v2097_v17 = vld [vmem:[#allocation2 + $0x30] sm:$0xf] }
0x1eb8   :  { %v2006_v18 = vpop.permute.xlu1 %2005  ;;  %3401 = vmatpush3.bf16.msra.mxu0 %v4057_v19  ;;  %3404 = vmatprep.mubr.msk.bf16.mxu0 %vm3677_vm0, %v3676_v22 }
0x1eb9   :  { %3397 = vmatmul.mubr.msk.bf16.vlgmr.msra.gmra.mrb[48].mxu1 %vm170_vm1, %v2006_v18  ;;  %3402 = vmatprep.subr.bf16.mxu0 %v3676_v22 }
0x1eba   :  { %3409 = vmatpush3.bf16.msra.mxu1 %v4067_v20  ;;  %3412 = vmatprep.mubr.msk.bf16.mxu1 %vm3677_vm0, %v3676_v22 }
0x1ebb   :  { %3410 = vmatprep.subr.bf16.mxu1 %v3676_v22 }
0x1ebc   :  { %3403 = vmatpush3.bf16.msra.mxu0 %v4076_v21 }
0x1ebd   :  { %3416 = vmatprep.subr.bf16.mxu0 %v3676_v22 }
0x1ebe   :  { %3411 = vmatpush3.bf16.msra.mxu1 %v4083_v24 }
0x1ebf   :  { %3424 = vmatprep.subr.bf16.mxu1 %v3676_v22 }
0x1f8a   :  { %v1997_v27 = vpop.f32.mrb[48].mxu0 }
0x1f8b   :  { %v3390_v29 = vpop.f32.mrb[49].mxu0  ;;  %v2003_v44 = vadd.f32 %v1997_v27, %v1954_v40 }
0x1f8c   :  { %v2000_v31 = vpop.f32.mrb[50].mxu0  ;;  %v2044_v32 = vpop.f32.mrb[48].mxu1 }
0x1f8d   :  { %v2053_v33 = vadd.f32 %v2051_v30, %v2044_v32  ;;  %v3391_v34 = vpop.f32.mrb[51].mxu0  ;;  %v3398_v35 = vpop.f32.mrb[49].mxu1 }
0x1f8e   :  { %v2047_v36 = vpop.f32.mrb[50].mxu1 }
0x1f8f   :  { %v2055_v37 = vcombine.low %v2053_v33, %v2053_v33  ;;  %v3399_v39 = vpop.f32.mrb[51].mxu1 }
0x1f91   :  { %v2062_v45 = vrot.slane %v2055_v37, %v3775_v25 }
0x1f93   :  { %v2064_v46 = vsel %vm475_vm2, %v2003_v44, %v2062_v45 }
0x1f94   :  { %3606 = vtanh.f32 %v2064_v46  ;;  %v3087_v23 = vmul.f32 -1.442695, %v2064_v46 }
0x1f96   :  { %3608 = vpow2.f32 %v3087_v23 }
0x1f9e   :  { %v3607_v47 = vpop.eup %3606 }
0x1f9f   :  { %2074 = vrot.lane.b32.xlu1 %v3607_v47, %s3678_s2 }
0x1fa0   :  { %v3609_v49 = vpop.eup %3608 }
0x1fa1   :  { %v2068_v50 = vadd.f32 1.0, %v3609_v49 }
0x1fa3   :  { %3610 = vrcp.f32 %v2068_v50  ;;  %v2241_v50 = vld [vmem:[#allocation2 + $0x8] sm:$0xf] }
0x1fad   :  { %v3611_v51 = vpop.eup %3610 }
0x1fae   :  { %v2072_v48 = vmul.f32 %v3611_v51, %v1939_v9 }
0x2011   :  { %v2075_v53 = vpop.permute.xlu1 %2074 }
0x2012   :  { %v2077_v55 = vmul.f32 %v3611_v51, %v2075_v53 }
0x2014   :  { %2079 = vrot.lane.b32.xlu0 %v2077_v55, %s3679_s25  ;;  %v2337_v55 = vrot.slane %v2241_v50, 2 }
0x2086   :  { %v2080_v56 = vpop.permute.xlu0 %2079 }
0x2087   :  { %v2082_v57 = vadd.f32 %v2080_v56, %v2072_v48 }
0x2089   :  { %3612 = vtanh.f32 %v2082_v57 }
0x2093   :  { %v3613_v58 = vpop.eup %3612 }
0x2094   :  { %2085 = vrot.lane.b32.xlu1 %v3613_v58, %s3678_s2 }
0x2106   :  { %v2086_v61 = vpop.permute.xlu1 %2085 }
0x2107   :  { %v4167_v62 = vmul.f32 %v3611_v51, %v2086_v61 }
0x2109   :  { %v2099_v41 = vpack.c.bf16 %v4167_v62, %v4167_v62 }
0x210b   :  { %2101 = vrot.lane.b32.xlu1 %v2099_v41, %s3679_s25  ;;  %v2147_v63 = vrot.slane %v2099_v41, 1 }
0x210d   :  { %2148 = vrot.lane.b32.xlu0 %v2147_v63, %s3679_s25 }
0x217d   :  { %v2102_v52 = vpop.permute.xlu1 %2101 }
0x217e   :  { %3405 = vmatmul.mubr.msk.bf16.vlgmr.msra.gmra.mrb[52].mxu0 %vm170_vm1, %v2102_v52 }
0x217f   :  { %v2149_v0 = vpop.permute.xlu0 %2148  ;;  %3417 = vmatpush3.bf16.msra.mxu0 %v4057_v19  ;;  %3420 = vmatprep.mubr.msk.bf16.mxu0 %vm3677_vm0, %v3676_v22 }
0x2180   :  { %3413 = vmatmul.mubr.msk.bf16.vlgmr.msra.gmra.mrb[52].mxu1 %vm170_vm1, %v2149_v0  ;;  %3418 = vmatprep.subr.bf16.mxu0 %v3676_v22  ;;  %v2240_v0 = vld [vmem:[#allocation2 + $0x34] sm:$0xf] }
0x2181   :  { %3425 = vmatpush3.bf16.msra.mxu1 %v4067_v20  ;;  %3428 = vmatprep.mubr.msk.bf16.mxu1 %vm3677_vm0, %v3676_v22 }
0x2182   :  { %3426 = vmatprep.subr.bf16.mxu1 %v3676_v22 }
0x2183   :  { %3419 = vmatpush3.bf16.msra.mxu0 %v4076_v21 }
0x2184   :  { %3432 = vmatprep.subr.bf16.mxu0 %v3676_v22 }
0x2185   :  { %3427 = vmatpush3.bf16.msra.mxu1 %v4083_v24 }
0x2186   :  { %3440 = vmatprep.subr.bf16.mxu1 %v3676_v22 }
0x2251   :  { %v2140_v1 = vpop.f32.mrb[52].mxu0 }
0x2252   :  { %v3406_v3 = vpop.f32.mrb[53].mxu0  ;;  %v2146_v18 = vadd.f32 %v2140_v1, %v2097_v17 }
0x2253   :  { %v2143_v6 = vpop.f32.mrb[54].mxu0  ;;  %v2187_v7 = vpop.f32.mrb[52].mxu1 }
0x2254   :  { %v2196_v8 = vadd.f32 %v2194_v4, %v2187_v7  ;;  %v3407_v9 = vpop.f32.mrb[55].mxu0  ;;  %v3414_v10 = vpop.f32.mrb[53].mxu1 }
0x2255   :  { %v2190_v11 = vpop.f32.mrb[54].mxu1 }
0x2256   :  { %v2198_v15 = vcombine.low %v2196_v8, %v2196_v8  ;;  %v3415_v16 = vpop.f32.mrb[55].mxu1 }
0x2258   :  { %v2205_v26 = vrot.slane %v2198_v15, %v3775_v25 }
0x225a   :  { %v2207_v27 = vsel %vm475_vm2, %v2146_v18, %v2205_v26 }
0x225b   :  { %3614 = vtanh.f32 %v2207_v27  ;;  %v3090_v30 = vmul.f32 -1.442695, %v2207_v27 }
0x225d   :  { %3616 = vpow2.f32 %v3090_v30 }
0x2265   :  { %v3615_v29 = vpop.eup %3614 }
0x2266   :  { %2217 = vrot.lane.b32.xlu0 %v3615_v29, %s3678_s2 }
0x2267   :  { %v3617_v31 = vpop.eup %3616 }
0x2268   :  { %v2211_v32 = vadd.f32 1.0, %v3617_v31 }
0x226a   :  { %3618 = vrcp.f32 %v2211_v32 }
0x2274   :  { %v3619_v33 = vpop.eup %3618 }
0x2275   :  { %v2215_v36 = vmul.f32 %v3619_v33, %v2082_v57 }
0x22d8   :  { %v2218_v34 = vpop.permute.xlu0 %2217 }
0x22d9   :  { %v2220_v35 = vmul.f32 %v3619_v33, %v2218_v34 }
0x22db   :  { %2222 = vrot.lane.b32.xlu1 %v2220_v35, %s3679_s25 }
0x234d   :  { %v2223_v37 = vpop.permute.xlu1 %2222 }
0x234e   :  { %v2225_v39 = vadd.f32 %v2223_v37, %v2215_v36 }
0x2350   :  { %3620 = vtanh.f32 %v2225_v39 }
0x235a   :  { %v3621_v40 = vpop.eup %3620 }
0x235b   :  { %2228 = vrot.lane.b32.xlu0 %v3621_v40, %s3678_s2 }
0x23cd   :  { %v2229_v44 = vpop.permute.xlu0 %2228 }
0x23ce   :  { %v4192_v45 = vmul.f32 %v3619_v33, %v2229_v44  ;;  %v2384_v33 = vld [vmem:[#allocation2 + $0x4] sm:$0xf] }
0x23cf   :  { %v2480_v35 = vrot.slane %v2384_v33, 2 }
0x23d0   :  { %v2242_v46 = vpack.c.bf16 %v4192_v45, %v4192_v45 }
0x23d2   :  { %2244 = vrot.lane.b32.xlu0 %v2242_v46, %s3679_s25  ;;  %v2290_v47 = vrot.slane %v2242_v46, 1 }
0x23d4   :  { %2291 = vrot.lane.b32.xlu1 %v2290_v47, %s3679_s25 }
0x2444   :  { %v2245_v23 = vpop.permute.xlu0 %2244 }
0x2445   :  { %3421 = vmatmul.mubr.msk.bf16.vlgmr.msra.gmra.mrb[56].mxu0 %vm170_vm1, %v2245_v23  ;;  %v2383_v23 = vld [vmem:[#allocation2 + $0x38] sm:$0xf] }
0x2446   :  { %v2292_v49 = vpop.permute.xlu1 %2291  ;;  %3433 = vmatpush3.bf16.msra.mxu0 %v4057_v19  ;;  %3436 = vmatprep.mubr.msk.bf16.mxu0 %vm3677_vm0, %v3676_v22 }
0x2447   :  { %3429 = vmatmul.mubr.msk.bf16.vlgmr.msra.gmra.mrb[56].mxu1 %vm170_vm1, %v2292_v49  ;;  %3434 = vmatprep.subr.bf16.mxu0 %v3676_v22 }
0x2448   :  { %3441 = vmatpush3.bf16.msra.mxu1 %v4067_v20  ;;  %3444 = vmatprep.mubr.msk.bf16.mxu1 %vm3677_vm0, %v3676_v22 }
0x2449   :  { %3442 = vmatprep.subr.bf16.mxu1 %v3676_v22 }
0x244a   :  { %3435 = vmatpush3.bf16.msra.mxu0 %v4076_v21 }
0x244b   :  { %3448 = vmatprep.subr.bf16.mxu0 %v3676_v22 }
0x244c   :  { %3443 = vmatpush3.bf16.msra.mxu1 %v4083_v24 }
0x244d   :  { %3456 = vmatprep.subr.bf16.mxu1 %v3676_v22 }
0x2518   :  { %v2283_v51 = vpop.f32.mrb[56].mxu0 }
0x2519   :  { %v3422_v53 = vpop.f32.mrb[57].mxu0  ;;  %v2289_v60 = vadd.f32 %v2283_v51, %v2240_v0 }
0x251a   :  { %v2286_v48 = vpop.f32.mrb[58].mxu0  ;;  %v2330_v56 = vpop.f32.mrb[56].mxu1 }
0x251b   :  { %v2339_v57 = vadd.f32 %v2337_v55, %v2330_v56  ;;  %v3423_v58 = vpop.f32.mrb[59].mxu0  ;;  %v3430_v61 = vpop.f32.mrb[57].mxu1 }
0x251c   :  { %v2333_v41 = vpop.f32.mrb[58].mxu1 }
0x251d   :  { %v2341_v63 = vcombine.low %v2339_v57, %v2339_v57  ;;  %v3431_v52 = vpop.f32.mrb[59].mxu1 }
0x251f   :  { %v2348_v1 = vrot.slane %v2341_v63, %v3775_v25 }
0x2521   :  { %v2350_v3 = vsel %vm475_vm2, %v2289_v60, %v2348_v1 }
0x2522   :  { %3622 = vtanh.f32 %v2350_v3  ;;  %v3093_v6 = vmul.f32 -1.442695, %v2350_v3 }
0x2524   :  { %3624 = vpow2.f32 %v3093_v6  ;;  %v2527_v6 = vld [vmem:[#allocation2] sm:$0xf] }
0x252c   :  { %v3623_v4 = vpop.eup %3622 }
0x252d   :  { %2360 = vrot.lane.b32.xlu1 %v3623_v4, %s3678_s2 }
0x252e   :  { %v3625_v7 = vpop.eup %3624 }
0x252f   :  { %v2354_v8 = vadd.f32 1.0, %v3625_v7 }
0x2531   :  { %3626 = vrcp.f32 %v2354_v8 }
0x253b   :  { %v3627_v9 = vpop.eup %3626 }
0x253c   :  { %v2358_v15 = vmul.f32 %v3627_v9, %v2225_v39 }
0x259f   :  { %v2361_v10 = vpop.permute.xlu1 %2360 }
0x25a0   :  { %v2363_v11 = vmul.f32 %v3627_v9, %v2361_v10 }
0x25a2   :  { %2365 = vrot.lane.b32.xlu0 %v2363_v11, %s3679_s25 }
0x2614   :  { %v2366_v16 = vpop.permute.xlu0 %2365 }
0x2615   :  { %v2368_v17 = vadd.f32 %v2366_v16, %v2358_v15 }
0x2617   :  { %3628 = vtanh.f32 %v2368_v17 }
0x2621   :  { %v3629_v18 = vpop.eup %3628 }
0x2622   :  { %2371 = vrot.lane.b32.xlu1 %v3629_v18, %s3678_s2 }
0x2694   :  { %v2372_v26 = vpop.permute.xlu1 %2371 }
0x2695   :  { %v4217_v27 = vmul.f32 %v3627_v9, %v2372_v26  ;;  %v2623_v9 = vrot.slane %v2527_v6, 2 }
0x2697   :  { %v2385_v29 = vpack.c.bf16 %v4217_v27, %v4217_v27 }
0x2699   :  { %2387 = vrot.lane.b32.xlu1 %v2385_v29, %s3679_s25  ;;  %v2433_v30 = vrot.slane %v2385_v29, 1 }
0x269b   :  { %2434 = vrot.lane.b32.xlu0 %v2433_v30, %s3679_s25  ;;  %v2526_v30 = vld [vmem:[#allocation2 + $0x3c] sm:$0xf] }
0x270b   :  { %v2388_v31 = vpop.permute.xlu1 %2387 }
0x270c   :  { %3437 = vmatmul.mubr.msk.bf16.vlgmr.msra.gmra.mrb[60].mxu0 %vm170_vm1, %v2388_v31 }
0x270d   :  { %v2435_v32 = vpop.permute.xlu0 %2434  ;;  %3449 = vmatpush3.bf16.msra.mxu0 %v4057_v19  ;;  %3452 = vmatprep.mubr.msk.bf16.mxu0 %vm3677_vm0, %v3676_v22 }
0x270e   :  { %3445 = vmatmul.mubr.msk.bf16.vlgmr.msra.gmra.mrb[60].mxu1 %vm170_vm1, %v2435_v32  ;;  %3450 = vmatprep.subr.bf16.mxu0 %v3676_v22 }
0x270f   :  { %3457 = vmatpush3.bf16.msra.mxu1 %v4067_v20  ;;  %3460 = vmatprep.mubr.msk.bf16.mxu1 %vm3677_vm0, %v3676_v22 }
0x2710   :  { %3458 = vmatprep.subr.bf16.mxu1 %v3676_v22 }
0x2711   :  { %3451 = vmatpush3.bf16.msra.mxu0 %v4076_v21 }
0x2713   :  { %3459 = vmatpush3.bf16.msra.mxu1 %v4083_v24 }
0x27df   :  { %v2426_v19 = vpop.f32.mrb[60].mxu0 }
0x27e0   :  { %v3438_v34 = vpop.f32.mrb[61].mxu0  ;;  %v2432_v49 = vadd.f32 %v2426_v19, %v2383_v23 }
0x27e1   :  { %v2429_v36 = vpop.f32.mrb[62].mxu0  ;;  %v2473_v37 = vpop.f32.mrb[60].mxu1 }
0x27e2   :  { %v2482_v39 = vadd.f32 %v2480_v35, %v2473_v37  ;;  %v3439_v40 = vpop.f32.mrb[63].mxu0  ;;  %v3446_v44 = vpop.f32.mrb[61].mxu1 }
0x27e3   :  { %v2476_v46 = vpop.f32.mrb[62].mxu1 }
0x27e4   :  { %v2484_v20 = vcombine.low %v2482_v39, %v2482_v39  ;;  %v3447_v47 = vpop.f32.mrb[63].mxu1 }
0x27e6   :  { %v2491_v50 = vrot.slane %v2484_v20, %v3775_v25 }
0x27e8   :  { %v2493_v21 = vsel %vm475_vm2, %v2432_v49, %v2491_v50 }
0x27e9   :  { %3630 = vtanh.f32 %v2493_v21  ;;  %v3096_v51 = vmul.f32 -1.442695, %v2493_v21 }
0x27eb   :  { %3632 = vpow2.f32 %v3096_v51 }
0x27f3   :  { %v3631_v24 = vpop.eup %3630 }
0x27f4   :  { %2503 = vrot.lane.b32.xlu0 %v3631_v24, %s3678_s2 }
0x27f5   :  { %v3633_v53 = vpop.eup %3632 }
0x27f6   :  { %v2497_v55 = vadd.f32 1.0, %v3633_v53 }
0x27f8   :  { %3634 = vrcp.f32 %v2497_v55 }
0x2802   :  { %v3635_v48 = vpop.eup %3634 }
0x2803   :  { %v2501_v58 = vmul.f32 %v3635_v48, %v2368_v17 }
0x2866   :  { %v2504_v56 = vpop.permute.xlu0 %2503 }
0x2867   :  { %v2506_v57 = vmul.f32 %v3635_v48, %v2504_v56 }
0x2869   :  { %2508 = vrot.lane.b32.xlu1 %v2506_v57, %s3679_s25 }
0x28db   :  { %v2509_v61 = vpop.permute.xlu1 %2508 }
0x28dc   :  { %v2511_v41 = vadd.f32 %v2509_v61, %v2501_v58 }
0x28de   :  { %3636 = vtanh.f32 %v2511_v41 }
0x28e8   :  { %v3637_v63 = vpop.eup %3636 }
0x28e9   :  { %2514 = vrot.lane.b32.xlu0 %v3637_v63, %s3678_s2 }
0x295b   :  { %v2515_v52 = vpop.permute.xlu0 %2514 }
0x295c   :  { %v2517_v0 = vmul.f32 %v3635_v48, %v2515_v52 }
0x295e   :  { %v2528_v60 = vpack.c.bf16 %v2517_v0, %v2517_v0 }
0x2960   :  { %2530 = vrot.lane.b32.xlu0 %v2528_v60, %s3679_s25  ;;  %v2576_v1 = vrot.slane %v2528_v60, 1 }
0x2962   :  { %2577 = vrot.lane.b32.xlu1 %v2576_v1, %s3679_s25 }
0x29d2   :  { %v2531_v3 = vpop.permute.xlu0 %2530 }
0x29d3   :  { %3453 = vmatmul.mubr.msk.bf16.vlgmr.msra.gmra.mrb[64].mxu0 %vm170_vm1, %v2531_v3 }
0x29d4   :  { %v2578_v4 = vpop.permute.xlu1 %2577  ;;  %3468 = vmatprep.mubr.msk.f32.mxu0 %vm3677_vm0, %v3676_v22 }
0x29d5   :  { %3461 = vmatmul.mubr.msk.bf16.vlgmr.msra.gmra.mrb[64].mxu1 %vm170_vm1, %v2578_v4 }
0x29d6   :  { %3475 = vmatprep.mubr.msk.f32.mxu1 %vm3677_vm0, %v3676_v22 }
0x2aa6   :  { %v2569_v7 = vpop.f32.mrb[64].mxu0 }
0x2aa7   :  { %v3454_v8 = vpop.f32.mrb[65].mxu0  ;;  %v2575_v31 = vadd.f32 %v2569_v7, %v2526_v30 }
0x2aa8   :  { %v2572_v10 = vpop.f32.mrb[66].mxu0  ;;  %v2616_v11 = vpop.f32.mrb[64].mxu1 }
0x2aa9   :  { %v2625_v15 = vadd.f32 %v2623_v9, %v2616_v11  ;;  %v3455_v16 = vpop.f32.mrb[67].mxu0  ;;  %v3462_v17 = vpop.f32.mrb[65].mxu1 }
0x2aaa   :  { %v2619_v18 = vpop.f32.mrb[66].mxu1 }
0x2aab   :  { %v2627_v26 = vcombine.low %v2625_v15, %v2625_v15  ;;  %v3463_v29 = vpop.f32.mrb[67].mxu1 }
0x2aad   :  { %v2634_v32 = vrot.slane %v2627_v26, %v3775_v25 }
0x2aaf   :  { %v2636_v33 = vsel %vm475_vm2, %v2575_v31, %v2634_v32 }
0x2ab0   :  { %3638 = vtanh.f32 %v2636_v33  ;;  %v3099_v19 = vmul.f32 -1.442695, %v2636_v33 }
0x2ab2   :  { %3640 = vpow2.f32 %v3099_v19 }
0x2aba   :  { %v3639_v22 = vpop.eup %3638 }
0x2abb   :  { %2646 = vrot.lane.b32.xlu1 %v3639_v22, %s3678_s2 }
0x2abc   :  { %v3641_v34 = vpop.eup %3640 }
0x2abd   :  { %v2640_v35 = vadd.f32 1.0, %v3641_v34 }
0x2abf   :  { %3642 = vrcp.f32 %v2640_v35 }
0x2ac9   :  { %v3643_v36 = vpop.eup %3642 }
0x2aca   :  { %v2644_v25 = vmul.f32 %v3643_v36, %v2511_v41 }
0x2b2d   :  { %v2647_v37 = vpop.permute.xlu1 %2646 }
0x2b2e   :  { %v2649_v39 = vmul.f32 %v3643_v36, %v2647_v37 }
0x2b30   :  { %2651 = vrot.lane.b32.xlu0 %v2649_v39, %s3679_s25  ;;  %v3680_v39 = vmov 0.0|0.0  }
0x2b31   :  { %3478 = vmatprep.subr.bf16.mxu0 %v3680_v39  ;;  %3482 = vmatprep.subr.bf16.mxu1 %v3680_v39 }
0x2b34   :  { %1661 = vrot.lane.b32.xlu0 %v4092_v59, %s3679_s25 }
0x2b38   :  { %2519 = vrot.lane.b32.xlu0 %v2517_v0, %s3679_s25 }
0x2b3c   :  { %1518 = vrot.lane.b32.xlu0 %v4047_v13, %s3679_s25 }
0x2b40   :  { %1083 = vrot.lane.b32.xlu0 %v3972_v28, %s3679_s25 }
0x2b44   :  { %2090 = vrot.lane.b32.xlu0 %v4167_v62, %s3679_s25 }
0x2b48   :  { %1947 = vrot.lane.b32.xlu0 %v4142_v12, %s3679_s25 }
0x2ba2   :  { %v2652_v40 = vpop.permute.xlu0 %2651 }
0x2ba3   :  { %v2654_v44 = vadd.f32 %v2652_v40, %v2644_v25 }
0x2ba5   :  { %3644 = vtanh.f32 %v2654_v44 }
0x2ba6   :  { %v1662_v59 = vpop.permute.xlu0 %1661 }
0x2ba7   :  { %1665 = vst.msk [vmem:[#allocation3 + $0x10] sm:$0x3] %vm505_vm3, %v1662_v59 }
0x2ba8   :  { %1667 = vst.msk [vmem:[#allocation4 + $0xc] sm:$0xc] %vm508_vm4, %v1662_v59 }
0x2baa   :  { %v2520_v13 = vpop.permute.xlu0 %2519 }
0x2bab   :  { %2523 = vst.msk [vmem:[#allocation3 + $0x1c] sm:$0x3] %vm505_vm3, %v2520_v13 }
0x2bac   :  { %2525 = vst.msk [vmem:[#allocation4] sm:$0xc] %vm508_vm4, %v2520_v13 }
0x2bae   :  { %v1519_v28 = vpop.permute.xlu0 %1518 }
0x2baf   :  { %v3645_v62 = vpop.eup %3644  ;;  %1522 = vst.msk [vmem:[#allocation3 + $0xe] sm:$0x3] %vm505_vm3, %v1519_v28  ;;  %v4311_v49 = vld [vmem:[#allocation4 + $0xe] sm:$0x3] }
0x2bb0   :  { %1524 = vst.msk [vmem:[#allocation4 + $0xe] sm:$0xc] %vm508_vm4, %v1519_v28  ;;  %2657 = vrot.lane.b32.xlu1 %v3645_v62, %s3678_s2  ;;  %v2783_v55 = vrot.slane %v4311_v49, 1 }
0x2bb2   :  { %v1084_v12 = vpop.permute.xlu0 %1083 }
0x2bb3   :  { %1087 = vst.msk [vmem:[#allocation3 + $0x8] sm:$0x3] %vm505_vm3, %v1084_v12  ;;  %v2685_v24 = vld [vmem:[#allocation4 + $0x2] sm:$0x3] }
0x2bb4   :  { %1089 = vst.msk [vmem:[#allocation4 + $0x14] sm:$0xc] %vm508_vm4, %v1084_v12  ;;  %1373 = vrot.lane.b32.xlu1 %v4022_v43, %s3679_s25  ;;  %v2771_v63 = vrot.slane %v2685_v24, 7 }
0x2bb6   :  { %v2091_v46 = vpop.permute.xlu0 %2090 }
0x2bb7   :  { %2094 = vst.msk [vmem:[#allocation3 + $0x16] sm:$0x3] %vm505_vm3, %v2091_v46  ;;  %v2692_v51 = vld [vmem:[#allocation4 + $0x10] sm:$0x3] }
0x2bb8   :  { %2096 = vst.msk [vmem:[#allocation4 + $0x6] sm:$0xc] %vm508_vm4, %v2091_v46  ;;  %1228 = vrot.lane.b32.xlu1 %v3997_v2, %s3679_s25  ;;  %v2916_v1 = vsel %vm2719_vm5, %v2692_v51, %v2783_v55 }
0x2bba   :  { %v1948_v20 = vpop.permute.xlu0 %1947 }
0x2bbb   :  { %1951 = vst.msk [vmem:[#allocation3 + $0x14] sm:$0x3] %vm505_vm3, %v1948_v20  ;;  %v4315_v53 = vld [vmem:[#allocation4 + $0x16] sm:$0x3] }
0x2bbc   :  { %1953 = vst.msk [vmem:[#allocation4 + $0x8] sm:$0xc] %vm508_vm4, %v1948_v20  ;;  %2376 = vrot.lane.b32.xlu1 %v4217_v27, %s3679_s25  ;;  %v2789_v60 = vrot.slane %v4315_v53, 5 }
0x2bbf   :  { %v2688_v57 = vld [vmem:[#allocation4 + $0x8] sm:$0x3] }
0x2bc0   :  { %2233 = vrot.lane.b32.xlu1 %v4192_v45, %s3679_s25  ;;  %v2777_v4 = vrot.slane %v2688_v57, 4 }
0x2bc2   :  { %v2678_v53 = vld [vmem:[#allocation3 + $0x14] sm:$0x3] }
0x2bc3   :  { %v2689_v58 = vld [vmem:[#allocation4 + $0xa] sm:$0x3] }
0x2bc4   :  { %938 = vrot.lane.b32.xlu1 %v3947_v54, %s3679_s25  ;;  %v2779_v6 = vrot.slane %v2689_v58, 3 }
0x2bc8   :  { %793 = vrot.lane.b32.xlu1 %v3922_v14, %s3679_s25 }
0x2bcc   :  { %648 = vrot.lane.b32.xlu1 %v3897_v42, %s3679_s25 }
0x2bd0   :  { %502 = vrot.lane.b32.xlu1 %v3872_v5, %s3679_s25 }
0x2c22   :  { %v2658_v2 = vpop.permute.xlu1 %2657 }
0x2c23   :  { %v2660_v43 = vmul.f32 %v3643_v36, %v2658_v2 }
0x2c25   :  { %2662 = vrot.lane.b32.xlu0 %v2660_v43, %s3679_s25 }
0x2c26   :  { %v1374_v27 = vpop.permute.xlu1 %1373 }
0x2c27   :  { %1377 = vst.msk [vmem:[#allocation3 + $0xc] sm:$0x3] %vm505_vm3, %v1374_v27 }
0x2c28   :  { %1379 = vst.msk [vmem:[#allocation4 + $0x10] sm:$0xc] %vm508_vm4, %v1374_v27 }
0x2c29   :  { %1804 = vrot.lane.b32.xlu0 %v4117_v38, %s3679_s25 }
0x2c2a   :  { %v1229_v54 = vpop.permute.xlu1 %1228 }
0x2c2b   :  { %1232 = vst.msk [vmem:[#allocation3 + $0xa] sm:$0x3] %vm505_vm3, %v1229_v54 }
0x2c2c   :  { %1234 = vst.msk [vmem:[#allocation4 + $0x12] sm:$0xc] %vm508_vm4, %v1229_v54 }
0x2c2e   :  { %v2377_v42 = vpop.permute.xlu1 %2376 }
0x2c2f   :  { %2380 = vst.msk [vmem:[#allocation3 + $0x1a] sm:$0x3] %vm505_vm3, %v2377_v42  ;;  %v2693_v50 = vld [vmem:[#allocation4 + $0x12] sm:$0x3] }
0x2c30   :  { %2382 = vst.msk [vmem:[#allocation4 + $0x2] sm:$0xc] %vm508_vm4, %v2377_v42  ;;  %v2785_v48 = vrot.slane %v2693_v50, 7 }
0x2c32   :  { %v2234_v5 = vpop.permute.xlu1 %2233  ;;  %v2917_v7 = vsel %vm2722_vm6, %v2785_v48, %v2916_v1  ;;  %v2786_v31 = vsel %vm2719_vm5, %v2785_v48, %v2692_v51  ;;  %v2676_v48 = vld [vmem:[#allocation3 + $0x10] sm:$0x3] }
0x2c33   :  { %2237 = vst.msk [vmem:[#allocation3 + $0x18] sm:$0x3] %vm505_vm3, %v2234_v5  ;;  %v2694_v21 = vld [vmem:[#allocation4 + $0x14] sm:$0x3] }
0x2c34   :  { %2239 = vst.msk [vmem:[#allocation4 + $0x4] sm:$0xc] %vm508_vm4, %v2234_v5  ;;  %v2787_v61 = vrot.slane %v2694_v21, 6 }
0x2c36   :  { %v939_v14 = vpop.permute.xlu1 %938  ;;  %v2918_v11 = vsel %vm2725_vm7, %v2787_v61, %v2917_v7  ;;  %v2788_v28 = vsel %vm2722_vm6, %v2787_v61, %v2786_v31  ;;  %v2679_v61 = vld [vmem:[#allocation3 + $0x16] sm:$0x3] }
0x2c37   :  { %942 = vst.msk [vmem:[#allocation3 + $0x6] sm:$0x3] %vm505_vm3, %v939_v14  ;;  %v2686_v41 = vld [vmem:[#allocation4 + $0x4] sm:$0x3]  ;;  %v2919_v35 = vsel %vm2728_vm8, %v2789_v60, %v2918_v11  ;;  %v2790_v54 = vsel %vm2725_vm7, %v2789_v60, %v2788_v28 }
0x2c38   :  { %944 = vst.msk [vmem:[#allocation4 + $0x16] sm:$0xc] %vm508_vm4, %v939_v14  ;;  %v2773_v10 = vrot.slane %v2686_v41, 6 }
0x2c3a   :  { %v794_v38 = vpop.permute.xlu1 %793 }
0x2c3b   :  { %797 = vst.msk [vmem:[#allocation3 + $0x4] sm:$0x3] %vm505_vm3, %v794_v38  ;;  %v2687_v52 = vld [vmem:[#allocation4 + $0x6] sm:$0x3] }
0x2c3c   :  { %799 = vst.msk [vmem:[#allocation4 + $0x18] sm:$0xc] %vm508_vm4, %v794_v38  ;;  %v2775_v15 = vrot.slane %v2687_v52, 5 }
0x2c3e   :  { %v649_v45 = vpop.permute.xlu1 %648  ;;  %v2671_v58 = vld [vmem:[#allocation3 + $0x6] sm:$0x3] }
0x2c3f   :  { %652 = vst.msk [vmem:[#allocation3 + $0x2] sm:$0x3] %vm505_vm3, %v649_v45  ;;  %v2696_v0 = vld [vmem:[#allocation4 + $0x18] sm:$0x3]  ;;  %v2724_v7 = vrot.slane %v2671_v58, 5  ;;  %v2700_v58 = vld [vmem:[%s4419_s5] sm:$0xff] }
0x2c40   :  { %654 = vst.msk [vmem:[#allocation4 + $0x1a] sm:$0xc] %vm508_vm4, %v649_v45  ;;  %v2791_v16 = vrot.slane %v2696_v0, 4  ;;  %v2701_v45 = vld [vmem:[%s4420_s6] sm:$0xff] }
0x2c42   :  { %v503_v47 = vpop.permute.xlu1 %502  ;;  %v2920_v44 = vsel %vm2731_vm9, %v2791_v16, %v2919_v35  ;;  %v2792_v42 = vsel %vm2728_vm8, %v2791_v16, %v2790_v54  ;;  %v2670_v51 = vld [vmem:[#allocation3 + $0x4] sm:$0x3]  ;;  %v2673_v16 = vld [vmem:[#allocation3 + $0xa] sm:$0x3] }
0x2c43   :  { %506 = vst.msk [vmem:[#allocation3] sm:$0x3] %vm505_vm3, %v503_v47  ;;  %v2697_v3 = vld [vmem:[#allocation4 + $0x1a] sm:$0x3]  ;;  %v2721_v41 = vrot.slane %v2670_v51, 6 }
0x2c44   :  { %509 = vst.msk [vmem:[#allocation4 + $0x1c] sm:$0xc] %vm508_vm4, %v503_v47  ;;  %v2793_v26 = vrot.slane %v2697_v3, 3 }
0x2c46   :  { %v2921_v13 = vsel %vm2734_vm10, %v2793_v26, %v2920_v44  ;;  %v2794_v5 = vsel %vm2731_vm9, %v2793_v26, %v2792_v42  ;;  %v2669_v49 = vld [vmem:[#allocation3 + $0x2] sm:$0x3] }
0x2c47   :  { %v2698_v9 = vld [vmem:[#allocation4 + $0x1c] sm:$0x3] }
0x2c48   :  { %v2795_v32 = vrot.slane %v2698_v9, 2 }
0x2c4a   :  { %v2922_v12 = vsel %vm2737_vm11, %v2795_v32, %v2921_v13  ;;  %v2796_v14 = vsel %vm2734_vm10, %v2795_v32, %v2794_v5  ;;  %v2668_v24 = vld [vmem:[#allocation3] sm:$0x3] }
0x2c4b   :  { %v2699_v36 = vld [vmem:[#allocation4 + $0x1e] sm:$0x3] }
0x2c4c   :  { %v2797_v20 = vrot.slane %v2699_v36, 1 }
0x2c4e   :  { %v2798_v38 = vsel %vm2737_vm11, %v2797_v20, %v2796_v14 }
0x2c97   :  { %v2663_v23 = vpop.permute.xlu0 %2662 }
0x2c98   :  { %2666 = vst.msk [vmem:[#allocation3 + $0x1e] sm:$0x3] %vm505_vm3, %v2663_v23 }
0x2c99   :  { %2667 = vst.msk [vmem:[#allocation4 - $0x2] sm:$0xc] %vm508_vm4, %v2663_v23  ;;  %v4354_v23 = vld [vmem:[#allocation3 + $0xe] sm:$0x3] }
0x2c9a   :  { %v2736_v21 = vrot.slane %v4354_v23, 1 }
0x2c9b   :  { %v1805_v56 = vpop.permute.xlu0 %1804 }
0x2c9c   :  { %1808 = vst.msk [vmem:[#allocation3 + $0x12] sm:$0x3] %vm505_vm3, %v1805_v56  ;;  %v2900_v52 = vsel %vm2719_vm5, %v2676_v48, %v2736_v21 }
0x2c9d   :  { %1810 = vst.msk [vmem:[#allocation4 + $0xa] sm:$0xc] %vm508_vm4, %v1805_v56 }
0x2ca0   :  { %v2684_v8 = vld [vmem:[#allocation4] sm:$0x3] }
0x2ca1   :  { %v2910_v17 = vsel %vm2722_vm6, %v2771_v63, %v2684_v8  ;;  %v2772_v18 = vsel %vm2719_vm5, %v2771_v63, %v2684_v8  ;;  %v2741_v63 = vrot.slane %v2678_v53, 6  ;;  %v2743_v8 = vrot.slane %v2679_v61, 5 }
0x2ca2   :  { %v2911_v29 = vsel %vm2725_vm7, %v2773_v10, %v2910_v17  ;;  %v2774_v30 = vsel %vm2722_vm6, %v2773_v10, %v2772_v18  ;;  %v2681_v17 = vld [vmem:[#allocation3 + $0x1a] sm:$0x3] }
0x2ca3   :  { %v2912_v33 = vsel %vm2728_vm8, %v2775_v15, %v2911_v29  ;;  %v2776_v22 = vsel %vm2725_vm7, %v2775_v15, %v2774_v30  ;;  %v2677_v47 = vld [vmem:[#allocation3 + $0x12] sm:$0x3] }
0x2ca4   :  { %v2690_v19 = vld [vmem:[#allocation4 + $0xc] sm:$0x3]  ;;  %v2913_v34 = vsel %vm2731_vm9, %v2777_v4, %v2912_v33  ;;  %v2778_v37 = vsel %vm2728_vm8, %v2777_v4, %v2776_v22  ;;  %v2739_v50 = vrot.slane %v2677_v47, 7  ;;  %v2672_v4 = vld [vmem:[#allocation3 + $0x8] sm:$0x3] }
0x2ca5   :  { %v2781_v25 = vrot.slane %v2690_v19, 2  ;;  %v2914_v40 = vsel %vm2734_vm10, %v2779_v6, %v2913_v34  ;;  %v2780_v59 = vsel %vm2731_vm9, %v2779_v6, %v2778_v37  ;;  %v2680_v6 = vld [vmem:[#allocation3 + $0x18] sm:$0x3]  ;;  %v2727_v18 = vrot.slane %v2672_v4, 4  ;;  %v2674_v33 = vld [vmem:[#allocation3 + $0xc] sm:$0x3] }
0x2ca6   :  { %v2740_v56 = vsel %vm2719_vm5, %v2739_v50, %v2676_v48  ;;  %v2901_v60 = vsel %vm2722_vm6, %v2739_v50, %v2900_v52  ;;  %v2745_v26 = vrot.slane %v2680_v6, 4  ;;  %v2682_v22 = vld [vmem:[#allocation3 + $0x1c] sm:$0x3]  ;;  %v2730_v19 = vrot.slane %v2673_v16, 3 }
0x2ca7   :  { %v2915_v62 = vsel %vm2737_vm11, %v2781_v25, %v2914_v40  ;;  %v2782_v46 = vsel %vm2734_vm10, %v2781_v25, %v2780_v59  ;;  %v2742_v1 = vsel %vm2722_vm6, %v2741_v63, %v2740_v56  ;;  %v2902_v10 = vsel %vm2725_vm7, %v2741_v63, %v2901_v60  ;;  %v2683_v59 = vld [vmem:[#allocation3 + $0x1e] sm:$0x3] }
0x2ca8   :  { %v3496_v2 = vpack.i.bf16 %v2922_v12, %v2915_v62  ;;  %v2784_v43 = vsel %vm2737_vm11, %v2783_v55, %v2782_v46  ;;  %v2718_v55 = vrot.slane %v2669_v49, 7  ;;  %v2744_v11 = vsel %vm2725_vm7, %v2743_v8, %v2742_v1 }
0x2ca9   :  { %v3501_v27 = vpack.i.bf16 %v2784_v43, %v2797_v20  ;;  %v2903_v30 = vsel %vm2728_vm8, %v2743_v8, %v2902_v10  ;;  %v2746_v31 = vsel %vm2728_vm8, %v2745_v26, %v2744_v11  ;;  %v2747_v34 = vrot.slane %v2681_v17, 3 }
0x2caa   :  { %3497 = vrot.lane.b32.xlu0 %v3496_v2, %s3679_s25  ;;  %v2720_v57 = vsel %vm2719_vm5, %v2718_v55, %v2668_v24  ;;  %v2894_v0 = vsel %vm2722_vm6, %v2718_v55, %v2668_v24  ;;  %v2904_v36 = vsel %vm2731_vm9, %v2745_v26, %v2903_v30  ;;  %v2733_v25 = vrot.slane %v2674_v33, 2 }
0x2cab   :  { %3502 = vrot.lane.b32.xlu1 %v3501_v27, %s3679_s25  ;;  %v2723_v3 = vsel %vm2722_vm6, %v2721_v41, %v2720_v57  ;;  %v2895_v9 = vsel %vm2725_vm7, %v2721_v41, %v2894_v0  ;;  %v2748_v37 = vsel %vm2731_vm9, %v2747_v34, %v2746_v31  ;;  %v2749_v40 = vrot.slane %v2682_v22, 2 }
0x2cac   :  { %v2726_v15 = vsel %vm2725_vm7, %v2724_v7, %v2723_v3  ;;  %v2896_v29 = vsel %vm2728_vm8, %v2724_v7, %v2895_v9  ;;  %v2905_v13 = vsel %vm2734_vm10, %v2747_v34, %v2904_v36  ;;  %v2751_v43 = vrot.slane %v2683_v59, 1 }
0x2cad   :  { %v2729_v32 = vsel %vm2728_vm8, %v2727_v18, %v2726_v15  ;;  %v2897_v35 = vsel %vm2731_vm9, %v2727_v18, %v2896_v29  ;;  %v2750_v62 = vsel %vm2734_vm10, %v2749_v40, %v2748_v37  ;;  %v2906_v54 = vsel %vm2737_vm11, %v2749_v40, %v2905_v13 }
0x2cae   :  { %2801 = vrot.lane.b32.xlu0 %v2798_v38, %s3679_s25  ;;  %v2732_v39 = vsel %vm2731_vm9, %v2730_v19, %v2729_v32  ;;  %v2898_v44 = vsel %vm2734_vm10, %v2730_v19, %v2897_v35 }
0x2caf   :  { %2809 = vperm.xlu1 %3506, %v2701_v45   ;;  %v2735_v12 = vsel %vm2734_vm10, %v2733_v25, %v2732_v39  ;;  %v2899_v2 = vsel %vm2737_vm11, %v2733_v25, %v2898_v44  ;;  %v2752_v45 = vsel %vm2737_vm11, %v2751_v43, %v2750_v62 }
0x2cb0   :  { %v2738_v47 = vsel %vm2737_vm11, %v2736_v21, %v2735_v12 }
0x2d1c   :  { %v3498_v28 = vpop.permute.xlu0 %3497 }
0x2d1d   :  { %v3500_v46 = vunpack.i.h.bf16 %v3498_v28  ;;  %v3499_v20 = vunpack.i.l.bf16 %v3498_v28  ;;  %v3503_v27 = vpop.permute.xlu1 %3502 }
0x2d1e   :  { %v3505_v42 = vunpack.i.h.bf16 %v3503_v27  ;;  %v3504_v5 = vunpack.i.l.bf16 %v3503_v27 }
0x2d1f   :  { %v2933_v14 = vsel %vm170_vm1, %v2906_v54, %v3500_v46  ;;  %v2932_v38 = vsel %vm170_vm1, %v2899_v2, %v3499_v20 }
0x2d20   :  { %v2940_v49 = vrot.slane %v2933_v14, 1  ;;  %v2939_v50 = vrot.slane %v2932_v38, 1  ;;  %v2934_v24 = vsel %vm170_vm1, %v2751_v43, %v3504_v5  ;;  %v2802_v51 = vpop.permute.xlu0 %2801  ;;  %v2805_v53 = vsel %vm170_vm1, %v2738_v47, %v3505_v42 }
0x2d21   :  { %v2942_v55 = vrot.slane %v2934_v24, 1  ;;  %v2806_v48 = vsel %vm170_vm1, %v2752_v45, %v2802_v51 }
0x2d22   :  { %v2941_v56 = vsel %vm2938_vm12, %v2939_v50, %v2940_v49  ;;  %v3479_v57 = vpack.c.bf16 %v2806_v48, %v2805_v53 }
0x2d23   :  { %v2943_v23 = vsel %vm2938_vm12, %v2940_v49, %v2942_v55 }
0x2d24   :  { %3481 = vmatpush3.bf16.xpose.msk.msra.mxu0 %vm3480_vm14, %v3479_v57  ;;  %v3483_v21 = vpack.c.bf16 %v2943_v23, %v2941_v56 }
0x2d26   :  { %3485 = vmatpush3.bf16.xpose.msk.msra.mxu1 %vm3480_vm14, %v3483_v21 }
0x2d2b   :  { %3469 = vmatmul.mubr.msk.f32.vlgmr.msra.gmra.mrb[68].mxu0 %vm2812_vm13, %v2700_v58 }
0x2d2d   :  { %3476 = vmatmul.mubr.msk.f32.vlgmr.msra.gmra.mrb[68].mxu1 %vm2812_vm13, %v2700_v58 }
0x2d2e   :  { %v2810_v61 = vpop.permute.xlu1 %2809 }
0x2dfe   :  { %v2888_v41 = vpop.f32.mrb[68].mxu0 }
0x2dff   :  { %v2889_v63 = vadd.f32 %v2888_v41, %v2810_v61  ;;  %v3470_v52 = vpop.f32.mrb[69].mxu0 }
0x2e00   :  { %v3014_v0 = vpop.f32.mrb[68].mxu1 }
0x2e01   :  { %2893 = vst.msk [vmem:[#allocation5] sm:$0xff] %vm2892_vm15, %v2889_v63  ;;  %v3015_v60 = vadd.f32 %v3014_v0, %v2810_v61  ;;  %v3477_v1 = vpop.f32.mrb[69].mxu1 }
0x2e03   :  { %3019 = vst.msk [vmem:[#allocation5 + $0x8] sm:$0xff] %vm2892_vm15, %v3015_v60 }
0x2e04   :  { %3661 = shalt.err (!%p3658_p4)
}
0x2e05   :  { %s3662_s16 = scalar_lea.hbm %s4421_s7, 256 }
0x2e06   :  { %p3663_p5 = scmp.ne.s32.totalorder %s4421_s7, %s3662_s16  ;;  %p3666_p6 = scmp.lt.u32.totalorder %s3662_s16, %s4421_s7 }
0x2e08   :  { %p3668_p7 = pnand %p3666_p6, %p3663_p5 }
0x2e0a   :  { %3671 = shalt.err (!%p3668_p7)
}
0x2e0b   :  { %s3682_s0 = smov 128   ;;  %s3683_s20 = smov 8  }
0x2e0c   :  { %3031 = dma.vmem_to_hbm [thread:$0]  %s3026_s13, 256, %s4421_s7, [#allocation6], %s3682_s0, %s3682_s0, %s3683_s20  }
0x2e0d   :  { %3672 = dma.done.wait [#allocation6], 256  }
0x2e0e   :  { %3673 = vsyncadd [#allocation6], 4294967040 }
0x2e0f   :  { %3035 = vsyncpa [#allocation6], 1 }

// kernel: resnet_bilstm_forward.2
= control target key start
LH: loop header
LB: loop body
LE: loop exit
PB: predicated region body
PF: predicated region fallthrough
CT: control target
= control target key end

     0   :  { %s8066_s24 = smov 0   ;;  %s12573_s0 = inlined_call_operand.vmem [shape: f32[2,16,16,4], index: 0, kind: input, shape index: {}]   ;;  %s12574_s1 = inlined_call_operand.vmem [shape: bf16[36,32], index: 1, kind: input, shape index: {}]   ;;  %s12575_s2 = inlined_call_operand.vmem [shape: f32[1,32], index: 2, kind: input, shape index: {}]   ;;  %s12576_s3 = inlined_call_operand.vmem [shape: bf16[288,32], index: 3, kind: input, shape index: {}]   ;;  %s12577_s4 = inlined_call_operand.vmem [shape: f32[1,32], index: 4, kind: input, shape index: {}]   ;;  %s12578_s5 = inlined_call_operand.vmem [shape: bf16[288,32], index: 5, kind: input, shape index: {}]   ;;  %s12579_s6 = inlined_call_operand.vmem [shape: f32[1,32], index: 6, kind: input, shape index: {}]   ;;  %s12580_s7 = inlined_call_operand.vmem [shape: f32[2,16,32], index: 7, kind: output, shape index: {}]  }
   0x1 LB: > { %s5783_s25 = sadd.s32 4294967295, %s8013_s24   ;;  %p5787_p0 = scmp.ge.s32.totalorder %s8013_s24, 1  ;;  %s8013_s24 = sphi %s8066_s24, %s17_s24  }
   0x2   : > { %p237_p1 = scmp.lt.s32.totalorder %s8013_s24, 3 }
   0x4   : > { %p238_p2 = pnand %p5787_p0, %p237_p1 }
   0x6   : > { %241 = sbr.rel (%p238_p2) target bundleno = 1546 (0x60a), region = 48 }
   0xd   : > { %vm312_vm0 = vcmask 31744   ;;  %vm315_vm1 = vcmask 25600   ;;  %p8076_p3 = scmp.lt.s32.totalorder %s5783_s25, 1  ;;  %v12581_v0 = vmov 0.0   ;;  %vm503_vm2 = vcmask 1046528   ;;  %s8016_s8 = smov 4  }
   0xe   : > { %313 = vst.msk [vmem:[#allocation2] sm:$0xff] %vm312_vm0, %v12581_v0  ;;  %314 = vst.msk [vmem:[#allocation2 + $0x8] sm:$0xff] %vm312_vm0, %v12581_v0  ;;  %vm584_vm3 = vcmask 1045504   ;;  %s8017_s9 = smov 8   ;;  %s8018_s10 = smov 12   ;;  %vm1689_vm4 = vcmask 261120  }
   0xf   : > { %316 = vst.msk [vmem:[#allocation2 + $0x10] sm:$0x3] %vm315_vm1, %v12581_v0  ;;  %319 = vst.msk [vmem:[#allocation2 + $0x28] sm:$0x3] %vm315_vm1, %v12581_v0  ;;  %s13151_s25 = smov (!%p8076_p3, %s5783_s25), 1  ;;  %s8019_s11 = smov 16  }
  0x10   : > { %317 = vst.msk [vmem:[#allocation2 + $0x18] sm:$0xff] %vm312_vm0, %v12581_v0  ;;  %318 = vst.msk [vmem:[#allocation2 + $0x20] sm:$0xff] %vm312_vm0, %v12581_v0  ;;  %s5884_s27 = sshll.u32 %s13151_s25, 8  ;;  %s8020_s16 = smov 20   ;;  %vm1814_vm5 = vcmask 1041408   ;;  %vm1491_vm6 = vcmask 64512  }
  0x11   : > { %320 = vst.msk [vmem:[#allocation2 + $0x30] sm:$0xff] %vm312_vm0, %v12581_v0  ;;  %321 = vst.msk [vmem:[#allocation2 + $0x38] sm:$0xff] %vm312_vm0, %v12581_v0  ;;  %s8198_s30 = scalar_lea.vmem %s12573_s0, %s5884_s27  ;;  %s8021_s19 = smov 24   ;;  %vm1524_vm7 = vcmask 97280   ;;  %vm1557_vm8 = vcmask 130048   ;;  %vm1590_vm9 = vcmask 162816  }
  0x12   : > { %322 = vst.msk [vmem:[#allocation2 + $0x40] sm:$0x3] %vm315_vm1, %v12581_v0  ;;  %325 = vst.msk [vmem:[#allocation2 + $0x58] sm:$0x3] %vm315_vm1, %v12581_v0  ;;  %v282_v1 = vld [vmem:[%s8198_s30 + $0x10] sm:$0xff]  ;;  %v283_v2 = vld [vmem:[%s8198_s30 + $0x18] sm:$0xff] }
  0x13   : > { %323 = vst.msk [vmem:[#allocation2 + $0x48] sm:$0xff] %vm312_vm0, %v12581_v0  ;;  %324 = vst.msk [vmem:[#allocation2 + $0x50] sm:$0xff] %vm312_vm0, %v12581_v0  ;;  %v280_v3 = vld [vmem:[%s8198_s30] sm:$0xff]  ;;  %v281_v4 = vld [vmem:[%s8198_s30 + $0x8] sm:$0xff]  ;;  %s8022_s20 = smov 28   ;;  %s8023_s21 = smov 32  }
  0x14   : > { %326 = vst.msk [vmem:[#allocation2 + $0x60] sm:$0xff] %vm312_vm0, %v12581_v0  ;;  %327 = vst.msk [vmem:[#allocation2 + $0x68] sm:$0xff] %vm312_vm0, %v12581_v0  ;;  %v284_v5 = vld [vmem:[%s8198_s30 + $0x20] sm:$0xff]  ;;  %v285_v6 = vld [vmem:[%s8198_s30 + $0x28] sm:$0xff]  ;;  %vm1623_vm10 = vcmask 195584   ;;  %vm1656_vm11 = vcmask 228352  }
  0x15   : > { %328 = vst.msk [vmem:[#allocation2 + $0x70] sm:$0x3] %vm315_vm1, %v12581_v0  ;;  %331 = vst.msk [vmem:[#allocation2 + $0x88] sm:$0x3] %vm315_vm1, %v12581_v0  ;;  %v8209_v7 = vld [vmem:[#allocation2] sm:$0xff]  ;;  %v8211_v8 = vld [vmem:[#allocation2 + $0x8] sm:$0xff] }
  0x16   : > { %329 = vst.msk [vmem:[#allocation2 + $0x78] sm:$0xff] %vm312_vm0, %v12581_v0  ;;  %330 = vst.msk [vmem:[#allocation2 + $0x80] sm:$0xff] %vm312_vm0, %v12581_v0  ;;  %v8213_v9 = vld [vmem:[#allocation2 + $0x10] sm:$0x3]  ;;  %v504_v10 = vrot.slane %v8209_v7, 1  ;;  %v505_v11 = vrot.slane %v8211_v8, 1 }
  0x17   : > { %332 = vst.msk [vmem:[#allocation2 + $0x90] sm:$0xff] %vm312_vm0, %v12581_v0  ;;  %333 = vst.msk [vmem:[#allocation2 + $0x98] sm:$0xff] %vm312_vm0, %v12581_v0  ;;  %v507_v12 = vrot.slane %v8213_v9, 1  ;;  %v286_v13 = vld [vmem:[%s8198_s30 + $0x30] sm:$0xff]  ;;  %v287_v14 = vld [vmem:[%s8198_s30 + $0x38] sm:$0xff]  ;;  %vm1765_vm12 = vcmask 293888  }
  0x18   : > { %334 = vst.msk [vmem:[#allocation2 + $0xa0] sm:$0x3] %vm315_vm1, %v12581_v0  ;;  %337 = vst.msk [vmem:[#allocation2 + $0xb8] sm:$0x3] %vm315_vm1, %v12581_v0  ;;  %v288_v15 = vld [vmem:[%s8198_s30 + $0x40] sm:$0xff]  ;;  %v289_v16 = vld [vmem:[%s8198_s30 + $0x48] sm:$0xff]  ;;  %v506_v18 = vsel %vm503_vm2, %v504_v10, %v505_v11 }
  0x19   : > { %335 = vst.msk [vmem:[#allocation2 + $0xa8] sm:$0xff] %vm312_vm0, %v12581_v0  ;;  %336 = vst.msk [vmem:[#allocation2 + $0xb0] sm:$0xff] %vm312_vm0, %v12581_v0  ;;  %v290_v17 = vld [vmem:[%s8198_s30 + $0x50] sm:$0xff]  ;;  %v508_v19 = vsel %vm503_vm2, %v505_v11, %v507_v12  ;;  %v291_v20 = vld [vmem:[%s8198_s30 + $0x58] sm:$0xff]  ;;  %vm2013_vm13 = vcmask 254976   ;;  %s8024_s22 = smov 64  }
  0x1a   : > { %338 = vst.msk [vmem:[#allocation2 + $0xc0] sm:$0xff] %vm312_vm0, %v12581_v0  ;;  %339 = vst.msk [vmem:[#allocation2 + $0xc8] sm:$0xff] %vm312_vm0, %v12581_v0  ;;  %v292_v21 = vld [vmem:[%s8198_s30 + $0x60] sm:$0xff]  ;;  %v293_v22 = vld [vmem:[%s8198_s30 + $0x68] sm:$0xff]  ;;  %v6302_v23 = vpack.i.bf16 %v508_v19, %v506_v18  ;;  %vm3059_vm14 = vcmask 523264   ;;  %vm3092_vm15 = vcmask 785408  }
  0x1b   : > { %340 = vst.msk [vmem:[#allocation2 + $0xd0] sm:$0x3] %vm315_vm1, %v12581_v0  ;;  %343 = vst.msk [vmem:[#allocation2 + $0xe8] sm:$0x3] %vm315_vm1, %v12581_v0  ;;  %v294_v24 = vld [vmem:[%s8198_s30 + $0x70] sm:$0xff]  ;;  %v295_v25 = vld [vmem:[%s8198_s30 + $0x78] sm:$0xff] }
  0x1c   : > { %341 = vst.msk [vmem:[#allocation2 + $0xd8] sm:$0xff] %vm312_vm0, %v12581_v0  ;;  %342 = vst.msk [vmem:[#allocation2 + $0xe0] sm:$0xff] %vm312_vm0, %v12581_v0  ;;  %v296_v26 = vld [vmem:[%s8198_s30 + $0x80] sm:$0xff]  ;;  %v297_v27 = vld [vmem:[%s8198_s30 + $0x88] sm:$0xff]  ;;  %6303 = vrot.lane.b32.xlu0 %v6302_v23, %s8016_s8 }
  0x1d   : > { %344 = vst.msk [vmem:[#allocation2 + $0xf0] sm:$0xff] %vm312_vm0, %v12581_v0  ;;  %345 = vst.msk [vmem:[#allocation2 + $0xf8] sm:$0xff] %vm312_vm0, %v12581_v0  ;;  %v298_v28 = vld [vmem:[%s8198_s30 + $0x90] sm:$0xff]  ;;  %v299_v29 = vld [vmem:[%s8198_s30 + $0x98] sm:$0xff] }
  0x1e   : > { %346 = vst.msk [vmem:[#allocation2 + $0x100] sm:$0x3] %vm315_vm1, %v12581_v0  ;;  %349 = vst.msk [vmem:[#allocation2 + $0x118] sm:$0x3] %vm315_vm1, %v12581_v0 }
  0x1f   : > { %347 = vst.msk [vmem:[#allocation2 + $0x108] sm:$0xff] %vm312_vm0, %v12581_v0  ;;  %348 = vst.msk [vmem:[#allocation2 + $0x110] sm:$0xff] %vm312_vm0, %v12581_v0 }
  0x20   : > { %350 = vst.msk [vmem:[#allocation2 + $0x120] sm:$0xff] %vm312_vm0, %v12581_v0  ;;  %351 = vst.msk [vmem:[#allocation2 + $0x128] sm:$0xff] %vm312_vm0, %v12581_v0 }
  0x21   : > { %352 = vst.msk [vmem:[#allocation2 + $0x130] sm:$0x3] %vm315_vm1, %v12581_v0  ;;  %355 = vst.msk [vmem:[#allocation2 + $0x148] sm:$0x3] %vm315_vm1, %v12581_v0 }
  0x22   : > { %353 = vst.msk [vmem:[#allocation2 + $0x138] sm:$0xff] %vm312_vm0, %v12581_v0  ;;  %354 = vst.msk [vmem:[#allocation2 + $0x140] sm:$0xff] %vm312_vm0, %v12581_v0 }
  0x23   : > { %356 = vst.msk [vmem:[#allocation2 + $0x150] sm:$0xff] %vm312_vm0, %v12581_v0  ;;  %357 = vst.msk [vmem:[#allocation2 + $0x158] sm:$0xff] %vm312_vm0, %v12581_v0 }
  0x24   : > { %358 = vst.msk [vmem:[#allocation2 + $0x160] sm:$0x3] %vm315_vm1, %v12581_v0  ;;  %361 = vst.msk [vmem:[#allocation2 + $0x178] sm:$0x3] %vm315_vm1, %v12581_v0 }
  0x25   : > { %359 = vst.msk [vmem:[#allocation2 + $0x168] sm:$0xff] %vm312_vm0, %v12581_v0  ;;  %360 = vst.msk [vmem:[#allocation2 + $0x170] sm:$0xff] %vm312_vm0, %v12581_v0 }
  0x26   : > { %362 = vst.msk [vmem:[#allocation2 + $0x180] sm:$0xff] %vm312_vm0, %v12581_v0  ;;  %363 = vst.msk [vmem:[#allocation2 + $0x188] sm:$0xff] %vm312_vm0, %v12581_v0 }
  0x27   : > { %364 = vst.msk [vmem:[#allocation2 + $0x190] sm:$0x3] %vm315_vm1, %v12581_v0  ;;  %367 = vst.msk [vmem:[#allocation2 + $0x1a8] sm:$0x3] %vm315_vm1, %v12581_v0 }
  0x28   : > { %365 = vst.msk [vmem:[#allocation2 + $0x198] sm:$0xff] %vm312_vm0, %v12581_v0  ;;  %366 = vst.msk [vmem:[#allocation2 + $0x1a0] sm:$0xff] %vm312_vm0, %v12581_v0 }
  0x29   : > { %371 = vst.msk [vmem:[#allocation2 + $0x31] sm:$0xff] %vm312_vm0, %v282_v1  ;;  %372 = vst.msk [vmem:[#allocation2 + $0x39] sm:$0xff] %vm312_vm0, %v283_v2 }
  0x2a   : > { %369 = vst.msk [vmem:[#allocation2 + $0x19] sm:$0xff] %vm312_vm0, %v280_v3  ;;  %370 = vst.msk [vmem:[#allocation2 + $0x21] sm:$0xff] %vm312_vm0, %v281_v4 }
  0x2b   : > { %373 = vst.msk [vmem:[#allocation2 + $0x49] sm:$0xff] %vm312_vm0, %v284_v5  ;;  %374 = vst.msk [vmem:[#allocation2 + $0x51] sm:$0xff] %vm312_vm0, %v285_v6 }
  0x2c   : > { %375 = vst.msk [vmem:[#allocation2 + $0x61] sm:$0xff] %vm312_vm0, %v286_v13  ;;  %376 = vst.msk [vmem:[#allocation2 + $0x69] sm:$0xff] %vm312_vm0, %v287_v14 }
  0x2d   : > { %377 = vst.msk [vmem:[#allocation2 + $0x79] sm:$0xff] %vm312_vm0, %v288_v15  ;;  %378 = vst.msk [vmem:[#allocation2 + $0x81] sm:$0xff] %vm312_vm0, %v289_v16 }
  0x2e   : > { %379 = vst.msk [vmem:[#allocation2 + $0x91] sm:$0xff] %vm312_vm0, %v290_v17  ;;  %380 = vst.msk [vmem:[#allocation2 + $0x99] sm:$0xff] %vm312_vm0, %v291_v20 }
  0x2f   : > { %381 = vst.msk [vmem:[#allocation2 + $0xa9] sm:$0xff] %vm312_vm0, %v292_v21  ;;  %382 = vst.msk [vmem:[#allocation2 + $0xb1] sm:$0xff] %vm312_vm0, %v293_v22 }
  0x30   : > { %383 = vst.msk [vmem:[#allocation2 + $0xc1] sm:$0xff] %vm312_vm0, %v294_v24  ;;  %384 = vst.msk [vmem:[#allocation2 + $0xc9] sm:$0xff] %vm312_vm0, %v295_v25  ;;  %v8249_v30 = vld [vmem:[#allocation2 + $0x30] sm:$0xff]  ;;  %v8251_v31 = vld [vmem:[#allocation2 + $0x38] sm:$0xff] }
  0x31   : > { %385 = vst.msk [vmem:[#allocation2 + $0xd9] sm:$0xff] %vm312_vm0, %v296_v26  ;;  %v8253_v32 = vld [vmem:[#allocation2 + $0x40] sm:$0x3]  ;;  %386 = vst.msk [vmem:[#allocation2 + $0xe1] sm:$0xff] %vm312_vm0, %v297_v27  ;;  %v514_v33 = vrot.slane %v8249_v30, 1  ;;  %v515_v34 = vrot.slane %v8251_v31, 1 }
  0x32   : > { %387 = vst.msk [vmem:[#allocation2 + $0xf1] sm:$0xff] %vm312_vm0, %v298_v28  ;;  %388 = vst.msk [vmem:[#allocation2 + $0xf9] sm:$0xff] %vm312_vm0, %v299_v29  ;;  %v517_v35 = vrot.slane %v8253_v32, 1  ;;  %v8261_v36 = vld [vmem:[#allocation2 + $0x18] sm:$0xff]  ;;  %v8263_v37 = vld [vmem:[#allocation2 + $0x20] sm:$0xff] }
  0x33   : > { %v8265_v38 = vld [vmem:[#allocation2 + $0x28] sm:$0x3]  ;;  %v509_v39 = vrot.slane %v8261_v36, 1  ;;  %v510_v40 = vrot.slane %v8263_v37, 1  ;;  %v8271_v42 = vld [vmem:[#allocation2 + $0x50] sm:$0xff]  ;;  %v516_v43 = vsel %vm503_vm2, %v514_v33, %v515_v34  ;;  %v8279_v48 = vld [vmem:[#allocation2 + $0x60] sm:$0xff] }
  0x34   : > { %v8269_v41 = vld [vmem:[#allocation2 + $0x48] sm:$0xff]  ;;  %v518_v44 = vsel %vm503_vm2, %v515_v34, %v517_v35  ;;  %v512_v45 = vrot.slane %v8265_v38, 1  ;;  %v8276_v46 = vld [vmem:[#allocation2 + $0x58] sm:$0x3]  ;;  %v520_v52 = vrot.slane %v8271_v42, 1  ;;  %v8292_v56 = vld [vmem:[#allocation2 + $0x80] sm:$0xff] }
  0x35   : > { %v519_v47 = vrot.slane %v8269_v41, 1  ;;  %v8281_v49 = vld [vmem:[#allocation2 + $0x68] sm:$0xff]  ;;  %v8283_v50 = vpack.i.bf16 %v518_v44, %v516_v43  ;;  %v511_v51 = vsel %vm503_vm2, %v509_v39, %v510_v40  ;;  %v522_v53 = vrot.slane %v8276_v46, 1  ;;  %v8288_v54 = vld [vmem:[#allocation2 + $0x70] sm:$0x3]  ;;  %v8290_v55 = vld [vmem:[#allocation2 + $0x78] sm:$0xff] }
  0x36   : > { %v513_v57 = vsel %vm503_vm2, %v510_v40, %v512_v45  ;;  %v524_v58 = vrot.slane %v8279_v48, 1  ;;  %v525_v59 = vrot.slane %v8281_v49, 1  ;;  %v527_v60 = vrot.slane %v8288_v54, 1  ;;  %v8298_v61 = vld [vmem:[#allocation2 + $0x88] sm:$0x3]  ;;  %v8300_v62 = vld [vmem:[#allocation2 + $0x90] sm:$0xff] }
  0x37   : > { %12783 = vst [vmem:[#allocation4_spill] sm:$0xff] %v8283_v50  ;;  %6313 = vrot.lane.b32.xlu1 %v8283_v50, %s8016_s8  ;;  %v8304_v63 = vpack.i.bf16 %v513_v57, %v511_v51  ;;  %v521_v1 = vsel %vm503_vm2, %v519_v47, %v520_v52  ;;  %v523_v2 = vsel %vm503_vm2, %v520_v52, %v522_v53  ;;  %v529_v3 = vrot.slane %v8290_v55, 1  ;;  %v8309_v4 = vld [vmem:[#allocation2 + $0x98] sm:$0xff]  ;;  %v8311_v5 = vld [vmem:[#allocation2 + $0xa0] sm:$0x3]  ;;  %v8313_v6 = vld [vmem:[#allocation2 + $0xa8] sm:$0xff] }
  0x38   : > { %v8315_v10 = vpack.i.bf16 %v523_v2, %v521_v1  ;;  %v526_v11 = vsel %vm503_vm2, %v524_v58, %v525_v59  ;;  %v528_v12 = vsel %vm503_vm2, %v525_v59, %v527_v60  ;;  %v530_v13 = vrot.slane %v8292_v56, 1  ;;  %v8320_v14 = vld [vmem:[#allocation2 + $0xb0] sm:$0xff]  ;;  %v8322_v15 = vld [vmem:[#allocation2 + $0xb8] sm:$0x3]  ;;  %v8324_v16 = vld [vmem:[#allocation2 + $0xc0] sm:$0xff] }
  0x39   : > { %12784 = vst [vmem:[#allocation5_spill] sm:$0xff] %v8304_v63  ;;  %6308 = vrot.lane.b32.xlu0 %v8304_v63, %s8016_s8  ;;  %v8328_v17 = vpack.i.bf16 %v528_v12, %v526_v11  ;;  %v532_v18 = vrot.slane %v8298_v61, 1  ;;  %v534_v19 = vrot.slane %v8300_v62, 1  ;;  %v535_v20 = vrot.slane %v8309_v4, 1  ;;  %v8333_v21 = vld [vmem:[#allocation2 + $0xc8] sm:$0xff]  ;;  %v8341_v27 = vld [vmem:[#allocation2 + $0xd8] sm:$0xff] }
  0x3a   : > { %12785 = vst [vmem:[#allocation6_spill] sm:$0xff] %v8315_v10  ;;  %v8335_v22 = vld [vmem:[#allocation2 + $0xd0] sm:$0x3]  ;;  %v531_v23 = vsel %vm503_vm2, %v529_v3, %v530_v13  ;;  %v537_v24 = vrot.slane %v8311_v5, 1  ;;  %v539_v25 = vrot.slane %v8313_v6, 1  ;;  %v540_v26 = vrot.slane %v8320_v14, 1 }
  0x3b   : > { %12786 = vst [vmem:[#allocation7_spill] sm:$0xff] %v8328_v17  ;;  %v8343_v28 = vld [vmem:[#allocation2 + $0xe0] sm:$0xff]  ;;  %v8345_v29 = vld [vmem:[#allocation2 + $0xf0] sm:$0xff]  ;;  %6318 = vrot.lane.b32.xlu1 %v8315_v10, %s8016_s8  ;;  %v533_v33 = vsel %vm503_vm2, %v530_v13, %v532_v18  ;;  %v536_v34 = vsel %vm503_vm2, %v534_v19, %v535_v20  ;;  %v542_v35 = vrot.slane %v8322_v15, 1  ;;  %v544_v39 = vrot.slane %v8324_v16, 1  ;;  %v8355_v43 = vld [vmem:[#allocation2 + $0xf8] sm:$0xff] }
  0x3c   : > { %v8353_v40 = vld [vmem:[#allocation2 + $0xe8] sm:$0x3]  ;;  %v300_v44 = vld [vmem:[%s8198_s30 + $0xa0] sm:$0xff]  ;;  %v8358_v45 = vpack.i.bf16 %v533_v33, %v531_v23  ;;  %v538_v47 = vsel %vm503_vm2, %v535_v20, %v537_v24  ;;  %v541_v51 = vsel %vm503_vm2, %v539_v25, %v540_v26  ;;  %v545_v52 = vrot.slane %v8333_v21, 1  ;;  %v302_v58 = vld [vmem:[%s8198_s30 + $0xb0] sm:$0xff] }
  0x3d   : > { %v8363_v53 = vld [vmem:[#allocation2 + $0x100] sm:$0x3]  ;;  %v301_v57 = vld [vmem:[%s8198_s30 + $0xa8] sm:$0xff]  ;;  %389 = vst.msk [vmem:[#allocation2 + $0x109] sm:$0xff] %vm312_vm0, %v300_v44  ;;  %6323 = vrot.lane.b32.xlu0 %v8328_v17, %s8016_s8  ;;  %v8370_v59 = vpack.i.bf16 %v538_v47, %v536_v34  ;;  %v543_v60 = vsel %vm503_vm2, %v540_v26, %v542_v35  ;;  %v547_v1 = vrot.slane %v8335_v22, 1  ;;  %v549_v2 = vrot.slane %v8341_v27, 1 }
  0x3e   : > { %12787 = vst [vmem:[#allocation8_spill] sm:$0xff] %v8358_v45  ;;  %390 = vst.msk [vmem:[#allocation2 + $0x111] sm:$0xff] %vm312_vm0, %v301_v57  ;;  %v303_v3 = vld [vmem:[%s8198_s30 + $0xb8] sm:$0xff]  ;;  %v304_v11 = vld [vmem:[%s8198_s30 + $0xc0] sm:$0xff]  ;;  %v8380_v13 = vpack.i.bf16 %v543_v60, %v541_v51  ;;  %v546_v18 = vsel %vm503_vm2, %v544_v39, %v545_v52  ;;  %v550_v19 = vrot.slane %v8343_v28, 1  ;;  %v552_v20 = vrot.slane %v8353_v40, 1 }
  0x3f   : > { %12788 = vst [vmem:[#allocation9_spill] sm:$0xff] %v8370_v59  ;;  %391 = vst.msk [vmem:[#allocation2 + $0x121] sm:$0xff] %vm312_vm0, %v302_v58  ;;  %v305_v12 = vld [vmem:[%s8198_s30 + $0xc8] sm:$0xff]  ;;  %v306_v23 = vld [vmem:[%s8198_s30 + $0xd0] sm:$0xff]  ;;  %6328 = vrot.lane.b32.xlu1 %v8358_v45, %s8016_s8  ;;  %v548_v26 = vsel %vm503_vm2, %v545_v52, %v547_v1  ;;  %v554_v33 = vrot.slane %v8345_v29, 1  ;;  %v555_v34 = vrot.slane %v8355_v43, 1 }
  0x40   : > { %12789 = vst [vmem:[#allocation10_spill] sm:$0xff] %v8380_v13  ;;  %392 = vst.msk [vmem:[#allocation2 + $0x129] sm:$0xff] %vm312_vm0, %v303_v3  ;;  %v307_v24 = vld [vmem:[%s8198_s30 + $0xd8] sm:$0xff]  ;;  %v308_v25 = vld [vmem:[%s8198_s30 + $0xe0] sm:$0xff]  ;;  %v557_v35 = vrot.slane %v8363_v53, 1  ;;  %v551_v51 = vsel %vm503_vm2, %v549_v2, %v550_v19  ;;  %v553_v57 = vsel %vm503_vm2, %v550_v19, %v552_v20  ;;  %v588_v52 = vrot.slane %v8213_v9, 2 }
  0x41   : > { %393 = vst.msk [vmem:[#allocation2 + $0x139] sm:$0xff] %vm312_vm0, %v304_v11  ;;  %394 = vst.msk [vmem:[#allocation2 + $0x141] sm:$0xff] %vm312_vm0, %v305_v12  ;;  %v309_v39 = vld [vmem:[%s8198_s30 + $0xe8] sm:$0xff]  ;;  %v310_v44 = vld [vmem:[%s8198_s30 + $0xf0] sm:$0xff]  ;;  %6333 = vrot.lane.b32.xlu0 %v8370_v59, %s8016_s8  ;;  %v8411_v58 = vpack.i.bf16 %v548_v26, %v546_v18  ;;  %v556_v60 = vsel %vm503_vm2, %v554_v33, %v555_v34  ;;  %v585_v2 = vrot.slane %v8209_v7, 2  ;;  %v586_v3 = vrot.slane %v8211_v8, 2 }
  0x42   : > { %395 = vst.msk [vmem:[#allocation2 + $0x151] sm:$0xff] %vm312_vm0, %v306_v23  ;;  %396 = vst.msk [vmem:[#allocation2 + $0x159] sm:$0xff] %vm312_vm0, %v307_v24  ;;  %v311_v47 = vld [vmem:[%s8198_s30 + $0xf8] sm:$0xff]  ;;  %v558_v1 = vsel %vm503_vm2, %v555_v34, %v557_v35  ;;  %v8420_v9 = vpack.i.bf16 %v553_v57, %v551_v51  ;;  %v593_v24 = vrot.slane %v8265_v38, 2  ;;  %v600_v63 = vrot.slane %v8269_v41, 2 }
  0x43   : > { %397 = vst.msk [vmem:[#allocation2 + $0x169] sm:$0xff] %vm312_vm0, %v308_v25  ;;  %398 = vst.msk [vmem:[#allocation2 + $0x171] sm:$0xff] %vm312_vm0, %v309_v39  ;;  %6338 = vrot.lane.b32.xlu1 %v8380_v13, %s8016_s8  ;;  %v8436_v25 = vpack.i.bf16 %v558_v1, %v556_v60  ;;  %v8454_v60 = vsel %vm584_vm3, %v585_v2, %v586_v3  ;;  %v8457_v1 = vsel %vm584_vm3, %v586_v3, %v588_v52 }
  0x44   : > { %399 = vst.msk [vmem:[#allocation2 + $0x181] sm:$0xff] %vm312_vm0, %v310_v44  ;;  %400 = vst.msk [vmem:[#allocation2 + $0x189] sm:$0xff] %vm312_vm0, %v311_v47  ;;  %v8422_v12 = vld [vmem:[#allocation2 + $0x108] sm:$0xff] }
  0x45   : > { %12790 = vst [vmem:[#allocation11_spill] sm:$0xff] %v8411_v58  ;;  %12791 = vst [vmem:[#allocation12_spill] sm:$0xff] %v8420_v9  ;;  %v8426_v20 = vld [vmem:[#allocation2 + $0x110] sm:$0xff]  ;;  %v8428_v23 = vld [vmem:[#allocation2 + $0x118] sm:$0x3]  ;;  %v559_v7 = vrot.slane %v8422_v12, 1  ;;  %6343 = vrot.lane.b32.xlu0 %v8411_v58, %s8016_s8 }
  0x46   : > { %v8431_v8 = vld [vmem:[#allocation2 + $0x120] sm:$0xff]  ;;  %12792 = vst [vmem:[#allocation13_spill] sm:$0xff] %v8436_v25  ;;  %v560_v26 = vrot.slane %v8426_v20, 1  ;;  %v562_v33 = vrot.slane %v8428_v23, 1 }
  0x47   : > { %v8440_v34 = vld [vmem:[#allocation2 + $0x128] sm:$0xff]  ;;  %v8442_v35 = vld [vmem:[#allocation2 + $0x130] sm:$0x3]  ;;  %v564_v39 = vrot.slane %v8431_v8, 1  ;;  %6348 = vrot.lane.b32.xlu1 %v8420_v9, %s8016_s8 }
  0x48   : > { %v565_v44 = vrot.slane %v8440_v34, 1  ;;  %v567_v47 = vrot.slane %v8442_v35, 1  ;;  %v8447_v38 = vld [vmem:[#allocation2 + $0x138] sm:$0xff]  ;;  %v8449_v51 = vld [vmem:[#allocation2 + $0x140] sm:$0xff]  ;;  %v8451_v57 = vld [vmem:[#allocation2 + $0x148] sm:$0x3]  ;;  %v561_v0 = vsel %vm503_vm2, %v559_v7, %v560_v26  ;;  %v563_v11 = vsel %vm503_vm2, %v560_v26, %v562_v33 }
  0x49   : > { %v569_v18 = vrot.slane %v8447_v38, 1  ;;  %v570_v19 = vrot.slane %v8449_v51, 1  ;;  %v8465_v58 = vld [vmem:[#allocation2 + $0x150] sm:$0xff]  ;;  %v8467_v13 = vld [vmem:[#allocation2 + $0x158] sm:$0xff]  ;;  %v8469_v2 = vld [vmem:[#allocation2 + $0x160] sm:$0x3]  ;;  %v8471_v59 = vpack.i.bf16 %v563_v11, %v561_v0  ;;  %6353 = vrot.lane.b32.xlu0 %v8436_v25, %s8016_s8 }
  0x4a   : > { %v566_v52 = vsel %vm503_vm2, %v564_v39, %v565_v44  ;;  %v568_v3 = vsel %vm503_vm2, %v565_v44, %v567_v47  ;;  %v572_v7 = vrot.slane %v8451_v57, 1  ;;  %v8476_v9 = vld [vmem:[#allocation2 + $0x168] sm:$0xff]  ;;  %v8478_v26 = vld [vmem:[#allocation2 + $0x170] sm:$0xff]  ;;  %v8480_v33 = vld [vmem:[#allocation2 + $0x178] sm:$0x3]  ;;  %v574_v11 = vrot.slane %v8465_v58, 1 }
  0x4b   : > { %12793 = vst [vmem:[#allocation14_spill] sm:$0xff] %v8471_v59  ;;  %v8484_v45 = vpack.i.bf16 %v568_v3, %v566_v52  ;;  %v571_v0 = vsel %vm503_vm2, %v569_v18, %v570_v19  ;;  %v575_v39 = vrot.slane %v8467_v13, 1  ;;  %v577_v47 = vrot.slane %v8469_v2, 1  ;;  %6358 = vrot.lane.b32.xlu1 %v8471_v59, %s8016_s8 }
  0x4c   : > { %v573_v44 = vsel %vm503_vm2, %v570_v19, %v572_v7  ;;  %v579_v17 = vrot.slane %v8476_v9, 1  ;;  %v580_v10 = vrot.slane %v8478_v26, 1  ;;  %v582_v18 = vrot.slane %v8480_v33, 1 }
  0x4d   : > { %12794 = vst [vmem:[#allocation15_spill] sm:$0xff] %v8484_v45  ;;  %v8495_v25 = vpack.i.bf16 %v573_v44, %v571_v0  ;;  %v576_v52 = vsel %vm503_vm2, %v574_v11, %v575_v39  ;;  %v595_v3 = vrot.slane %v8249_v30, 2  ;;  %v578_v50 = vsel %vm503_vm2, %v575_v39, %v577_v47  ;;  %6363 = vrot.lane.b32.xlu0 %v8484_v45, %s8016_s8 }
  0x4e   : > { %v581_v19 = vsel %vm503_vm2, %v579_v17, %v580_v10  ;;  %v596_v7 = vrot.slane %v8251_v31, 2  ;;  %v8506_v59 = vpack.i.bf16 %v578_v50, %v576_v52  ;;  %v583_v0 = vsel %vm503_vm2, %v580_v10, %v582_v18 }
  0x4f   : > { %v601_v11 = vrot.slane %v8271_v42, 2  ;;  %v603_v44 = vrot.slane %v8276_v46, 2  ;;  %6368 = vrot.lane.b32.xlu1 %v8495_v25, %s8016_s8  ;;  %v8513_v39 = vpack.i.bf16 %v583_v0, %v581_v19  ;;  %v6382_v17 = vpack.i.bf16 %v8457_v1, %v8454_v60 }
  0x50   : > { %12795 = vst [vmem:[#allocation16_spill] sm:$0xff] %v8506_v59  ;;  %v12797_v47 = vrot.slane %v8263_v37, 2  ;;  %v12798_v45 = vrot.slane %v8261_v36, 2  ;;  %v597_v46 = vsel %vm584_vm3, %v595_v3, %v596_v7  ;;  %v12800_v18 = vrot.slane %v8253_v32, 2 }
  0x51   : > { %12796 = vst [vmem:[#allocation17_spill] sm:$0xff] %v8513_v39  ;;  %v605_v0 = vrot.slane %v8279_v48, 2  ;;  %6373 = vrot.lane.b32.xlu0 %v8506_v59, %s8016_s8  ;;  %v602_v60 = vsel %vm584_vm3, %v600_v63, %v601_v11  ;;  %v604_v1 = vsel %vm584_vm3, %v601_v11, %v603_v44  ;;  %v611_v3 = vrot.slane %v8292_v56, 2 }
  0x52   : > { %v592_v50 = vsel %vm584_vm3, %v12798_v45, %v12797_v47  ;;  %v12799_v10 = vmov %v12797_v47  ;;  %v599_v19 = vsel %vm584_vm3, %v596_v7, %v12800_v18  ;;  %v606_v45 = vrot.slane %v8281_v49, 2 }
  0x53   : > { %v594_v52 = vsel %vm584_vm3, %v12799_v10, %v593_v24  ;;  %v608_v47 = vrot.slane %v8288_v54, 2  ;;  %v610_v24 = vrot.slane %v8290_v55, 2  ;;  %v613_v32 = vrot.slane %v8298_v61, 2  ;;  %6378 = vrot.lane.b32.xlu1 %v8513_v39, %s8016_s8  ;;  %s8025_s8 = smov 96  }
  0x54   : > { %v615_v7 = vrot.slane %v8300_v62, 2  ;;  %v8542_v10 = vpack.i.bf16 %v594_v52, %v592_v50  ;;  %v616_v63 = vrot.slane %v8309_v4, 2  ;;  %v618_v11 = vrot.slane %v8311_v5, 2 }
  0x55   : > { %v8546_v44 = vpack.i.bf16 %v599_v19, %v597_v46  ;;  %v8548_v54 = vpack.i.bf16 %v604_v1, %v602_v60  ;;  %6383 = vrot.lane.b32.xlu0 %v6382_v17, %s8017_s9  ;;  %v607_v61 = vsel %vm584_vm3, %v605_v0, %v606_v45  ;;  %v609_v18 = vsel %vm584_vm3, %v606_v45, %v608_v47 }
  0x56   : > { %v620_v59 = vrot.slane %v8313_v6, 2  ;;  %v621_v50 = vrot.slane %v8320_v14, 2  ;;  %v612_v52 = vsel %vm584_vm3, %v610_v24, %v611_v3  ;;  %v614_v39 = vsel %vm584_vm3, %v611_v3, %v613_v32 }
  0x57   : > { %12801 = vst [vmem:[#allocation18_spill] sm:$0xff] %v8546_v44  ;;  %v623_v5 = vrot.slane %v8322_v15, 2  ;;  %v625_v46 = vrot.slane %v8324_v16, 2  ;;  %6388 = vrot.lane.b32.xlu1 %v8542_v10, %s8017_s9  ;;  %v617_v17 = vsel %vm584_vm3, %v615_v7, %v616_v63  ;;  %v619_v19 = vsel %vm584_vm3, %v616_v63, %v618_v11 }
  0x58   : > { %v626_v0 = vrot.slane %v8333_v21, 2  ;;  %v628_v60 = vrot.slane %v8335_v22, 2  ;;  %v630_v1 = vrot.slane %v8341_v27, 2  ;;  %v631_v45 = vrot.slane %v8343_v28, 2 }
  0x59   : > { %v633_v47 = vrot.slane %v8353_v40, 2  ;;  %v635_v15 = vrot.slane %v8345_v29, 2  ;;  %6393 = vrot.lane.b32.xlu0 %v8546_v44, %s8017_s9  ;;  %v8571_v24 = vpack.i.bf16 %v609_v18, %v607_v61  ;;  %v636_v3 = vrot.slane %v8355_v43, 2 }
  0x5a   : > { %v638_v32 = vrot.slane %v8363_v53, 2  ;;  %v8575_v7 = vpack.i.bf16 %v614_v39, %v612_v52  ;;  %v8577_v22 = vpack.i.bf16 %v619_v19, %v617_v17  ;;  %v640_v63 = vrot.slane %v8422_v12, 2 }
  0x5b   : > { %v641_v11 = vrot.slane %v8426_v20, 2  ;;  %6398 = vrot.lane.b32.xlu1 %v8548_v54, %s8017_s9  ;;  %v622_v40 = vsel %vm584_vm3, %v620_v59, %v621_v50  ;;  %v624_v61 = vsel %vm584_vm3, %v621_v50, %v623_v5  ;;  %v643_v18 = vrot.slane %v8428_v23, 2 }
  0x5c   : > { %v645_v44 = vrot.slane %v8431_v8, 2  ;;  %v627_v53 = vsel %vm584_vm3, %v625_v46, %v626_v0  ;;  %v629_v39 = vsel %vm584_vm3, %v626_v0, %v628_v60  ;;  %v646_v52 = vrot.slane %v8440_v34, 2 }
  0x5d   : > { %v648_v17 = vrot.slane %v8442_v35, 2  ;;  %6403 = vrot.lane.b32.xlu0 %v8571_v24, %s8017_s9  ;;  %v632_v19 = vsel %vm584_vm3, %v630_v1, %v631_v45  ;;  %v634_v59 = vsel %vm584_vm3, %v631_v45, %v633_v47  ;;  %v650_v50 = vrot.slane %v8447_v38, 2 }
  0x5e   : > { %v651_v23 = vrot.slane %v8449_v51, 2  ;;  %v637_v5 = vsel %vm584_vm3, %v635_v15, %v636_v3  ;;  %v639_v46 = vsel %vm584_vm3, %v636_v3, %v638_v32  ;;  %v653_v0 = vrot.slane %v8451_v57, 2 }
  0x5f   : > { %v655_v60 = vrot.slane %v8465_v58, 2  ;;  %6408 = vrot.lane.b32.xlu1 %v8575_v7, %s8017_s9  ;;  %v8603_v35 = vpack.i.bf16 %v624_v61, %v622_v40  ;;  %v642_v1 = vsel %vm584_vm3, %v640_v63, %v641_v11  ;;  %v644_v45 = vsel %vm584_vm3, %v641_v11, %v643_v18  ;;  %v8621_v11 = vld [vmem:[#allocation2 + $0x190] sm:$0x3] }
  0x60   : > { %v8609_v47 = vpack.i.bf16 %v629_v39, %v627_v53  ;;  %v8611_v15 = vpack.i.bf16 %v634_v59, %v632_v19  ;;  %v8613_v3 = vpack.i.bf16 %v639_v46, %v637_v5  ;;  %v647_v57 = vsel %vm584_vm3, %v645_v44, %v646_v52  ;;  %v8627_v39 = vld [vmem:[#allocation2 + $0x180] sm:$0xff]  ;;  %v8629_v44 = vld [vmem:[#allocation2 + $0x188] sm:$0xff] }
  0x61   : > { %6413 = vrot.lane.b32.xlu0 %v8577_v22, %s8017_s9  ;;  %v8616_v32 = vpack.i.bf16 %v644_v45, %v642_v1  ;;  %v649_v40 = vsel %vm584_vm3, %v646_v52, %v648_v17  ;;  %v656_v61 = vrot.slane %v8467_v13, 2  ;;  %v658_v63 = vrot.slane %v8469_v2, 2 }
  0x62   : > { %v660_v18 = vrot.slane %v8476_v9, 2  ;;  %v661_v53 = vrot.slane %v8478_v26, 2  ;;  %v652_v52 = vsel %vm584_vm3, %v650_v50, %v651_v23  ;;  %v654_v2 = vsel %vm584_vm3, %v651_v23, %v653_v0 }
  0x63   : > { %6418 = vrot.lane.b32.xlu1 %v8603_v35, %s8017_s9  ;;  %v657_v17 = vsel %vm584_vm3, %v655_v60, %v656_v61  ;;  %v659_v19 = vsel %vm584_vm3, %v656_v61, %v658_v63  ;;  %v668_v59 = vrot.slane %v8627_v39, 1  ;;  %v669_v5 = vrot.slane %v8629_v44, 1 }
  0x64   : > { %v671_v46 = vrot.slane %v8621_v11, 1  ;;  %v663_v1 = vrot.slane %v8480_v33, 2  ;;  %v8645_v50 = vpack.i.bf16 %v649_v40, %v647_v57  ;;  %v8649_v60 = vpack.i.bf16 %v654_v2, %v652_v52  ;;  %v12813_v2 = vld [vmem:[#allocation13_spill] sm:$0xff] }
  0x65   : > { %6423 = vrot.lane.b32.xlu0 %v8609_v47, %s8017_s9  ;;  %v670_v23 = vsel %vm503_vm2, %v668_v59, %v669_v5  ;;  %v8655_v61 = vpack.i.bf16 %v659_v19, %v657_v17  ;;  %v662_v33 = vsel %vm584_vm3, %v660_v18, %v661_v53  ;;  %v6462_v40 = vpack.i.bf16 %v8263_v37, %v8261_v36  ;;  %v12814_v17 = vld [vmem:[#allocation14_spill] sm:$0xff] }
  0x66   : > { %v672_v0 = vsel %vm503_vm2, %v669_v5, %v671_v46  ;;  %v664_v63 = vsel %vm584_vm3, %v661_v53, %v663_v1  ;;  %v8673_v18 = vpack.i.bf16 %v8251_v31, %v8249_v30  ;;  %v6472_v53 = vpack.i.bf16 %v8271_v42, %v8269_v41  ;;  %v12815_v5 = vld [vmem:[#allocation15_spill] sm:$0xff] }
  0x67   : > { %6428 = vrot.lane.b32.xlu1 %v8611_v15, %s8017_s9  ;;  %v8651_v45 = vpack.i.bf16 %v672_v0, %v670_v23  ;;  %v8663_v57 = vpack.i.bf16 %v664_v63, %v662_v33  ;;  %v6477_v52 = vpack.i.bf16 %v8281_v49, %v8279_v48  ;;  %v6482_v36 = vpack.i.bf16 %v8292_v56, %v8290_v55  ;;  %v12817_v23 = vld [vmem:[#allocation16_spill] sm:$0xff]  ;;  %v12818_v33 = vld [vmem:[#allocation17_spill] sm:$0xff] }
  0x68   : > { %v6487_v37 = vpack.i.bf16 %v8309_v4, %v8300_v62  ;;  %v6492_v30 = vpack.i.bf16 %v8320_v14, %v8313_v6  ;;  %v6497_v31 = vpack.i.bf16 %v8333_v21, %v8324_v16  ;;  %v6502_v41 = vpack.i.bf16 %v8343_v28, %v8341_v27  ;;  %v12804_v6 = vld [vmem:[#allocation5_spill] sm:$0xff]  ;;  %v12805_v14 = vld [vmem:[#allocation4_spill] sm:$0xff]  ;;  %v12806_v16 = vld [vmem:[#allocation6_spill] sm:$0xff] }
  0x69   : > { %6433 = vrot.lane.b32.xlu0 %v8613_v3, %s8017_s9  ;;  %12802 = vst [vmem:[#allocation19_spill] sm:$0xff] %v8651_v45  ;;  %v6507_v42 = vpack.i.bf16 %v8355_v43, %v8345_v29  ;;  %v8694_v48 = vpack.i.bf16 %v8426_v20, %v8422_v12  ;;  %v8698_v49 = vpack.i.bf16 %v8440_v34, %v8431_v8  ;;  %v12807_v21 = vld [vmem:[#allocation7_spill] sm:$0xff]  ;;  %v12808_v27 = vld [vmem:[#allocation8_spill] sm:$0xff]  ;;  %v12809_v28 = vld [vmem:[#allocation9_spill] sm:$0xff] }
  0x6a   : > { %v6522_v55 = vpack.i.bf16 %v8449_v51, %v8447_v38  ;;  %v6527_v56 = vpack.i.bf16 %v8467_v13, %v8465_v58  ;;  %v6532_v62 = vpack.i.bf16 %v8478_v26, %v8476_v9  ;;  %v8710_v4 = vpack.i.bf16 %v8629_v44, %v8627_v39  ;;  %v12810_v29 = vld [vmem:[#allocation10_spill] sm:$0xff]  ;;  %v12811_v43 = vld [vmem:[#allocation11_spill] sm:$0xff]  ;;  %v12812_v9 = vld [vmem:[#allocation12_spill] sm:$0xff] }
  0x6b   : > { %6438 = vrot.lane.b32.xlu1 %v8616_v32, %s8017_s9  ;;  %v7902_v0 = vld [vmem:[%s12574_s1] sm:$0xff]  }
  0x6c   : > { %12803 = vst [vmem:[#allocation20_spill] sm:$0xff] %v8710_v4  ;;  %6165 = vmatprep.subr.bf16.mxu0 %v7902_v0  ;;  %6275 = vmatprep.subr.bf16.mxu1 %v7902_v0 }
  0x6d   : > { %6443 = vrot.lane.b32.xlu0 %v8645_v50, %s8017_s9  ;;  %6166 = vmatpush3.bf16.msra.mxu0 %v7902_v0 }
  0x6e   : > { %6278 = vmatpush3.bf16.msra.mxu1 %v7902_v0 }
  0x6f   : > { %6448 = vrot.lane.b32.xlu1 %v8649_v60, %s8017_s9 }
  0x71   : > { %6453 = vrot.lane.b32.xlu0 %v8655_v61, %s8017_s9 }
  0x73   : > { %6458 = vrot.lane.b32.xlu1 %v8663_v57, %s8017_s9 }
  0x75   : > { %6463 = vrot.lane.b32.xlu0 %v6462_v40, %s8018_s10 }
  0x77   : > { %6468 = vrot.lane.b32.xlu1 %v8673_v18, %s8018_s10 }
  0x79   : > { %6473 = vrot.lane.b32.xlu0 %v6472_v53, %s8018_s10  ;;  %v7903_v53 = vld [vmem:[%s12574_s1 + $0x8] sm:$0xff]  }
  0x7a   : > { %6167 = vmatprep.subr.bf16.mxu0 %v7903_v53  ;;  %6276 = vmatprep.subr.bf16.mxu1 %v7903_v53 }
  0x7b   : > { %6478 = vrot.lane.b32.xlu1 %v6477_v52, %s8018_s10  ;;  %6168 = vmatpush3.bf16.msra.mxu0 %v7903_v53 }
  0x7c   : > { %6279 = vmatpush3.bf16.msra.mxu1 %v7903_v53 }
  0x7d   : > { %6483 = vrot.lane.b32.xlu0 %v6482_v36, %s8018_s10 }
  0x7f   : > { %6488 = vrot.lane.b32.xlu1 %v6487_v37, %s8018_s10  ;;  %v12823_v37 = vld [vmem:[#allocation18_spill] sm:$0xff] }
  0x81   : > { %6493 = vrot.lane.b32.xlu0 %v6492_v30, %s8018_s10  ;;  %v12824_v30 = vmov 0.0  }
  0x82   : > { %2011 = vst.msk [vmem:[#allocation3] sm:$0xff] %vm1689_vm4, %v12824_v30  ;;  %2012 = vst.msk [vmem:[#allocation3 + $0x8] sm:$0xff] %vm1689_vm4, %v12824_v30 }
  0x83   : > { %6498 = vrot.lane.b32.xlu1 %v6497_v31, %s8018_s10  ;;  %2015 = vst.msk [vmem:[#allocation3 + $0x18] sm:$0xff] %vm1689_vm4, %v12824_v30  ;;  %2016 = vst.msk [vmem:[#allocation3 + $0x20] sm:$0xff] %vm1689_vm4, %v12824_v30 }
  0x84   : > { %2018 = vst.msk [vmem:[#allocation3 + $0x30] sm:$0xff] %vm1689_vm4, %v12824_v30  ;;  %2019 = vst.msk [vmem:[#allocation3 + $0x38] sm:$0xff] %vm1689_vm4, %v12824_v30 }
  0x85   : > { %6503 = vrot.lane.b32.xlu0 %v6502_v41, %s8018_s10  ;;  %2021 = vst.msk [vmem:[#allocation3 + $0x48] sm:$0xff] %vm1689_vm4, %v12824_v30  ;;  %2022 = vst.msk [vmem:[#allocation3 + $0x50] sm:$0xff] %vm1689_vm4, %v12824_v30  ;;  %v8836_v41 = vld [vmem:[#allocation2 + $0x48] sm:$0xff] }
  0x86   : > { %2024 = vst.msk [vmem:[#allocation3 + $0x60] sm:$0xff] %vm1689_vm4, %v12824_v30  ;;  %2025 = vst.msk [vmem:[#allocation3 + $0x68] sm:$0xff] %vm1689_vm4, %v12824_v30 }
  0x87   : > { %6508 = vrot.lane.b32.xlu1 %v6507_v42, %s8018_s10  ;;  %2027 = vst.msk [vmem:[#allocation3 + $0x78] sm:$0xff] %vm1689_vm4, %v12824_v30  ;;  %2028 = vst.msk [vmem:[#allocation3 + $0x80] sm:$0xff] %vm1689_vm4, %v12824_v30  ;;  %v8838_v42 = vld [vmem:[#allocation2 + $0x50] sm:$0xff] }
  0x88   : > { %2030 = vst.msk [vmem:[#allocation3 + $0x90] sm:$0xff] %vm1689_vm4, %v12824_v30  ;;  %2031 = vst.msk [vmem:[#allocation3 + $0x98] sm:$0xff] %vm1689_vm4, %v12824_v30 }
  0x89   : > { %6513 = vrot.lane.b32.xlu0 %v8694_v48, %s8018_s10  ;;  %2033 = vst.msk [vmem:[#allocation3 + $0xa8] sm:$0xff] %vm1689_vm4, %v12824_v30  ;;  %2034 = vst.msk [vmem:[#allocation3 + $0xb0] sm:$0xff] %vm1689_vm4, %v12824_v30 }
  0x8a   : > { %2036 = vst.msk [vmem:[#allocation3 + $0xc0] sm:$0xff] %vm1689_vm4, %v12824_v30  ;;  %2037 = vst.msk [vmem:[#allocation3 + $0xc8] sm:$0xff] %vm1689_vm4, %v12824_v30 }
  0x8b   : > { %6518 = vrot.lane.b32.xlu1 %v8698_v49, %s8018_s10  ;;  %2039 = vst.msk [vmem:[#allocation3 + $0xd8] sm:$0xff] %vm1689_vm4, %v12824_v30  ;;  %2040 = vst.msk [vmem:[#allocation3 + $0xe0] sm:$0xff] %vm1689_vm4, %v12824_v30 }
  0x8c   : > { %2042 = vst.msk [vmem:[#allocation3 + $0xf0] sm:$0xff] %vm1689_vm4, %v12824_v30  ;;  %2043 = vst.msk [vmem:[#allocation3 + $0xf8] sm:$0xff] %vm1689_vm4, %v12824_v30 }
  0x8d   : > { %6523 = vrot.lane.b32.xlu0 %v6522_v55, %s8018_s10  ;;  %2045 = vst.msk [vmem:[#allocation3 + $0x108] sm:$0xff] %vm1689_vm4, %v12824_v30  ;;  %2046 = vst.msk [vmem:[#allocation3 + $0x110] sm:$0xff] %vm1689_vm4, %v12824_v30  ;;  %v6642_v55 = vpack.i.bf16 %v8838_v42, %v8836_v41 }
  0x8e   : > { %v8722_v26 = vpop.permute.xlu0 %6303  ;;  %2048 = vst.msk [vmem:[#allocation3 + $0x120] sm:$0xff] %vm1689_vm4, %v12824_v30  ;;  %2049 = vst.msk [vmem:[#allocation3 + $0x128] sm:$0xff] %vm1689_vm4, %v12824_v30 }
  0x8f   : > { %6528 = vrot.lane.b32.xlu1 %v6527_v56, %s8018_s10  ;;  %2051 = vst.msk [vmem:[#allocation3 + $0x138] sm:$0xff] %vm1689_vm4, %v12824_v30  ;;  %2052 = vst.msk [vmem:[#allocation3 + $0x140] sm:$0xff] %vm1689_vm4, %v12824_v30 }
  0x90   : > { %2054 = vst.msk [vmem:[#allocation3 + $0x150] sm:$0xff] %vm1689_vm4, %v12824_v30  ;;  %2055 = vst.msk [vmem:[#allocation3 + $0x158] sm:$0xff] %vm1689_vm4, %v12824_v30 }
  0x91   : > { %6533 = vrot.lane.b32.xlu0 %v6532_v62, %s8018_s10  ;;  %2057 = vst.msk [vmem:[#allocation3 + $0x168] sm:$0xff] %vm1689_vm4, %v12824_v30  ;;  %2058 = vst.msk [vmem:[#allocation3 + $0x170] sm:$0xff] %vm1689_vm4, %v12824_v30 }
  0x92   : > { %2060 = vst.msk [vmem:[#allocation3 + $0x180] sm:$0xff] %vm1689_vm4, %v12824_v30  ;;  %2061 = vst.msk [vmem:[#allocation3 + $0x188] sm:$0xff] %vm1689_vm4, %v12824_v30 }
  0x93   : > { %6538 = vrot.lane.b32.xlu1 %v8710_v4, %s8018_s10  ;;  %2063 = vst.msk [vmem:[#allocation3 + $0x198] sm:$0xff] %vm1689_vm4, %v12824_v30  ;;  %2064 = vst.msk [vmem:[#allocation3 + $0x1a0] sm:$0xff] %vm1689_vm4, %v12824_v30 }
  0x94   : > { %12825 = vst [vmem:[#allocation9_spill] sm:$0xff] %v8836_v41  ;;  %12826 = vst [vmem:[#allocation10_spill] sm:$0xff] %v8838_v42 }
  0x95   : > { %6543 = vrot.lane.b32.xlu0 %v12804_v6, %s8019_s11 }
  0x97   : > { %6548 = vrot.lane.b32.xlu1 %v12805_v14, %s8019_s11 }
  0x99   : > { %6553 = vrot.lane.b32.xlu0 %v12806_v16, %s8019_s11 }
  0x9b   : > { %6558 = vrot.lane.b32.xlu1 %v12807_v21, %s8019_s11 }
  0x9d   : > { %6563 = vrot.lane.b32.xlu0 %v12808_v27, %s8019_s11 }
  0x9f   : > { %6568 = vrot.lane.b32.xlu1 %v12809_v28, %s8019_s11 }
  0xa1   : > { %6573 = vrot.lane.b32.xlu0 %v12810_v29, %s8019_s11 }
  0xa3   : > { %6578 = vrot.lane.b32.xlu1 %v12811_v43, %s8019_s11 }
  0xa5   : > { %6583 = vrot.lane.b32.xlu0 %v12812_v9, %s8019_s11 }
  0xa7   : > { %6588 = vrot.lane.b32.xlu1 %v12813_v2, %s8019_s11 }
  0xa9   : > { %6593 = vrot.lane.b32.xlu0 %v12814_v17, %s8019_s11  ;;  %v8726_v19 = vpop.permute.xlu1 %6313 }
  0xab   : > { %v8728_v59 = vpop.permute.xlu0 %6308  ;;  %6598 = vrot.lane.b32.xlu1 %v12815_v5, %s8019_s11 }
  0xad   : > { %6603 = vrot.lane.b32.xlu0 %v8495_v25, %s8019_s11  ;;  %v8732_v46 = vpop.permute.xlu1 %6318 }
  0xaf   : > { %v8734_v1 = vpop.permute.xlu0 %6323  ;;  %6608 = vrot.lane.b32.xlu1 %v12817_v23, %s8019_s11 }
  0xb0   : > { %12816 = vst [vmem:[#allocation5_spill] sm:$0xff] %v8734_v1 }
  0xb1   : > { %6613 = vrot.lane.b32.xlu0 %v12818_v33, %s8019_s11  ;;  %v8741_v63 = vpop.permute.xlu1 %6328 }
  0xb2   : > { %12819 = vst [vmem:[#allocation4_spill] sm:$0xff] %v8741_v63 }
  0xb3   : > { %v8743_v40 = vpop.permute.xlu0 %6333  ;;  %6618 = vrot.lane.b32.xlu1 %v8651_v45, %s8019_s11 }
  0xb4   : > { %12820 = vst [vmem:[#allocation6_spill] sm:$0xff] %v8743_v40 }
  0xb5   : > { %6623 = vrot.lane.b32.xlu0 %v8542_v10, %s8020_s16  ;;  %v8751_v52 = vpop.permute.xlu1 %6338  ;;  %v7904_v10 = vld [vmem:[%s12574_s1 + $0x10] ss:$0 sps:$4 sm:$0x33]  }
  0xb6   : > { %12821 = vst [vmem:[#allocation7_spill] sm:$0xff] %v8751_v52  ;;  %6281 = vmatprep.subr.msk.bf16.mxu0 %vm1814_vm5, %v7904_v10  ;;  %6282 = vmatprep.subr.msk.bf16.mxu1 %vm1814_vm5, %v7904_v10  ;;  %v1816_v62 = vsel %vm1814_vm5, %v7904_v10, 0  ;;  %v8865_v10 = vld [vmem:[#allocation2 + $0x60] sm:$0xff] }
  0xb7   : > { %v8753_v36 = vpop.permute.xlu0 %6343  ;;  %6628 = vrot.lane.b32.xlu1 %v12823_v37, %s8020_s16  ;;  %6170 = vmatpush3.bf16.msra.mxu0 %v1816_v62  ;;  %12827 = vst [vmem:[#allocation11_spill] sm:$0xff] %v8865_v10 }
  0xb8   : > { %12822 = vst [vmem:[#allocation8_spill] sm:$0xff] %v8753_v36  ;;  %6280 = vmatpush3.bf16.msra.mxu1 %v1816_v62  ;;  %v8875_v62 = vld [vmem:[#allocation2 + $0x78] sm:$0xff] }
  0xb9   : > { %6633 = vrot.lane.b32.xlu0 %v8548_v54, %s8020_s16  ;;  %v8834_v31 = vpop.permute.xlu1 %6348  ;;  %12830 = vst [vmem:[#allocation14_spill] sm:$0xff] %v8875_v62 }
  0xbb   : > { %v8842_v56 = vpop.permute.xlu0 %6353  ;;  %6638 = vrot.lane.b32.xlu1 %v8673_v18, %s8021_s19 }
  0xbd   : > { %6643 = vrot.lane.b32.xlu0 %v6642_v55, %s8021_s19  ;;  %v8847_v6 = vpop.permute.xlu1 %6358  ;;  %v8867_v55 = vld [vmem:[#allocation2 + $0x68] sm:$0xff] }
  0xbe   : > { %12828 = vst [vmem:[#allocation12_spill] sm:$0xff] %v8867_v55 }
  0xbf   : > { %v8849_v0 = vpop.permute.xlu0 %6363  ;;  %6648 = vrot.lane.b32.xlu1 %v12805_v14, %s8022_s20  ;;  %v6672_v14 = vpack.i.bf16 %v8867_v55, %v8865_v10 }
  0xc1   : > { %6653 = vrot.lane.b32.xlu0 %v12806_v16, %s8022_s20  ;;  %v8855_v53 = vpop.permute.xlu1 %6368 }
  0xc2   : > { %v6370_v55 = vunpack.i.l.bf16 %v8855_v53 }
  0xc3   : > { %v8857_v30 = vpop.permute.xlu0 %6373  ;;  %6658 = vrot.lane.b32.xlu1 %v12823_v37, %s8023_s21  ;;  %v8877_v37 = vld [vmem:[#allocation2 + $0x80] sm:$0xff] }
  0xc4   : > { %12831 = vst [vmem:[#allocation15_spill] sm:$0xff] %v8877_v37  ;;  %v6376_v41 = vunpack.i.h.bf16 %v8857_v30 }
  0xc5   : > { %6663 = vrot.lane.b32.xlu0 %v8548_v54, %s8023_s21  ;;  %v8863_v18 = vpop.permute.xlu1 %6378  ;;  %v6677_v54 = vpack.i.bf16 %v8877_v37, %v8875_v62  ;;  %v8909_v37 = vld [vmem:[#allocation2 + $0x98] sm:$0xff] }
  0xc6   : > { %12840 = vst [vmem:[#allocation26_spill] sm:$0xff] %v8909_v37 }
  0xc7   : > { %v8871_v16 = vpop.permute.xlu0 %6383  ;;  %6668 = vrot.lane.b32.xlu1 %v8571_v24, %s8020_s16 }
  0xc8   : > { %12829 = vst [vmem:[#allocation13_spill] sm:$0xff] %v8871_v16 }
  0xc9   : > { %6673 = vrot.lane.b32.xlu0 %v6672_v14, %s8021_s19  ;;  %v8882_v36 = vpop.permute.xlu1 %6388 }
  0xca   : > { %12832 = vst [vmem:[#allocation16_spill] sm:$0xff] %v8882_v36 }
  0xcb   : > { %v8884_v52 = vpop.permute.xlu0 %6393  ;;  %6678 = vrot.lane.b32.xlu1 %v6677_v54, %s8021_s19  ;;  %v8907_v54 = vld [vmem:[#allocation2 + $0x90] sm:$0xff] }
  0xcc   : > { %12833 = vst [vmem:[#allocation17_spill] sm:$0xff] %v8884_v52  ;;  %12839 = vst [vmem:[#allocation25_spill] sm:$0xff] %v8907_v54 }
  0xcd   : > { %6683 = vrot.lane.b32.xlu0 %v12807_v21, %s8022_s20  ;;  %v8889_v40 = vpop.permute.xlu1 %6398 }
  0xce   : > { %12834 = vst [vmem:[#allocation18_spill] sm:$0xff] %v8889_v40 }
  0xcf   : > { %v8891_v63 = vpop.permute.xlu0 %6403  ;;  %6688 = vrot.lane.b32.xlu1 %v12808_v27, %s8022_s20  ;;  %v6712_v27 = vpack.i.bf16 %v8909_v37, %v8907_v54 }
  0xd0   : > { %12835 = vst [vmem:[#allocation21_spill] sm:$0xff] %v8891_v63 }
  0xd1   : > { %6693 = vrot.lane.b32.xlu0 %v8571_v24, %s8023_s21  ;;  %v8897_v14 = vpop.permute.xlu1 %6408 }
  0xd2   : > { %12836 = vst [vmem:[#allocation22_spill] sm:$0xff] %v8897_v14  ;;  %v8919_v14 = vld [vmem:[#allocation2 + $0xb0] sm:$0xff] }
  0xd3   : > { %v8899_v62 = vpop.permute.xlu0 %6413  ;;  %6698 = vrot.lane.b32.xlu1 %v8575_v7, %s8023_s21  ;;  %12843 = vst [vmem:[#allocation29_spill] sm:$0xff] %v8919_v14 }
  0xd4   : > { %12837 = vst [vmem:[#allocation23_spill] sm:$0xff] %v8899_v62  ;;  %v8917_v62 = vld [vmem:[#allocation2 + $0xa8] sm:$0xff] }
  0xd5   : > { %6703 = vrot.lane.b32.xlu0 %v8575_v7, %s8020_s16  ;;  %v8905_v21 = vpop.permute.xlu1 %6418  ;;  %12842 = vst [vmem:[#allocation28_spill] sm:$0xff] %v8917_v62  ;;  %v6717_v7 = vpack.i.bf16 %v8919_v14, %v8917_v62  ;;  %v7952_v14 = vld [vmem:[#allocation2 + $0xc8] sm:$0xff] }
  0xd6   : > { %12838 = vst [vmem:[#allocation24_spill] sm:$0xff] %v8905_v21 }
  0xd7   : > { %v8913_v24 = vpop.permute.xlu0 %6423  ;;  %6708 = vrot.lane.b32.xlu1 %v8577_v22, %s8020_s16 }
  0xd8   : > { %12841 = vst [vmem:[#allocation27_spill] sm:$0xff] %v8913_v24 }
  0xd9   : > { %6713 = vrot.lane.b32.xlu0 %v6712_v27, %s8021_s19  ;;  %v8924_v21 = vpop.permute.xlu1 %6428 }
  0xdb   : > { %v8926_v63 = vpop.permute.xlu0 %6433  ;;  %6718 = vrot.lane.b32.xlu1 %v6717_v7, %s8021_s19  ;;  %v7951_v7 = vld [vmem:[#allocation2 + $0xc0] sm:$0xff] }
  0xdc   : > { %v6752_v37 = vpack.i.bf16 %v7952_v14, %v7951_v7  ;;  %v6351_v7 = vunpack.i.h.bf16 %v8834_v31 }
  0xdd   : > { %6723 = vrot.lane.b32.xlu0 %v12809_v28, %s8022_s20  ;;  %v8931_v24 = vpop.permute.xlu1 %6438 }
  0xdf   : > { %v8933_v54 = vpop.permute.xlu0 %6443  ;;  %6728 = vrot.lane.b32.xlu1 %v12810_v29, %s8022_s20  ;;  %v7954_v29 = vld [vmem:[#allocation2 + $0xe0] sm:$0xff] }
  0xe0   : > { %v1478_v4 = vsel %vm312_vm0, %v7954_v29, %v6351_v7 }
  0xe1   : > { %6733 = vrot.lane.b32.xlu0 %v8577_v22, %s8023_s21  ;;  %v8939_v27 = vpop.permute.xlu1 %6448  ;;  %v7953_v22 = vld [vmem:[#allocation2 + $0xd8] sm:$0xff] }
  0xe2   : > { %v6757_v40 = vpack.i.bf16 %v7954_v29, %v7953_v22 }
  0xe3   : > { %v8941_v62 = vpop.permute.xlu0 %6453  ;;  %6738 = vrot.lane.b32.xlu1 %v8603_v35, %s8023_s21 }
  0xe5   : > { %6743 = vrot.lane.b32.xlu0 %v8603_v35, %s8020_s16  ;;  %v8947_v28 = vpop.permute.xlu1 %6458 }
  0xe7   : > { %v8949_v10 = vpop.permute.xlu0 %6463  ;;  %6748 = vrot.lane.b32.xlu1 %v8609_v47, %s8020_s16 }
  0xe8   : > { %12844 = vst [vmem:[#allocation30_spill] sm:$0xff] %v8949_v10  ;;  %v6365_v10 = vunpack.i.l.bf16 %v8849_v0 }
  0xe9   : > { %6753 = vrot.lane.b32.xlu0 %v6752_v37, %s8021_s19  ;;  %v8954_v45 = vpop.permute.xlu1 %6468 }
  0xea   : > { %12845 = vst [vmem:[#allocation31_spill] sm:$0xff] %v8954_v45 }
  0xeb   : > { %v8956_v52 = vpop.permute.xlu0 %6473  ;;  %6758 = vrot.lane.b32.xlu1 %v6757_v40, %s8021_s19  ;;  %v6356_v40 = vunpack.i.h.bf16 %v8842_v56 }
  0xec   : > { %12846 = vst [vmem:[#allocation32_spill] sm:$0xff] %v8956_v52  ;;  %v6350_v52 = vunpack.i.l.bf16 %v8834_v31  ;;  %v6366_v31 = vunpack.i.h.bf16 %v8849_v0 }
  0xed   : > { %6763 = vrot.lane.b32.xlu0 %v12811_v43, %s8022_s20  ;;  %v8961_v35 = vpop.permute.xlu1 %6478  ;;  %v6355_v43 = vunpack.i.l.bf16 %v8842_v56  ;;  %v6371_v56 = vunpack.i.h.bf16 %v8855_v53 }
  0xee   : > { %12847 = vst [vmem:[#allocation33_spill] sm:$0xff] %v8961_v35  ;;  %v6361_v35 = vunpack.i.h.bf16 %v8847_v6  ;;  %v1477_v36 = vsel %vm312_vm0, %v7953_v22, %v6350_v52  ;;  %v1484_v52 = vsel %vm312_vm0, %v8440_v34, %v6366_v31  ;;  %v1483_v22 = vsel %vm312_vm0, %v8431_v8, %v6365_v10 }
  0xef   : > { %v8963_v14 = vpop.permute.xlu0 %6483  ;;  %6768 = vrot.lane.b32.xlu1 %v12812_v9, %s8022_s20  ;;  %v6435_v34 = vunpack.i.l.bf16 %v8926_v63  ;;  %v6380_v10 = vunpack.i.l.bf16 %v8863_v18 }
  0xf0   : > { %12848 = vst [vmem:[#allocation34_spill] sm:$0xff] %v8963_v14  ;;  %v6360_v14 = vunpack.i.l.bf16 %v8847_v6  ;;  %v6375_v6 = vunpack.i.l.bf16 %v8857_v30  ;;  %v1482_v53 = vsel %vm312_vm0, %v8426_v20, %v6361_v35  ;;  %v6431_v30 = vunpack.i.h.bf16 %v8924_v21 }
  0xf1   : > { %6773 = vrot.lane.b32.xlu0 %v8609_v47, %s8023_s21  ;;  %v8969_v37 = vpop.permute.xlu1 %6488  ;;  %v7955_v47 = vld [vmem:[#allocation2 + $0xf0] sm:$0xff]  ;;  %v1486_v20 = vsel %vm312_vm0, %v8449_v51, %v6371_v56  ;;  %v6436_v35 = vunpack.i.h.bf16 %v8926_v63  ;;  %v6381_v51 = vunpack.i.h.bf16 %v8863_v18 }
  0xf2   : > { %12849 = vst [vmem:[#allocation35_spill] sm:$0xff] %v8969_v37  ;;  %v7956_v37 = vld [vmem:[#allocation2 + $0xf8] sm:$0xff]  ;;  %v1479_v0 = vsel %vm312_vm0, %v7955_v47, %v6355_v43  ;;  %v1481_v42 = vsel %vm312_vm0, %v8422_v12, %v6360_v14  ;;  %v1485_v12 = vsel %vm312_vm0, %v8447_v38, %v6370_v55  ;;  %v9019_v29 = vsel %vm312_vm0, %v8465_v58, %v6375_v6 }
  0xf3   : > { %v8977_v9 = vpop.permute.xlu0 %6493  ;;  %6778 = vrot.lane.b32.xlu1 %v8611_v15, %s8023_s21  ;;  %v6792_v45 = vpack.i.bf16 %v7956_v37, %v7955_v47  ;;  %v1480_v16 = vsel %vm312_vm0, %v7956_v37, %v6356_v40  ;;  %v6441_v58 = vunpack.i.h.bf16 %v8931_v24  ;;  %v6440_v14 = vunpack.i.l.bf16 %v8931_v24 }
  0xf4   : > { %12850 = vst [vmem:[#allocation36_spill] sm:$0xff] %v8977_v9  ;;  %v6446_v40 = vunpack.i.h.bf16 %v8933_v54  ;;  %v6445_v24 = vunpack.i.l.bf16 %v8933_v54  ;;  %v6450_v54 = vunpack.i.l.bf16 %v8939_v27 }
  0xf5   : > { %6783 = vrot.lane.b32.xlu0 %v8611_v15, %s8020_s16  ;;  %v8989_v9 = vpop.permute.xlu1 %6498  ;;  %v6430_v15 = vunpack.i.l.bf16 %v8924_v21  ;;  %v9015_v21 = vsel %vm312_vm0, %v8467_v13, %v6376_v41  ;;  %v1511_v13 = vsel %vm1491_vm6, %v1478_v4, %v6431_v30  ;;  %v1512_v4 = vsel %vm1491_vm6, %v1479_v0, %v6435_v34 }
  0xf6   : > { %v1515_v6 = vsel %vm1491_vm6, %v1482_v53, %v6441_v58  ;;  %v6451_v0 = vunpack.i.h.bf16 %v8939_v27  ;;  %v1516_v53 = vsel %vm1491_vm6, %v1483_v22, %v6445_v24  ;;  %v6455_v27 = vunpack.i.l.bf16 %v8941_v62 }
  0xf7   : > { %v9001_v1 = vpop.permute.xlu0 %6503  ;;  %6788 = vrot.lane.b32.xlu1 %v8613_v3, %s8020_s16  ;;  %v1510_v41 = vsel %vm1491_vm6, %v1477_v36, %v6430_v15  ;;  %v1513_v36 = vsel %vm1491_vm6, %v1480_v16, %v6436_v35  ;;  %v1514_v16 = vsel %vm1491_vm6, %v1481_v42, %v6440_v14  ;;  %v1517_v42 = vsel %vm1491_vm6, %v1484_v52, %v6446_v40 }
  0xf8   : > { %v1519_v22 = vsel %vm1491_vm6, %v1486_v20, %v6451_v0  ;;  %v1518_v52 = vsel %vm1491_vm6, %v1485_v12, %v6450_v54  ;;  %v6461_v58 = vunpack.i.h.bf16 %v8947_v28  ;;  %v7958_v12 = vld [vmem:[#allocation2 + $0x168] sm:$0xff] }
  0xf9   : > { %6793 = vrot.lane.b32.xlu0 %v6792_v45, %s8021_s19  ;;  %v6509_v8 = vpop.permute.xlu1 %6508 }
  0xfa   : > { %v6511_v38 = vunpack.i.h.bf16 %v6509_v8  ;;  %v6510_v55 = vunpack.i.l.bf16 %v6509_v8  ;;  %v6456_v8 = vunpack.i.h.bf16 %v8941_v62  ;;  %v6460_v62 = vunpack.i.l.bf16 %v8947_v28 }
  0xfb   : > { %v6514_v37 = vpop.permute.xlu0 %6513  ;;  %6798 = vrot.lane.b32.xlu1 %v8694_v48, %s8021_s19  ;;  %v1520_v28 = vsel %vm1491_vm6, %v9019_v29, %v6455_v27  ;;  %v7962_v27 = vld [vmem:[#allocation2 + $0x158] sm:$0xff] }
  0xfc   : > { %v9033_v45 = vsel %vm1524_vm7, %v1510_v41, %v6510_v55  ;;  %v9036_v63 = vsel %vm1524_vm7, %v1511_v13, %v6511_v38  ;;  %v6516_v18 = vunpack.i.h.bf16 %v6514_v37  ;;  %v6515_v7 = vunpack.i.l.bf16 %v6514_v37 }
  0xfd   : > { %6803 = vrot.lane.b32.xlu0 %v12813_v2, %s8022_s20  ;;  %v6519_v48 = vpop.permute.xlu1 %6518  ;;  %v1521_v40 = vsel %vm1491_vm6, %v9015_v21, %v6456_v8  ;;  %v7959_v21 = vld [vmem:[#allocation2 + $0x138] sm:$0xff]  ;;  %v7961_v8 = vld [vmem:[#allocation2 + $0x150] sm:$0xff] }
  0xfe   : > { %v9045_v43 = vsel %vm1524_vm7, %v1512_v4, %v6515_v7  ;;  %v9048_v47 = vsel %vm1524_vm7, %v1513_v36, %v6516_v18  ;;  %v6521_v31 = vunpack.i.h.bf16 %v6519_v48  ;;  %v6520_v56 = vunpack.i.l.bf16 %v6519_v48  ;;  %v7957_v4 = vld [vmem:[#allocation2 + $0x170] sm:$0xff] }
  0xff   : > { %v6524_v30 = vpop.permute.xlu0 %6523  ;;  %6808 = vrot.lane.b32.xlu1 %v12814_v17, %s8022_s20  ;;  %v1490_v20 = vsel %vm312_vm0, %v7957_v4, %v6381_v51  ;;  %v1489_v36 = vsel %vm312_vm0, %v7958_v12, %v6380_v10 }
 0x100   : > { %v9057_v2 = vsel %vm1524_vm7, %v1514_v16, %v6520_v56  ;;  %v9060_v15 = vsel %vm1524_vm7, %v1515_v6, %v6521_v31  ;;  %v6526_v35 = vunpack.i.h.bf16 %v6524_v30  ;;  %v6525_v34 = vunpack.i.l.bf16 %v6524_v30 }
 0x101   : > { %6813 = vrot.lane.b32.xlu0 %v8613_v3, %s8023_s21  ;;  %v6529_v17 = vpop.permute.xlu1 %6528  ;;  %v1523_v10 = vsel %vm1491_vm6, %v1490_v20, %v6461_v58  ;;  %v1522_v6 = vsel %vm1491_vm6, %v1489_v36, %v6460_v62  ;;  %v9163_v36 = vld [vmem:[#allocation2 + $0x1a0] sm:$0xff] }
 0x102   : > { %v9069_v38 = vsel %vm1524_vm7, %v1516_v53, %v6525_v34  ;;  %v9072_v55 = vsel %vm1524_vm7, %v1517_v42, %v6526_v35  ;;  %v6531_v13 = vunpack.i.h.bf16 %v6529_v17  ;;  %v6530_v41 = vunpack.i.l.bf16 %v6529_v17 }
 0x103   : > { %v6534_v14 = vpop.permute.xlu0 %6533  ;;  %6818 = vrot.lane.b32.xlu1 %v8616_v32, %s8023_s21  ;;  %v6872_v17 = vpack.i.bf16 %v7962_v27, %v7961_v8 }
 0x104   : > { %v9081_v3 = vsel %vm1524_vm7, %v1518_v52, %v6530_v41  ;;  %v9084_v37 = vsel %vm1524_vm7, %v1519_v22, %v6531_v13  ;;  %v6536_v18 = vunpack.i.h.bf16 %v6534_v14  ;;  %v6535_v7 = vunpack.i.l.bf16 %v6534_v14 }
 0x105   : > { %6823 = vrot.lane.b32.xlu0 %v8616_v32, %s8020_s16  ;;  %v6539_v24 = vpop.permute.xlu1 %6538  ;;  %v7960_v32 = vld [vmem:[#allocation2 + $0x140] sm:$0xff]  ;;  %v673_v13 = vrot.slane %v8627_v39, 2  ;;  %v6877_v22 = vpack.i.bf16 %v7957_v4, %v7958_v12  ;;  %v6306_v52 = vunpack.i.h.bf16 %v8722_v26  ;;  %v6316_v14 = vunpack.i.h.bf16 %v8726_v19  ;;  %v9161_v12 = vld [vmem:[#allocation2 + $0x198] sm:$0xff] }
 0x106   : > { %v9095_v48 = vsel %vm1524_vm7, %v1520_v28, %v6535_v7  ;;  %v9098_v31 = vsel %vm1524_vm7, %v1521_v40, %v6536_v18  ;;  %v6541_v51 = vunpack.i.h.bf16 %v6539_v24  ;;  %v6540_v56 = vunpack.i.l.bf16 %v6539_v24  ;;  %v7963_v28 = vld [vmem:[#allocation2 + $0x8] sm:$0xff]  ;;  %v7964_v24 = vld [vmem:[#allocation2] sm:$0xff] }
 0x107   : > { %v9102_v29 = vpop.permute.xlu0 %6543  ;;  %6828 = vrot.lane.b32.xlu1 %v8645_v50, %s8020_s16  ;;  %v6837_v16 = vpack.i.bf16 %v7960_v32, %v7959_v21  ;;  %v9166_v40 = vsel %vm312_vm0, %v7963_v28, %v6306_v52  ;;  %v12851_v28 = vld [vmem:[#allocation5_spill] sm:$0xff] }
 0x108   : > { %v9107_v0 = vsel %vm1524_vm7, %v1522_v6, %v6540_v56  ;;  %v9110_v54 = vsel %vm1524_vm7, %v1523_v10, %v6541_v51 }
 0x109   : > { %6833 = vrot.lane.b32.xlu0 %v8698_v49, %s8021_s19  ;;  %v9114_v30 = vpop.permute.xlu1 %6548 }
 0x10b   : > { %v9116_v35 = vpop.permute.xlu0 %6553  ;;  %6838 = vrot.lane.b32.xlu1 %v6837_v16, %s8021_s19  ;;  %v7965_v16 = vld [vmem:[#allocation2 + $0x38] sm:$0xff] }
 0x10c   : > { %v9185_v8 = vsel %vm312_vm0, %v7965_v16, %v6316_v14 }
 0x10d   : > { %6843 = vrot.lane.b32.xlu0 %v12815_v5, %s8022_s20  ;;  %v9121_v34 = vpop.permute.xlu1 %6558 }
 0x10f   : > { %v9123_v53 = vpop.permute.xlu0 %6563  ;;  %6848 = vrot.lane.b32.xlu1 %v8495_v25, %s8022_s20  ;;  %v674_v25 = vrot.slane %v8629_v44, 2 }
 0x111   : > { %6853 = vrot.lane.b32.xlu0 %v8645_v50, %s8023_s21  ;;  %v9129_v49 = vpop.permute.xlu1 %6568  ;;  %v676_v50 = vrot.slane %v8621_v11, 2  ;;  %v675_v39 = vsel %vm584_vm3, %v673_v13, %v674_v25  ;;  %v454_v13 = vld [vmem:[#allocation2 + $0x1a8] sm:$0x3] }
 0x113   : > { %v9131_v42 = vpop.permute.xlu0 %6573  ;;  %6858 = vrot.lane.b32.xlu1 %v8649_v60, %s8023_s21  ;;  %v677_v11 = vsel %vm584_vm3, %v674_v25, %v676_v50  ;;  %v7966_v50 = vld [vmem:[#allocation2 + $0x30] sm:$0xff] }
 0x114   : > { %v9174_v56 = vpack.i.bf16 %v677_v11, %v675_v39  ;;  %v7967_v39 = vld [vmem:[#allocation2 + $0x20] sm:$0xff]  ;;  %v6320_v11 = vunpack.i.l.bf16 %v8732_v46 }
 0x115   : > { %6863 = vrot.lane.b32.xlu0 %v8649_v60, %s8020_s16  ;;  %v9137_v5 = vpop.permute.xlu1 %6578  ;;  %v6305_v60 = vunpack.i.l.bf16 %v8722_v26 }
 0x117   : > { %v9142_v41 = vpop.permute.xlu0 %6583  ;;  %6868 = vrot.lane.b32.xlu1 %v8655_v61, %s8020_s16  ;;  %v9169_v51 = vsel %vm312_vm0, %v7964_v24, %v6305_v60  ;;  %v681_v60 = vrot.slane %v9161_v12, 1  ;;  %v6326_v24 = vunpack.i.h.bf16 %v12851_v28 }
 0x119   : > { %6873 = vrot.lane.b32.xlu0 %v6872_v17, %s8021_s19  ;;  %v6589_v58 = vpop.permute.xlu1 %6588 }
 0x11a   : > { %v6591_v62 = vunpack.i.h.bf16 %v6589_v58  ;;  %v6590_v44 = vunpack.i.l.bf16 %v6589_v58 }
 0x11b   : > { %v6594_v18 = vpop.permute.xlu0 %6593  ;;  %6878 = vrot.lane.b32.xlu1 %v6877_v22, %s8021_s19 }
 0x11c   : > { %v9155_v7 = vsel %vm1557_vm8, %v9033_v45, %v6590_v44  ;;  %v9159_v26 = vsel %vm1557_vm8, %v9036_v63, %v6591_v62  ;;  %v6596_v4 = vunpack.i.h.bf16 %v6594_v18  ;;  %v6595_v20 = vunpack.i.l.bf16 %v6594_v18 }
 0x11d   : > { %v6315_v45 = vunpack.i.l.bf16 %v8726_v19  ;;  %6883 = vrot.lane.b32.xlu0 %v12817_v23, %s8022_s20  ;;  %v6599_v63 = vpop.permute.xlu1 %6598  ;;  %v6311_v19 = vunpack.i.h.bf16 %v8728_v59  ;;  %v684_v18 = vrot.slane %v454_v13, 1 }
 0x11e   : > { %v9178_v10 = vsel %vm1557_vm8, %v9045_v43, %v6595_v20  ;;  %v9182_v6 = vsel %vm1557_vm8, %v9048_v47, %v6596_v4  ;;  %v6601_v21 = vunpack.i.h.bf16 %v6599_v63  ;;  %v6600_v32 = vunpack.i.l.bf16 %v6599_v63 }
 0x11f   : > { %v6604_v23 = vpop.permute.xlu0 %6603  ;;  %6888 = vrot.lane.b32.xlu1 %v12818_v33, %s8022_s20  ;;  %v6917_v43 = vpack.i.bf16 %v9163_v36, %v9161_v12  ;;  %v9201_v22 = vsel %vm312_vm0, %v7966_v50, %v6315_v45  ;;  %v6310_v33 = vunpack.i.l.bf16 %v8728_v59  ;;  %v1462_v59 = vsel %vm312_vm0, %v7967_v39, %v6311_v19  ;;  %v7968_v19 = vld [vmem:[#allocation2 + $0x18] sm:$0xff] }
 0x120   : > { %v9194_v27 = vsel %vm1557_vm8, %v9057_v2, %v6600_v32  ;;  %v9198_v47 = vsel %vm1557_vm8, %v9060_v15, %v6601_v21  ;;  %v6606_v17 = vunpack.i.h.bf16 %v6604_v23  ;;  %v6605_v25 = vunpack.i.l.bf16 %v6604_v23 }
 0x121   : > { %6893 = vrot.lane.b32.xlu0 %v8655_v61, %s8023_s21  ;;  %v6609_v52 = vpop.permute.xlu1 %6608  ;;  %v682_v2 = vrot.slane %v9163_v36, 1  ;;  %v6321_v61 = vunpack.i.h.bf16 %v8732_v46  ;;  %v687_v45 = vrot.slane %v9163_v36, 2  ;;  %v686_v63 = vrot.slane %v9161_v12, 2 }
 0x122   : > { %v9210_v15 = vsel %vm1557_vm8, %v9069_v38, %v6605_v25  ;;  %v9214_v58 = vsel %vm1557_vm8, %v9072_v55, %v6606_v17  ;;  %v6611_v62 = vunpack.i.h.bf16 %v6609_v52  ;;  %v6610_v44 = vunpack.i.l.bf16 %v6609_v52  ;;  %v12854_v52 = vld [vmem:[#allocation16_spill] sm:$0xff] }
 0x123   : > { %v6614_v14 = vpop.permute.xlu0 %6613  ;;  %6898 = vrot.lane.b32.xlu1 %v8663_v57, %s8023_s21  ;;  %v689_v21 = vrot.slane %v454_v13, 2  ;;  %v1461_v23 = vsel %vm312_vm0, %v7968_v19, %v6310_v33  ;;  %v685_v12 = vsel %vm503_vm2, %v682_v2, %v684_v18  ;;  %v688_v39 = vsel %vm584_vm3, %v686_v63, %v687_v45  ;;  %v12857_v18 = vld [vmem:[#allocation12_spill] sm:$0xff] }
 0x124   : > { %v9223_v38 = vsel %vm1557_vm8, %v9081_v3, %v6610_v44  ;;  %v9227_v55 = vsel %vm1557_vm8, %v9084_v37, %v6611_v62  ;;  %v6616_v4 = vunpack.i.h.bf16 %v6614_v14  ;;  %v6615_v20 = vunpack.i.l.bf16 %v6614_v14  ;;  %v12856_v14 = vld [vmem:[#allocation9_spill] sm:$0xff] }
 0x125   : > { %6903 = vrot.lane.b32.xlu0 %v8663_v57, %s8020_s16  ;;  %v6619_v46 = vpop.permute.xlu1 %6618  ;;  %v12852_v57 = vld [vmem:[#allocation10_spill] sm:$0xff]  ;;  %v6391_v62 = vunpack.i.h.bf16 %v12854_v52  ;;  %v6390_v44 = vunpack.i.l.bf16 %v12854_v52  ;;  %v12860_v52 = vld [vmem:[#allocation17_spill] sm:$0xff] }
 0x126   : > { %v9236_v3 = vsel %vm1557_vm8, %v9095_v48, %v6615_v20  ;;  %v9240_v37 = vsel %vm1557_vm8, %v9098_v31, %v6616_v4  ;;  %v6621_v32 = vunpack.i.h.bf16 %v6619_v46  ;;  %v6620_v16 = vunpack.i.l.bf16 %v6619_v46  ;;  %v12853_v31 = vld [vmem:[#allocation13_spill] sm:$0xff]  ;;  %v12858_v20 = vld [vmem:[#allocation30_spill] sm:$0xff] }
 0x127   : > { %v9245_v17 = vsel %vm312_vm0, %v12852_v57, %v6321_v61  ;;  %v9247_v36 = vpop.permute.xlu0 %6623  ;;  %6908 = vrot.lane.b32.xlu1 %v9174_v56, %s8020_s16  ;;  %v683_v48 = vsel %vm503_vm2, %v681_v60, %v682_v2  ;;  %v6386_v25 = vunpack.i.h.bf16 %v12853_v31  ;;  %v6385_v13 = vunpack.i.l.bf16 %v12853_v31  ;;  %v12855_v60 = vld [vmem:[#allocation20_spill] sm:$0xff] }
 0x128   : > { %v9257_v50 = vsel %vm1557_vm8, %v9107_v0, %v6620_v16  ;;  %v9261_v33 = vsel %vm1557_vm8, %v9110_v54, %v6621_v32  ;;  %v690_v61 = vsel %vm584_vm3, %v687_v45, %v689_v21  ;;  %v9271_v0 = vsel %vm312_vm0, %v12856_v14, %v6320_v11  ;;  %v12859_v16 = vld [vmem:[#allocation31_spill] sm:$0xff] }
 0x129   : > { %6913 = vrot.lane.b32.xlu0 %v12855_v60, %s8021_s19  ;;  %v6629_v2 = vpop.permute.xlu1 %6628  ;;  %v9275_v54 = vsel %vm312_vm0, %v12857_v18, %v6326_v24  ;;  %v6466_v46 = vunpack.i.h.bf16 %v12858_v20  ;;  %v6465_v32 = vunpack.i.l.bf16 %v12858_v20  ;;  %v6470_v19 = vunpack.i.l.bf16 %v12859_v16 }
 0x12a   : > { %v6927_v45 = vpack.i.bf16 %v685_v12, %v683_v48  ;;  %v1493_v11 = vsel %vm1491_vm6, %v9166_v40, %v6386_v25  ;;  %v1492_v24 = vsel %vm1491_vm6, %v9169_v51, %v6385_v13  ;;  %v6937_v63 = vpack.i.bf16 %v690_v61, %v688_v39  ;;  %v12862_v40 = vld [vmem:[#allocation18_spill] sm:$0xff] }
 0x12b   : > { %v9281_v57 = vpop.permute.xlu0 %6633  ;;  %6918 = vrot.lane.b32.xlu1 %v6917_v43, %s8021_s19  ;;  %v1494_v21 = vsel %vm1491_vm6, %v1461_v23, %v6390_v44  ;;  %v1495_v31 = vsel %vm1491_vm6, %v1462_v59, %v6391_v62  ;;  %v6471_v14 = vunpack.i.h.bf16 %v12859_v16  ;;  %v12861_v43 = vld [vmem:[#allocation19_spill] sm:$0xff]  ;;  %v6546_v51 = vunpack.i.h.bf16 %v9102_v29 }
 0x12c   : > { %v6545_v13 = vunpack.i.l.bf16 %v9102_v29  ;;  %v1525_v59 = vsel %vm1524_vm7, %v1492_v24, %v6465_v32  ;;  %v1526_v62 = vsel %vm1524_vm7, %v1493_v11, %v6466_v46  ;;  %v1527_v44 = vsel %vm1524_vm7, %v1494_v21, %v6470_v19 }
 0x12d   : > { %6923 = vrot.lane.b32.xlu0 %v12861_v43, %s8022_s20  ;;  %v6639_v48 = vpop.permute.xlu1 %6638  ;;  %v6551_v61 = vunpack.i.h.bf16 %v9114_v30  ;;  %v6550_v18 = vunpack.i.l.bf16 %v9114_v30  ;;  %v6626_v20 = vunpack.i.h.bf16 %v9247_v36  ;;  %v6625_v16 = vunpack.i.l.bf16 %v9247_v36  ;;  %v12863_v43 = vld [vmem:[#allocation32_spill] sm:$0xff] }
 0x12e   : > { %v1528_v29 = vsel %vm1524_vm7, %v1495_v31, %v6471_v14  ;;  %v6476_v32 = vunpack.i.h.bf16 %v12863_v43  ;;  %v6631_v24 = vunpack.i.h.bf16 %v6629_v2  ;;  %v6630_v46 = vunpack.i.l.bf16 %v6629_v2 }
 0x12f   : > { %v6644_v39 = vpop.permute.xlu0 %6643  ;;  %6928 = vrot.lane.b32.xlu1 %v6927_v45, %s8022_s20  ;;  %v1558_v45 = vsel %vm1557_vm8, %v1525_v59, %v6545_v13  ;;  %v1559_v11 = vsel %vm1557_vm8, %v1526_v62, %v6546_v51  ;;  %v6641_v30 = vunpack.i.h.bf16 %v6639_v48  ;;  %v6640_v21 = vunpack.i.l.bf16 %v6639_v48 }
 0x130   : > { %v6646_v23 = vunpack.i.h.bf16 %v6644_v39  ;;  %v6645_v25 = vunpack.i.l.bf16 %v6644_v39  ;;  %v1560_v31 = vsel %vm1557_vm8, %v1527_v44, %v6550_v18  ;;  %v1561_v2 = vsel %vm1557_vm8, %v1528_v29, %v6551_v61 }
 0x131   : > { %6933 = vrot.lane.b32.xlu0 %v9174_v56, %s8023_s21  ;;  %v6649_v19 = vpop.permute.xlu1 %6648  ;;  %v1591_v56 = vsel %vm1590_vm9, %v1558_v45, %v6625_v16  ;;  %v1592_v14 = vsel %vm1590_vm9, %v1559_v11, %v6626_v20  ;;  %v1593_v13 = vsel %vm1590_vm9, %v1560_v31, %v6630_v46  ;;  %v1594_v51 = vsel %vm1590_vm9, %v1561_v2, %v6631_v24  ;;  %v12865_v31 = vld [vmem:[#allocation11_spill] sm:$0xff] }
 0x132   : > { %v6651_v36 = vunpack.i.h.bf16 %v6649_v19  ;;  %v6650_v12 = vunpack.i.l.bf16 %v6649_v19  ;;  %v1624_v4 = vsel %vm1623_vm10, %v1591_v56, %v6640_v21  ;;  %v1626_v44 = vsel %vm1623_vm10, %v1593_v13, %v6645_v25 }
 0x133   : > { %v6654_v60 = vpop.permute.xlu0 %6653  ;;  %6938 = vrot.lane.b32.xlu1 %v6937_v63, %s8023_s21  ;;  %v1625_v63 = vsel %vm1623_vm10, %v1592_v14, %v6641_v30  ;;  %v1627_v61 = vsel %vm1623_vm10, %v1594_v51, %v6646_v23  ;;  %v6475_v45 = vunpack.i.l.bf16 %v12863_v43  ;;  %v12864_v23 = vunpack.i.l.bf16 %v12851_v28  ;;  %v12867_v14 = vld [vmem:[#allocation33_spill] sm:$0xff] }
 0x134   : > { %v6656_v48 = vunpack.i.h.bf16 %v6654_v60  ;;  %v6655_v59 = vunpack.i.l.bf16 %v6654_v60  ;;  %v1657_v20 = vsel %vm1656_vm11, %v1624_v4, %v6650_v12  ;;  %v1658_v16 = vsel %vm1656_vm11, %v1625_v63, %v6651_v36  ;;  %v12866_v12 = vld [vmem:[#allocation4_spill] sm:$0xff] }
 0x135   : > { %v6659_v62 = vpop.permute.xlu1 %6658  ;;  %v9335_v4 = vsel %vm312_vm0, %v12865_v31, %v12864_v23  ;;  %v6331_v36 = vunpack.i.h.bf16 %v12866_v12  ;;  %v6330_v43 = vunpack.i.l.bf16 %v12866_v12  ;;  %v6481_v13 = vunpack.i.h.bf16 %v12867_v14 }
 0x136   : > { %v6661_v39 = vunpack.i.h.bf16 %v6659_v62  ;;  %v6660_v19 = vunpack.i.l.bf16 %v6659_v62  ;;  %v1659_v11 = vsel %vm1656_vm11, %v1626_v44, %v6655_v59  ;;  %v1660_v30 = vsel %vm1656_vm11, %v1627_v61, %v6656_v48 }
 0x137   : > { %v6664_v18 = vpop.permute.xlu0 %6663  ;;  %v6480_v51 = vunpack.i.l.bf16 %v12867_v14  ;;  %v12868_v59 = vunpack.i.h.bf16 %v12860_v52  ;;  %v6556_v63 = vunpack.i.h.bf16 %v9116_v35  ;;  %v6555_v44 = vunpack.i.l.bf16 %v9116_v35 }
 0x138   : > { %v6666_v29 = vunpack.i.h.bf16 %v6664_v18  ;;  %v6665_v24 = vunpack.i.l.bf16 %v6664_v18  ;;  %v1690_v60 = vsel %vm1689_vm4, %v1657_v20, %v6660_v19  ;;  %v1691_v46 = vsel %vm1689_vm4, %v1658_v16, %v6661_v39 }
 0x139   : > { %v6669_v25 = vpop.permute.xlu1 %6668  ;;  %v1722_v21 = vpack.c.bf16 %v1691_v46, %v1690_v60  ;;  %v1497_v62 = vsel %vm1491_vm6, %v9185_v8, %v12868_v59  ;;  %v12869_v39 = vunpack.i.l.bf16 %v12860_v52  ;;  %v12870_v61 = vunpack.i.h.bf16 %v12862_v40 }
 0x13a   : > { %v1692_v2 = vsel %vm1689_vm4, %v1659_v11, %v6665_v24  ;;  %v1693_v56 = vsel %vm1689_vm4, %v1660_v30, %v6666_v29  ;;  %v12871_v20 = vunpack.i.l.bf16 %v12862_v40  ;;  %v1530_v52 = vsel %vm1524_vm7, %v1497_v62, %v6476_v32 }
 0x13b   : > { %v6674_v48 = vpop.permute.xlu0 %6673  ;;  %6171 = vmatprep.mubr.msk.bf16.mxu0 %vm1765_vm12, %v1722_v21  ;;  %v1723_v28 = vpack.c.bf16 %v1693_v56, %v1692_v2  ;;  %v1496_v19 = vsel %vm1491_vm6, %v9201_v22, %v12869_v39  ;;  %v1499_v18 = vsel %vm1491_vm6, %v9245_v17, %v12870_v61  ;;  %v6561_v29 = vunpack.i.h.bf16 %v9121_v34 }
 0x13c   : > { %v1498_v16 = vsel %vm1491_vm6, %v9271_v0, %v12871_v20  ;;  %v1529_v8 = vsel %vm1524_vm7, %v1496_v19, %v6475_v45  ;;  %v6560_v35 = vunpack.i.l.bf16 %v9121_v34  ;;  %v6636_v24 = vunpack.i.h.bf16 %v9281_v57 }
 0x13d   : > { %6172 = vmatmul.mubr.msk.bf16.vlgmr.msra.gmra.mrb[0].mxu0 %vm1765_vm12, %v1723_v28  ;;  %v6679_v22 = vpop.permute.xlu1 %6678  ;;  %v6635_v17 = vunpack.i.l.bf16 %v9281_v57  ;;  %v1531_v40 = vsel %vm1524_vm7, %v1498_v16, %v6480_v51  ;;  %v1532_v60 = vsel %vm1524_vm7, %v1499_v18, %v6481_v13  ;;  %v6671_v0 = vunpack.i.h.bf16 %v6669_v25 }
 0x13e   : > { %v6670_v46 = vunpack.i.l.bf16 %v6669_v25  ;;  %v1562_v32 = vsel %vm1557_vm8, %v1529_v8, %v6555_v44  ;;  %v1563_v11 = vsel %vm1557_vm8, %v1530_v52, %v6556_v63  ;;  %v6676_v30 = vunpack.i.h.bf16 %v6674_v48 }
 0x13f   : > { %v6684_v45 = vpop.permute.xlu0 %6683  ;;  %v6675_v21 = vunpack.i.l.bf16 %v6674_v48  ;;  %v6681_v23 = vunpack.i.h.bf16 %v6679_v22  ;;  %v6680_v31 = vunpack.i.l.bf16 %v6679_v22  ;;  %v1564_v57 = vsel %vm1557_vm8, %v1531_v40, %v6560_v35 }
 0x140   : > { %v6686_v34 = vunpack.i.h.bf16 %v6684_v45  ;;  %v6685_v2 = vunpack.i.l.bf16 %v6684_v45  ;;  %v1565_v14 = vsel %vm1557_vm8, %v1532_v60, %v6561_v29  ;;  %v1595_v13 = vsel %vm1590_vm9, %v1562_v32, %v6635_v17  ;;  %v12873_v32 = vld [vmem:[#allocation22_spill] sm:$0xff] }
 0x141   : > { %v6689_v56 = vpop.permute.xlu1 %6688  ;;  %v1596_v25 = vsel %vm1590_vm9, %v1563_v11, %v6636_v24  ;;  %v1597_v51 = vsel %vm1590_vm9, %v1564_v57, %v6670_v46  ;;  %v1598_v28 = vsel %vm1590_vm9, %v1565_v14, %v6671_v0  ;;  %v1628_v39 = vsel %vm1623_vm10, %v1595_v13, %v6675_v21  ;;  %v12872_v24 = vld [vmem:[#allocation21_spill] sm:$0xff]  ;;  %v12875_v14 = vld [vmem:[#allocation15_spill] sm:$0xff] }
 0x142   : > { %v6691_v59 = vunpack.i.h.bf16 %v6689_v56  ;;  %v6690_v62 = vunpack.i.l.bf16 %v6689_v56  ;;  %v1629_v19 = vsel %vm1623_vm10, %v1596_v25, %v6676_v30  ;;  %v1630_v61 = vsel %vm1623_vm10, %v1597_v51, %v6680_v31  ;;  %v12874_v31 = vld [vmem:[#allocation34_spill] sm:$0xff] }
 0x143   : > { %v6694_v48 = vpop.permute.xlu0 %6693  ;;  %v1631_v18 = vsel %vm1623_vm10, %v1598_v28, %v6681_v23  ;;  %v1661_v20 = vsel %vm1656_vm11, %v1628_v39, %v6685_v2  ;;  %v1662_v16 = vsel %vm1656_vm11, %v1629_v19, %v6686_v34  ;;  %v6406_v17 = vunpack.i.h.bf16 %v12872_v24  ;;  %v12876_v25 = vld [vmem:[#allocation14_spill] sm:$0xff] }
 0x144   : > { %v6696_v63 = vunpack.i.h.bf16 %v6694_v48  ;;  %v6695_v44 = vunpack.i.l.bf16 %v6694_v48  ;;  %v1663_v40 = vsel %vm1656_vm11, %v1630_v61, %v6690_v62  ;;  %v1664_v60 = vsel %vm1656_vm11, %v1631_v18, %v6691_v59  ;;  %v12877_v28 = vld [vmem:[#allocation6_spill] sm:$0xff]  ;;  %v12878_v48 = vld [vmem:[#allocation7_spill] sm:$0xff] }
 0x145   : > { %v6699_v8 = vpop.permute.xlu1 %6698  ;;  %v6405_v45 = vunpack.i.l.bf16 %v12872_v24  ;;  %v6411_v11 = vunpack.i.h.bf16 %v12873_v32  ;;  %v6410_v23 = vunpack.i.l.bf16 %v12873_v32  ;;  %v6486_v34 = vunpack.i.h.bf16 %v12874_v31 }
 0x146   : > { %v1694_v52 = vsel %vm1689_vm4, %v1661_v20, %v6695_v44  ;;  %v1695_v22 = vsel %vm1689_vm4, %v1662_v16, %v6696_v63  ;;  %v6701_v29 = vunpack.i.h.bf16 %v6699_v8  ;;  %v6700_v35 = vunpack.i.l.bf16 %v6699_v8  ;;  %v12879_v63 = vld [vmem:[#allocation35_spill] sm:$0xff] }
 0x147   : > { %v6704_v0 = vpop.permute.xlu0 %6703  ;;  %v1724_v46 = vpack.c.bf16 %v1695_v22, %v1694_v52  ;;  %v6485_v2 = vunpack.i.l.bf16 %v12874_v31  ;;  %v1470_v13 = vsel %vm312_vm0, %v12875_v14, %v6331_v36  ;;  %v1469_v51 = vsel %vm312_vm0, %v12876_v25, %v6330_v43 }
 0x148   : > { %v1696_v30 = vsel %vm1689_vm4, %v1663_v40, %v6700_v35  ;;  %v1697_v21 = vsel %vm1689_vm4, %v1664_v60, %v6701_v29  ;;  %v6336_v59 = vunpack.i.h.bf16 %v12877_v28  ;;  %v6335_v62 = vunpack.i.l.bf16 %v12877_v28 }
 0x149   : > { %6175 = vmatprep.mubr.msk.bf16.mxu0 %vm1765_vm12, %v1724_v46  ;;  %v6709_v56 = vpop.permute.xlu1 %6708  ;;  %v1725_v57 = vpack.c.bf16 %v1697_v21, %v1696_v30  ;;  %v6341_v39 = vunpack.i.h.bf16 %v12878_v48  ;;  %v6340_v19 = vunpack.i.l.bf16 %v12878_v48  ;;  %v6491_v44 = vunpack.i.h.bf16 %v12879_v63 }
 0x14a   : > { %v6490_v61 = vunpack.i.l.bf16 %v12879_v63  ;;  %v1500_v12 = vsel %vm1491_vm6, %v9335_v4, %v6405_v45  ;;  %v1501_v36 = vsel %vm1491_vm6, %v9275_v54, %v6406_v17  ;;  %v6566_v43 = vunpack.i.h.bf16 %v9123_v53 }
 0x14b   : > { %v6714_v18 = vpop.permute.xlu0 %6713  ;;  %6176 = vmatmul.mubr.msk.bf16.gmra.mrb[4].mxu0 %vm1765_vm12, %v1725_v57  ;;  %v6565_v20 = vunpack.i.l.bf16 %v9123_v53  ;;  %v1503_v16 = vsel %vm1491_vm6, %v1470_v13, %v6411_v11  ;;  %v1502_v8 = vsel %vm1491_vm6, %v1469_v51, %v6410_v23  ;;  %v1533_v52 = vsel %vm1524_vm7, %v1500_v12, %v6485_v2 }
 0x14c   : > { %v1534_v22 = vsel %vm1524_vm7, %v1501_v36, %v6486_v34  ;;  %v6571_v35 = vunpack.i.h.bf16 %v9129_v49  ;;  %v6570_v4 = vunpack.i.l.bf16 %v9129_v49  ;;  %v6706_v24 = vunpack.i.h.bf16 %v6704_v0 }
 0x14d   : > { %v6719_v29 = vpop.permute.xlu1 %6718  ;;  %v6705_v40 = vunpack.i.l.bf16 %v6704_v0  ;;  %v1535_v54 = vsel %vm1524_vm7, %v1502_v8, %v6490_v61  ;;  %v1536_v17 = vsel %vm1524_vm7, %v1503_v16, %v6491_v44  ;;  %v6711_v53 = vunpack.i.h.bf16 %v6709_v56 }
 0x14e   : > { %v6710_v60 = vunpack.i.l.bf16 %v6709_v56  ;;  %v1566_v45 = vsel %vm1557_vm8, %v1533_v52, %v6565_v20  ;;  %v1567_v32 = vsel %vm1557_vm8, %v1534_v22, %v6566_v43  ;;  %v6716_v11 = vunpack.i.h.bf16 %v6714_v18 }
 0x14f   : > { %v6724_v46 = vpop.permute.xlu0 %6723  ;;  %v6715_v30 = vunpack.i.l.bf16 %v6714_v18  ;;  %v6721_v21 = vunpack.i.h.bf16 %v6719_v29  ;;  %v6720_v23 = vunpack.i.l.bf16 %v6719_v29  ;;  %v1568_v0 = vsel %vm1557_vm8, %v1535_v54, %v6570_v4  ;;  %v12880_v4 = vld [vmem:[#allocation23_spill] sm:$0xff] }
 0x150   : > { %v6726_v31 = vunpack.i.h.bf16 %v6724_v46  ;;  %v6725_v34 = vunpack.i.l.bf16 %v6724_v46  ;;  %v1569_v2 = vsel %vm1557_vm8, %v1536_v17, %v6571_v35  ;;  %v1599_v57 = vsel %vm1590_vm9, %v1566_v45, %v6705_v40  ;;  %v12881_v46 = vld [vmem:[#allocation24_spill] sm:$0xff] }
 0x151   : > { %v6729_v49 = vpop.permute.xlu1 %6728  ;;  %v1600_v56 = vsel %vm1590_vm9, %v1567_v32, %v6706_v24  ;;  %v1601_v14 = vsel %vm1590_vm9, %v1568_v0, %v6710_v60  ;;  %v1602_v13 = vsel %vm1590_vm9, %v1569_v2, %v6711_v53  ;;  %v1632_v44 = vsel %vm1623_vm10, %v1599_v57, %v6715_v30  ;;  %v12883_v0 = vld [vmem:[#allocation26_spill] sm:$0xff]  ;;  %v12884_v57 = vld [vmem:[#allocation25_spill] sm:$0xff] }
 0x152   : > { %v6731_v25 = vunpack.i.h.bf16 %v6729_v49  ;;  %v6730_v51 = vunpack.i.l.bf16 %v6729_v49  ;;  %v1633_v61 = vsel %vm1623_vm10, %v1600_v56, %v6716_v11  ;;  %v1634_v36 = vsel %vm1623_vm10, %v1601_v14, %v6720_v23  ;;  %v12885_v14 = vld [vmem:[#allocation29_spill] sm:$0xff] }
 0x153   : > { %v6734_v63 = vpop.permute.xlu0 %6733  ;;  %v1635_v43 = vsel %vm1623_vm10, %v1602_v13, %v6721_v21  ;;  %v1665_v20 = vsel %vm1656_vm11, %v1632_v44, %v6725_v34  ;;  %v1666_v16 = vsel %vm1656_vm11, %v1633_v61, %v6726_v31  ;;  %v6416_v24 = vunpack.i.h.bf16 %v12880_v4  ;;  %v12882_v21 = vld [vmem:[#allocation36_spill] sm:$0xff] }
 0x154   : > { %v6736_v18 = vunpack.i.h.bf16 %v6734_v63  ;;  %v6735_v12 = vunpack.i.l.bf16 %v6734_v63  ;;  %v1667_v40 = vsel %vm1656_vm11, %v1634_v36, %v6730_v51  ;;  %v1668_v54 = vsel %vm1656_vm11, %v1635_v43, %v6731_v25  ;;  %v12886_v25 = vld [vmem:[#allocation28_spill] sm:$0xff] }
 0x155   : > { %v6739_v8 = vpop.permute.xlu1 %6738  ;;  %v6415_v60 = vunpack.i.l.bf16 %v12880_v4  ;;  %v6421_v45 = vunpack.i.h.bf16 %v12881_v46  ;;  %v6420_v30 = vunpack.i.l.bf16 %v12881_v46  ;;  %v6496_v23 = vunpack.i.h.bf16 %v12882_v21 }
 0x156   : > { %v1698_v52 = vsel %vm1689_vm4, %v1665_v20, %v6735_v12  ;;  %v1699_v22 = vsel %vm1689_vm4, %v1666_v16, %v6736_v18  ;;  %v6741_v29 = vunpack.i.h.bf16 %v6739_v8  ;;  %v6740_v35 = vunpack.i.l.bf16 %v6739_v8 }
 0x157   : > { %v6744_v17 = vpop.permute.xlu0 %6743  ;;  %v1726_v53 = vpack.c.bf16 %v1699_v22, %v1698_v52  ;;  %v6495_v31 = vunpack.i.l.bf16 %v12882_v21  ;;  %v1472_v2 = vsel %vm312_vm0, %v12883_v0, %v6336_v59  ;;  %v1471_v56 = vsel %vm312_vm0, %v12884_v57, %v6335_v62 }
 0x158   : > { %v1700_v32 = vsel %vm1689_vm4, %v1667_v40, %v6740_v35  ;;  %v1701_v11 = vsel %vm1689_vm4, %v1668_v54, %v6741_v29  ;;  %v1474_v13 = vsel %vm312_vm0, %v12885_v14, %v6341_v39  ;;  %v1473_v51 = vsel %vm312_vm0, %v12886_v25, %v6340_v19 }
 0x159   : > { %6179 = vmatprep.mubr.msk.bf16.mxu0 %vm1765_vm12, %v1726_v53  ;;  %v6749_v34 = vpop.permute.xlu1 %6748  ;;  %v1727_v49 = vpack.c.bf16 %v1701_v11, %v1700_v32  ;;  %v6501_v63 = vunpack.i.h.bf16 %v8989_v9  ;;  %v6500_v44 = vunpack.i.l.bf16 %v8989_v9  ;;  %v1504_v28 = vsel %vm1491_vm6, %v1471_v56, %v6415_v60 }
 0x15a   : > { %v1505_v62 = vsel %vm1491_vm6, %v1472_v2, %v6416_v24  ;;  %v6576_v61 = vunpack.i.h.bf16 %v9131_v42  ;;  %v6575_v39 = vunpack.i.l.bf16 %v9131_v42  ;;  %v1507_v48 = vsel %vm1491_vm6, %v1474_v13, %v6421_v45 }
 0x15b   : > { %v6754_v59 = vpop.permute.xlu0 %6753  ;;  %6180 = vmatmul.mubr.msk.bf16.gmra.mrb[8].mxu0 %vm1765_vm12, %v1727_v49  ;;  %v1506_v18 = vsel %vm1491_vm6, %v1473_v51, %v6420_v30  ;;  %v1537_v19 = vsel %vm1524_vm7, %v1504_v28, %v6495_v31  ;;  %v1538_v12 = vsel %vm1524_vm7, %v1505_v62, %v6496_v23  ;;  %v6581_v36 = vunpack.i.h.bf16 %v9137_v5 }
 0x15c   : > { %v6580_v43 = vunpack.i.l.bf16 %v9137_v5  ;;  %v6746_v20 = vunpack.i.h.bf16 %v6744_v17  ;;  %v6745_v16 = vunpack.i.l.bf16 %v6744_v17  ;;  %v1539_v8 = vsel %vm1524_vm7, %v1506_v18, %v6500_v44 }
 0x15d   : > { %v6759_v9 = vpop.permute.xlu1 %6758  ;;  %v1540_v52 = vsel %vm1524_vm7, %v1507_v48, %v6501_v63  ;;  %v6751_v42 = vunpack.i.h.bf16 %v6749_v34  ;;  %v6750_v22 = vunpack.i.l.bf16 %v6749_v34  ;;  %v1570_v35 = vsel %vm1557_vm8, %v1537_v19, %v6575_v39 }
 0x15e   : > { %v1571_v4 = vsel %vm1557_vm8, %v1538_v12, %v6576_v61  ;;  %v6756_v24 = vunpack.i.h.bf16 %v6754_v59  ;;  %v6755_v40 = vunpack.i.l.bf16 %v6754_v59  ;;  %v6761_v54 = vunpack.i.h.bf16 %v6759_v9  ;;  %v12887_v12 = vld [vmem:[#allocation8_spill] sm:$0xff] }
 0x15f   : > { %v6764_v29 = vpop.permute.xlu0 %6763  ;;  %v6760_v53 = vunpack.i.l.bf16 %v6759_v9  ;;  %v1572_v17 = vsel %vm1557_vm8, %v1539_v8, %v6580_v43  ;;  %v1573_v45 = vsel %vm1557_vm8, %v1540_v52, %v6581_v36  ;;  %v1603_v32 = vsel %vm1590_vm9, %v1570_v35, %v6745_v16  ;;  %v12888_v16 = vld [vmem:[#allocation27_spill] sm:$0xff] }
 0x160   : > { %v6766_v60 = vunpack.i.h.bf16 %v6764_v29  ;;  %v6765_v46 = vunpack.i.l.bf16 %v6764_v29  ;;  %v1604_v11 = vsel %vm1590_vm9, %v1571_v4, %v6746_v20  ;;  %v1605_v30 = vsel %vm1590_vm9, %v1572_v17, %v6750_v22 }
 0x161   : > { %v6769_v5 = vpop.permute.xlu1 %6768  ;;  %v1606_v21 = vsel %vm1590_vm9, %v1573_v45, %v6751_v42  ;;  %v1636_v49 = vsel %vm1623_vm10, %v1603_v32, %v6755_v40  ;;  %v1637_v0 = vsel %vm1623_vm10, %v1604_v11, %v6756_v24  ;;  %v1638_v56 = vsel %vm1623_vm10, %v1605_v30, %v6760_v53  ;;  %v7969_v24 = vld [vmem:[#allocation2 + $0xc8] sm:$0xff] }
 0x162   : > { %v6771_v23 = vunpack.i.h.bf16 %v6769_v5  ;;  %v6770_v31 = vunpack.i.l.bf16 %v6769_v5  ;;  %v1639_v14 = vsel %vm1623_vm10, %v1606_v21, %v6761_v54  ;;  %v1669_v13 = vsel %vm1656_vm11, %v1636_v49, %v6765_v46  ;;  %v7970_v54 = vld [vmem:[#allocation2 + $0xc0] sm:$0xff] }
 0x163   : > { %v6774_v34 = vpop.permute.xlu0 %6773  ;;  %v1670_v25 = vsel %vm1656_vm11, %v1637_v0, %v6766_v60  ;;  %v6346_v9 = vunpack.i.h.bf16 %v12887_v12  ;;  %v6345_v36 = vunpack.i.l.bf16 %v12887_v12  ;;  %v6426_v8 = vunpack.i.h.bf16 %v12888_v16 }
 0x164   : > { %v6776_v2 = vunpack.i.h.bf16 %v6774_v34  ;;  %v6775_v57 = vunpack.i.l.bf16 %v6774_v34  ;;  %v1671_v62 = vsel %vm1656_vm11, %v1638_v56, %v6770_v31  ;;  %v1672_v61 = vsel %vm1656_vm11, %v1639_v14, %v6771_v23 }
 0x165   : > { %v6779_v51 = vpop.permute.xlu1 %6778  ;;  %v6425_v52 = vunpack.i.l.bf16 %v12888_v16  ;;  %v6506_v42 = vunpack.i.h.bf16 %v9001_v1  ;;  %v6505_v22 = vunpack.i.l.bf16 %v9001_v1  ;;  %v6586_v35 = vunpack.i.h.bf16 %v9142_v41 }
 0x166   : > { %v1702_v63 = vsel %vm1689_vm4, %v1669_v13, %v6775_v57  ;;  %v1703_v44 = vsel %vm1689_vm4, %v1670_v25, %v6776_v2  ;;  %v6781_v59 = vunpack.i.h.bf16 %v6779_v51  ;;  %v6780_v28 = vunpack.i.l.bf16 %v6779_v51 }
 0x167   : > { %v6784_v39 = vpop.permute.xlu0 %6783  ;;  %v1728_v48 = vpack.c.bf16 %v1703_v44, %v1702_v63  ;;  %v6585_v4 = vunpack.i.l.bf16 %v9142_v41  ;;  %v1476_v40 = vsel %vm312_vm0, %v7969_v24, %v6346_v9  ;;  %v1475_v53 = vsel %vm312_vm0, %v7970_v54, %v6345_v36 }
 0x168   : > { %v1704_v18 = vsel %vm1689_vm4, %v1671_v62, %v6780_v28  ;;  %v1705_v19 = vsel %vm1689_vm4, %v1672_v61, %v6781_v59  ;;  %v1508_v46 = vsel %vm1491_vm6, %v1475_v53, %v6425_v52  ;;  %v1509_v5 = vsel %vm1491_vm6, %v1476_v40, %v6426_v8 }
 0x169   : > { %6183 = vmatprep.mubr.msk.bf16.mxu0 %vm1765_vm12, %v1728_v48  ;;  %v6789_v43 = vpop.permute.xlu1 %6788  ;;  %v1729_v20 = vpack.c.bf16 %v1705_v19, %v1704_v18  ;;  %v6786_v17 = vunpack.i.h.bf16 %v6784_v39  ;;  %v6785_v1 = vunpack.i.l.bf16 %v6784_v39  ;;  %v1541_v45 = vsel %vm1524_vm7, %v1508_v46, %v6505_v22 }
 0x16a   : > { %v1542_v32 = vsel %vm1524_vm7, %v1509_v5, %v6506_v42  ;;  %v6791_v11 = vunpack.i.h.bf16 %v6789_v43  ;;  %v6790_v30 = vunpack.i.l.bf16 %v6789_v43  ;;  %v1574_v21 = vsel %vm1557_vm8, %v1541_v45, %v6585_v4 }
 0x16b   : > { %v6794_v29 = vpop.permute.xlu0 %6793  ;;  %6184 = vmatmul.mubr.msk.bf16.gmra.mrb[12].mxu0 %vm1765_vm12, %v1729_v20  ;;  %v1575_v23 = vsel %vm1557_vm8, %v1542_v32, %v6586_v35  ;;  %v1607_v14 = vsel %vm1590_vm9, %v1574_v21, %v6785_v1 }
 0x16c   : > { %v6796_v31 = vunpack.i.h.bf16 %v6794_v29  ;;  %v6795_v34 = vunpack.i.l.bf16 %v6794_v29  ;;  %v1608_v13 = vsel %vm1590_vm9, %v1575_v23, %v6786_v17  ;;  %v1609_v25 = vsel %vm1590_vm9, %v9155_v7, %v6790_v30 }
 0x16d   : > { %v6799_v60 = vpop.permute.xlu1 %6798  ;;  %v1610_v51 = vsel %vm1590_vm9, %v9159_v26, %v6791_v11 }
 0x16e   : > { %v6801_v49 = vunpack.i.h.bf16 %v6799_v60  ;;  %v6800_v0 = vunpack.i.l.bf16 %v6799_v60  ;;  %v1640_v61 = vsel %vm1623_vm10, %v1607_v14, %v6795_v34  ;;  %v1641_v39 = vsel %vm1623_vm10, %v1608_v13, %v6796_v31 }
 0x16f   : > { %v6804_v41 = vpop.permute.xlu0 %6803 }
 0x170   : > { %v6806_v2 = vunpack.i.h.bf16 %v6804_v41  ;;  %v6805_v57 = vunpack.i.l.bf16 %v6804_v41  ;;  %v1642_v48 = vsel %vm1623_vm10, %v1609_v25, %v6800_v0  ;;  %v1643_v18 = vsel %vm1623_vm10, %v1610_v51, %v6801_v49 }
 0x171   : > { %v6809_v56 = vpop.permute.xlu1 %6808 }
 0x172   : > { %v6811_v63 = vunpack.i.h.bf16 %v6809_v56  ;;  %v6810_v44 = vunpack.i.l.bf16 %v6809_v56  ;;  %v1673_v12 = vsel %vm1656_vm11, %v1640_v61, %v6805_v57  ;;  %v1674_v7 = vsel %vm1656_vm11, %v1641_v39, %v6806_v2 }
 0x173   : > { %v6814_v59 = vpop.permute.xlu0 %6813 }
 0x174   : > { %v6816_v28 = vunpack.i.h.bf16 %v6814_v59  ;;  %v6815_v62 = vunpack.i.l.bf16 %v6814_v59  ;;  %v1675_v20 = vsel %vm1656_vm11, %v1642_v48, %v6810_v44  ;;  %v1676_v16 = vsel %vm1656_vm11, %v1643_v18, %v6811_v63 }
 0x175   : > { %v6819_v19 = vpop.permute.xlu1 %6818 }
 0x176   : > { %v6821_v9 = vunpack.i.h.bf16 %v6819_v19  ;;  %v6820_v26 = vunpack.i.l.bf16 %v6819_v19  ;;  %v1706_v36 = vsel %vm1689_vm4, %v1673_v12, %v6815_v62  ;;  %v1707_v43 = vsel %vm1689_vm4, %v1674_v7, %v6816_v28 }
 0x177   : > { %v6824_v8 = vpop.permute.xlu0 %6823  ;;  %v1730_v52 = vpack.c.bf16 %v1707_v43, %v1706_v36 }
 0x178   : > { %v1708_v42 = vsel %vm1689_vm4, %v1675_v20, %v6820_v26  ;;  %v1709_v22 = vsel %vm1689_vm4, %v1676_v16, %v6821_v9  ;;  %v6826_v40 = vunpack.i.h.bf16 %v6824_v8  ;;  %v6825_v54 = vunpack.i.l.bf16 %v6824_v8 }
 0x179   : > { %6187 = vmatprep.mubr.msk.bf16.mxu1 %vm1765_vm12, %v1730_v52  ;;  %v6829_v29 = vpop.permute.xlu1 %6828  ;;  %v1731_v35 = vpack.c.bf16 %v1709_v22, %v1708_v42 }
 0x17a   : > { %v6831_v53 = vunpack.i.h.bf16 %v6829_v29  ;;  %v6830_v60 = vunpack.i.l.bf16 %v6829_v29  ;;  %v1611_v41 = vsel %vm1590_vm9, %v9178_v10, %v6825_v54  ;;  %v1612_v21 = vsel %vm1590_vm9, %v9182_v6, %v6826_v40 }
 0x17b   : > { %v6834_v4 = vpop.permute.xlu0 %6833  ;;  %6188 = vmatmul.mubr.msk.bf16.vlgmr.msra.gmra.mrb[0].mxu1 %vm1765_vm12, %v1731_v35  ;;  %v12889_v40 = vmov 0.0  }
 0x17c   : > { %v6836_v5 = vunpack.i.h.bf16 %v6834_v4  ;;  %v6835_v17 = vunpack.i.l.bf16 %v6834_v4  ;;  %v1613_v23 = vsel %vm1590_vm9, %v9194_v27, %v6830_v60  ;;  %v1614_v31 = vsel %vm1590_vm9, %v9198_v47, %v6831_v53  ;;  %2020 = vst.msk [vmem:[#allocation3 + $0x40] sm:$0x3] %vm2013_vm13, %v12889_v40  ;;  %2014 = vst.msk [vmem:[#allocation3 + $0x10] sm:$0x3] %vm2013_vm13, %v12889_v40 }
 0x17d   : > { %v6839_v24 = vpop.permute.xlu1 %6838  ;;  %2017 = vst.msk [vmem:[#allocation3 + $0x28] sm:$0x3] %vm2013_vm13, %v12889_v40  ;;  %2023 = vst.msk [vmem:[#allocation3 + $0x58] sm:$0x3] %vm2013_vm13, %v12889_v40 }
 0x17e   : > { %v6841_v1 = vunpack.i.h.bf16 %v6839_v24  ;;  %v6840_v45 = vunpack.i.l.bf16 %v6839_v24  ;;  %v1644_v2 = vsel %vm1623_vm10, %v1611_v41, %v6835_v17  ;;  %v1645_v57 = vsel %vm1623_vm10, %v1612_v21, %v6836_v5  ;;  %2026 = vst.msk [vmem:[#allocation3 + $0x70] sm:$0x3] %vm2013_vm13, %v12889_v40  ;;  %2029 = vst.msk [vmem:[#allocation3 + $0x88] sm:$0x3] %vm2013_vm13, %v12889_v40 }
 0x17f   : > { %v6844_v46 = vpop.permute.xlu0 %6843  ;;  %2032 = vst.msk [vmem:[#allocation3 + $0xa0] sm:$0x3] %vm2013_vm13, %v12889_v40  ;;  %2035 = vst.msk [vmem:[#allocation3 + $0xb8] sm:$0x3] %vm2013_vm13, %v12889_v40 }
 0x180   : > { %v6846_v32 = vunpack.i.h.bf16 %v6844_v46  ;;  %v6845_v11 = vunpack.i.l.bf16 %v6844_v46  ;;  %v1646_v10 = vsel %vm1623_vm10, %v1613_v23, %v6840_v45  ;;  %v1647_v13 = vsel %vm1623_vm10, %v1614_v31, %v6841_v1  ;;  %2038 = vst.msk [vmem:[#allocation3 + $0xd0] sm:$0x3] %vm2013_vm13, %v12889_v40  ;;  %2041 = vst.msk [vmem:[#allocation3 + $0xe8] sm:$0x3] %vm2013_vm13, %v12889_v40 }
 0x181   : > { %v6849_v30 = vpop.permute.xlu1 %6848  ;;  %2044 = vst.msk [vmem:[#allocation3 + $0x100] sm:$0x3] %vm2013_vm13, %v12889_v40  ;;  %2047 = vst.msk [vmem:[#allocation3 + $0x118] sm:$0x3] %vm2013_vm13, %v12889_v40 }
 0x182   : > { %v6851_v34 = vunpack.i.h.bf16 %v6849_v30  ;;  %v6850_v49 = vunpack.i.l.bf16 %v6849_v30  ;;  %v1677_v6 = vsel %vm1656_vm11, %v1644_v2, %v6845_v11  ;;  %v1678_v27 = vsel %vm1656_vm11, %v1645_v57, %v6846_v32  ;;  %2050 = vst.msk [vmem:[#allocation3 + $0x130] sm:$0x3] %vm2013_vm13, %v12889_v40  ;;  %2053 = vst.msk [vmem:[#allocation3 + $0x148] sm:$0x3] %vm2013_vm13, %v12889_v40 }
 0x183   : > { %v6854_v0 = vpop.permute.xlu0 %6853  ;;  %2056 = vst.msk [vmem:[#allocation3 + $0x160] sm:$0x3] %vm2013_vm13, %v12889_v40  ;;  %2059 = vst.msk [vmem:[#allocation3 + $0x178] sm:$0x3] %vm2013_vm13, %v12889_v40 }
 0x184   : > { %v6856_v56 = vunpack.i.h.bf16 %v6854_v0  ;;  %v6855_v14 = vunpack.i.l.bf16 %v6854_v0  ;;  %v1679_v59 = vsel %vm1656_vm11, %v1646_v10, %v6850_v49  ;;  %v1680_v28 = vsel %vm1656_vm11, %v1647_v13, %v6851_v34  ;;  %2062 = vst.msk [vmem:[#allocation3 + $0x190] sm:$0x3] %vm2013_vm13, %v12889_v40  ;;  %2065 = vst.msk [vmem:[#allocation3 + $0x1a8] sm:$0x3] %vm2013_vm13, %v12889_v40 }
 0x185   : > { %v6859_v25 = vpop.permute.xlu1 %6858 }
 0x186   : > { %v1710_v47 = vsel %vm1689_vm4, %v1677_v6, %v6855_v14  ;;  %v1711_v51 = vsel %vm1689_vm4, %v1678_v27, %v6856_v56  ;;  %v6861_v63 = vunpack.i.h.bf16 %v6859_v25  ;;  %v6860_v44 = vunpack.i.l.bf16 %v6859_v25  ;;  %v9621_v56 = vld [vmem:[#allocation3] sm:$0xff]  ;;  %v9623_v14 = vld [vmem:[#allocation3 + $0x8] sm:$0xff]  ;;  %v2101_v6 = vld [vmem:[#allocation3 + $0x10] sm:$0x3] }
 0x187   : > { %v6864_v62 = vpop.permute.xlu0 %6863  ;;  %v1732_v61 = vpack.c.bf16 %v1711_v51, %v1710_v47  ;;  %12890 = vst [vmem:[#allocation5_spill] sm:$0xff] %v9621_v56  ;;  %12891 = vst [vmem:[#allocation10_spill] sm:$0xff] %v9623_v14  ;;  %v2201_v27 = vrot.slane %v9621_v56, 1  ;;  %v2202_v25 = vrot.slane %v9623_v14, 1  ;;  %v2204_v51 = vrot.slane %v2101_v6, 1 }
 0x188   : > { %v1712_v39 = vsel %vm1689_vm4, %v1679_v59, %v6860_v44  ;;  %v1713_v48 = vsel %vm1689_vm4, %v1680_v28, %v6861_v63  ;;  %v6866_v9 = vunpack.i.h.bf16 %v6864_v62  ;;  %v6865_v26 = vunpack.i.l.bf16 %v6864_v62  ;;  %3822 = vst.msk [vmem:[#allocation3] sm:$0xff] %vm1689_vm4, %v12889_v40  ;;  %3823 = vst.msk [vmem:[#allocation3 + $0x8] sm:$0xff] %vm1689_vm4, %v12889_v40 }
 0x189   : > { %6191 = vmatprep.mubr.msk.bf16.mxu1 %vm1765_vm12, %v1732_v61  ;;  %v6869_v18 = vpop.permute.xlu1 %6868  ;;  %v1733_v19 = vpack.c.bf16 %v1713_v48, %v1712_v39  ;;  %3824 = vst.msk [vmem:[#allocation3 + $0x10] sm:$0x3] %vm2013_vm13, %v12889_v40  ;;  %v2281_v63 = vrot.slane %v9621_v56, 2  ;;  %v2282_v44 = vrot.slane %v9623_v14, 2  ;;  %v2203_v59 = vsel %vm503_vm2, %v2201_v27, %v2202_v25 }
 0x18a   : > { %v6871_v36 = vunpack.i.h.bf16 %v6869_v18  ;;  %v6870_v43 = vunpack.i.l.bf16 %v6869_v18  ;;  %v1615_v4 = vsel %vm1590_vm9, %v9210_v15, %v6865_v26  ;;  %v1616_v24 = vsel %vm1590_vm9, %v9214_v58, %v6866_v9 }
 0x18b   : > { %v6874_v12 = vpop.permute.xlu0 %6873  ;;  %6192 = vmatmul.mubr.msk.bf16.gmra.mrb[4].mxu1 %vm1765_vm12, %v1733_v19  ;;  %v2205_v62 = vsel %vm503_vm2, %v2202_v25, %v2204_v51  ;;  %v2284_v61 = vrot.slane %v2101_v6, 2  ;;  %v2283_v18 = vsel %vm584_vm3, %v2281_v63, %v2282_v44 }
 0x18c   : > { %v6876_v16 = vunpack.i.h.bf16 %v6874_v12  ;;  %v6875_v8 = vunpack.i.l.bf16 %v6874_v12  ;;  %v1617_v15 = vsel %vm1590_vm9, %v9223_v38, %v6870_v43  ;;  %v1618_v58 = vsel %vm1590_vm9, %v9227_v55, %v6871_v36 }
 0x18d   : > { %v6879_v7 = vpop.permute.xlu1 %6878  ;;  %v6942_v9 = vpack.i.bf16 %v2205_v62, %v2203_v59  ;;  %v2285_v26 = vsel %vm584_vm3, %v2282_v44, %v2284_v61 }
 0x18e   : > { %v6881_v52 = vunpack.i.h.bf16 %v6879_v7  ;;  %v6880_v42 = vunpack.i.l.bf16 %v6879_v7  ;;  %v1648_v46 = vsel %vm1623_vm10, %v1615_v4, %v6875_v8  ;;  %v1649_v5 = vsel %vm1623_vm10, %v1616_v24, %v6876_v16 }
 0x18f   : > { %v6884_v20 = vpop.permute.xlu0 %6883  ;;  %6943 = vrot.lane.b32.xlu0 %v6942_v9, %s8023_s21 }
 0x190   : > { %v6886_v22 = vunpack.i.h.bf16 %v6884_v20  ;;  %v6885_v29 = vunpack.i.l.bf16 %v6884_v20  ;;  %v1650_v45 = vsel %vm1623_vm10, %v1617_v15, %v6880_v42  ;;  %v1651_v32 = vsel %vm1623_vm10, %v1618_v58, %v6881_v52 }
 0x191   : > { %v6889_v35 = vpop.permute.xlu1 %6888 }
 0x192   : > { %v6891_v54 = vunpack.i.h.bf16 %v6889_v35  ;;  %v6890_v53 = vunpack.i.l.bf16 %v6889_v35  ;;  %v1681_v11 = vsel %vm1656_vm11, %v1648_v46, %v6885_v29  ;;  %v1682_v38 = vsel %vm1656_vm11, %v1649_v5, %v6886_v22 }
 0x193   : > { %v6894_v60 = vpop.permute.xlu0 %6893  ;;  %v6947_v22 = vpack.i.bf16 %v2285_v26, %v2283_v18 }
 0x194   : > { %v6896_v17 = vunpack.i.h.bf16 %v6894_v60  ;;  %v6895_v1 = vunpack.i.l.bf16 %v6894_v60  ;;  %v1683_v31 = vsel %vm1656_vm11, %v1650_v45, %v6890_v53  ;;  %v1684_v34 = vsel %vm1656_vm11, %v1651_v32, %v6891_v54 }
 0x195   : > { %v6899_v30 = vpop.permute.xlu1 %6898  ;;  %6948 = vrot.lane.b32.xlu1 %v6947_v22, %s8024_s22 }
 0x196   : > { %v1714_v55 = vsel %vm1689_vm4, %v1681_v11, %v6895_v1  ;;  %v1715_v41 = vsel %vm1689_vm4, %v1682_v38, %v6896_v17  ;;  %v6901_v21 = vunpack.i.h.bf16 %v6899_v30  ;;  %v6900_v23 = vunpack.i.l.bf16 %v6899_v30 }
 0x197   : > { %v6904_v49 = vpop.permute.xlu0 %6903  ;;  %v1734_v0 = vpack.c.bf16 %v1715_v41, %v1714_v55 }
 0x198   : > { %v1716_v2 = vsel %vm1689_vm4, %v1683_v31, %v6900_v23  ;;  %v1717_v57 = vsel %vm1689_vm4, %v1684_v34, %v6901_v21  ;;  %v6906_v39 = vunpack.i.h.bf16 %v6904_v49  ;;  %v6905_v48 = vunpack.i.l.bf16 %v6904_v49  ;;  %v7905_v31 = vld [vmem:[%s12576_s3 + $0x80] sm:$0xff]   ;;  %v7906_v34 = vld [vmem:[%s12576_s3 + $0x88] sm:$0xff]  }
 0x199   : > { %6195 = vmatprep.mubr.msk.bf16.mxu1 %vm1765_vm12, %v1734_v0  ;;  %v6909_v10 = vpop.permute.xlu1 %6908  ;;  %v1735_v13 = vpack.c.bf16 %v1717_v57, %v1716_v2  ;;  %6203 = vmatprep.subr.bf16.mxu0 %v7905_v31  ;;  %v9674_v49 = vld [vmem:[%s12575_s2] ss:$0 sm:$0xff] }
 0x19a   : > { %v6911_v19 = vunpack.i.h.bf16 %v6909_v10  ;;  %v6910_v12 = vunpack.i.l.bf16 %v6909_v10  ;;  %v1619_v29 = vsel %vm1590_vm9, %v9236_v3, %v6905_v48  ;;  %v1620_v35 = vsel %vm1590_vm9, %v9240_v37, %v6906_v39  ;;  %6204 = vmatpush3.bf16.msra.mxu0 %v7905_v31 }
 0x19b   : > { %v6914_v47 = vpop.permute.xlu0 %6913  ;;  %6196 = vmatmul.mubr.msk.bf16.gmra.mrb[8].mxu1 %vm1765_vm12, %v1735_v13  ;;  %6205 = vmatprep.subr.bf16.mxu0 %v7906_v34 }
 0x19c   : > { %v6916_v36 = vunpack.i.h.bf16 %v6914_v47  ;;  %v6915_v43 = vunpack.i.l.bf16 %v6914_v47  ;;  %v1621_v4 = vsel %vm1590_vm9, %v9257_v50, %v6910_v12  ;;  %v1622_v24 = vsel %vm1590_vm9, %v9261_v33, %v6911_v19 }
 0x19d   : > { %v6919_v28 = vpop.permute.xlu1 %6918 }
 0x19e   : > { %v6921_v20 = vunpack.i.h.bf16 %v6919_v28  ;;  %v6920_v16 = vunpack.i.l.bf16 %v6919_v28  ;;  %v1652_v53 = vsel %vm1623_vm10, %v1619_v29, %v6915_v43  ;;  %v1653_v60 = vsel %vm1623_vm10, %v1620_v35, %v6916_v36  ;;  %6206 = vmatpush3.bf16.msra.mxu0 %v7906_v34 }
 0x19f   : > { %v6924_v7 = vpop.permute.xlu0 %6923 }
 0x1a0   : > { %v6926_v8 = vunpack.i.h.bf16 %v6924_v7  ;;  %v6925_v52 = vunpack.i.l.bf16 %v6924_v7  ;;  %v1654_v37 = vsel %vm1623_vm10, %v1621_v4, %v6920_v16  ;;  %v1655_v5 = vsel %vm1623_vm10, %v1622_v24, %v6921_v20 }
 0x1a1   : > { %v6929_v42 = vpop.permute.xlu1 %6928 }
 0x1a2   : > { %v6931_v15 = vunpack.i.h.bf16 %v6929_v42  ;;  %v6930_v58 = vunpack.i.l.bf16 %v6929_v42  ;;  %v1685_v50 = vsel %vm1656_vm11, %v1652_v53, %v6925_v52  ;;  %v1686_v33 = vsel %vm1656_vm11, %v1653_v60, %v6926_v8 }
 0x1a3   : > { %v6934_v54 = vpop.permute.xlu0 %6933 }
 0x1a4   : > { %v6936_v3 = vunpack.i.h.bf16 %v6934_v54  ;;  %v6935_v46 = vunpack.i.l.bf16 %v6934_v54  ;;  %v1687_v38 = vsel %vm1656_vm11, %v1654_v37, %v6930_v58  ;;  %v1688_v30 = vsel %vm1656_vm11, %v1655_v5, %v6931_v15 }
 0x1a5   : > { %v6939_v17 = vpop.permute.xlu1 %6938 }
 0x1a6   : > { %v1718_v1 = vsel %vm1689_vm4, %v1685_v50, %v6935_v46  ;;  %v1719_v45 = vsel %vm1689_vm4, %v1686_v33, %v6936_v3  ;;  %v6941_v32 = vunpack.i.h.bf16 %v6939_v17  ;;  %v6940_v11 = vunpack.i.l.bf16 %v6939_v17 }
 0x1a7   : > { %v1736_v55 = vpack.c.bf16 %v1719_v45, %v1718_v1 }
 0x1a8   : > { %v1720_v41 = vsel %vm1689_vm4, %v1687_v38, %v6940_v11  ;;  %v1721_v21 = vsel %vm1689_vm4, %v1688_v30, %v6941_v32 }
 0x1a9   : > { %6199 = vmatprep.mubr.msk.bf16.mxu1 %vm1765_vm12, %v1736_v55  ;;  %v1737_v23 = vpack.c.bf16 %v1721_v21, %v1720_v41 }
 0x1ab   : > { %6200 = vmatmul.mubr.msk.bf16.gmra.mrb[12].mxu1 %vm1765_vm12, %v1737_v23 }
 0x210   : > { %v6173_v0 = vpop.f32.mrb[0].mxu0 }
 0x211   : > { %v9677_v2 = vadd.f32 %v6173_v0, %v9674_v49  ;;  %v1852_v57 = vpop.f32.mrb[1].mxu0 }
 0x212   : > { %v9680_v10 = vadd.f32 %v9674_v49, %v1852_v57  ;;  %v6174_v13 = vpop.f32.mrb[2].mxu0 }
 0x213   : > { %12892 = vst [vmem:[#allocation13_spill] sm:$0xff] %v9677_v2  ;;  %v12657_v6 = vmax.f32 %v9677_v2, 0.0  ;;  %v9684_v27 = vadd.f32 %v6174_v13, %v9674_v49  ;;  %v1855_v25 = vpop.f32.mrb[3].mxu0 }
 0x214   : > { %12893 = vst [vmem:[#allocation16_spill] sm:$0xff] %v9680_v10  ;;  %v12661_v47 = vmax.f32 %v9680_v10, 0.0  ;;  %v9688_v51 = vadd.f32 %v9674_v49, %v1855_v25 }
 0x215   : > { %12894 = vst [vmem:[#allocation20_spill] sm:$0xff] %v9684_v27  ;;  %2069 = vst.msk [vmem:[#allocation3 + $0x31] sm:$0xff] %vm1689_vm4, %v12657_v6  ;;  %v12654_v63 = vmax.f32 %v9684_v27, 0.0 }
 0x216   : > { %12895 = vst [vmem:[#allocation9_spill] sm:$0xff] %v9688_v51  ;;  %2067 = vst.msk [vmem:[#allocation3 + $0x19] sm:$0xff] %vm1689_vm4, %v12661_v47  ;;  %v12660_v44 = vmax.f32 %v9688_v51, 0.0 }
 0x217   : > { %2070 = vst.msk [vmem:[#allocation3 + $0x39] sm:$0xff] %vm1689_vm4, %v12654_v63 }
 0x218   : > { %2068 = vst.msk [vmem:[#allocation3 + $0x21] sm:$0xff] %vm1689_vm4, %v12660_v44 }
 0x21c   : > { %v9704_v59 = vld [vmem:[#allocation3 + $0x30] sm:$0xff] }
 0x21d   : > { %12896 = vst [vmem:[#allocation12_spill] sm:$0xff] %v9704_v59  ;;  %3828 = vst.msk [vmem:[#allocation3 + $0x30] sm:$0xff] %vm1689_vm4, %v12889_v40  ;;  %v9708_v28 = vld [vmem:[#allocation3 + $0x18] sm:$0xff]  ;;  %v2291_v48 = vrot.slane %v9704_v59, 2 }
 0x21e   : > { %12897 = vst [vmem:[#allocation30_spill] sm:$0xff] %v9708_v28  ;;  %v9710_v62 = vld [vmem:[#allocation3 + $0x38] sm:$0xff]  ;;  %v9712_v61 = vld [vmem:[#allocation3 + $0x40] sm:$0x3]  ;;  %v6177_v39 = vpop.f32.mrb[4].mxu0  ;;  %3825 = vst.msk [vmem:[#allocation3 + $0x18] sm:$0xff] %vm1689_vm4, %v12889_v40 }
 0x21f   : > { %12898 = vst [vmem:[#allocation31_spill] sm:$0xff] %v9710_v62  ;;  %3829 = vst.msk [vmem:[#allocation3 + $0x38] sm:$0xff] %vm1689_vm4, %v12889_v40  ;;  %v9721_v18 = vld [vmem:[#allocation3 + $0x28] sm:$0x3]  ;;  %v9724_v19 = vadd.f32 %v6177_v39, %v9674_v49  ;;  %v1868_v12 = vpop.f32.mrb[5].mxu0  ;;  %v6952_v7 = vpack.i.bf16 %v9710_v62, %v9704_v59  ;;  %v9728_v9 = vld [vmem:[#allocation3 + $0x20] sm:$0xff] }
 0x220   : > { %3830 = vst.msk [vmem:[#allocation3 + $0x40] sm:$0x3] %vm2013_vm13, %v12889_v40  ;;  %12900 = vst [vmem:[#allocation19_spill] sm:$0xff] %v9728_v9  ;;  %v2292_v26 = vrot.slane %v9710_v62, 2  ;;  %v2294_v36 = vrot.slane %v9712_v61, 2  ;;  %v9735_v43 = vadd.f32 %v9674_v49, %v1868_v12  ;;  %v6178_v20 = vpop.f32.mrb[6].mxu0  ;;  %v6962_v16 = vpack.i.bf16 %v9728_v9, %v9708_v28 }
 0x221   : > { %12899 = vst [vmem:[#allocation17_spill] sm:$0xff] %v9724_v19  ;;  %3827 = vst.msk [vmem:[#allocation3 + $0x28] sm:$0x3] %vm2013_vm13, %v12889_v40  ;;  %v12651_v8 = vmax.f32 %v9724_v19, 0.0  ;;  %6953 = vrot.lane.b32.xlu0 %v6952_v7, %s8024_s22  ;;  %v9744_v52 = vadd.f32 %v6178_v20, %v9674_v49  ;;  %v1871_v42 = vpop.f32.mrb[7].mxu0 }
 0x222   : > { %12901 = vst [vmem:[#allocation18_spill] sm:$0xff] %v9735_v43  ;;  %3826 = vst.msk [vmem:[#allocation3 + $0x20] sm:$0xff] %vm1689_vm4, %v12889_v40  ;;  %v9747_v22 = vsel %vm584_vm3, %v2291_v48, %v2292_v26  ;;  %v9750_v29 = vsel %vm584_vm3, %v2292_v26, %v2294_v36  ;;  %v12653_v35 = vmax.f32 %v9735_v43, 0.0  ;;  %v9754_v4 = vadd.f32 %v9674_v49, %v1871_v42 }
 0x223   : > { %12902 = vst [vmem:[#allocation32_spill] sm:$0xff] %v9744_v52  ;;  %6963 = vrot.lane.b32.xlu1 %v6962_v16, %s8025_s8  ;;  %v3223_v24 = vpack.c.bf16 %v9750_v29, %v9747_v22  ;;  %2073 = vst.msk [vmem:[#allocation3 + $0x61] sm:$0xff] %vm1689_vm4, %v12651_v8  ;;  %v12650_v15 = vmax.f32 %v9744_v52, 0.0 }
 0x224   : > { %12903 = vst [vmem:[#allocation11_spill] sm:$0xff] %v9754_v4  ;;  %2071 = vst.msk [vmem:[#allocation3 + $0x49] sm:$0xff] %vm1689_vm4, %v12653_v35  ;;  %v12652_v54 = vmax.f32 %v9754_v4, 0.0 }
 0x225   : > { %6207 = vmatprep.mubr.msk.bf16.mxu0 %vm1689_vm4, %v3223_v24  ;;  %2074 = vst.msk [vmem:[#allocation3 + $0x69] sm:$0xff] %vm1689_vm4, %v12650_v15  ;;  %6958 = vrot.lane.b32.xlu0 %v6952_v7, %s8025_s8 }
 0x226   : > { %2072 = vst.msk [vmem:[#allocation3 + $0x51] sm:$0xff] %vm1689_vm4, %v12652_v54 }
 0x22a   : > { %v9777_v53 = vld [vmem:[#allocation3 + $0x60] sm:$0xff] }
 0x22b   : > { %12904 = vst [vmem:[#allocation4_spill] sm:$0xff] %v9777_v53  ;;  %3834 = vst.msk [vmem:[#allocation3 + $0x60] sm:$0xff] %vm1689_vm4, %v12889_v40  ;;  %v9781_v60 = vld [vmem:[#allocation3 + $0x48] sm:$0xff]  ;;  %v2301_v50 = vrot.slane %v9777_v53, 2 }
 0x22c   : > { %12905 = vst [vmem:[#allocation33_spill] sm:$0xff] %v9781_v60  ;;  %3831 = vst.msk [vmem:[#allocation3 + $0x48] sm:$0xff] %vm1689_vm4, %v12889_v40  ;;  %v9785_v3 = vld [vmem:[#allocation3 + $0x68] sm:$0xff]  ;;  %v9787_v46 = vld [vmem:[#allocation3 + $0x70] sm:$0x3]  ;;  %v2296_v45 = vrot.slane %v9781_v60, 2 }
 0x22d   : > { %12906 = vst [vmem:[#allocation21_spill] sm:$0xff] %v9785_v3  ;;  %3835 = vst.msk [vmem:[#allocation3 + $0x68] sm:$0xff] %vm1689_vm4, %v12889_v40  ;;  %v9793_v37 = vld [vmem:[#allocation3 + $0x50] sm:$0xff]  ;;  %v9795_v5 = vld [vmem:[#allocation3 + $0x58] sm:$0x3]  ;;  %v2302_v33 = vrot.slane %v9785_v3, 2 }
 0x22e   : > { %3836 = vst.msk [vmem:[#allocation3 + $0x70] sm:$0x3] %vm2013_vm13, %v12889_v40  ;;  %12907 = vst [vmem:[#allocation22_spill] sm:$0xff] %v9793_v37  ;;  %v2304_v17 = vrot.slane %v9787_v46, 2  ;;  %v6181_v1 = vpop.f32.mrb[8].mxu0  ;;  %v2297_v32 = vrot.slane %v9793_v37, 2 }
 0x22f   : > { %3832 = vst.msk [vmem:[#allocation3 + $0x50] sm:$0xff] %vm1689_vm4, %v12889_v40  ;;  %v2299_v11 = vrot.slane %v9795_v5, 2  ;;  %v9808_v38 = vadd.f32 %v6181_v1, %v9674_v49  ;;  %v1884_v30 = vpop.f32.mrb[9].mxu0  ;;  %v9811_v55 = vsel %vm584_vm3, %v2301_v50, %v2302_v33 }
 0x230   : > { %3833 = vst.msk [vmem:[#allocation3 + $0x58] sm:$0x3] %vm2013_vm13, %v12889_v40  ;;  %v9814_v41 = vsel %vm584_vm3, %v2302_v33, %v2304_v17  ;;  %v9817_v21 = vadd.f32 %v9674_v49, %v1884_v30  ;;  %v6182_v23 = vpop.f32.mrb[10].mxu0  ;;  %v9820_v31 = vsel %vm584_vm3, %v2296_v45, %v2297_v32 }
 0x231   : > { %12908 = vst [vmem:[#allocation34_spill] sm:$0xff] %v9808_v38  ;;  %v9823_v34 = vsel %vm584_vm3, %v2297_v32, %v2299_v11  ;;  %v12647_v0 = vmax.f32 %v9808_v38, 0.0  ;;  %v9827_v57 = vadd.f32 %v6182_v23, %v9674_v49  ;;  %v1887_v13 = vpop.f32.mrb[11].mxu0  ;;  %v3229_v12 = vpack.c.bf16 %v9814_v41, %v9811_v55 }
 0x232   : > { %12909 = vst [vmem:[#allocation15_spill] sm:$0xff] %v9817_v21  ;;  %v3226_v25 = vpack.c.bf16 %v9823_v34, %v9820_v31  ;;  %v12649_v39 = vmax.f32 %v9817_v21, 0.0  ;;  %v9833_v48 = vadd.f32 %v9674_v49, %v1887_v13 }
 0x233   : > { %12910 = vst [vmem:[#allocation14_spill] sm:$0xff] %v9827_v57  ;;  %2077 = vst.msk [vmem:[#allocation3 + $0x91] sm:$0xff] %vm1689_vm4, %v12647_v0  ;;  %v12646_v7 = vmax.f32 %v9827_v57, 0.0 }
 0x234   : > { %12911 = vst [vmem:[#allocation6_spill] sm:$0xff] %v9833_v48  ;;  %6208 = vmatmul.mubr.msk.bf16.vlgmr.msra.gmra.mrb[16].mxu0 %vm1689_vm4, %v3226_v25  ;;  %2075 = vst.msk [vmem:[#allocation3 + $0x79] sm:$0xff] %vm1689_vm4, %v12649_v39  ;;  %v12648_v36 = vmax.f32 %v9833_v48, 0.0 }
 0x235   : > { %6211 = vmatprep.mubr.msk.bf16.mxu0 %vm1689_vm4, %v3229_v12  ;;  %2078 = vst.msk [vmem:[#allocation3 + $0x99] sm:$0xff] %vm1689_vm4, %v12646_v7 }
 0x236   : > { %2076 = vst.msk [vmem:[#allocation3 + $0x81] sm:$0xff] %vm1689_vm4, %v12648_v36 }
 0x23a   : > { %v9861_v24 = vld [vmem:[#allocation3 + $0x90] sm:$0xff] }
 0x23b   : > { %12912 = vst [vmem:[#allocation7_spill] sm:$0xff] %v9861_v24  ;;  %3840 = vst.msk [vmem:[#allocation3 + $0x90] sm:$0xff] %vm1689_vm4, %v12889_v40  ;;  %v9865_v50 = vld [vmem:[#allocation3 + $0x78] sm:$0xff]  ;;  %v2311_v32 = vrot.slane %v9861_v24, 2 }
 0x23c   : > { %3837 = vst.msk [vmem:[#allocation3 + $0x78] sm:$0xff] %vm1689_vm4, %v12889_v40  ;;  %v9869_v33 = vld [vmem:[#allocation3 + $0x98] sm:$0xff]  ;;  %v9871_v17 = vld [vmem:[#allocation3 + $0xa0] sm:$0x3]  ;;  %v2306_v13 = vrot.slane %v9865_v50, 2 }
 0x23d   : > { %12913 = vst [vmem:[#allocation35_spill] sm:$0xff] %v9869_v33  ;;  %3841 = vst.msk [vmem:[#allocation3 + $0x98] sm:$0xff] %vm1689_vm4, %v12889_v40  ;;  %v9877_v1 = vld [vmem:[#allocation3 + $0x80] sm:$0xff]  ;;  %v9879_v45 = vld [vmem:[#allocation3 + $0x88] sm:$0x3]  ;;  %v2312_v11 = vrot.slane %v9869_v33, 2 }
 0x23e   : > { %3842 = vst.msk [vmem:[#allocation3 + $0xa0] sm:$0x3] %vm2013_vm13, %v12889_v40  ;;  %v2314_v30 = vrot.slane %v9871_v17, 2  ;;  %3839 = vst.msk [vmem:[#allocation3 + $0x88] sm:$0x3] %vm2013_vm13, %v12889_v40  ;;  %v6185_v23 = vpop.f32.mrb[12].mxu0 }
 0x23f   : > { %3838 = vst.msk [vmem:[#allocation3 + $0x80] sm:$0xff] %vm1689_vm4, %v12889_v40  ;;  %v2307_v25 = vrot.slane %v9877_v1, 2  ;;  %v2309_v12 = vrot.slane %v9879_v45, 2  ;;  %v9892_v7 = vadd.f32 %v6185_v23, %v9674_v49  ;;  %v1900_v0 = vpop.f32.mrb[13].mxu0  ;;  %v9895_v36 = vsel %vm584_vm3, %v2311_v32, %v2312_v11 }
 0x240   : > { %v9898_v39 = vsel %vm584_vm3, %v2312_v11, %v2314_v30  ;;  %v9901_v15 = vadd.f32 %v9674_v49, %v1900_v0  ;;  %v6186_v8 = vpop.f32.mrb[14].mxu0 }
 0x241   : > { %12914 = vst [vmem:[#allocation23_spill] sm:$0xff] %v9892_v7  ;;  %v9904_v54 = vsel %vm584_vm3, %v2306_v13, %v2307_v25  ;;  %v9907_v35 = vsel %vm584_vm3, %v2307_v25, %v2309_v12  ;;  %v12655_v23 = vmax.f32 %v9892_v7, 0.0  ;;  %v9911_v63 = vadd.f32 %v6186_v8, %v9674_v49  ;;  %v1903_v32 = vpop.f32.mrb[15].mxu0 }
 0x242   : > { %12915 = vst [vmem:[#allocation24_spill] sm:$0xff] %v9901_v15  ;;  %v3232_v11 = vpack.c.bf16 %v9907_v35, %v9904_v54  ;;  %v12656_v30 = vmax.f32 %v9901_v15, 0.0  ;;  %v9917_v0 = vadd.f32 %v9674_v49, %v1903_v32  ;;  %v3235_v13 = vpack.c.bf16 %v9898_v39, %v9895_v36 }
 0x243   : > { %12916 = vst [vmem:[#allocation36_spill] sm:$0xff] %v9911_v63  ;;  %2081 = vst.msk [vmem:[#allocation3 + $0xc1] sm:$0xff] %vm1689_vm4, %v12655_v23  ;;  %v12658_v25 = vmax.f32 %v9911_v63, 0.0 }
 0x244   : > { %12917 = vst [vmem:[#allocation26_spill] sm:$0xff] %v9917_v0  ;;  %6212 = vmatmul.mubr.msk.bf16.gmra.mrb[20].mxu0 %vm1689_vm4, %v3232_v11  ;;  %2079 = vst.msk [vmem:[#allocation3 + $0xa9] sm:$0xff] %vm1689_vm4, %v12656_v30  ;;  %v12659_v12 = vmax.f32 %v9917_v0, 0.0 }
 0x245   : > { %6215 = vmatprep.mubr.msk.bf16.mxu0 %vm1689_vm4, %v3235_v13  ;;  %2082 = vst.msk [vmem:[#allocation3 + $0xc9] sm:$0xff] %vm1689_vm4, %v12658_v25 }
 0x246   : > { %2080 = vst.msk [vmem:[#allocation3 + $0xb1] sm:$0xff] %vm1689_vm4, %v12659_v12 }
 0x24a   : > { %v9945_v30 = vld [vmem:[#allocation3 + $0xc0] sm:$0xff] }
 0x24b   : > { %12918 = vst [vmem:[#allocation25_spill] sm:$0xff] %v9945_v30  ;;  %3846 = vst.msk [vmem:[#allocation3 + $0xc0] sm:$0xff] %vm1689_vm4, %v12889_v40  ;;  %v9949_v13 = vld [vmem:[#allocation3 + $0xa8] sm:$0xff]  ;;  %v2321_v47 = vrot.slane %v9945_v30, 2 }
 0x24c   : > { %3843 = vst.msk [vmem:[#allocation3 + $0xa8] sm:$0xff] %vm1689_vm4, %v12889_v40  ;;  %v9953_v6 = vld [vmem:[#allocation3 + $0xc8] sm:$0xff]  ;;  %v9955_v25 = vld [vmem:[#allocation3 + $0xd0] sm:$0x3]  ;;  %v2316_v8 = vrot.slane %v9949_v13, 2 }
 0x24d   : > { %12919 = vst [vmem:[#allocation29_spill] sm:$0xff] %v9953_v6  ;;  %3847 = vst.msk [vmem:[#allocation3 + $0xc8] sm:$0xff] %vm1689_vm4, %v12889_v40  ;;  %v9961_v12 = vld [vmem:[#allocation3 + $0xb0] sm:$0xff]  ;;  %v9963_v44 = vld [vmem:[#allocation3 + $0xb8] sm:$0x3]  ;;  %v2322_v11 = vrot.slane %v9953_v6, 2 }
 0x24e   : > { %3848 = vst.msk [vmem:[#allocation3 + $0xd0] sm:$0x3] %vm2013_vm13, %v12889_v40  ;;  %v2324_v23 = vrot.slane %v9955_v25, 2  ;;  %3845 = vst.msk [vmem:[#allocation3 + $0xb8] sm:$0x3] %vm2013_vm13, %v12889_v40  ;;  %v6189_v32 = vpop.f32.mrb[0].mxu1 }
 0x24f   : > { %3844 = vst.msk [vmem:[#allocation3 + $0xb0] sm:$0xff] %vm1689_vm4, %v12889_v40  ;;  %v2317_v42 = vrot.slane %v9961_v12, 2  ;;  %v2319_v16 = vrot.slane %v9963_v44, 2  ;;  %v9976_v20 = vadd.f32 %v6189_v32, %v9674_v49  ;;  %v1916_v26 = vpop.f32.mrb[1].mxu1  ;;  %v9979_v58 = vsel %vm584_vm3, %v2321_v47, %v2322_v11 }
 0x250   : > { %v9982_v63 = vsel %vm584_vm3, %v2322_v11, %v2324_v23  ;;  %v9985_v7 = vadd.f32 %v9674_v49, %v1916_v26  ;;  %v6190_v0 = vpop.f32.mrb[2].mxu1 }
 0x251   : > { %12920 = vst [vmem:[#allocation28_spill] sm:$0xff] %v9976_v20  ;;  %v9988_v15 = vsel %vm584_vm3, %v2316_v8, %v2317_v42  ;;  %v9991_v57 = vsel %vm584_vm3, %v2317_v42, %v2319_v16  ;;  %v12668_v32 = vmax.f32 %v9976_v20, 0.0  ;;  %v9995_v38 = vadd.f32 %v6190_v0, %v9674_v49  ;;  %v1919_v47 = vpop.f32.mrb[3].mxu1 }
 0x252   : > { %12921 = vst [vmem:[#allocation8_spill] sm:$0xff] %v9985_v7  ;;  %12922 = vst [vmem:[#allocation27_spill] sm:$0xff] %v9991_v57  ;;  %v3238_v23 = vpack.c.bf16 %v9991_v57, %v9988_v15  ;;  %v12669_v11 = vmax.f32 %v9985_v7, 0.0  ;;  %v10001_v26 = vadd.f32 %v9674_v49, %v1919_v47  ;;  %v3241_v8 = vpack.c.bf16 %v9982_v63, %v9979_v58 }
 0x253   : > { %12923 = vst [vmem:[#allocation37_spill] sm:$0xff] %v9995_v38  ;;  %2085 = vst.msk [vmem:[#allocation3 + $0xf1] sm:$0xff] %vm1689_vm4, %v12668_v32  ;;  %v12670_v16 = vmax.f32 %v9995_v38, 0.0  ;;  %v2211_v47 = vrot.slane %v9704_v59, 1  ;;  %v2206_v32 = vrot.slane %v9708_v28, 1  ;;  %v2207_v20 = vrot.slane %v9728_v9, 1 }
 0x254   : > { %12924 = vst [vmem:[#allocation38_spill] sm:$0xff] %v10001_v26  ;;  %6216 = vmatmul.mubr.msk.bf16.gmra.mrb[24].mxu0 %vm1689_vm4, %v3238_v23  ;;  %2083 = vst.msk [vmem:[#allocation3 + $0xd9] sm:$0xff] %vm1689_vm4, %v12669_v11  ;;  %v12671_v0 = vmax.f32 %v10001_v26, 0.0  ;;  %v2212_v11 = vrot.slane %v9710_v62, 1  ;;  %v2209_v26 = vrot.slane %v9721_v18, 1  ;;  %v2289_v62 = vrot.slane %v9721_v18, 2 }
 0x255   : > { %6219 = vmatprep.mubr.msk.bf16.mxu0 %vm1689_vm4, %v3241_v8  ;;  %2086 = vst.msk [vmem:[#allocation3 + $0xf9] sm:$0xff] %vm1689_vm4, %v12670_v16  ;;  %v2214_v8 = vrot.slane %v9712_v61, 1  ;;  %v7907_v18 = vld [vmem:[%s12576_s3 + $0x40] sm:$0xff]  }
 0x256   : > { %2084 = vst.msk [vmem:[#allocation3 + $0xe1] sm:$0xff] %vm1689_vm4, %v12671_v0  ;;  %v10039_v23 = vsel %vm503_vm2, %v2211_v47, %v2212_v11  ;;  %5905 = vmatprep.subr.bf16.mxu1 %v7907_v18 }
 0x257   : > { %12927 = vst [vmem:[#allocation41_spill] sm:$0xff] %v10039_v23  ;;  %v10049_v38 = vsel %vm503_vm2, %v2212_v11, %v2214_v8 }
 0x258   : > { %12929 = vst [vmem:[#allocation43_spill] sm:$0xff] %v10049_v38 }
 0x25a   : > { %v10032_v42 = vld [vmem:[#allocation3 + $0xf0] sm:$0xff] }
 0x25b   : > { %12925 = vst [vmem:[#allocation39_spill] sm:$0xff] %v10032_v42  ;;  %3852 = vst.msk [vmem:[#allocation3 + $0xf0] sm:$0xff] %vm1689_vm4, %v12889_v40  ;;  %v10036_v16 = vld [vmem:[#allocation3 + $0xd8] sm:$0xff]  ;;  %v2331_v8 = vrot.slane %v10032_v42, 2 }
 0x25c   : > { %12926 = vst [vmem:[#allocation40_spill] sm:$0xff] %v10036_v16  ;;  %3849 = vst.msk [vmem:[#allocation3 + $0xd8] sm:$0xff] %vm1689_vm4, %v12889_v40  ;;  %v10044_v0 = vld [vmem:[#allocation3 + $0xf8] sm:$0xff]  ;;  %v10046_v61 = vld [vmem:[#allocation3 + $0x100] sm:$0x3]  ;;  %v2326_v4 = vrot.slane %v10036_v16, 2 }
 0x25d   : > { %12928 = vst [vmem:[#allocation42_spill] sm:$0xff] %v10044_v0  ;;  %3853 = vst.msk [vmem:[#allocation3 + $0xf8] sm:$0xff] %vm1689_vm4, %v12889_v40  ;;  %v10058_v47 = vld [vmem:[#allocation3 + $0xe0] sm:$0xff]  ;;  %v10060_v48 = vld [vmem:[#allocation3 + $0xe8] sm:$0x3]  ;;  %v10064_v11 = vpack.i.bf16 %v10044_v0, %v10032_v42  ;;  %v2332_v21 = vrot.slane %v10044_v0, 2 }
 0x25e   : > { %3854 = vst.msk [vmem:[#allocation3 + $0x100] sm:$0x3] %vm2013_vm13, %v12889_v40  ;;  %12930 = vst [vmem:[#allocation44_spill] sm:$0xff] %v10058_v47  ;;  %v2334_v7 = vrot.slane %v10046_v61, 2  ;;  %v6193_v52 = vpop.f32.mrb[4].mxu1  ;;  %v10075_v19 = vpack.i.bf16 %v10058_v47, %v10036_v16  ;;  %v2327_v43 = vrot.slane %v10058_v47, 2 }
 0x25f   : > { %12931 = vst [vmem:[#allocation45_spill] sm:$0xff] %v10064_v11  ;;  %3850 = vst.msk [vmem:[#allocation3 + $0xe0] sm:$0xff] %vm1689_vm4, %v12889_v40  ;;  %v2329_v27 = vrot.slane %v10060_v48, 2  ;;  %v10081_v2 = vadd.f32 %v6193_v52, %v9674_v49  ;;  %v1932_v51 = vpop.f32.mrb[5].mxu1  ;;  %6968 = vrot.lane.b32.xlu0 %v10064_v11, %s8024_s22  ;;  %v10086_v10 = vsel %vm584_vm3, %v2331_v8, %v2332_v21  ;;  %v2249_v18 = vrot.slane %v10060_v48, 1 }
 0x260   : > { %3851 = vst.msk [vmem:[#allocation3 + $0xe8] sm:$0x3] %vm2013_vm13, %v12889_v40  ;;  %12932 = vst [vmem:[#allocation46_spill] sm:$0xff] %v10075_v19  ;;  %v10089_v59 = vsel %vm584_vm3, %v2332_v21, %v2334_v7  ;;  %v10093_v56 = vadd.f32 %v9674_v49, %v1932_v51  ;;  %v6194_v14 = vpop.f32.mrb[6].mxu1  ;;  %6973 = vrot.lane.b32.xlu1 %v10075_v19, %s8024_s22  ;;  %v6977_v52 = vpack.i.bf16 %v10049_v38, %v10039_v23  ;;  %v7909_v38 = vld [vmem:[%s12576_s3 + $0x48] sm:$0xff]  }
 0x261   : > { %12933 = vst [vmem:[#allocation47_spill] sm:$0xff] %v10081_v2  ;;  %v10100_v11 = vsel %vm584_vm3, %v2326_v4, %v2327_v43  ;;  %v10103_v8 = vsel %vm584_vm3, %v2327_v43, %v2329_v27  ;;  %v10110_v21 = vadd.f32 %v6194_v14, %v9674_v49  ;;  %v1935_v7 = vpop.f32.mrb[7].mxu1  ;;  %v2252_v23 = vrot.slane %v10044_v0, 1  ;;  %v7908_v27 = vld [vmem:[%s12576_s3] sm:$0xff]  }
 0x262   : > { %12934 = vst [vmem:[#allocation48_spill] sm:$0xff] %v10093_v56  ;;  %v3244_v57 = vpack.c.bf16 %v10103_v8, %v10100_v11  ;;  %v12698_v43 = vmax.f32 %v10093_v56, 0.0  ;;  %v10120_v4 = vadd.f32 %v9674_v49, %v1935_v7  ;;  %v3247_v51 = vpack.c.bf16 %v10089_v59, %v10086_v10  ;;  %5906 = vmatpush3.bf16.msra.mxu1 %v7908_v27  ;;  %v7911_v27 = vld [vmem:[%s12576_s3 + $0x50] sm:$0xff]  }
 0x263   : > { %12935 = vst [vmem:[#allocation49_spill] sm:$0xff] %v10110_v21  ;;  %v2254_v14 = vrot.slane %v10046_v61, 1  ;;  %v12937_v0 = vmax.f32 %v10081_v2, 0.0  ;;  %v12697_v19 = vmax.f32 %v10110_v21, 0.0  ;;  %6978 = vrot.lane.b32.xlu0 %v6977_v52, %s8023_s21  ;;  %v10135_v7 = vsel %vm503_vm2, %v2206_v32, %v2207_v20  ;;  %5907 = vmatprep.subr.bf16.mxu1 %v7909_v38 }
 0x264   : > { %12936 = vst [vmem:[#allocation50_spill] sm:$0xff] %v10120_v4  ;;  %6220 = vmatmul.mubr.msk.bf16.gmra.mrb[28].mxu0 %vm1689_vm4, %v3244_v57  ;;  %12938 = vst [vmem:[#allocation51_spill] sm:$0xff] %v10135_v7  ;;  %v10138_v61 = vsel %vm503_vm2, %v2207_v20, %v2209_v26  ;;  %v12940_v57 = vpack.i.bf16 %v9750_v29, %v9747_v22  ;;  %v2251_v32 = vrot.slane %v10032_v42, 1  ;;  %v12943_v26 = vrot.slane %v9728_v9, 2 }
 0x265   : > { %2089 = vst.msk [vmem:[#allocation3 + $0x121] sm:$0xff] %vm1689_vm4, %v12937_v0  ;;  %12939 = vst [vmem:[#allocation52_spill] sm:$0xff] %v10138_v61  ;;  %v12699_v0 = vmax.f32 %v10120_v4, 0.0  ;;  %6223 = vmatprep.mubr.msk.bf16.mxu0 %vm1689_vm4, %v3247_v51  ;;  %v7910_v51 = vld [vmem:[%s12576_s3 + $0x8] sm:$0xff]   ;;  %v2247_v20 = vrot.slane %v10058_v47, 1 }
 0x266   : > { %2087 = vst.msk [vmem:[#allocation3 + $0x109] sm:$0xff] %vm1689_vm4, %v12698_v43  ;;  %6988 = vrot.lane.b32.xlu1 %v12940_v57, %s8024_s22  ;;  %2090 = vst.msk [vmem:[#allocation3 + $0x129] sm:$0xff] %vm1689_vm4, %v12697_v19  ;;  %v6992_v57 = vpack.i.bf16 %v10138_v61, %v10135_v7  ;;  %v10168_v19 = vsel %vm503_vm2, %v2251_v32, %v2252_v23  ;;  %v10171_v43 = vsel %vm503_vm2, %v2252_v23, %v2254_v14 }
 0x267   : > { %2088 = vst.msk [vmem:[#allocation3 + $0x111] sm:$0xff] %vm1689_vm4, %v12699_v0  ;;  %12941 = vst [vmem:[#allocation53_spill] sm:$0xff] %v10168_v19  ;;  %6983 = vrot.lane.b32.xlu0 %v6977_v52, %s8025_s8  ;;  %v2290_v0 = vsel %vm584_vm3, %v12943_v26, %v2289_v62  ;;  %v2286_v23 = vrot.slane %v9708_v28, 2  ;;  %v10186_v38 = vpack.i.bf16 %v10171_v43, %v10168_v19  ;;  %v2246_v14 = vrot.slane %v10036_v16, 1  ;;  %v7912_v52 = vld [vmem:[%s12576_s3 + $0x10] sm:$0xff]  }
 0x268   : > { %12942 = vst [vmem:[#allocation54_spill] sm:$0xff] %v10171_v43  ;;  %5908 = vmatpush3.bf16.msra.mxu1 %v7910_v51  ;;  %v7002_v32 = vpack.i.bf16 %v9747_v22, %v2290_v0  ;;  %v12945_v48 = vmov %v12943_v26  ;;  %v10213_v21 = vsel %vm503_vm2, %v2247_v20, %v2249_v18  ;;  %v7027_v19 = vpack.i.bf16 %v9785_v3, %v9777_v53 }
 0x269   : > { %v10198_v26 = vsel %vm584_vm3, %v2286_v23, %v12945_v48  ;;  %5909 = vmatprep.subr.bf16.mxu1 %v7911_v27  ;;  %v10210_v22 = vsel %vm503_vm2, %v2246_v14, %v2247_v20  ;;  %12948 = vst [vmem:[#allocation58_spill] sm:$0xff] %v10213_v21  ;;  %v2222_v28 = vrot.slane %v9785_v3, 1 }
 0x26a   : > { %6993 = vrot.lane.b32.xlu1 %v6992_v57, %s8023_s21  ;;  %v7913_v57 = vld [vmem:[%s12576_s3 + $0x58] sm:$0xff]   ;;  %12947 = vst [vmem:[#allocation57_spill] sm:$0xff] %v10210_v22  ;;  %v7007_v18 = vpack.i.bf16 %v2290_v0, %v10198_v26  ;;  %v7012_v56 = vpack.i.bf16 %v10213_v21, %v10210_v22 }
 0x26b   : > { %6998 = vrot.lane.b32.xlu0 %v10186_v38, %s8023_s21 }
 0x26c   : > { %v10192_v62 = vld [vmem:[#allocation3 + $0x120] sm:$0xff]  ;;  %5910 = vmatpush3.bf16.msra.mxu1 %v7912_v52  ;;  %v7914_v52 = vld [vmem:[%s12576_s3 + $0x18] sm:$0xff]  }
 0x26d   : > { %12944 = vst [vmem:[#allocation55_spill] sm:$0xff] %v10192_v62  ;;  %3858 = vst.msk [vmem:[#allocation3 + $0x120] sm:$0xff] %vm1689_vm4, %v12889_v40  ;;  %v10205_v51 = vld [vmem:[#allocation3 + $0x108] sm:$0xff]  ;;  %v10219_v23 = vld [vmem:[#allocation3 + $0x130] sm:$0x3]  ;;  %v2341_v20 = vrot.slane %v10192_v62, 2  ;;  %5911 = vmatprep.subr.bf16.mxu1 %v7913_v57 }
 0x26e   : > { %12946 = vst [vmem:[#allocation56_spill] sm:$0xff] %v10205_v51  ;;  %3855 = vst.msk [vmem:[#allocation3 + $0x108] sm:$0xff] %vm1689_vm4, %v12889_v40  ;;  %v10217_v27 = vld [vmem:[#allocation3 + $0x128] sm:$0xff]  ;;  %7003 = vrot.lane.b32.xlu1 %v7002_v32, %s8023_s21  ;;  %v10226_v14 = vld [vmem:[#allocation3 + $0x110] sm:$0xff]  ;;  %v2344_v4 = vrot.slane %v10219_v23, 2  ;;  %v6197_v32 = vpop.f32.mrb[8].mxu1 }
 0x26f   : > { %12949 = vst [vmem:[#allocation59_spill] sm:$0xff] %v10217_v27  ;;  %3859 = vst.msk [vmem:[#allocation3 + $0x128] sm:$0xff] %vm1689_vm4, %v12889_v40  ;;  %v10228_v48 = vld [vmem:[#allocation3 + $0x118] sm:$0x3]  ;;  %v2342_v2 = vrot.slane %v10217_v27, 2  ;;  %v2336_v42 = vrot.slane %v10205_v51, 2  ;;  %v10247_v47 = vadd.f32 %v6197_v32, %v9674_v49  ;;  %7008 = vrot.lane.b32.xlu0 %v7007_v18, %s8024_s22 }
 0x270   : > { %3860 = vst.msk [vmem:[#allocation3 + $0x130] sm:$0x3] %vm2013_vm13, %v12889_v40  ;;  %12950 = vst [vmem:[#allocation60_spill] sm:$0xff] %v10226_v14  ;;  %v2337_v0 = vrot.slane %v10226_v14, 2  ;;  %v2339_v16 = vrot.slane %v10228_v48, 2  ;;  %v1948_v43 = vpop.f32.mrb[9].mxu1  ;;  %5912 = vmatpush3.bf16.msra.mxu1 %v7914_v52 }
 0x271   : > { %3856 = vst.msk [vmem:[#allocation3 + $0x110] sm:$0xff] %vm1689_vm4, %v12889_v40  ;;  %12951 = vst [vmem:[#allocation61_spill] sm:$0xff] %v10247_v47  ;;  %v10253_v22 = vsel %vm584_vm3, %v2341_v20, %v2342_v2  ;;  %v10256_v21 = vsel %vm584_vm3, %v2342_v2, %v2344_v4  ;;  %v10259_v57 = vadd.f32 %v9674_v49, %v1948_v43  ;;  %v6198_v9 = vpop.f32.mrb[10].mxu1  ;;  %v7915_v20 = vld [vmem:[%s12576_s3 + $0x60] sm:$0xff]   ;;  %v7917_v2 = vld [vmem:[%s12576_s3 + $0x68] sm:$0xff]  }
 0x272   : > { %3857 = vst.msk [vmem:[#allocation3 + $0x118] sm:$0x3] %vm2013_vm13, %v12889_v40  ;;  %7013 = vrot.lane.b32.xlu1 %v7012_v56, %s8023_s21  ;;  %v10263_v32 = vsel %vm584_vm3, %v2336_v42, %v2337_v0  ;;  %v10266_v18 = vsel %vm584_vm3, %v2337_v0, %v2339_v16  ;;  %v10274_v43 = vadd.f32 %v6198_v9, %v9674_v49  ;;  %v1951_v4 = vpop.f32.mrb[11].mxu1  ;;  %v2224_v42 = vrot.slane %v9787_v46, 1  ;;  %v7916_v16 = vld [vmem:[%s12576_s3 + $0x20] sm:$0xff]  }
 0x273   : > { %12952 = vst [vmem:[#allocation62_spill] sm:$0xff] %v10259_v57  ;;  %v3250_v7 = vpack.c.bf16 %v10266_v18, %v10263_v32  ;;  %v12715_v0 = vmax.f32 %v10259_v57, 0.0  ;;  %v10284_v3 = vadd.f32 %v9674_v49, %v1951_v4  ;;  %v3253_v9 = vpack.c.bf16 %v10256_v21, %v10253_v22  ;;  %5913 = vmatprep.subr.bf16.mxu1 %v7915_v20 }
 0x274   : > { %12953 = vst [vmem:[#allocation63_spill] sm:$0xff] %v10274_v43  ;;  %v12955_v46 = vmax.f32 %v10247_v47, 0.0  ;;  %v12716_v52 = vmax.f32 %v10274_v43, 0.0  ;;  %7028 = vrot.lane.b32.xlu0 %v7027_v19, %s8024_s22  ;;  %5914 = vmatpush3.bf16.msra.mxu1 %v7916_v16  ;;  %v10327_v4 = vsel %vm503_vm2, %v2222_v28, %v2224_v42  ;;  %v7919_v16 = vld [vmem:[%s12576_s3 + $0x70] sm:$0xff]   ;;  %v12964_v47 = vrot.slane %v10217_v27, 1 }
 0x275   : > { %12954 = vst [vmem:[#allocation64_spill] sm:$0xff] %v10284_v3  ;;  %6224 = vmatmul.mubr.msk.bf16.gmra.mrb[32].mxu0 %vm1689_vm4, %v3250_v7  ;;  %2091 = vst.msk [vmem:[#allocation3 + $0x139] sm:$0xff] %vm1689_vm4, %v12715_v0  ;;  %v12717_v20 = vmax.f32 %v10284_v3, 0.0  ;;  %5915 = vmatprep.subr.bf16.mxu1 %v7917_v2  ;;  %v7921_v7 = vld [vmem:[%s12576_s3 + $0x78] sm:$0xff]  }
 0x276   : > { %2093 = vst.msk [vmem:[#allocation3 + $0x151] sm:$0xff] %vm1689_vm4, %v12955_v46  ;;  %6227 = vmatprep.mubr.msk.bf16.mxu0 %vm1689_vm4, %v3253_v9  ;;  %7018 = vrot.lane.b32.xlu1 %v7012_v56, %s8025_s8  ;;  %v2221_v46 = vrot.slane %v9777_v53, 1  ;;  %2094 = vst.msk [vmem:[#allocation3 + $0x159] sm:$0xff] %vm1689_vm4, %v12716_v52  ;;  %v7918_v56 = vld [vmem:[%s12576_s3 + $0x28] sm:$0xff]   ;;  %v7022_v9 = vpack.i.bf16 %v10086_v10, %v10103_v8 }
 0x277   : > { %2092 = vst.msk [vmem:[#allocation3 + $0x141] sm:$0xff] %vm1689_vm4, %v12717_v20  ;;  %12957 = vst [vmem:[#allocation66_spill] sm:$0xff] %v10327_v4 }
 0x278   : > { %v10324_v52 = vsel %vm503_vm2, %v2221_v46, %v2222_v28  ;;  %7033 = vrot.lane.b32.xlu0 %v7027_v19, %s8025_s8  ;;  %5916 = vmatpush3.bf16.msra.mxu1 %v7918_v56  ;;  %v7920_v28 = vld [vmem:[%s12576_s3 + $0x30] sm:$0xff]   ;;  %v7037_v19 = vpack.i.bf16 %v9793_v37, %v9781_v60  ;;  %v2261_v46 = vrot.slane %v10192_v62, 1 }
 0x279   : > { %12956 = vst [vmem:[#allocation65_spill] sm:$0xff] %v10324_v52  ;;  %v7047_v20 = vpack.i.bf16 %v10327_v4, %v10324_v52  ;;  %5917 = vmatprep.subr.bf16.mxu1 %v7919_v16  ;;  %v2216_v16 = vrot.slane %v9781_v60, 1 }
 0x27a   : > { %7023 = vrot.lane.b32.xlu1 %v7022_v9, %s8023_s21  ;;  %v10372_v3 = vsel %vm503_vm2, %v2261_v46, %v12964_v47  ;;  %v2217_v46 = vrot.slane %v9793_v37, 1 }
 0x27b   : > { %12965 = vst [vmem:[#allocation73_spill] sm:$0xff] %v10372_v3 }
 0x27c   : > { %v10346_v2 = vld [vmem:[#allocation3 + $0x138] sm:$0xff]  ;;  %7048 = vrot.lane.b32.xlu0 %v7047_v20, %s8023_s21  ;;  %5918 = vmatpush3.bf16.msra.mxu1 %v7920_v28  ;;  %v7922_v28 = vld [vmem:[%s12576_s3 + $0x38] sm:$0xff]  }
 0x27d   : > { %v10340_v42 = vld [vmem:[#allocation3 + $0x150] sm:$0xff]  ;;  %12959 = vst [vmem:[#allocation68_spill] sm:$0xff] %v10346_v2  ;;  %3861 = vst.msk [vmem:[#allocation3 + $0x138] sm:$0xff] %vm1689_vm4, %v12889_v40  ;;  %v10352_v56 = vld [vmem:[#allocation3 + $0x158] sm:$0xff]  ;;  %v2346_v60 = vrot.slane %v10346_v2, 2  ;;  %5919 = vmatprep.subr.bf16.mxu1 %v7921_v7 }
 0x27e   : > { %12958 = vst [vmem:[#allocation67_spill] sm:$0xff] %v10340_v42  ;;  %3864 = vst.msk [vmem:[#allocation3 + $0x150] sm:$0xff] %vm1689_vm4, %v12889_v40  ;;  %v10354_v9 = vld [vmem:[#allocation3 + $0x160] sm:$0x3]  ;;  %7038 = vrot.lane.b32.xlu1 %v7037_v19, %s8024_s22  ;;  %v10367_v43 = vld [vmem:[#allocation3 + $0x148] sm:$0x3] }
 0x27f   : > { %12960 = vst [vmem:[#allocation69_spill] sm:$0xff] %v10352_v56  ;;  %12961 = vst [vmem:[#allocation70_spill] sm:$0xff] %v10354_v9  ;;  %v10365_v0 = vld [vmem:[#allocation3 + $0x140] sm:$0xff]  ;;  %v2351_v57 = vrot.slane %v10340_v42, 2  ;;  %v2352_v53 = vrot.slane %v10352_v56, 2  ;;  %v2354_v52 = vrot.slane %v10354_v9, 2 }
 0x280   : > { %3865 = vst.msk [vmem:[#allocation3 + $0x158] sm:$0xff] %vm1689_vm4, %v12889_v40  ;;  %12962 = vst [vmem:[#allocation71_spill] sm:$0xff] %v10365_v0  ;;  %v6201_v4 = vpop.f32.mrb[12].mxu1  ;;  %v2347_v61 = vrot.slane %v10365_v0, 2  ;;  %v2349_v47 = vrot.slane %v10367_v43, 2  ;;  %7053 = vrot.lane.b32.xlu0 %v7047_v20, %s8025_s8  ;;  %v2219_v0 = vrot.slane %v9795_v5, 1  ;;  %v7067_v20 = vpack.i.bf16 %v10198_v26, %v10372_v3  ;;  %5920 = vmatpush3.bf16.msra.mxu1 %v7922_v28 }
 0x281   : > { %3866 = vst.msk [vmem:[#allocation3 + $0x160] sm:$0x3] %vm2013_vm13, %v12889_v40  ;;  %12963 = vst [vmem:[#allocation72_spill] sm:$0xff] %v10367_v43  ;;  %v10389_v42 = vadd.f32 %v6201_v4, %v9674_v49  ;;  %v1964_v9 = vpop.f32.mrb[13].mxu1  ;;  %v2353_v56 = vsel %vm584_vm3, %v2351_v57, %v2352_v53  ;;  %v2355_v2 = vsel %vm584_vm3, %v2352_v53, %v2354_v52 }
 0x282   : > { %3862 = vst.msk [vmem:[#allocation3 + $0x140] sm:$0xff] %vm1689_vm4, %v12889_v40  ;;  %v10396_v43 = vadd.f32 %v9674_v49, %v1964_v9  ;;  %v6202_v7 = vpop.f32.mrb[14].mxu1  ;;  %7043 = vrot.lane.b32.xlu1 %v7037_v19, %s8025_s8  ;;  %v10400_v37 = vsel %vm584_vm3, %v2346_v60, %v2347_v61  ;;  %v10403_v4 = vsel %vm584_vm3, %v2347_v61, %v2349_v47 }
 0x283   : > { %3863 = vst.msk [vmem:[#allocation3 + $0x148] sm:$0x3] %vm2013_vm13, %v12889_v40  ;;  %12966 = vst [vmem:[#allocation74_spill] sm:$0xff] %v10389_v42  ;;  %v12739_v57 = vmax.f32 %v10389_v42, 0.0  ;;  %v10409_v53 = vadd.f32 %v6202_v7, %v9674_v49  ;;  %v1967_v5 = vpop.f32.mrb[15].mxu1  ;;  %v3256_v52 = vpack.c.bf16 %v10403_v4, %v10400_v37  ;;  %v3259_v9 = vpack.c.bf16 %v2355_v2, %v2353_v56 }
 0x284   : > { %12967 = vst [vmem:[#allocation75_spill] sm:$0xff] %v10396_v43  ;;  %v12741_v60 = vmax.f32 %v10396_v43, 0.0  ;;  %v10417_v61 = vadd.f32 %v9674_v49, %v1967_v5  ;;  %7068 = vrot.lane.b32.xlu0 %v7067_v20, %s8023_s21  ;;  %v10426_v47 = vsel %vm503_vm2, %v2216_v16, %v2217_v46  ;;  %v10429_v28 = vsel %vm503_vm2, %v2217_v46, %v2219_v0  ;;  %v10480_v0 = vld [vmem:[#allocation3 + $0x198] sm:$0xff] }
 0x285   : > { %12968 = vst [vmem:[#allocation76_spill] sm:$0xff] %v10409_v53  ;;  %2097 = vst.msk [vmem:[#allocation3 + $0x181] sm:$0xff] %vm1689_vm4, %v12739_v57  ;;  %v12738_v26 = vmax.f32 %v10409_v53, 0.0  ;;  %6228 = vmatmul.mubr.msk.bf16.gmra.mrb[36].mxu0 %vm1689_vm4, %v3256_v52  ;;  %v12972_v7 = vpack.i.bf16 %v9814_v41, %v9811_v55  ;;  %v10440_v20 = vpack.i.bf16 %v2355_v2, %v2353_v56  ;;  %v2257_v56 = vrot.slane %v10226_v14, 1 }
 0x286   : > { %12969 = vst [vmem:[#allocation77_spill] sm:$0xff] %v10417_v61  ;;  %12970 = vst [vmem:[#allocation78_spill] sm:$0xff] %v10426_v47  ;;  %v12740_v49 = vmax.f32 %v10417_v61, 0.0  ;;  %6231 = vmatprep.mubr.msk.bf16.mxu0 %vm1689_vm4, %v3259_v9  ;;  %v7062_v16 = vpack.i.bf16 %v10429_v28, %v10426_v47  ;;  %v12973_v46 = vpack.i.bf16 %v9820_v31, %v9750_v29  ;;  %v2231_v5 = vrot.slane %v9861_v24, 1 }
 0x287   : > { %12971 = vst [vmem:[#allocation79_spill] sm:$0xff] %v10429_v28  ;;  %2095 = vst.msk [vmem:[#allocation3 + $0x169] sm:$0xff] %vm1689_vm4, %v12741_v60  ;;  %7058 = vrot.lane.b32.xlu1 %v12972_v7, %s8024_s22  ;;  %v12974_v52 = vpack.i.bf16 %v9823_v34, %v9820_v31  ;;  %v2256_v29 = vrot.slane %v10205_v51, 1  ;;  %v2259_v7 = vrot.slane %v10228_v48, 1  ;;  %v7097_v31 = vpack.i.bf16 %v9869_v33, %v9861_v24 }
 0x288   : > { %2098 = vst.msk [vmem:[#allocation3 + $0x189] sm:$0xff] %vm1689_vm4, %v12738_v26  ;;  %2096 = vst.msk [vmem:[#allocation3 + $0x171] sm:$0xff] %vm1689_vm4, %v12740_v49  ;;  %7073 = vrot.lane.b32.xlu0 %v12973_v46, %s8023_s21  ;;  %v2232_v46 = vrot.slane %v9869_v33, 1  ;;  %v2234_v26 = vrot.slane %v9871_v17, 1  ;;  %v10508_v33 = vld [vmem:[#allocation3 + $0x1a0] sm:$0xff] }
 0x289   : > { %12976 = vst [vmem:[#allocation81_spill] sm:$0xff] %v10480_v0  ;;  %3873 = vst.msk [vmem:[#allocation3 + $0x198] sm:$0xff] %vm1689_vm4, %v12889_v40  ;;  %v10518_v47 = vsel %vm503_vm2, %v2257_v56, %v2259_v7 }
 0x28a   : > { %12980 = vst [vmem:[#allocation85_spill] sm:$0xff] %v10518_v47  ;;  %3874 = vst.msk [vmem:[#allocation3 + $0x1a0] sm:$0xff] %vm1689_vm4, %v12889_v40 }
 0x28b   : > { %7063 = vrot.lane.b32.xlu1 %v7062_v16, %s8023_s21 }
 0x28c   : > { %v2147_v2 = vld [vmem:[#allocation3 + $0x180] sm:$0xff]  ;;  %7088 = vrot.lane.b32.xlu0 %v12974_v52, %s8024_s22 }
 0x28d   : > { %3870 = vst.msk [vmem:[#allocation3 + $0x180] sm:$0xff] %vm1689_vm4, %v12889_v40  ;;  %v2401_v52 = vrot.slane %v2147_v2, 2  ;;  %v2364_v60 = vrot.slane %v2147_v2, 1 }
 0x28e   : > { %v10465_v9 = vld [vmem:[#allocation3 + $0x168] sm:$0xff] }
 0x28f   : > { %12975 = vst [vmem:[#allocation80_spill] sm:$0xff] %v10465_v9  ;;  %v10471_v57 = vld [vmem:[#allocation3 + $0x188] sm:$0xff]  ;;  %v10473_v49 = vld [vmem:[#allocation3 + $0x190] sm:$0x3]  ;;  %7078 = vrot.lane.b32.xlu1 %v7062_v16, %s8025_s8  ;;  %3867 = vst.msk [vmem:[#allocation3 + $0x168] sm:$0xff] %vm1689_vm4, %v12889_v40  ;;  %v2356_v61 = vrot.slane %v10465_v9, 2 }
 0x290   : > { %3871 = vst.msk [vmem:[#allocation3 + $0x188] sm:$0xff] %vm1689_vm4, %v12889_v40  ;;  %v10486_v17 = vld [vmem:[#allocation3 + $0x178] sm:$0x3]  ;;  %v10488_v48 = vld [vmem:[#allocation3 + $0x170] sm:$0xff]  ;;  %v2402_v16 = vrot.slane %v10471_v57, 2  ;;  %v2404_v19 = vrot.slane %v10473_v49, 2  ;;  %v10493_v53 = vpack.i.bf16 %v10471_v57, %v2147_v2  ;;  %v10506_v2 = vsel %vm503_vm2, %v2256_v29, %v2257_v56  ;;  %7098 = vrot.lane.b32.xlu0 %v7097_v31, %s8024_s22 }
 0x291   : > { %3872 = vst.msk [vmem:[#allocation3 + $0x190] sm:$0x3] %vm2013_vm13, %v12889_v40  ;;  %12977 = vst [vmem:[#allocation82_spill] sm:$0xff] %v10488_v48  ;;  %v2357_v43 = vrot.slane %v10488_v48, 2  ;;  %v2359_v24 = vrot.slane %v10486_v17, 2 }
 0x292   : > { %12978 = vst [vmem:[#allocation83_spill] sm:$0xff] %v10493_v53  ;;  %3869 = vst.msk [vmem:[#allocation3 + $0x178] sm:$0x3] %vm2013_vm13, %v12889_v40  ;;  %v10512_v42 = vsel %vm584_vm3, %v2401_v52, %v2402_v16  ;;  %v10515_v28 = vsel %vm584_vm3, %v2402_v16, %v2404_v19  ;;  %v12981_v53 = vrot.slane %v10471_v57, 1  ;;  %v10527_v29 = vld [vmem:[#allocation3 + $0x1a8] sm:$0x3]  ;;  %v12982_v52 = vpack.i.bf16 %v9811_v55, %v9823_v34 }
 0x293   : > { %3868 = vst.msk [vmem:[#allocation3 + $0x170] sm:$0xff] %vm1689_vm4, %v12889_v40  ;;  %12979 = vst [vmem:[#allocation84_spill] sm:$0xff] %v10506_v2  ;;  %v2358_v19 = vsel %vm584_vm3, %v2356_v61, %v2357_v43  ;;  %v2360_v56 = vsel %vm584_vm3, %v2357_v43, %v2359_v24  ;;  %v3265_v16 = vpack.c.bf16 %v10515_v28, %v10512_v42  ;;  %v2227_v61 = vrot.slane %v9877_v1, 1 }
 0x294   : > { %v10523_v0 = vsel %vm503_vm2, %v2364_v60, %v12981_v53  ;;  %7083 = vrot.lane.b32.xlu1 %v12982_v52, %s8023_s21  ;;  %3875 = vst.msk [vmem:[#allocation3 + $0x1a8] sm:$0x3] %vm2013_vm13, %v12889_v40  ;;  %v3262_v7 = vpack.c.bf16 %v2360_v56, %v2358_v19  ;;  %v10538_v53 = vsel %vm503_vm2, %v2231_v5, %v2232_v46  ;;  %v2226_v5 = vrot.slane %v9865_v50, 1 }
 0x295   : > { %v10540_v60 = vpack.i.bf16 %v2360_v56, %v2358_v19  ;;  %v10546_v55 = vpack.i.bf16 %v10518_v47, %v10506_v2  ;;  %v10549_v34 = vsel %vm503_vm2, %v2232_v46, %v2234_v26  ;;  %7103 = vrot.lane.b32.xlu0 %v7097_v31, %s8025_s8  ;;  %v7107_v43 = vpack.i.bf16 %v9877_v1, %v9865_v50 }
 0x296   : > { %6232 = vmatmul.mubr.msk.bf16.gmra.mrb[40].mxu0 %vm1689_vm4, %v3262_v7  ;;  %v7117_v40 = vpack.i.bf16 %v10549_v34, %v10538_v53  ;;  %v2229_v26 = vrot.slane %v9879_v45, 1  ;;  %v12983_v46 = vpack.i.bf16 %v9904_v54, %v9814_v41  ;;  %v10574_v31 = vsel %vm503_vm2, %v2226_v5, %v2227_v61 }
 0x297   : > { %6235 = vmatprep.mubr.msk.bf16.mxu0 %vm1689_vm4, %v3265_v16  ;;  %v12984_v19 = vpack.i.bf16 %v9898_v39, %v9895_v36  ;;  %v12985_v56 = vpack.i.bf16 %v9907_v35, %v9904_v54  ;;  %v7157_v41 = vpack.i.bf16 %v9953_v6, %v9945_v30  ;;  %v2242_v7 = vrot.slane %v9953_v6, 1 }
 0x298   : > { %7093 = vrot.lane.b32.xlu1 %v10546_v55, %s8023_s21  ;;  %v10577_v52 = vsel %vm503_vm2, %v2227_v61, %v2229_v26  ;;  %v2244_v16 = vrot.slane %v9955_v25, 1  ;;  %v12986_v61 = vpack.i.bf16 %v9895_v36, %v9907_v35  ;;  %v7167_v26 = vpack.i.bf16 %v9961_v12, %v9949_v13 }
 0x299   : > { %7118 = vrot.lane.b32.xlu0 %v7117_v40, %s8023_s21  ;;  %v7132_v45 = vpack.i.bf16 %v10577_v52, %v10574_v31  ;;  %v2237_v5 = vrot.slane %v9961_v12, 1  ;;  %v2236_v35 = vrot.slane %v9949_v13, 1  ;;  %v12987_v36 = vpack.i.bf16 %v10100_v11, %v9982_v63 }
 0x29a   : > { %v10601_v54 = vsel %vm503_vm2, %v2242_v7, %v2244_v16  ;;  %v12991_v16 = vld [vmem:[#allocation46_spill] sm:$0xff]  ;;  %v13006_v24 = vpack.i.bf16 %v10266_v18, %v10263_v32 }
 0x29c   : > { %7108 = vrot.lane.b32.xlu1 %v7107_v43, %s8024_s22 }
 0x29d   : > { %7123 = vrot.lane.b32.xlu0 %v7117_v40, %s8025_s8  ;;  %v2241_v40 = vrot.slane %v9945_v30, 1 }
 0x2a0   : > { %7113 = vrot.lane.b32.xlu1 %v7107_v43, %s8025_s8  ;;  %v10598_v43 = vsel %vm503_vm2, %v2241_v40, %v2242_v7  ;;  %v10643_v7 = vpop.permute.xlu0 %6943 }
 0x2a1   : > { %7138 = vrot.lane.b32.xlu0 %v12983_v46, %s8023_s21  ;;  %v7177_v25 = vpack.i.bf16 %v10601_v54, %v10598_v43  ;;  %v2239_v46 = vrot.slane %v9963_v44, 1 }
 0x2a4   : > { %7128 = vrot.lane.b32.xlu1 %v12984_v19, %s8024_s22  ;;  %v10624_v19 = vsel %vm503_vm2, %v2236_v35, %v2237_v5  ;;  %v10651_v40 = vpop.permute.xlu0 %6953 }
 0x2a5   : > { %7153 = vrot.lane.b32.xlu0 %v12985_v56, %s8024_s22  ;;  %v12988_v56 = vpack.i.bf16 %v9982_v63, %v9979_v58  ;;  %v12990_v63 = vpack.i.bf16 %v10263_v32, %v10089_v59 }
 0x2a8   : > { %7133 = vrot.lane.b32.xlu1 %v7132_v45, %s8023_s21 }
 0x2a9   : > { %7158 = vrot.lane.b32.xlu0 %v7157_v41, %s8024_s22 }
 0x2ac   : > { %7143 = vrot.lane.b32.xlu1 %v7132_v45, %s8025_s8  ;;  %v10627_v45 = vsel %vm503_vm2, %v2237_v5, %v2239_v46  ;;  %v12995_v5 = vld [vmem:[#allocation45_spill] sm:$0xff]  ;;  %v10668_v46 = vpop.permute.xlu0 %6958 }
 0x2ad   : > { %7163 = vrot.lane.b32.xlu0 %v7157_v41, %s8025_s8  ;;  %v7197_v44 = vpack.i.bf16 %v10627_v45, %v10624_v19  ;;  %v12989_v41 = vpack.i.bf16 %v9988_v15, %v9898_v39  ;;  %v12992_v39 = vpack.i.bf16 %v10103_v8, %v10100_v11  ;;  %v2264_v11 = vrot.slane %v10219_v23, 1 }
 0x2b0   : > { %7148 = vrot.lane.b32.xlu1 %v12986_v61, %s8023_s21  ;;  %v12993_v61 = vld [vmem:[#allocation27_spill] sm:$0xff] }
 0x2b1   : > { %7178 = vrot.lane.b32.xlu0 %v7177_v25, %s8023_s21  ;;  %v12996_v8 = vpack.i.bf16 %v12993_v61, %v9988_v15  ;;  %v12999_v15 = vpack.i.bf16 %v10253_v22, %v10266_v18  ;;  %v13012_v18 = vld [vmem:[#allocation67_spill] sm:$0xff] }
 0x2b4   : > { %7168 = vrot.lane.b32.xlu1 %v7167_v26, %s8024_s22 }
 0x2b5   : > { %7183 = vrot.lane.b32.xlu0 %v7177_v25, %s8025_s8  ;;  %v12994_v25 = vpack.i.bf16 %v9979_v58, %v12993_v61 }
 0x2b8   : > { %7173 = vrot.lane.b32.xlu1 %v7167_v26, %s8025_s8  ;;  %v7232_v26 = vpack.i.bf16 %v10226_v14, %v10205_v51  ;;  %v13011_v51 = vld [vmem:[#allocation70_spill] sm:$0xff] }
 0x2b9   : > { %7188 = vrot.lane.b32.xlu0 %v12987_v36, %s8023_s21  ;;  %v7262_v36 = vpack.i.bf16 %v10217_v27, %v10192_v62  ;;  %v2274_v32 = vrot.slane %v13011_v51, 1 }
 0x2bc   : > { %7193 = vrot.lane.b32.xlu1 %v12988_v56, %s8024_s22 }
 0x2bd   : > { %7203 = vrot.lane.b32.xlu0 %v12989_v41, %s8023_s21 }
 0x2c0   : > { %7198 = vrot.lane.b32.xlu1 %v7197_v44, %s8023_s21 }
 0x2c1   : > { %7208 = vrot.lane.b32.xlu0 %v10186_v38, %s8025_s8  ;;  %v10657_v38 = vpop.permute.xlu1 %6948 }
 0x2c4   : > { %7213 = vrot.lane.b32.xlu1 %v7197_v44, %s8025_s8  ;;  %v12997_v44 = vrot.slane %v10217_v27, 1 }
 0x2c5   : > { %7223 = vrot.lane.b32.xlu0 %v12990_v63, %s8023_s21  ;;  %v10670_v35 = vpop.permute.xlu1 %6963 }
 0x2c6   : > { %v10688_v41 = vsel %vm503_vm2, %v12997_v44, %v2264_v11 }
 0x2c7   : > { %12998 = vst [vmem:[#allocation46_spill] sm:$0xff] %v10688_v41 }
 0x2c8   : > { %7218 = vrot.lane.b32.xlu1 %v12991_v16, %s8025_s8  ;;  %v13000_v16 = vpack.i.bf16 %v10089_v59, %v10086_v10 }
 0x2c9   : > { %7238 = vrot.lane.b32.xlu0 %v12992_v39, %s8024_s22 }
 0x2cc   : > { %7228 = vrot.lane.b32.xlu1 %v12994_v25, %s8023_s21  ;;  %v13001_v25 = vpack.i.bf16 %v10400_v37, %v10256_v21 }
 0x2cd   : > { %7248 = vrot.lane.b32.xlu0 %v12995_v5, %s8025_s8  ;;  %v13002_v5 = vld [vmem:[#allocation71_spill] sm:$0xff] }
 0x2ce   : > { %v2267_v11 = vrot.slane %v13002_v5, 1 }
 0x2d0   : > { %7233 = vrot.lane.b32.xlu1 %v7232_v26, %s8024_s22 }
 0x2d1   : > { %7258 = vrot.lane.b32.xlu0 %v12996_v8, %s8024_s22  ;;  %v10679_v58 = vpop.permute.xlu0 %6968  ;;  %v13003_v8 = vld [vmem:[#allocation72_spill] sm:$0xff] }
 0x2d2   : > { %v10683_v56 = vpop.permute.xlu1 %6973  ;;  %v2269_v44 = vrot.slane %v13003_v8, 1 }
 0x2d4   : > { %7243 = vrot.lane.b32.xlu1 %v10546_v55, %s8025_s8  ;;  %v7272_v55 = vpack.i.bf16 %v10688_v41, %v10372_v3  ;;  %v10732_v8 = vsel %vm503_vm2, %v2267_v11, %v2269_v44  ;;  %v6950_v3 = vunpack.i.l.bf16 %v10657_v38 }
 0x2d5   : > { %7263 = vrot.lane.b32.xlu0 %v7262_v36, %s8024_s22  ;;  %v10695_v23 = vpop.permute.xlu0 %6978  ;;  %13008 = vst [vmem:[#allocation72_spill] sm:$0xff] %v10732_v8 }
 0x2d8   : > { %7253 = vrot.lane.b32.xlu1 %v12999_v15, %s8023_s21  ;;  %v10699_v63 = vpop.permute.xlu1 %6988 }
 0x2d9   : > { %7273 = vrot.lane.b32.xlu0 %v7272_v55, %s8025_s8  ;;  %v10706_v39 = vpop.permute.xlu0 %6983  ;;  %v13005_v55 = vld [vmem:[#allocation68_spill] sm:$0xff] }
 0x2da   : > { %v2266_v10 = vrot.slane %v13005_v55, 1 }
 0x2dc   : > { %7268 = vrot.lane.b32.xlu1 %v13000_v16, %s8024_s22  ;;  %v10708_v61 = vpop.permute.xlu1 %6993  ;;  %v7287_v16 = vpack.i.bf16 %v13002_v5, %v13005_v55  ;;  %v13010_v5 = vld [vmem:[#allocation69_spill] sm:$0xff] }
 0x2dd   : > { %7283 = vrot.lane.b32.xlu0 %v13001_v25, %s8023_s21  ;;  %v10717_v15 = vpop.permute.xlu0 %6998  ;;  %v10729_v25 = vsel %vm503_vm2, %v2266_v10, %v2267_v11  ;;  %v2272_v62 = vrot.slane %v13010_v5, 1  ;;  %v10750_v44 = vpack.i.bf16 %v13010_v5, %v13012_v18 }
 0x2de   : > { %13004 = vst [vmem:[#allocation27_spill] sm:$0xff] %v10717_v15  ;;  %13007 = vst [vmem:[#allocation45_spill] sm:$0xff] %v10729_v25  ;;  %v7297_v55 = vpack.i.bf16 %v10732_v8, %v10729_v25  ;;  %v7307_v25 = vpack.i.bf16 %v10688_v41, %v10403_v4  ;;  %v6951_v41 = vunpack.i.h.bf16 %v10657_v38  ;;  %v13017_v15 = vld [vmem:[#allocation5_spill] sm:$0xff]  ;;  %v2367_v38 = vrot.slane %v10473_v49, 1 }
 0x2df   : > { %v10760_v51 = vsel %vm503_vm2, %v2272_v62, %v2274_v32  ;;  %v6946_v32 = vunpack.i.h.bf16 %v10643_v7 }
 0x2e0   : > { %7278 = vrot.lane.b32.xlu1 %v7232_v26, %s8025_s8  ;;  %v10720_v59 = vpop.permute.xlu1 %7003  ;;  %13014 = vst [vmem:[#allocation87_spill] sm:$0xff] %v10760_v51 }
 0x2e1   : > { %7293 = vrot.lane.b32.xlu0 %v13006_v24, %s8024_s22  ;;  %v10735_v26 = vpop.permute.xlu0 %7008  ;;  %v2271_v24 = vrot.slane %v13012_v18, 1 }
 0x2e3   : > { %v10757_v14 = vsel %vm503_vm2, %v2271_v24, %v2272_v62  ;;  %v13015_v62 = vpack.i.bf16 %v10256_v21, %v10253_v22  ;;  %v7005_v21 = vunpack.i.l.bf16 %v10720_v59  ;;  %v2276_v22 = vrot.slane %v10465_v9, 1 }
 0x2e4   : > { %7288 = vrot.lane.b32.xlu1 %v7287_v16, %s8024_s22  ;;  %v10737_v27 = vpop.permute.xlu1 %7013  ;;  %13013 = vst [vmem:[#allocation70_spill] sm:$0xff] %v10757_v14  ;;  %v10769_v18 = vpack.i.bf16 %v10760_v51, %v10757_v14  ;;  %v2277_v14 = vrot.slane %v10488_v48, 1  ;;  %v2279_v51 = vrot.slane %v10486_v17, 1  ;;  %v10800_v17 = vpack.i.bf16 %v10488_v48, %v10465_v9  ;;  %v13020_v9 = vld [vmem:[#allocation52_spill] sm:$0xff] }
 0x2e5   : > { %13009 = vst [vmem:[#allocation86_spill] sm:$0xff] %v10737_v27  ;;  %7303 = vrot.lane.b32.xlu0 %v7262_v36, %s8025_s8 }
 0x2e6   : > { %v10746_v11 = vpop.permute.xlu0 %7028  ;;  %v10810_v30 = vsel %vm503_vm2, %v2277_v14, %v2279_v51  ;;  %v6965_v51 = vunpack.i.l.bf16 %v10670_v35 }
 0x2e7   : > { %13019 = vst [vmem:[#allocation5_spill] sm:$0xff] %v10810_v30 }
 0x2e8   : > { %7298 = vrot.lane.b32.xlu1 %v7297_v55, %s8025_s8  ;;  %v10752_v10 = vpop.permute.xlu1 %7018 }
 0x2e9   : > { %7313 = vrot.lane.b32.xlu0 %v10750_v44, %s8024_s22 }
 0x2ea   : > { %v10765_v36 = vpop.permute.xlu0 %7033 }
 0x2ec   : > { %7308 = vrot.lane.b32.xlu1 %v7307_v25, %s8023_s21  ;;  %v10771_v5 = vpop.permute.xlu1 %7023  ;;  %v6945_v25 = vunpack.i.l.bf16 %v10643_v7 }
 0x2ed   : > { %7323 = vrot.lane.b32.xlu0 %v10769_v18, %s8025_s8 }
 0x2ee   : > { %v10780_v24 = vpop.permute.xlu0 %7048  ;;  %v3027_v47 = vsel %vm1689_vm4, %v13017_v15, %v6945_v25  ;;  %v3126_v15 = vsel %vm1689_vm4, %v13020_v9, %v7005_v21  ;;  %v6955_v9 = vunpack.i.l.bf16 %v10651_v40  ;;  %v6986_v21 = vunpack.i.h.bf16 %v10706_v39 }
 0x2ef   : > { %v3060_v25 = vsel %vm3059_vm14, %v3027_v47, %v6950_v3  ;;  %v13022_v47 = vrot.slane %v10471_v57, 1  ;;  %v6996_v57 = vunpack.i.h.bf16 %v10708_v61 }
 0x2f0   : > { %7318 = vrot.lane.b32.xlu1 %v13015_v62, %s8024_s22  ;;  %v10783_v8 = vpop.permute.xlu1 %7038  ;;  %v13016_v62 = vld [vmem:[#allocation10_spill] sm:$0xff] }
 0x2f1   : > { %7333 = vrot.lane.b32.xlu0 %v10440_v20, %s8023_s21  ;;  %v3028_v7 = vsel %vm1689_vm4, %v13016_v62, %v6946_v32  ;;  %v6966_v32 = vunpack.i.h.bf16 %v10670_v35  ;;  %v10840_v35 = vsel %vm503_vm2, %v13022_v47, %v2367_v38  ;;  %v7010_v38 = vunpack.i.l.bf16 %v10735_v26 }
 0x2f2   : > { %v10796_v2 = vpop.permute.xlu0 %7053  ;;  %v3061_v62 = vsel %vm3059_vm14, %v3028_v7, %v6951_v41  ;;  %v6985_v7 = vunpack.i.l.bf16 %v10706_v39  ;;  %v7011_v39 = vunpack.i.h.bf16 %v10735_v26  ;;  %v6961_v26 = vunpack.i.h.bf16 %v10668_v46 }
 0x2f4   : > { %7328 = vrot.lane.b32.xlu1 %v7287_v16, %s8025_s8  ;;  %v10804_v27 = vpop.permute.xlu1 %7043  ;;  %v10807_v16 = vsel %vm503_vm2, %v2276_v22, %v2277_v14  ;;  %v6956_v14 = vunpack.i.h.bf16 %v10651_v40 }
 0x2f5   : > { %13018 = vst [vmem:[#allocation10_spill] sm:$0xff] %v10807_v16  ;;  %7343 = vrot.lane.b32.xlu0 %v10800_v17, %s8024_s22  ;;  %v10827_v48 = vpack.i.bf16 %v10810_v30, %v10807_v16  ;;  %v6995_v16 = vunpack.i.l.bf16 %v10708_v61  ;;  %v13023_v30 = vld [vmem:[#allocation51_spill] sm:$0xff]  ;;  %v13025_v61 = vld [vmem:[#allocation81_spill] sm:$0xff] }
 0x2f6   : > { %v10823_v22 = vpop.permute.xlu0 %7068  ;;  %v3158_v3 = vsel %vm3059_vm14, %v3126_v15, %v6956_v14 }
 0x2f7   : > { %13021 = vst [vmem:[#allocation52_spill] sm:$0xff] %v10823_v22  ;;  %v7071_v49 = vunpack.i.h.bf16 %v10823_v22 }
 0x2f8   : > { %7338 = vrot.lane.b32.xlu1 %v7297_v55, %s8023_s21  ;;  %v3094_v55 = vsel %vm3092_vm15, %v3061_v62, %v6966_v32  ;;  %v13024_v32 = vpack.i.bf16 %v10403_v4, %v10400_v37  ;;  %v3093_v62 = vsel %vm3092_vm15, %v3060_v25, %v6965_v51  ;;  %v7006_v37 = vunpack.i.h.bf16 %v10720_v59  ;;  %v13027_v59 = vld [vmem:[#allocation19_spill] sm:$0xff] }
 0x2f9   : > { %v10830_v41 = vpop.permute.xlu1 %7058  ;;  %7353 = vrot.lane.b32.xlu0 %v10827_v48, %s8025_s8  ;;  %v3125_v40 = vsel %vm1689_vm4, %v13023_v30, %v7071_v49  ;;  %v3190_v49 = vsel %vm3092_vm15, %v3158_v3, %v6986_v21  ;;  %v2409_v25 = vrot.slane %v13025_v61, 1  ;;  %v2410_v51 = vrot.slane %v10508_v33, 1 }
 0x2fa   : > { %v7074_v15 = vpop.permute.xlu0 %7073  ;;  %v3157_v14 = vsel %vm3059_vm14, %v3125_v40, %v6955_v9  ;;  %v3221_v9 = vpack.c.bf16 %v3094_v55, %v3093_v62  ;;  %v13026_v40 = vld [vmem:[#allocation30_spill] sm:$0xff]  ;;  %v3030_v3 = vsel %vm1689_vm4, %v13027_v59, %v6996_v57  ;;  %v6960_v62 = vunpack.i.l.bf16 %v10668_v46 }
 0x2fb   : > { %v7075_v47 = vunpack.i.l.bf16 %v7074_v15  ;;  %v3189_v30 = vsel %vm3092_vm15, %v3157_v14, %v6985_v7  ;;  %v7040_v7 = vunpack.i.l.bf16 %v10783_v8  ;;  %v7076_v21 = vunpack.i.h.bf16 %v7074_v15  ;;  %v13028_v14 = vld [vmem:[#allocation43_spill] sm:$0xff]  ;;  %v13029_v15 = vld [vmem:[#allocation41_spill] sm:$0xff] }
 0x2fc   : > { %7348 = vrot.lane.b32.xlu1 %v13024_v32, %s8024_s22  ;;  %v3222_v4 = vpack.c.bf16 %v3190_v49, %v3189_v30  ;;  %v3029_v32 = vsel %vm1689_vm4, %v13026_v40, %v6995_v16  ;;  %v6981_v16 = vunpack.i.h.bf16 %v10695_v23  ;;  %v7041_v40 = vunpack.i.h.bf16 %v10783_v8 }
 0x2fd   : > { %v10856_v22 = vpop.permute.xlu1 %7063  ;;  %7363 = vrot.lane.b32.xlu0 %v10540_v60, %s8023_s21  ;;  %v3128_v30 = vsel %vm1689_vm4, %v13028_v14, %v7075_v47  ;;  %v3062_v55 = vsel %vm3059_vm14, %v3029_v32, %v7010_v38  ;;  %v6980_v57 = vunpack.i.l.bf16 %v10695_v23  ;;  %v3127_v47 = vsel %vm1689_vm4, %v13029_v15, %v7006_v37 }
 0x2fe   : > { %v10875_v49 = vpop.permute.xlu0 %7088  ;;  %3500 = vmatprep.mubr.bf16.mxu1 %v3222_v4  ;;  %v13030_v4 = vld [vmem:[#allocation83_spill] sm:$0xff]  ;;  %v7382_v46 = vpack.i.bf16 %v10840_v35, %v10523_v0  ;;  %v3159_v8 = vsel %vm3059_vm14, %v3127_v47, %v7040_v7  ;;  %v3160_v38 = vsel %vm3059_vm14, %v3128_v30, %v7041_v40  ;;  %v3095_v23 = vsel %vm3092_vm15, %v3062_v55, %v6960_v62  ;;  %v13033_v40 = vld [vmem:[#allocation12_spill] sm:$0xff] }
 0x2ff   : > { %3501 = vmatmul.mubr.bf16.vlgmr.msra.gmra.mrb[16].mxu1 %v3221_v9  ;;  %v7030_v15 = vunpack.i.l.bf16 %v10746_v11  ;;  %v2412_v55 = vrot.slane %v10527_v29, 1  ;;  %v13032_v62 = vld [vmem:[#allocation31_spill] sm:$0xff]  ;;  %v3031_v47 = vsel %vm1689_vm4, %v13033_v40, %v6980_v57  ;;  %v7046_v57 = vunpack.i.h.bf16 %v10804_v27 }
 0x300   : > { %7358 = vrot.lane.b32.xlu1 %v10750_v44, %s8025_s8  ;;  %v3063_v44 = vsel %vm3059_vm14, %v3030_v3, %v7011_v39  ;;  %v13031_v39 = vld [vmem:[#allocation78_spill] sm:$0xff]  ;;  %v6991_v3 = vunpack.i.h.bf16 %v10699_v63  ;;  %v2414_v40 = vrot.slane %v13025_v61, 2 }
 0x301   : > { %v7079_v6 = vpop.permute.xlu1 %7078  ;;  %7373 = vrot.lane.b32.xlu0 %v13030_v4, %s8024_s22  ;;  %v3129_v37 = vsel %vm1689_vm4, %v13031_v39, %v7076_v21  ;;  %v3032_v21 = vsel %vm1689_vm4, %v13032_v62, %v6981_v16  ;;  %v13034_v39 = vld [vmem:[#allocation79_spill] sm:$0xff] }
 0x302   : > { %v7081_v59 = vunpack.i.h.bf16 %v7079_v6  ;;  %v7080_v14 = vunpack.i.l.bf16 %v7079_v6  ;;  %v10896_v9 = vpop.permute.xlu0 %7098  ;;  %v3161_v16 = vsel %vm3059_vm14, %v3129_v37, %v7030_v15  ;;  %v2413_v37 = vsel %vm503_vm2, %v2410_v51, %v2412_v55 }
 0x303   : > { %v2415_v55 = vrot.slane %v10508_v33, 2 }
 0x304   : > { %7368 = vrot.lane.b32.xlu1 %v10769_v18, %s8023_s21  ;;  %v3191_v6 = vsel %vm3092_vm15, %v3159_v8, %v7080_v14  ;;  %v3192_v32 = vsel %vm3092_vm15, %v3160_v38, %v7081_v59  ;;  %v3096_v18 = vsel %vm3092_vm15, %v3063_v44, %v6961_v26  ;;  %v6990_v14 = vunpack.i.l.bf16 %v10699_v63 }
 0x305   : > { %v3225_v30 = vpack.c.bf16 %v3192_v32, %v3191_v6  ;;  %7383 = vrot.lane.b32.xlu0 %v7382_v46, %s8025_s8  ;;  %v7031_v26 = vunpack.i.h.bf16 %v10746_v11  ;;  %v7056_v44 = vunpack.i.h.bf16 %v10796_v2  ;;  %v3224_v8 = vpack.c.bf16 %v3096_v18, %v3095_v23 }
 0x306   : > { %v10903_v7 = vpop.permute.xlu1 %7083  ;;  %v7055_v38 = vunpack.i.l.bf16 %v10796_v2  ;;  %v7045_v63 = vunpack.i.l.bf16 %v10804_v27  ;;  %v7402_v23 = vpack.i.bf16 %v10508_v33, %v13025_v61  ;;  %v2411_v2 = vsel %vm503_vm2, %v2409_v25, %v2410_v51 }
 0x307   : > { %v7085_v59 = vunpack.i.l.bf16 %v10903_v7  ;;  %3508 = vmatprep.mubr.bf16.mxu1 %v3225_v30  ;;  %v10923_v6 = vpop.permute.xlu0 %7103  ;;  %v10925_v11 = vpop.f32.mrb[16].mxu0  ;;  %v13035_v18 = vpack.i.bf16 %v10515_v28, %v10512_v42  ;;  %v3064_v62 = vsel %vm3059_vm14, %v3031_v47, %v6990_v14  ;;  %v3065_v51 = vsel %vm3059_vm14, %v3032_v21, %v6991_v3 }
 0x308   : > { %7378 = vrot.lane.b32.xlu1 %v10440_v20, %s8024_s22  ;;  %3509 = vmatmul.mubr.bf16.gmra.mrb[20].mxu1 %v3224_v8  ;;  %v10934_v27 = vpop.f32.mrb[17].mxu0  ;;  %v3193_v15 = vsel %vm3092_vm15, %v3161_v16, %v7055_v38  ;;  %v2417_v42 = vrot.slane %v10527_v29, 2  ;;  %v3097_v47 = vsel %vm3092_vm15, %v3064_v62, %v7045_v63  ;;  %v3098_v61 = vsel %vm3092_vm15, %v3065_v51, %v7046_v57 }
 0x309   : > { %v3130_v46 = vsel %vm1689_vm4, %v13034_v39, %v7085_v59  ;;  %7393 = vrot.lane.b32.xlu0 %v13035_v18, %s8023_s21  ;;  %v10944_v59 = vpop.f32.mrb[18].mxu0  ;;  %v7412_v3 = vpack.i.bf16 %v2413_v37, %v2411_v2  ;;  %v3227_v29 = vpack.c.bf16 %v3098_v61, %v3097_v47  ;;  %v7066_v57 = vunpack.i.h.bf16 %v10856_v22  ;;  %v13036_v18 = vld [vmem:[#allocation22_spill] sm:$0xff] }
 0x30a   : > { %v10927_v32 = vpop.permute.xlu1 %7093  ;;  %v3162_v20 = vsel %vm3059_vm14, %v3130_v46, %v7031_v26  ;;  %v10951_v28 = vpop.f32.mrb[19].mxu0  ;;  %v7091_v63 = vunpack.i.h.bf16 %v10875_v49  ;;  %v7090_v39 = vunpack.i.l.bf16 %v10875_v49  ;;  %v7086_v2 = vunpack.i.h.bf16 %v10903_v7 }
 0x30b   : > { %v3194_v30 = vsel %vm3092_vm15, %v3162_v20, %v7056_v44  ;;  %v10953_v26 = vpop.permute.xlu0 %7118  ;;  %v2416_v44 = vsel %vm584_vm3, %v2414_v40, %v2415_v55  ;;  %v13038_v40 = vld [vmem:[#allocation66_spill] sm:$0xff]  ;;  %v7036_v47 = vunpack.i.h.bf16 %v10765_v36  ;;  %v7035_v61 = vunpack.i.l.bf16 %v10765_v36 }
 0x30c   : > { %7388 = vrot.lane.b32.xlu1 %v10800_v17, %s8025_s8  ;;  %v3228_v25 = vpack.c.bf16 %v3194_v30, %v3193_v15  ;;  %v2418_v17 = vsel %vm584_vm3, %v2415_v55, %v2417_v42  ;;  %v13037_v15 = vld [vmem:[#allocation33_spill] sm:$0xff] }
 0x30d   : > { %7403 = vrot.lane.b32.xlu0 %v7402_v23, %s8024_s22  ;;  %v3268_v33 = vpack.c.bf16 %v2418_v17, %v2416_v44 }
 0x30e   : > { %v7109_v14 = vpop.permute.xlu1 %7108  ;;  %3516 = vmatprep.mubr.bf16.mxu1 %v3228_v25 }
 0x30f   : > { %v10962_v21 = vpop.permute.xlu0 %7123  ;;  %6236 = vmatmul.mubr.msk.bf16.gmra.mrb[44].mxu0 %vm1689_vm4, %v3268_v33  ;;  %v7110_v30 = vunpack.i.l.bf16 %v7109_v14  ;;  %v7111_v44 = vunpack.i.h.bf16 %v7109_v14 }
 0x310   : > { %7398 = vrot.lane.b32.xlu1 %v10827_v48, %s8023_s21  ;;  %3517 = vmatmul.mubr.bf16.gmra.mrb[24].mxu1 %v3227_v29  ;;  %v7065_v48 = vunpack.i.l.bf16 %v10856_v22  ;;  %v3034_v22 = vsel %vm1689_vm4, %v13036_v18, %v7066_v57 }
 0x311   : > { %7413 = vrot.lane.b32.xlu0 %v7412_v3, %s8025_s8  ;;  %v3067_v42 = vsel %vm3059_vm14, %v3034_v22, %v7091_v63  ;;  %v13039_v3 = vld [vmem:[#allocation65_spill] sm:$0xff]  ;;  %v7050_v22 = vunpack.i.l.bf16 %v10780_v24 }
 0x312   : > { %v10965_v8 = vpop.permute.xlu1 %7113  ;;  %v3131_v33 = vsel %vm1689_vm4, %v13039_v3, %v7086_v2  ;;  %v7051_v2 = vunpack.i.h.bf16 %v10780_v24  ;;  %v7126_v24 = vunpack.i.h.bf16 %v10962_v21 }
 0x313   : > { %v7139_v16 = vpop.permute.xlu0 %7138  ;;  %v3163_v57 = vsel %vm3059_vm14, %v3131_v33, %v7110_v30  ;;  %v13041_v33 = vld [vmem:[#allocation4_spill] sm:$0xff] }
 0x314   : > { %7408 = vrot.lane.b32.xlu1 %v10540_v60, %s8024_s22  ;;  %v7140_v46 = vunpack.i.l.bf16 %v7139_v16  ;;  %v7141_v49 = vunpack.i.h.bf16 %v7139_v16 }
 0x316   : > { %v10970_v38 = vpop.permute.xlu1 %7128  ;;  %v3132_v25 = vsel %vm1689_vm4, %v13038_v40, %v7140_v46  ;;  %v3133_v63 = vsel %vm1689_vm4, %v10574_v31, %v7141_v49  ;;  %v7061_v40 = vunpack.i.h.bf16 %v10830_v41  ;;  %v7101_v49 = vunpack.i.h.bf16 %v10896_v9 }
 0x317   : > { %v10978_v20 = vpop.permute.xlu0 %7153  ;;  %v10980_v23 = vpop.f32.mrb[20].mxu0 }
 0x318   : > { %7418 = vrot.lane.b32.xlu1 %v13030_v4, %s8025_s8  ;;  %v10985_v37 = vpop.f32.mrb[21].mxu0  ;;  %v3033_v4 = vsel %vm1689_vm4, %v13037_v15, %v7065_v48  ;;  %v3164_v48 = vsel %vm3059_vm14, %v3132_v25, %v7111_v44  ;;  %v7100_v15 = vunpack.i.l.bf16 %v10896_v9  ;;  %v7060_v25 = vunpack.i.l.bf16 %v10830_v41  ;;  %v13040_v41 = vld [vmem:[#allocation21_spill] sm:$0xff] }
 0x319   : > { %v10991_v62 = vpop.f32.mrb[22].mxu0  ;;  %v3066_v7 = vsel %vm3059_vm14, %v3033_v4, %v7090_v39  ;;  %v3100_v39 = vsel %vm3092_vm15, %v3067_v42, %v7036_v47  ;;  %v7116_v42 = vunpack.i.h.bf16 %v10965_v8  ;;  %v7115_v47 = vunpack.i.l.bf16 %v10965_v8 }
 0x31a   : > { %v10982_v60 = vpop.permute.xlu1 %7133  ;;  %v10995_v51 = vpop.f32.mrb[23].mxu0  ;;  %v3099_v46 = vsel %vm3092_vm15, %v3066_v7, %v7035_v61  ;;  %v3165_v61 = vsel %vm3059_vm14, %v3133_v63, %v7100_v15  ;;  %v7125_v44 = vunpack.i.l.bf16 %v10962_v21  ;;  %v3036_v9 = vsel %vm1689_vm4, %v13040_v41, %v7051_v2 }
 0x31b   : > { %v10997_v55 = vpop.permute.xlu0 %7158  ;;  %v3230_v31 = vpack.c.bf16 %v3100_v39, %v3099_v46  ;;  %v7155_v41 = vunpack.i.l.bf16 %v10978_v20 }
 0x31e   : > { %v7144_v17 = vpop.permute.xlu1 %7143 }
 0x31f   : > { %v7146_v29 = vunpack.i.h.bf16 %v7144_v17  ;;  %v7145_v16 = vunpack.i.l.bf16 %v7144_v17  ;;  %v11011_v18 = vpop.permute.xlu0 %7163 }
 0x321   : > { %v3195_v36 = vsel %vm3092_vm15, %v3163_v57, %v7145_v16  ;;  %v3196_v14 = vsel %vm3092_vm15, %v3164_v48, %v7146_v29  ;;  %v3035_v29 = vsel %vm1689_vm4, %v13041_v33, %v7050_v22  ;;  %v3197_v57 = vsel %vm3092_vm15, %v3165_v61, %v7125_v44 }
 0x322   : > { %v7149_v4 = vpop.permute.xlu1 %7148  ;;  %v3231_v30 = vpack.c.bf16 %v3196_v14, %v3195_v36  ;;  %v3068_v21 = vsel %vm3059_vm14, %v3035_v29, %v7060_v25 }
 0x323   : > { %v7150_v7 = vunpack.i.l.bf16 %v7149_v4  ;;  %v11028_v3 = vpop.permute.xlu0 %7178  ;;  %v3101_v39 = vsel %vm3092_vm15, %v3068_v21, %v7115_v47 }
 0x324   : > { %3524 = vmatprep.mubr.bf16.mxu1 %v3231_v30 }
 0x325   : > { %v3134_v17 = vsel %vm1689_vm4, %v10577_v52, %v7150_v7  ;;  %3525 = vmatmul.mubr.bf16.gmra.mrb[28].mxu1 %v3230_v31  ;;  %v3069_v52 = vsel %vm3059_vm14, %v3036_v9, %v7061_v40  ;;  %v7136_v7 = vunpack.i.h.bf16 %v10982_v60  ;;  %v7135_v31 = vunpack.i.l.bf16 %v10982_v60 }
 0x326   : > { %v7169_v8 = vpop.permute.xlu1 %7168  ;;  %v3166_v16 = vsel %vm3059_vm14, %v3134_v17, %v7101_v49  ;;  %v3102_v63 = vsel %vm3092_vm15, %v3069_v52, %v7116_v42  ;;  %v7156_v17 = vunpack.i.h.bf16 %v10978_v20  ;;  %v7151_v9 = vunpack.i.h.bf16 %v7149_v4 }
 0x327   : > { %v3198_v48 = vsel %vm3092_vm15, %v3166_v16, %v7126_v24  ;;  %v11041_v36 = vpop.permute.xlu0 %7183  ;;  %v11043_v14 = vpop.f32.mrb[24].mxu0  ;;  %v3233_v15 = vpack.c.bf16 %v3102_v63, %v3101_v39  ;;  %v3038_v47 = vsel %vm1689_vm4, %v9877_v1, %v7136_v7  ;;  %v3037_v61 = vsel %vm1689_vm4, %v9865_v50, %v7135_v31 }
 0x328   : > { %v3234_v46 = vpack.c.bf16 %v3198_v48, %v3197_v57  ;;  %v11047_v22 = vpop.f32.mrb[25].mxu0  ;;  %v7170_v33 = vunpack.i.l.bf16 %v7169_v8  ;;  %v3070_v16 = vsel %vm3059_vm14, %v3037_v61, %v7155_v41  ;;  %v3071_v1 = vsel %vm3059_vm14, %v3038_v47, %v7156_v17 }
 0x329   : > { %v11049_v30 = vpop.f32.mrb[26].mxu0  ;;  %v7106_v50 = vunpack.i.h.bf16 %v10923_v6  ;;  %v7105_v57 = vunpack.i.l.bf16 %v10923_v6  ;;  %v7171_v48 = vunpack.i.h.bf16 %v7169_v8  ;;  %v7121_v52 = vunpack.i.h.bf16 %v10953_v26 }
 0x32a   : > { %v11045_v2 = vpop.permute.xlu1 %7173  ;;  %3532 = vmatprep.mubr.bf16.mxu1 %v3234_v46  ;;  %v11051_v25 = vpop.f32.mrb[27].mxu0  ;;  %v3135_v20 = vsel %vm1689_vm4, %v10538_v53, %v7151_v9  ;;  %v7120_v7 = vunpack.i.l.bf16 %v10953_v26  ;;  %v7131_v53 = vunpack.i.h.bf16 %v10970_v38  ;;  %v7130_v61 = vunpack.i.l.bf16 %v10970_v38 }
 0x32b   : > { %v11053_v40 = vpop.permute.xlu0 %7188  ;;  %v3103_v63 = vsel %vm3092_vm15, %v3070_v16, %v7105_v57  ;;  %v6976_v9 = vunpack.i.h.bf16 %v10683_v56  ;;  %v7021_v16 = vunpack.i.h.bf16 %v10752_v10  ;;  %v7175_v38 = vunpack.i.l.bf16 %v11045_v2  ;;  %v13042_v57 = vld [vmem:[#allocation35_spill] sm:$0xff] }
 0x32c   : > { %v7190_v26 = vunpack.i.l.bf16 %v11053_v40 }
 0x32d   : > { %3533 = vmatmul.mubr.bf16.gmra.mrb[32].mxu1 %v3233_v15  ;;  %v3104_v15 = vsel %vm3092_vm15, %v3071_v1, %v7106_v50  ;;  %v7020_v1 = vunpack.i.l.bf16 %v10752_v10  ;;  %v7025_v10 = vunpack.i.l.bf16 %v10771_v5 }
 0x32e   : > { %v11057_v49 = vpop.permute.xlu1 %7193 }
 0x32f   : > { %v7204_v42 = vpop.permute.xlu0 %7203 }
 0x330   : > { %v7205_v24 = vunpack.i.l.bf16 %v7204_v42  ;;  %v7206_v6 = vunpack.i.h.bf16 %v7204_v42 }
 0x332   : > { %v11063_v44 = vpop.permute.xlu1 %7198  ;;  %v3136_v60 = vsel %vm1689_vm4, %v10549_v34, %v7205_v24  ;;  %v3167_v34 = vsel %vm3059_vm14, %v3135_v20, %v7170_v33  ;;  %v3236_v33 = vpack.c.bf16 %v3104_v15, %v3103_v63 }
 0x333   : > { %v11069_v29 = vpop.permute.xlu0 %7208  ;;  %v3168_v39 = vsel %vm3059_vm14, %v3136_v60, %v7171_v48  ;;  %v6975_v60 = vunpack.i.l.bf16 %v10683_v56  ;;  %v3040_v48 = vsel %vm1689_vm4, %v13042_v57, %v7121_v52  ;;  %v3137_v56 = vsel %vm1689_vm4, %v10624_v19, %v7206_v6 }
 0x334   : > { %v3073_v15 = vsel %vm3059_vm14, %v3040_v48, %v7131_v53  ;;  %v7191_v57 = vunpack.i.h.bf16 %v11053_v40 }
 0x336   : > { %v7214_v21 = vpop.permute.xlu1 %7213 }
 0x337   : > { %v7216_v4 = vunpack.i.h.bf16 %v7214_v21  ;;  %v7215_v46 = vunpack.i.l.bf16 %v7214_v21  ;;  %v11083_v8 = vpop.permute.xlu0 %7223  ;;  %v11089_v24 = vpop.f32.mrb[28].mxu0  ;;  %v13043_v21 = vld [vmem:[#allocation7_spill] sm:$0xff] }
 0x338   : > { %v11095_v42 = vpop.f32.mrb[29].mxu0  ;;  %v3039_v20 = vsel %vm1689_vm4, %v13043_v21, %v7120_v7  ;;  %v7161_v7 = vunpack.i.h.bf16 %v10997_v55  ;;  %v7200_v21 = vunpack.i.l.bf16 %v11063_v44 }
 0x339   : > { %v3199_v31 = vsel %vm3092_vm15, %v3167_v34, %v7215_v46  ;;  %v3200_v47 = vsel %vm3092_vm15, %v3168_v39, %v7216_v4  ;;  %v11101_v50 = vpop.f32.mrb[30].mxu0  ;;  %v7176_v4 = vunpack.i.h.bf16 %v11045_v2  ;;  %v7160_v39 = vunpack.i.l.bf16 %v10997_v55 }
 0x33a   : > { %v11091_v17 = vpop.permute.xlu1 %7218  ;;  %v3237_v41 = vpack.c.bf16 %v3200_v47, %v3199_v31  ;;  %v11110_v46 = vpop.f32.mrb[31].mxu0  ;;  %v3072_v52 = vsel %vm3059_vm14, %v3039_v20, %v7130_v61  ;;  %v3140_v2 = vsel %vm1689_vm4, %v10601_v54, %v7190_v26  ;;  %v7186_v31 = vunpack.i.h.bf16 %v11041_v36 }
 0x33b   : > { %v11112_v34 = vpop.permute.xlu0 %7238  ;;  %v7185_v47 = vunpack.i.l.bf16 %v11041_v36  ;;  %v3106_v54 = vsel %vm3092_vm15, %v3073_v15, %v7176_v4  ;;  %v7201_v26 = vunpack.i.h.bf16 %v11063_v44  ;;  %v3172_v40 = vsel %vm3059_vm14, %v3140_v2, %v6976_v9 }
 0x33c   : > { %3540 = vmatprep.mubr.bf16.mxu1 %v3237_v41  ;;  %v3169_v41 = vsel %vm3059_vm14, %v3137_v56, %v7160_v39  ;;  %v13044_v56 = vld [vmem:[#allocation58_spill] sm:$0xff]  ;;  %v7211_v15 = vunpack.i.h.bf16 %v11069_v29  ;;  %v3204_v9 = vsel %vm3092_vm15, %v3172_v40, %v7021_v16  ;;  %v7210_v44 = vunpack.i.l.bf16 %v11069_v29 }
 0x33d   : > { %3541 = vmatmul.mubr.bf16.gmra.mrb[36].mxu1 %v3236_v33  ;;  %v3105_v33 = vsel %vm3092_vm15, %v3072_v52, %v7175_v38  ;;  %v3142_v4 = vsel %vm1689_vm4, %v13044_v56, %v7025_v10  ;;  %v6970_v10 = vunpack.i.l.bf16 %v10679_v58  ;;  %v7166_v16 = vunpack.i.h.bf16 %v11011_v18 }
 0x33e   : > { %v7229_v63 = vpop.permute.xlu1 %7228  ;;  %v7165_v29 = vunpack.i.l.bf16 %v11011_v18  ;;  %v7026_v40 = vunpack.i.h.bf16 %v10771_v5  ;;  %v7195_v56 = vunpack.i.l.bf16 %v11057_v49  ;;  %v7221_v5 = vunpack.i.h.bf16 %v11091_v17 }
 0x33f   : > { %v7231_v19 = vunpack.i.h.bf16 %v7229_v63  ;;  %v7230_v6 = vunpack.i.l.bf16 %v7229_v63  ;;  %v11130_v61 = vpop.permute.xlu0 %7248  ;;  %v13045_v63 = vld [vmem:[#allocation57_spill] sm:$0xff] }
 0x340   : > { %v3141_v52 = vsel %vm1689_vm4, %v13045_v63, %v7191_v57 }
 0x341   : > { %v3139_v53 = vsel %vm1689_vm4, %v10598_v43, %v7231_v19  ;;  %v3138_v55 = vsel %vm1689_vm4, %v10627_v45, %v7230_v6  ;;  %v3201_v43 = vsel %vm3092_vm15, %v3169_v41, %v7185_v47  ;;  %v3042_v47 = vsel %vm1689_vm4, %v9961_v12, %v7201_v26 }
 0x342   : > { %v11134_v48 = vpop.permute.xlu1 %7233  ;;  %v3170_v36 = vsel %vm3059_vm14, %v3138_v55, %v7161_v7  ;;  %v3171_v38 = vsel %vm3059_vm14, %v3139_v53, %v6975_v60  ;;  %v3239_v7 = vpack.c.bf16 %v3106_v54, %v3105_v33  ;;  %v3041_v41 = vsel %vm1689_vm4, %v9949_v13, %v7200_v21 }
 0x343   : > { %v3202_v45 = vsel %vm3092_vm15, %v3170_v36, %v7186_v31  ;;  %v3203_v20 = vsel %vm3092_vm15, %v3171_v38, %v7020_v1  ;;  %v7259_v60 = vpop.permute.xlu0 %7258  ;;  %v6971_v31 = vunpack.i.h.bf16 %v10679_v58  ;;  %v3173_v58 = vsel %vm3059_vm14, %v3141_v52, %v6970_v10  ;;  %v13048_v10 = vld [vmem:[#allocation25_spill] sm:$0xff] }
 0x344   : > { %v3240_v39 = vpack.c.bf16 %v3202_v45, %v3201_v43  ;;  %v7261_v2 = vunpack.i.h.bf16 %v7259_v60  ;;  %v7260_v19 = vunpack.i.l.bf16 %v7259_v60  ;;  %v3243_v1 = vpack.c.bf16 %v3204_v9, %v3203_v20 }
 0x345   : > { %v3174_v55 = vsel %vm3059_vm14, %v3142_v4, %v6971_v31  ;;  %v3205_v18 = vsel %vm3092_vm15, %v3173_v58, %v7210_v44  ;;  %v7181_v21 = vunpack.i.h.bf16 %v11028_v3  ;;  %v7180_v43 = vunpack.i.l.bf16 %v11028_v3 }
 0x346   : > { %v7244_v6 = vpop.permute.xlu1 %7243  ;;  %3548 = vmatprep.mubr.bf16.mxu1 %v3240_v39  ;;  %v3074_v33 = vsel %vm3059_vm14, %v3041_v41, %v7260_v19  ;;  %v3075_v57 = vsel %vm3059_vm14, %v3042_v47, %v7261_v2  ;;  %v3206_v36 = vsel %vm3092_vm15, %v3174_v55, %v7211_v15  ;;  %v7196_v45 = vunpack.i.h.bf16 %v11057_v49  ;;  %v13046_v2 = vld [vmem:[#allocation53_spill] sm:$0xff] }
 0x347   : > { %3549 = vmatmul.mubr.bf16.gmra.mrb[40].mxu1 %v3239_v7  ;;  %v11160_v53 = vpop.permute.xlu0 %7263  ;;  %v3107_v13 = vsel %vm3092_vm15, %v3074_v33, %v7165_v29  ;;  %v3108_v26 = vsel %vm3092_vm15, %v3075_v57, %v7166_v16  ;;  %v7225_v4 = vunpack.i.l.bf16 %v11083_v8  ;;  %v3246_v15 = vpack.c.bf16 %v3206_v36, %v3205_v18  ;;  %v13050_v36 = vld [vmem:[#allocation86_spill] sm:$0xff] }
 0x348   : > { %3556 = vmatprep.mubr.bf16.mxu1 %v3243_v1  ;;  %v11164_v12 = vpop.f32.mrb[32].mxu0  ;;  %v3242_v52 = vpack.c.bf16 %v3108_v26, %v3107_v13  ;;  %v7220_v60 = vunpack.i.l.bf16 %v11091_v17  ;;  %v7236_v3 = vunpack.i.h.bf16 %v11134_v48  ;;  %v7235_v7 = vunpack.i.l.bf16 %v11134_v48  ;;  %v13047_v1 = vld [vmem:[#allocation29_spill] sm:$0xff]  ;;  %v13049_v17 = vld [vmem:[#allocation54_spill] sm:$0xff] }
 0x349   : > { %v11172_v38 = vpop.f32.mrb[33].mxu0  ;;  %v7246_v44 = vunpack.i.h.bf16 %v7244_v6  ;;  %v7245_v49 = vunpack.i.l.bf16 %v7244_v6  ;;  %v3143_v19 = vsel %vm1689_vm4, %v13046_v2, %v7026_v40  ;;  %v3044_v31 = vsel %vm1689_vm4, %v13047_v1, %v7181_v21  ;;  %v13052_v2 = vld [vmem:[#allocation27_spill] sm:$0xff] }
 0x34a   : > { %v11166_v54 = vpop.permute.xlu1 %7253  ;;  %v11178_v20 = vpop.f32.mrb[34].mxu0  ;;  %v3043_v47 = vsel %vm1689_vm4, %v13048_v10, %v7180_v43  ;;  %v3144_v41 = vsel %vm1689_vm4, %v13049_v17, %v7225_v4  ;;  %v3077_v29 = vsel %vm3059_vm14, %v3044_v31, %v7196_v45  ;;  %v3175_v55 = vsel %vm3059_vm14, %v3143_v19, %v7235_v7  ;;  %v13053_v10 = vld [vmem:[#allocation44_spill] sm:$0xff] }
 0x34b   : > { %v11182_v39 = vpop.f32.mrb[35].mxu0  ;;  %v11184_v63 = vpop.permute.xlu0 %7273  ;;  %v7255_v48 = vunpack.i.l.bf16 %v11166_v54  ;;  %v3076_v6 = vsel %vm3059_vm14, %v3043_v47, %v7195_v56  ;;  %v3110_v58 = vsel %vm3092_vm15, %v3077_v29, %v7221_v5  ;;  %v3176_v13 = vsel %vm3059_vm14, %v3144_v41, %v7236_v3  ;;  %v13054_v17 = vld [vmem:[#allocation40_spill] sm:$0xff] }
 0x34c   : > { %v3109_v57 = vsel %vm3092_vm15, %v3076_v6, %v7220_v60  ;;  %v3207_v26 = vsel %vm3092_vm15, %v3175_v55, %v7245_v49  ;;  %v3208_v18 = vsel %vm3092_vm15, %v3176_v13, %v7246_v44  ;;  %v7016_v40 = vunpack.i.h.bf16 %v13050_v36  ;;  %v13055_v41 = vld [vmem:[#allocation84_spill] sm:$0xff] }
 0x34d   : > { %v7015_v21 = vunpack.i.l.bf16 %v13050_v36  ;;  %v7226_v43 = vunpack.i.h.bf16 %v11083_v8  ;;  %v7241_v45 = vunpack.i.h.bf16 %v11112_v34  ;;  %v7240_v56 = vunpack.i.l.bf16 %v11112_v34 }
 0x34e   : > { %v11190_v9 = vpop.permute.xlu1 %7268  ;;  %v7251_v4 = vunpack.i.h.bf16 %v11130_v61  ;;  %v3245_v60 = vpack.c.bf16 %v3110_v58, %v3109_v57  ;;  %v7250_v3 = vunpack.i.l.bf16 %v11130_v61  ;;  %v7266_v7 = vunpack.i.h.bf16 %v11160_v53 }
 0x34f   : > { %3557 = vmatmul.mubr.bf16.gmra.mrb[44].mxu1 %v3242_v52  ;;  %v11201_v16 = vpop.permute.xlu0 %7283  ;;  %v13051_v52 = vld [vmem:[#allocation85_spill] sm:$0xff]  ;;  %v7265_v44 = vunpack.i.l.bf16 %v11160_v53  ;;  %v3249_v8 = vpack.c.bf16 %v3208_v18, %v3207_v26  ;;  %v7001_v19 = vunpack.i.h.bf16 %v13052_v2  ;;  %v7000_v34 = vunpack.i.l.bf16 %v13052_v2  ;;  %v13056_v18 = vld [vmem:[#allocation42_spill] sm:$0xff] }
 0x350   : > { %3564 = vmatprep.mubr.bf16.mxu1 %v3246_v15  ;;  %v3146_v15 = vsel %vm1689_vm4, %v13051_v52, %v7255_v48  ;;  %v7276_v1 = vunpack.i.h.bf16 %v11184_v63  ;;  %v7275_v31 = vunpack.i.l.bf16 %v11184_v63  ;;  %v3046_v47 = vsel %vm1689_vm4, %v13053_v10, %v7016_v40  ;;  %v13057_v40 = vld [vmem:[#allocation39_spill] sm:$0xff]  ;;  %v13058_v52 = vld [vmem:[#allocation52_spill] sm:$0xff] }
 0x351   : > { %v3045_v61 = vsel %vm1689_vm4, %v13054_v17, %v7015_v21  ;;  %v3178_v53 = vsel %vm3059_vm14, %v3146_v15, %v7266_v7  ;;  %v3145_v48 = vsel %vm1689_vm4, %v13055_v41, %v7226_v43  ;;  %v3079_v57 = vsel %vm3059_vm14, %v3046_v47, %v7241_v45 }
 0x352   : > { %v11205_v33 = vpop.permute.xlu1 %7278  ;;  %v3078_v29 = vsel %vm3059_vm14, %v3045_v61, %v7240_v56  ;;  %v3112_v13 = vsel %vm3092_vm15, %v3079_v57, %v7251_v4  ;;  %v3177_v26 = vsel %vm3059_vm14, %v3145_v48, %v7265_v44  ;;  %v3048_v36 = vsel %vm1689_vm4, %v13056_v18, %v7001_v19  ;;  %v13059_v48 = vld [vmem:[#allocation73_spill] sm:$0xff] }
 0x353   : > { %v11221_v5 = vpop.permute.xlu0 %7293  ;;  %v3111_v55 = vsel %vm3092_vm15, %v3078_v29, %v7250_v3  ;;  %v3047_v21 = vsel %vm1689_vm4, %v13057_v40, %v7000_v34  ;;  %v3209_v56 = vsel %vm3092_vm15, %v3177_v26, %v7275_v31  ;;  %v3210_v45 = vsel %vm3092_vm15, %v3178_v53, %v7276_v1 }
 0x354   : > { %v7070_v15 = vunpack.i.l.bf16 %v13058_v52  ;;  %v7271_v4 = vunpack.i.h.bf16 %v11190_v9  ;;  %v7270_v3 = vunpack.i.l.bf16 %v11190_v9  ;;  %v7285_v44 = vunpack.i.l.bf16 %v11201_v16 }
 0x355   : > { %v7280_v2 = vunpack.i.l.bf16 %v11205_v33  ;;  %v3248_v1 = vpack.c.bf16 %v3112_v13, %v3111_v55  ;;  %v7096_v31 = vunpack.i.h.bf16 %v10927_v32  ;;  %v3252_v17 = vpack.c.bf16 %v3210_v45, %v3209_v56  ;;  %v13060_v55 = vld [vmem:[#allocation46_spill] sm:$0xff] }
 0x356   : > { %v7289_v49 = vpop.permute.xlu1 %7288  ;;  %v7095_v9 = vunpack.i.l.bf16 %v10927_v32  ;;  %v7286_v29 = vunpack.i.h.bf16 %v11201_v16  ;;  %v3080_v57 = vsel %vm3059_vm14, %v3047_v21, %v7270_v3  ;;  %v3148_v13 = vsel %vm1689_vm4, %v13060_v55, %v7285_v44 }
 0x357   : > { %3565 = vmatmul.mubr.bf16.gmra.mrb[48].mxu1 %v3245_v60  ;;  %v11237_v6 = vpop.permute.xlu0 %7303  ;;  %v7256_v60 = vunpack.i.h.bf16 %v11166_v54  ;;  %v7291_v10 = vunpack.i.h.bf16 %v7289_v49  ;;  %v7290_v54 = vunpack.i.l.bf16 %v7289_v49  ;;  %v3081_v49 = vsel %vm3059_vm14, %v3048_v36, %v7271_v4 }
 0x358   : > { %3572 = vmatprep.mubr.bf16.mxu1 %v3249_v8  ;;  %v11241_v63 = vpop.f32.mrb[36].mxu0  ;;  %v7281_v8 = vunpack.i.h.bf16 %v11205_v33  ;;  %v7296_v32 = vunpack.i.h.bf16 %v11221_v5  ;;  %v7295_v40 = vunpack.i.l.bf16 %v11221_v5  ;;  %v7306_v56 = vunpack.i.h.bf16 %v11237_v6 }
 0x359   : > { %v11250_v43 = vpop.f32.mrb[37].mxu0  ;;  %v3147_v33 = vsel %vm1689_vm4, %v13059_v48, %v7256_v60  ;;  %v3180_v36 = vsel %vm3059_vm14, %v3148_v13, %v7291_v10  ;;  %v7305_v45 = vunpack.i.l.bf16 %v11237_v6  ;;  %v13061_v60 = vld [vmem:[#allocation72_spill] sm:$0xff]  ;;  %v3908_v13 = vld [vmem:[#allocation3] sm:$0xff] }
 0x35a   : > { %v7299_v58 = vpop.permute.xlu1 %7298  ;;  %v11258_v7 = vpop.f32.mrb[38].mxu0  ;;  %v3114_v18 = vsel %vm3092_vm15, %v3081_v49, %v7281_v8  ;;  %v3179_v21 = vsel %vm3059_vm14, %v3147_v33, %v7290_v54  ;;  %v13062_v8 = vld [vmem:[#allocation60_spill] sm:$0xff]  ;;  %v13064_v54 = vld [vmem:[#allocation45_spill] sm:$0xff] }
 0x35b   : > { %v11263_v19 = vpop.f32.mrb[39].mxu0  ;;  %v7314_v34 = vpop.permute.xlu0 %7313  ;;  %v7301_v61 = vunpack.i.h.bf16 %v7299_v58  ;;  %v7300_v53 = vunpack.i.l.bf16 %v7299_v58  ;;  %v3113_v58 = vsel %vm3092_vm15, %v3080_v57, %v7280_v2  ;;  %v3050_v5 = vsel %vm1689_vm4, %v13062_v8, %v7096_v31  ;;  %v13063_v2 = vld [vmem:[#allocation56_spill] sm:$0xff] }
 0x35c   : > { %v7315_v48 = vunpack.i.l.bf16 %v7314_v34  ;;  %v3149_v10 = vsel %vm1689_vm4, %v13064_v54, %v7286_v29  ;;  %v3251_v49 = vpack.c.bf16 %v3114_v18, %v3113_v58  ;;  %v3083_v55 = vsel %vm3059_vm14, %v3050_v5, %v7296_v32 }
 0x35d   : > { %v3211_v3 = vsel %vm3092_vm15, %v3179_v21, %v7300_v53  ;;  %v3212_v44 = vsel %vm3092_vm15, %v3180_v36, %v7301_v61  ;;  %v3910_v21 = vld [vmem:[#allocation3 + $0x10] sm:$0x3]  ;;  %v3116_v29 = vsel %vm3092_vm15, %v3083_v55, %v7306_v56  ;;  %v4090_v54 = vrot.slane %v3908_v13, 2 }
 0x35e   : > { %v11266_v47 = vpop.permute.xlu1 %7308  ;;  %v3255_v53 = vpack.c.bf16 %v3212_v44, %v3211_v3  ;;  %v3181_v58 = vsel %vm3059_vm14, %v3149_v10, %v7315_v48  ;;  %v4013_v18 = vrot.slane %v3910_v21, 1  ;;  %v13065_v3 = vld [vmem:[#allocation55_spill] sm:$0xff] }
 0x35f   : > { %v7310_v41 = vunpack.i.l.bf16 %v11266_v47  ;;  %3573 = vmatmul.mubr.bf16.gmra.mrb[52].mxu1 %v3248_v1  ;;  %v7324_v26 = vpop.permute.xlu0 %7323  ;;  %v3049_v1 = vsel %vm1689_vm4, %v13063_v2, %v7095_v9  ;;  %v3909_v9 = vld [vmem:[#allocation3 + $0x8] sm:$0xff]  ;;  %v7311_v2 = vunpack.i.h.bf16 %v11266_v47 }
 0x360   : > { %3580 = vmatprep.mubr.bf16.mxu1 %v3252_v17  ;;  %v7316_v17 = vunpack.i.h.bf16 %v7314_v34  ;;  %v7326_v33 = vunpack.i.h.bf16 %v7324_v26  ;;  %v7325_v6 = vunpack.i.l.bf16 %v7324_v26  ;;  %v3082_v61 = vsel %vm3059_vm14, %v3049_v1, %v7295_v40 }
 0x361   : > { %v3150_v4 = vsel %vm1689_vm4, %v13061_v60, %v7310_v41  ;;  %v3115_v34 = vsel %vm3092_vm15, %v3082_v61, %v7305_v45  ;;  %v4010_v26 = vrot.slane %v3908_v13, 1  ;;  %v4011_v36 = vrot.slane %v3909_v9, 1 }
 0x362   : > { %v11282_v16 = vpop.permute.xlu1 %7318  ;;  %v3182_v31 = vsel %vm3059_vm14, %v3150_v4, %v7316_v17  ;;  %v3213_v40 = vsel %vm3092_vm15, %v3181_v58, %v7325_v6  ;;  %v3051_v45 = vsel %vm1689_vm4, %v13065_v3, %v7070_v15  ;;  %v3254_v8 = vpack.c.bf16 %v3116_v29, %v3115_v34  ;;  %v13068_v3 = vld [vmem:[#allocation70_spill] sm:$0xff] }
 0x363   : > { %v7334_v57 = vpop.permute.xlu0 %7333  ;;  %v3214_v32 = vsel %vm3092_vm15, %v3182_v31, %v7326_v33  ;;  %v4012_v4 = vsel %vm503_vm2, %v4010_v26, %v4011_v36  ;;  %v4014_v5 = vsel %vm503_vm2, %v4011_v36, %v4013_v18  ;;  %v7321_v1 = vunpack.i.h.bf16 %v11282_v16 }
 0x364   : > { %v7422_v48 = vpack.i.bf16 %v4014_v5, %v4012_v4  ;;  %v7320_v52 = vunpack.i.l.bf16 %v11282_v16  ;;  %v3258_v15 = vpack.c.bf16 %v3214_v32, %v3213_v40  ;;  %v4091_v33 = vrot.slane %v3909_v9, 2  ;;  %v13066_v9 = vld [vmem:[#allocation59_spill] sm:$0xff]  ;;  %v11335_v40 = vld [vmem:[#allocation3 + $0x198] sm:$0xff] }
 0x365   : > { %v4093_v6 = vrot.slane %v3910_v21, 2  ;;  %v3052_v21 = vsel %vm1689_vm4, %v13066_v9, %v7311_v2  ;;  %v13067_v32 = vld [vmem:[#allocation87_spill] sm:$0xff] }
 0x366   : > { %v11297_v41 = vpop.permute.xlu1 %7328  ;;  %7423 = vrot.lane.b32.xlu1 %v7422_v48, %s8023_s21  ;;  %v4092_v16 = vsel %vm584_vm3, %v4090_v54, %v4091_v33  ;;  %v3085_v18 = vsel %vm3059_vm14, %v3052_v21, %v7321_v1 }
 0x367   : > { %3581 = vmatmul.mubr.bf16.gmra.mrb[56].mxu1 %v3251_v49  ;;  %v7344_v60 = vpop.permute.xlu0 %7343  ;;  %v7336_v49 = vunpack.i.h.bf16 %v7334_v57  ;;  %v7331_v61 = vunpack.i.h.bf16 %v11297_v41  ;;  %v7330_v55 = vunpack.i.l.bf16 %v11297_v41  ;;  %v4094_v26 = vsel %vm584_vm3, %v4091_v33, %v4093_v6  ;;  %v7923_v6 = vld [vmem:[%s12578_s5 + $0x80] sm:$0xff]  }
 0x368   : > { %3588 = vmatprep.mubr.bf16.mxu1 %v3255_v53  ;;  %v7335_v53 = vunpack.i.l.bf16 %v7334_v57  ;;  %v7346_v34 = vunpack.i.h.bf16 %v7344_v60  ;;  %v7345_v13 = vunpack.i.l.bf16 %v7344_v60  ;;  %v7427_v58 = vpack.i.bf16 %v4094_v26, %v4092_v16  ;;  %v11337_v60 = vld [vmem:[#allocation3 + $0x1a0] sm:$0xff]  ;;  %6239 = vmatprep.subr.bf16.mxu1 %v7923_v6 }
 0x369   : > { %v11312_v44 = vpop.f32.mrb[40].mxu0  ;;  %v3084_v41 = vsel %vm3059_vm14, %v3051_v45, %v7320_v52  ;;  %v3152_v4 = vsel %vm1689_vm4, %v13067_v32, %v7336_v49  ;;  %v7432_v52 = vpack.i.bf16 %v11337_v60, %v11335_v40  ;;  %6240 = vmatpush3.bf16.msra.mxu1 %v7923_v6 }
 0x36a   : > { %v11314_v56 = vpop.permute.xlu1 %7338  ;;  %v11319_v17 = vpop.f32.mrb[41].mxu0  ;;  %v3151_v5 = vsel %vm1689_vm4, %v13068_v3, %v7335_v53  ;;  %v3117_v48 = vsel %vm3092_vm15, %v3084_v41, %v7330_v55  ;;  %7428 = vrot.lane.b32.xlu1 %v7427_v58, %s8024_s22  ;;  %v3184_v54 = vsel %vm3059_vm14, %v3152_v4, %v7346_v34  ;;  %v13069_v41 = vld [vmem:[#allocation71_spill] sm:$0xff]  ;;  %v13072_v3 = vld [vmem:[#allocation10_spill] sm:$0xff] }
 0x36b   : > { %v11322_v10 = vpop.f32.mrb[42].mxu0  ;;  %v7354_v31 = vpop.permute.xlu0 %7353  ;;  %v3183_v1 = vsel %vm3059_vm14, %v3151_v5, %v7345_v13  ;;  %v7341_v49 = vunpack.i.h.bf16 %v11314_v56  ;;  %v7340_v53 = vunpack.i.l.bf16 %v11314_v56  ;;  %7433 = vrot.lane.b32.xlu0 %v7432_v52, %s8024_s22 }
 0x36c   : > { %v11326_v47 = vpop.f32.mrb[43].mxu0  ;;  %v7356_v57 = vunpack.i.h.bf16 %v7354_v31  ;;  %v7355_v36 = vunpack.i.l.bf16 %v7354_v31 }
 0x36d   : > { %v3054_v56 = vsel %vm1689_vm4, %v13069_v41, %v7341_v49 }
 0x36e   : > { %v7349_v29 = vpop.permute.xlu1 %7348  ;;  %v3216_v33 = vsel %vm3092_vm15, %v3184_v54, %v7356_v57 }
 0x36f   : > { %3589 = vmatmul.mubr.bf16.gmra.mrb[60].mxu1 %v3254_v8  ;;  %v7364_v2 = vpop.permute.xlu0 %7363  ;;  %v3118_v8 = vsel %vm3092_vm15, %v3085_v18, %v7331_v61  ;;  %v7351_v55 = vunpack.i.h.bf16 %v7349_v29  ;;  %v7350_v31 = vunpack.i.l.bf16 %v7349_v29  ;;  %v13070_v18 = vld [vmem:[#allocation68_spill] sm:$0xff]  ;;  %v13071_v29 = vld [vmem:[#allocation5_spill] sm:$0xff] }
 0x370   : > { %3596 = vmatprep.mubr.bf16.mxu1 %v3258_v15  ;;  %v3215_v15 = vsel %vm3092_vm15, %v3183_v1, %v7355_v36  ;;  %v3257_v61 = vpack.c.bf16 %v3118_v8, %v3117_v48  ;;  %v7366_v34 = vunpack.i.h.bf16 %v7364_v2  ;;  %v7365_v13 = vunpack.i.l.bf16 %v7364_v2 }
 0x371   : > { %v3261_v57 = vpack.c.bf16 %v3216_v33, %v3215_v15  ;;  %v3053_v32 = vsel %vm1689_vm4, %v13070_v18, %v7340_v53  ;;  %v3087_v8 = vsel %vm3059_vm14, %v3054_v56, %v7351_v55  ;;  %v13074_v18 = vld [vmem:[#allocation67_spill] sm:$0xff] }
 0x372   : > { %v7359_v45 = vpop.permute.xlu1 %7358  ;;  %v3154_v4 = vsel %vm1689_vm4, %v13071_v29, %v7366_v34  ;;  %v3153_v5 = vsel %vm1689_vm4, %v13072_v3, %v7365_v13  ;;  %v3086_v48 = vsel %vm3059_vm14, %v3053_v32, %v7350_v31 }
 0x373   : > { %v7374_v16 = vpop.permute.xlu0 %7373  ;;  %v7361_v26 = vunpack.i.h.bf16 %v7359_v45  ;;  %v7360_v9 = vunpack.i.l.bf16 %v7359_v45 }
 0x374   : > { %v7376_v36 = vunpack.i.h.bf16 %v7374_v16  ;;  %v7375_v58 = vunpack.i.l.bf16 %v7374_v16 }
 0x375   : > { %v3119_v52 = vsel %vm3092_vm15, %v3086_v48, %v7360_v9  ;;  %v3120_v15 = vsel %vm3092_vm15, %v3087_v8, %v7361_v26  ;;  %v13073_v26 = vld [vmem:[#allocation69_spill] sm:$0xff] }
 0x376   : > { %v7369_v21 = vpop.permute.xlu1 %7368  ;;  %v3185_v33 = vsel %vm3059_vm14, %v3153_v5, %v7375_v58  ;;  %v3186_v6 = vsel %vm3059_vm14, %v3154_v4, %v7376_v36  ;;  %v3260_v16 = vpack.c.bf16 %v3120_v15, %v3119_v52  ;;  %v7924_v4 = vld [vmem:[%s12578_s5 + $0x88] sm:$0xff]  }
 0x377   : > { %3597 = vmatmul.mubr.bf16.gmra.mrb[64].mxu1 %v3257_v61  ;;  %v7384_v2 = vpop.permute.xlu0 %7383  ;;  %v7371_v49 = vunpack.i.h.bf16 %v7369_v21  ;;  %v7370_v53 = vunpack.i.l.bf16 %v7369_v21  ;;  %6241 = vmatprep.subr.bf16.mxu1 %v7924_v4 }
 0x378   : > { %3604 = vmatprep.mubr.bf16.mxu1 %v3261_v57  ;;  %v7386_v45 = vunpack.i.h.bf16 %v7384_v2  ;;  %v7385_v1 = vunpack.i.l.bf16 %v7384_v2  ;;  %6242 = vmatpush3.bf16.msra.mxu1 %v7924_v4 }
 0x379   : > { %v3056_v58 = vsel %vm1689_vm4, %v13073_v26, %v7371_v49  ;;  %v3055_v36 = vsel %vm1689_vm4, %v13074_v18, %v7370_v53  ;;  %v13076_v26 = vld [vmem:[#allocation80_spill] sm:$0xff] }
 0x37a   : > { %v7379_v54 = vpop.permute.xlu1 %7378  ;;  %v3217_v61 = vsel %vm3092_vm15, %v3185_v33, %v7385_v1  ;;  %v3218_v34 = vsel %vm3092_vm15, %v3186_v6, %v7386_v45 }
 0x37b   : > { %v7381_v31 = vunpack.i.h.bf16 %v7379_v54  ;;  %v7380_v13 = vunpack.i.l.bf16 %v7379_v54  ;;  %v7394_v55 = vpop.permute.xlu0 %7393  ;;  %v3264_v57 = vpack.c.bf16 %v3218_v34, %v3217_v61 }
 0x37c   : > { %v7396_v3 = vunpack.i.h.bf16 %v7394_v55  ;;  %v7395_v5 = vunpack.i.l.bf16 %v7394_v55 }
 0x37d   : > { %v3088_v32 = vsel %vm3059_vm14, %v3055_v36, %v7380_v13  ;;  %v3089_v29 = vsel %vm3059_vm14, %v3056_v58, %v7381_v31 }
 0x37e   : > { %v7389_v41 = vpop.permute.xlu1 %7388  ;;  %v3156_v15 = vsel %vm1689_vm4, %v10840_v35, %v7396_v3  ;;  %v3155_v33 = vsel %vm1689_vm4, %v10523_v0, %v7395_v5 }
 0x37f   : > { %v7391_v56 = vunpack.i.h.bf16 %v7389_v41  ;;  %v7390_v9 = vunpack.i.l.bf16 %v7389_v41  ;;  %3605 = vmatmul.mubr.bf16.gmra.mrb[68].mxu1 %v3260_v16  ;;  %v7404_v21 = vpop.permute.xlu0 %7403 }
 0x380   : > { %3612 = vmatprep.mubr.bf16.mxu1 %v3264_v57  ;;  %v7406_v45 = vunpack.i.h.bf16 %v7404_v21  ;;  %v7405_v1 = vunpack.i.l.bf16 %v7404_v21 }
 0x381   : > { %v3121_v48 = vsel %vm3092_vm15, %v3088_v32, %v7390_v9  ;;  %v3122_v8 = vsel %vm3092_vm15, %v3089_v29, %v7391_v56  ;;  %v13075_v9 = vld [vmem:[#allocation82_spill] sm:$0xff] }
 0x382   : > { %v7399_v2 = vpop.permute.xlu1 %7398  ;;  %v3263_v52 = vpack.c.bf16 %v3122_v8, %v3121_v48  ;;  %v3187_v31 = vsel %vm3059_vm14, %v3155_v33, %v7405_v1  ;;  %v3188_v13 = vsel %vm3059_vm14, %v3156_v15, %v7406_v45  ;;  %v7925_v8 = vld [vmem:[%s12578_s5 + $0x40] sm:$0xff]  }
 0x383   : > { %v7414_v54 = vpop.permute.xlu0 %7413  ;;  %v7401_v61 = vunpack.i.h.bf16 %v7399_v2  ;;  %v7400_v34 = vunpack.i.l.bf16 %v7399_v2  ;;  %v11404_v2 = vld [vmem:[%s12577_s4] ss:$0 sm:$0xff]  ;;  %6035 = vmatprep.subr.bf16.mxu0 %v7925_v8 }
 0x384   : > { %v7416_v6 = vunpack.i.h.bf16 %v7414_v54  ;;  %v7415_v49 = vunpack.i.l.bf16 %v7414_v54  ;;  %v7926_v45 = vld [vmem:[%s12578_s5] sm:$0xff]  }
 0x385   : > { %v3058_v0 = vsel %vm1689_vm4, %v13075_v9, %v7401_v61  ;;  %v3057_v58 = vsel %vm1689_vm4, %v13076_v26, %v7400_v34  ;;  %6036 = vmatpush3.bf16.msra.mxu0 %v7926_v45  ;;  %v7928_v61 = vld [vmem:[%s12578_s5 + $0x8] sm:$0xff]   ;;  %v7932_v26 = vld [vmem:[%s12578_s5 + $0x18] sm:$0xff]  }
 0x386   : > { %v7409_v53 = vpop.permute.xlu1 %7408  ;;  %v3219_v57 = vsel %vm3092_vm15, %v3187_v31, %v7415_v49  ;;  %v3220_v41 = vsel %vm3092_vm15, %v3188_v13, %v7416_v6 }
 0x387   : > { %3613 = vmatmul.mubr.bf16.gmra.mrb[72].mxu1 %v3263_v52  ;;  %v7411_v55 = vunpack.i.h.bf16 %v7409_v53  ;;  %v7410_v16 = vunpack.i.l.bf16 %v7409_v53  ;;  %v3267_v35 = vpack.c.bf16 %v3220_v41, %v3219_v57  ;;  %v7927_v53 = vld [vmem:[%s12578_s5 + $0x48] sm:$0xff]  }
 0x388   : > { %6037 = vmatprep.subr.bf16.mxu0 %v7927_v53 }
 0x389   : > { %3620 = vmatprep.mubr.bf16.mxu1 %v3267_v35  ;;  %v3090_v21 = vsel %vm3059_vm14, %v3057_v58, %v7410_v16  ;;  %v3091_v32 = vsel %vm3059_vm14, %v3058_v0, %v7411_v55  ;;  %6038 = vmatpush3.bf16.msra.mxu0 %v7928_v61  ;;  %v7930_v16 = vld [vmem:[%s12578_s5 + $0x10] sm:$0xff]  }
 0x38a   : > { %v7419_v56 = vpop.permute.xlu1 %7418 }
 0x38b   : > { %v7421_v18 = vunpack.i.h.bf16 %v7419_v56  ;;  %v7420_v36 = vunpack.i.l.bf16 %v7419_v56 }
 0x38d   : > { %v3123_v29 = vsel %vm3092_vm15, %v3090_v21, %v7420_v36  ;;  %v3124_v4 = vsel %vm3092_vm15, %v3091_v32, %v7421_v18  ;;  %v7933_v21 = vld [vmem:[%s12578_s5 + $0x60] sm:$0xff]  }
 0x38e   : > { %v3266_v3 = vpack.c.bf16 %v3124_v4, %v3123_v29 }
 0x390   : > { %3621 = vmatmul.mubr.bf16.gmra.mrb[76].mxu1 %v3266_v3 }
 0x3d2   : > { %v5921_v5 = vpop.f32.mrb[16].mxu1 }
 0x3d3   : > { %v5922_v48 = vpop.f32.mrb[17].mxu1 }
 0x3d4   : > { %v5923_v1 = vadd.f32 %v5922_v48, %v5921_v5  ;;  %v5924_v54 = vpop.f32.mrb[18].mxu1 }
 0x3d5   : > { %v5925_v52 = vpop.f32.mrb[19].mxu1 }
 0x3d6   : > { %v3503_v15 = vadd.f32 %v5923_v1, %v11404_v2  ;;  %v5926_v33 = vadd.f32 %v5925_v52, %v5924_v54 }
 0x3d8   : > { %v3664_v6 = vadd.f32 %v10934_v27, %v3503_v15  ;;  %v3506_v49 = vadd.f32 %v5926_v33, %v11404_v2  ;;  %v7929_v27 = vld [vmem:[%s12578_s5 + $0x50] sm:$0xff]  }
 0x3d9   : > { %6039 = vmatprep.subr.bf16.mxu0 %v7929_v27 }
 0x3da   : > { %v3790_v34 = vmax.f32 %v3664_v6, 0.0  ;;  %v3667_v31 = vadd.f32 %v10951_v28, %v3506_v49  ;;  %v7931_v28 = vld [vmem:[%s12578_s5 + $0x58] sm:$0xff]   ;;  %6040 = vmatpush3.bf16.msra.mxu0 %v7930_v16 }
 0x3db   : > { %v5927_v13 = vpop.f32.mrb[20].mxu1  ;;  %6041 = vmatprep.subr.bf16.mxu0 %v7931_v28 }
 0x3dc   : > { %v5928_v55 = vpop.f32.mrb[21].mxu1  ;;  %3876 = vst.msk [vmem:[#allocation3 + $0x19] sm:$0xff] %vm1689_vm4, %v3790_v34  ;;  %v3791_v57 = vmax.f32 %v3667_v31, 0.0 }
 0x3dd   : > { %v5929_v41 = vadd.f32 %v5928_v55, %v5927_v13  ;;  %v5930_v35 = vpop.f32.mrb[22].mxu1 }
 0x3de   : > { %v5931_v56 = vpop.f32.mrb[23].mxu1  ;;  %3877 = vst.msk [vmem:[#allocation3 + $0x21] sm:$0xff] %vm1689_vm4, %v3791_v57  ;;  %6042 = vmatpush3.bf16.msra.mxu0 %v7932_v26 }
 0x3df   : > { %v3511_v9 = vadd.f32 %v5929_v41, %v11404_v2  ;;  %v5932_v0 = vadd.f32 %v5931_v56, %v5930_v35  ;;  %6043 = vmatprep.subr.bf16.mxu0 %v7933_v21  ;;  %v7935_v35 = vld [vmem:[%s12578_s5 + $0x68] sm:$0xff]  }
 0x3e1   : > { %v3672_v58 = vadd.f32 %v10925_v11, %v3511_v9  ;;  %v3514_v18 = vadd.f32 %v5932_v0, %v11404_v2  ;;  %v7934_v11 = vld [vmem:[%s12578_s5 + $0x20] sm:$0xff]  }
 0x3e2   : > { %v11439_v36 = vpop.f32.mrb[44].mxu0  ;;  %6044 = vmatpush3.bf16.msra.mxu0 %v7934_v11 }
 0x3e3   : > { %v3792_v32 = vmax.f32 %v3672_v58, 0.0  ;;  %v3675_v29 = vadd.f32 %v10944_v59, %v3514_v18  ;;  %v5933_v4 = vpop.f32.mrb[24].mxu1  ;;  %v11445_v3 = vpop.f32.mrb[45].mxu0  ;;  %v3911_v48 = vld [vmem:[#allocation3 + $0x18] sm:$0xff]  ;;  %6045 = vmatprep.subr.bf16.mxu0 %v7935_v35 }
 0x3e4   : > { %v5934_v5 = vpop.f32.mrb[25].mxu1  ;;  %v11451_v54 = vpop.f32.mrb[46].mxu0  ;;  %v4095_v33 = vrot.slane %v3911_v48, 2  ;;  %v4015_v13 = vrot.slane %v3911_v48, 1 }
 0x3e5   : > { %3878 = vst.msk [vmem:[#allocation3 + $0x31] sm:$0xff] %vm1689_vm4, %v3792_v32  ;;  %v3793_v8 = vmax.f32 %v3675_v29, 0.0  ;;  %v5935_v45 = vadd.f32 %v5934_v5, %v5933_v4  ;;  %v5936_v1 = vpop.f32.mrb[26].mxu1  ;;  %v3912_v59 = vld [vmem:[#allocation3 + $0x20] sm:$0xff]  ;;  %v3913_v15 = vld [vmem:[#allocation3 + $0x28] sm:$0x3] }
 0x3e6   : > { %v5937_v52 = vpop.f32.mrb[27].mxu1  ;;  %v11453_v6 = vpop.f32.mrb[47].mxu0  ;;  %v7437_v61 = vpack.i.bf16 %v3912_v59, %v3911_v48  ;;  %v4096_v34 = vrot.slane %v3912_v59, 2  ;;  %v4098_v31 = vrot.slane %v3913_v15, 2  ;;  %v4016_v55 = vrot.slane %v3912_v59, 1  ;;  %v7937_v29 = vld [vmem:[%s12578_s5 + $0x70] sm:$0xff]  }
 0x3e7   : > { %3879 = vst.msk [vmem:[#allocation3 + $0x39] sm:$0xff] %vm1689_vm4, %v3793_v8  ;;  %v3519_v49 = vadd.f32 %v5935_v45, %v11404_v2  ;;  %v5938_v53 = vadd.f32 %v5937_v52, %v5936_v1  ;;  %v4018_v27 = vrot.slane %v3913_v15, 1  ;;  %v7939_v8 = vld [vmem:[%s12578_s5 + $0x78] sm:$0xff]  }
 0x3e8   : > { %7438 = vrot.lane.b32.xlu1 %v7437_v61, %s8025_s8  ;;  %v4097_v41 = vsel %vm584_vm3, %v4095_v33, %v4096_v34  ;;  %v4099_v28 = vsel %vm584_vm3, %v4096_v34, %v4098_v31  ;;  %v11466_v56 = vsel %vm503_vm2, %v4015_v13, %v4016_v55  ;;  %v7940_v33 = vld [vmem:[%s12578_s5 + $0x38] sm:$0xff]  }
 0x3e9   : > { %v3680_v16 = vadd.f32 %v10985_v37, %v3519_v49  ;;  %v3522_v57 = vadd.f32 %v5938_v53, %v11404_v2  ;;  %v11469_v9 = vsel %vm503_vm2, %v4016_v55, %v4018_v27  ;;  %v7936_v37 = vld [vmem:[%s12578_s5 + $0x28] sm:$0xff]   ;;  %v7442_v58 = vpack.i.bf16 %v4099_v28, %v4097_v41 }
 0x3ea   : > { %v7447_v18 = vpack.i.bf16 %v11469_v9, %v11466_v56  ;;  %6046 = vmatpush3.bf16.msra.mxu0 %v7936_v37 }
 0x3eb   : > { %v3794_v0 = vmax.f32 %v3680_v16, 0.0  ;;  %v3683_v26 = vadd.f32 %v10995_v51, %v3522_v57  ;;  %7443 = vrot.lane.b32.xlu0 %v7442_v58, %s8023_s21  ;;  %v7938_v51 = vld [vmem:[%s12578_s5 + $0x30] sm:$0xff]   ;;  %6047 = vmatprep.subr.bf16.mxu0 %v7937_v29 }
 0x3ec   : > { %v3914_v21 = vld [vmem:[#allocation3 + $0x30] sm:$0xff]  ;;  %7448 = vrot.lane.b32.xlu1 %v7447_v18, %s8023_s21 }
 0x3ed   : > { %3880 = vst.msk [vmem:[#allocation3 + $0x49] sm:$0xff] %vm1689_vm4, %v3794_v0  ;;  %v3795_v32 = vmax.f32 %v3683_v26, 0.0  ;;  %v4100_v48 = vrot.slane %v3914_v21, 2  ;;  %v4020_v11 = vrot.slane %v3914_v21, 1 }
 0x3ee   : > { %v3915_v4 = vld [vmem:[#allocation3 + $0x38] sm:$0xff]  ;;  %v3916_v5 = vld [vmem:[#allocation3 + $0x40] sm:$0x3]  ;;  %6048 = vmatpush3.bf16.msra.mxu0 %v7938_v51 }
 0x3ef   : > { %3881 = vst.msk [vmem:[#allocation3 + $0x51] sm:$0xff] %vm1689_vm4, %v3795_v32  ;;  %v7457_v45 = vpack.i.bf16 %v3915_v4, %v3914_v21  ;;  %v4101_v1 = vrot.slane %v3915_v4, 2  ;;  %v4103_v52 = vrot.slane %v3916_v5, 2  ;;  %v4021_v59 = vrot.slane %v3915_v4, 1  ;;  %6049 = vmatprep.subr.bf16.mxu0 %v7939_v8 }
 0x3f0   : > { %v4023_v15 = vrot.slane %v3916_v5, 1  ;;  %7453 = vrot.lane.b32.xlu1 %v7442_v58, %s8024_s22 }
 0x3f1   : > { %7458 = vrot.lane.b32.xlu0 %v7457_v45, %s8024_s22  ;;  %v4102_v49 = vsel %vm584_vm3, %v4100_v48, %v4101_v1  ;;  %v4104_v53 = vsel %vm584_vm3, %v4101_v1, %v4103_v52  ;;  %v11498_v61 = vsel %vm503_vm2, %v4020_v11, %v4021_v59 }
 0x3f2   : > { %v5030_v34 = vpack.c.bf16 %v4104_v53, %v4102_v49  ;;  %v11501_v31 = vsel %vm503_vm2, %v4021_v59, %v4023_v15  ;;  %6050 = vmatpush3.bf16.msra.mxu0 %v7940_v33  ;;  %v7472_v16 = vpack.i.bf16 %v4104_v53, %v4102_v49 }
 0x3f3   : > { %v7467_v13 = vpack.i.bf16 %v11501_v31, %v11498_v61 }
 0x3f4   : > { %6243 = vmatprep.mubr.msk.bf16.mxu1 %vm1689_vm4, %v5030_v34  ;;  %v3917_v55 = vld [vmem:[#allocation3 + $0x48] sm:$0xff]  ;;  %7463 = vrot.lane.b32.xlu1 %v7457_v45, %s8025_s8 }
 0x3f5   : > { %7468 = vrot.lane.b32.xlu0 %v7467_v13, %s8025_s8  ;;  %v4105_v28 = vrot.slane %v3917_v55, 2  ;;  %v4025_v11 = vrot.slane %v3917_v55, 1 }
 0x3f6   : > { %v3918_v57 = vld [vmem:[#allocation3 + $0x50] sm:$0xff]  ;;  %v3919_v41 = vld [vmem:[#allocation3 + $0x58] sm:$0x3] }
 0x3f7   : > { %v4106_v37 = vrot.slane %v3918_v57, 2  ;;  %v4108_v0 = vrot.slane %v3919_v41, 2  ;;  %v4026_v18 = vrot.slane %v3918_v57, 1  ;;  %v4028_v21 = vrot.slane %v3919_v41, 1 }
 0x3f8   : > { %v5939_v27 = vpop.f32.mrb[28].mxu1  ;;  %7478 = vrot.lane.b32.xlu1 %v7467_v13, %s8023_s21  ;;  %v7487_v8 = vpack.i.bf16 %v3918_v57, %v3917_v55 }
 0x3f9   : > { %v5940_v35 = vpop.f32.mrb[29].mxu1  ;;  %7473 = vrot.lane.b32.xlu0 %v7472_v16, %s8023_s21  ;;  %v4107_v29 = vsel %vm584_vm3, %v4105_v28, %v4106_v37  ;;  %v4109_v51 = vsel %vm584_vm3, %v4106_v37, %v4108_v0  ;;  %v11517_v52 = vsel %vm503_vm2, %v4025_v11, %v4026_v18  ;;  %v11520_v59 = vsel %vm503_vm2, %v4026_v18, %v4028_v21 }
 0x3fa   : > { %v5941_v26 = vadd.f32 %v5940_v35, %v5939_v27  ;;  %v5942_v58 = vpop.f32.mrb[30].mxu1  ;;  %v5033_v48 = vpack.c.bf16 %v4109_v51, %v4107_v29  ;;  %v7502_v57 = vpack.i.bf16 %v4109_v51, %v4107_v29 }
 0x3fb   : > { %v5943_v32 = vpop.f32.mrb[31].mxu1 }
 0x3fc   : > { %v3527_v4 = vadd.f32 %v5941_v26, %v11404_v2  ;;  %v5944_v5 = vadd.f32 %v5943_v32, %v5942_v58  ;;  %6244 = vmatmul.mubr.msk.bf16.vlgmr.msra.gmra.mrb[80].mxu1 %vm1689_vm4, %v5033_v48  ;;  %7483 = vrot.lane.b32.xlu1 %v7472_v16, %s8024_s22 }
 0x3fd   : > { %7488 = vrot.lane.b32.xlu0 %v7487_v8, %s8024_s22 }
 0x3fe   : > { %v3688_v45 = vadd.f32 %v10980_v23, %v3527_v4  ;;  %v3530_v1 = vadd.f32 %v5944_v5, %v11404_v2  ;;  %v7497_v23 = vpack.i.bf16 %v11520_v59, %v11517_v52 }
 0x400   : > { %v3796_v15 = vmax.f32 %v3688_v45, 0.0  ;;  %v3691_v33 = vadd.f32 %v10991_v62, %v3530_v1  ;;  %v5945_v49 = vpop.f32.mrb[32].mxu1  ;;  %7493 = vrot.lane.b32.xlu1 %v7487_v8, %s8025_s8 }
 0x401   : > { %v5946_v53 = vpop.f32.mrb[33].mxu1  ;;  %7498 = vrot.lane.b32.xlu0 %v7497_v23, %s8025_s8 }
 0x402   : > { %3882 = vst.msk [vmem:[#allocation3 + $0x61] sm:$0xff] %vm1689_vm4, %v3796_v15  ;;  %v3797_v34 = vmax.f32 %v3691_v33, 0.0  ;;  %v5947_v13 = vadd.f32 %v5946_v53, %v5945_v49  ;;  %v5948_v55 = vpop.f32.mrb[34].mxu1 }
 0x403   : > { %v5949_v27 = vpop.f32.mrb[35].mxu1 }
 0x404   : > { %3883 = vst.msk [vmem:[#allocation3 + $0x69] sm:$0xff] %vm1689_vm4, %v3797_v34  ;;  %v3535_v16 = vadd.f32 %v5947_v13, %v11404_v2  ;;  %v5950_v62 = vadd.f32 %v5949_v27, %v5948_v55  ;;  %7508 = vrot.lane.b32.xlu1 %v7497_v23, %s8023_s21 }
 0x405   : > { %7503 = vrot.lane.b32.xlu0 %v7502_v57, %s8023_s21 }
 0x406   : > { %v3696_v41 = vadd.f32 %v11047_v22, %v3535_v16  ;;  %v3538_v35 = vadd.f32 %v5950_v62, %v11404_v2 }
 0x408   : > { %v3798_v28 = vmax.f32 %v3696_v41, 0.0  ;;  %v3699_v37 = vadd.f32 %v11051_v25, %v3538_v35  ;;  %7513 = vrot.lane.b32.xlu1 %v7502_v57, %s8024_s22 }
 0x409   : > { %v3920_v0 = vld [vmem:[#allocation3 + $0x60] sm:$0xff] }
 0x40a   : > { %3884 = vst.msk [vmem:[#allocation3 + $0x79] sm:$0xff] %vm1689_vm4, %v3798_v28  ;;  %v3799_v26 = vmax.f32 %v3699_v37, 0.0  ;;  %v4110_v21 = vrot.slane %v3920_v0, 2  ;;  %v4030_v51 = vrot.slane %v3920_v0, 1 }
 0x40b   : > { %v3921_v58 = vld [vmem:[#allocation3 + $0x68] sm:$0xff]  ;;  %v3922_v18 = vld [vmem:[#allocation3 + $0x70] sm:$0x3] }
 0x40c   : > { %3885 = vst.msk [vmem:[#allocation3 + $0x81] sm:$0xff] %vm1689_vm4, %v3799_v26  ;;  %v7517_v22 = vpack.i.bf16 %v3921_v58, %v3920_v0  ;;  %v4111_v32 = vrot.slane %v3921_v58, 2  ;;  %v4113_v29 = vrot.slane %v3922_v18, 2  ;;  %v4031_v4 = vrot.slane %v3921_v58, 1 }
 0x40d   : > { %v4033_v5 = vrot.slane %v3922_v18, 1 }
 0x40e   : > { %7518 = vrot.lane.b32.xlu0 %v7517_v22, %s8024_s22  ;;  %v4112_v25 = vsel %vm584_vm3, %v4110_v21, %v4111_v32  ;;  %v4114_v48 = vsel %vm584_vm3, %v4111_v32, %v4113_v29  ;;  %7523 = vrot.lane.b32.xlu1 %v7517_v22, %s8025_s8  ;;  %v11545_v8 = vsel %vm503_vm2, %v4030_v51, %v4031_v4 }
 0x40f   : > { %v5036_v11 = vpack.c.bf16 %v4114_v48, %v4112_v25  ;;  %v11548_v45 = vsel %vm503_vm2, %v4031_v4, %v4033_v5  ;;  %v7532_v13 = vpack.i.bf16 %v4114_v48, %v4112_v25 }
 0x410   : > { %v5951_v1 = vpop.f32.mrb[36].mxu1  ;;  %v7527_v15 = vpack.i.bf16 %v11548_v45, %v11545_v8 }
 0x411   : > { %v5952_v33 = vpop.f32.mrb[37].mxu1  ;;  %6247 = vmatprep.mubr.msk.bf16.mxu1 %vm1689_vm4, %v5036_v11  ;;  %v3923_v49 = vld [vmem:[#allocation3 + $0x78] sm:$0xff] }
 0x412   : > { %v5953_v53 = vadd.f32 %v5952_v33, %v5951_v1  ;;  %v5954_v23 = vpop.f32.mrb[38].mxu1  ;;  %7528 = vrot.lane.b32.xlu0 %v7527_v15, %s8025_s8  ;;  %7538 = vrot.lane.b32.xlu1 %v7527_v15, %s8023_s21  ;;  %v4115_v16 = vrot.slane %v3923_v49, 2  ;;  %v4035_v22 = vrot.slane %v3923_v49, 1 }
 0x413   : > { %v5955_v34 = vpop.f32.mrb[39].mxu1  ;;  %v3924_v55 = vld [vmem:[#allocation3 + $0x80] sm:$0xff]  ;;  %v3925_v27 = vld [vmem:[#allocation3 + $0x88] sm:$0x3] }
 0x414   : > { %v3543_v62 = vadd.f32 %v5953_v53, %v11404_v2  ;;  %v5956_v57 = vadd.f32 %v5955_v34, %v5954_v23  ;;  %v4116_v41 = vrot.slane %v3924_v55, 2  ;;  %v4118_v35 = vrot.slane %v3925_v27, 2 }
 0x415   : > { %v4036_v28 = vrot.slane %v3924_v55, 1  ;;  %v4038_v37 = vrot.slane %v3925_v27, 1  ;;  %v7547_v51 = vpack.i.bf16 %v3924_v55, %v3923_v49 }
 0x416   : > { %v3704_v0 = vadd.f32 %v11043_v14, %v3543_v62  ;;  %v3546_v26 = vadd.f32 %v5956_v57, %v11404_v2  ;;  %7533 = vrot.lane.b32.xlu0 %v7532_v13, %s8023_s21  ;;  %v4117_v58 = vsel %vm584_vm3, %v4115_v16, %v4116_v41  ;;  %v4119_v18 = vsel %vm584_vm3, %v4116_v41, %v4118_v35 }
 0x417   : > { %7543 = vrot.lane.b32.xlu1 %v7532_v13, %s8024_s22  ;;  %v5039_v21 = vpack.c.bf16 %v4119_v18, %v4117_v58  ;;  %v11565_v14 = vsel %vm503_vm2, %v4035_v22, %v4036_v28  ;;  %v11568_v4 = vsel %vm503_vm2, %v4036_v28, %v4038_v37  ;;  %v7562_v34 = vpack.i.bf16 %v4119_v18, %v4117_v58 }
 0x418   : > { %v3800_v32 = vmax.f32 %v3704_v0, 0.0  ;;  %v3707_v29 = vadd.f32 %v11049_v30, %v3546_v26  ;;  %v7557_v1 = vpack.i.bf16 %v11568_v4, %v11565_v14 }
 0x419   : > { %6248 = vmatmul.mubr.msk.bf16.gmra.mrb[84].mxu1 %vm1689_vm4, %v5039_v21 }
 0x41a   : > { %3886 = vst.msk [vmem:[#allocation3 + $0x91] sm:$0xff] %vm1689_vm4, %v3800_v32  ;;  %v3801_v5 = vmax.f32 %v3707_v29, 0.0  ;;  %v5957_v25 = vpop.f32.mrb[40].mxu1  ;;  %7548 = vrot.lane.b32.xlu0 %v7547_v51, %s8024_s22 }
 0x41b   : > { %v5958_v48 = vpop.f32.mrb[41].mxu1  ;;  %7553 = vrot.lane.b32.xlu1 %v7547_v51, %s8025_s8 }
 0x41c   : > { %3887 = vst.msk [vmem:[#allocation3 + $0x99] sm:$0xff] %vm1689_vm4, %v3801_v5  ;;  %v5959_v30 = vadd.f32 %v5958_v48, %v5957_v25  ;;  %v5960_v11 = vpop.f32.mrb[42].mxu1 }
 0x41d   : > { %v5961_v15 = vpop.f32.mrb[43].mxu1 }
 0x41e   : > { %v3551_v33 = vadd.f32 %v5959_v30, %v11404_v2  ;;  %v5962_v49 = vadd.f32 %v5961_v15, %v5960_v11  ;;  %7558 = vrot.lane.b32.xlu0 %v7557_v1, %s8025_s8 }
 0x41f   : > { %7568 = vrot.lane.b32.xlu1 %v7557_v1, %s8023_s21 }
 0x420   : > { %v3712_v53 = vadd.f32 %v11095_v42, %v3551_v33  ;;  %v3554_v23 = vadd.f32 %v5962_v49, %v11404_v2  ;;  %v4219_v33 = vrot.slane %v11337_v60, 1  ;;  %v4218_v49 = vrot.slane %v11335_v40, 1 }
 0x421   : > { %v3926_v13 = vld [vmem:[#allocation3 + $0x90] sm:$0xff] }
 0x422   : > { %v3802_v55 = vmax.f32 %v3712_v53, 0.0  ;;  %v3715_v27 = vadd.f32 %v11110_v46, %v3554_v23  ;;  %v5963_v16 = vpop.f32.mrb[44].mxu1  ;;  %7563 = vrot.lane.b32.xlu0 %v7562_v34, %s8023_s21  ;;  %v4120_v35 = vrot.slane %v3926_v13, 2  ;;  %v4040_v28 = vrot.slane %v3926_v13, 1 }
 0x423   : > { %v5964_v62 = vpop.f32.mrb[45].mxu1  ;;  %7573 = vrot.lane.b32.xlu1 %v7562_v34, %s8024_s22  ;;  %v3927_v57 = vld [vmem:[#allocation3 + $0x98] sm:$0xff]  ;;  %v3928_v41 = vld [vmem:[#allocation3 + $0xa0] sm:$0x3] }
 0x424   : > { %3888 = vst.msk [vmem:[#allocation3 + $0xa9] sm:$0xff] %vm1689_vm4, %v3802_v55  ;;  %v3803_v42 = vmax.f32 %v3715_v27, 0.0  ;;  %v5965_v37 = vadd.f32 %v5964_v62, %v5963_v16  ;;  %v5966_v0 = vpop.f32.mrb[46].mxu1  ;;  %v7577_v26 = vpack.i.bf16 %v3927_v57, %v3926_v13  ;;  %v4121_v18 = vrot.slane %v3927_v57, 2 }
 0x425   : > { %v5967_v58 = vpop.f32.mrb[47].mxu1  ;;  %v4123_v21 = vrot.slane %v3928_v41, 2  ;;  %v4041_v46 = vrot.slane %v3927_v57, 1  ;;  %v4043_v22 = vrot.slane %v3928_v41, 1 }
 0x426   : > { %3889 = vst.msk [vmem:[#allocation3 + $0xb1] sm:$0xff] %vm1689_vm4, %v3803_v42  ;;  %v3559_v32 = vadd.f32 %v5965_v37, %v11404_v2  ;;  %v5968_v29 = vadd.f32 %v5967_v58, %v5966_v0  ;;  %7578 = vrot.lane.b32.xlu0 %v7577_v26, %s8024_s22  ;;  %v4122_v51 = vsel %vm584_vm3, %v4120_v35, %v4121_v18 }
 0x427   : > { %7583 = vrot.lane.b32.xlu1 %v7577_v26, %s8025_s8  ;;  %v4124_v5 = vsel %vm584_vm3, %v4121_v18, %v4123_v21  ;;  %v11592_v25 = vsel %vm503_vm2, %v4040_v28, %v4041_v46  ;;  %v11595_v48 = vsel %vm503_vm2, %v4041_v46, %v4043_v22  ;;  %v11609_v35 = vsel %vm503_vm2, %v4218_v49, %v4219_v33 }
 0x428   : > { %v3720_v30 = vadd.f32 %v11089_v24, %v3559_v32  ;;  %v3562_v11 = vadd.f32 %v5968_v29, %v11404_v2  ;;  %v5042_v1 = vpack.c.bf16 %v4124_v5, %v4122_v51  ;;  %v7587_v15 = vpack.i.bf16 %v11595_v48, %v11592_v25 }
 0x429   : > { %v7592_v60 = vpack.i.bf16 %v4124_v5, %v4122_v51 }
 0x42a   : > { %v3804_v53 = vmax.f32 %v3720_v30, 0.0  ;;  %v3723_v23 = vadd.f32 %v11101_v50, %v3562_v11  ;;  %6251 = vmatprep.mubr.msk.bf16.mxu1 %vm1689_vm4, %v5042_v1  ;;  %v5969_v34 = vpop.f32.mrb[48].mxu1  ;;  %7588 = vrot.lane.b32.xlu0 %v7587_v15, %s8025_s8  ;;  %v3961_v50 = vld [vmem:[#allocation3 + $0x1a8] sm:$0x3] }
 0x42b   : > { %v5970_v13 = vpop.f32.mrb[49].mxu1  ;;  %7598 = vrot.lane.b32.xlu1 %v7587_v15, %s8023_s21  ;;  %v3929_v24 = vld [vmem:[#allocation3 + $0xa8] sm:$0xff]  ;;  %v4221_v29 = vrot.slane %v3961_v50, 1 }
 0x42c   : > { %3890 = vst.msk [vmem:[#allocation3 + $0xc1] sm:$0xff] %vm1689_vm4, %v3804_v53  ;;  %v3805_v55 = vmax.f32 %v3723_v23, 0.0  ;;  %v5971_v27 = vadd.f32 %v5970_v13, %v5969_v34  ;;  %v5972_v16 = vpop.f32.mrb[50].mxu1  ;;  %v4125_v62 = vrot.slane %v3929_v24, 2  ;;  %v4045_v0 = vrot.slane %v3929_v24, 1 }
 0x42d   : > { %v5973_v40 = vpop.f32.mrb[51].mxu1  ;;  %v3930_v57 = vld [vmem:[#allocation3 + $0xb0] sm:$0xff]  ;;  %v3931_v41 = vld [vmem:[#allocation3 + $0xb8] sm:$0x3]  ;;  %v11629_v23 = vsel %vm503_vm2, %v4219_v33, %v4221_v29 }
 0x42e   : > { %3891 = vst.msk [vmem:[#allocation3 + $0xc9] sm:$0xff] %vm1689_vm4, %v3805_v55  ;;  %v3567_v28 = vadd.f32 %v5971_v27, %v11404_v2  ;;  %v5974_v42 = vadd.f32 %v5973_v40, %v5972_v16  ;;  %7593 = vrot.lane.b32.xlu0 %v7592_v60, %s8023_s21  ;;  %v4126_v37 = vrot.slane %v3930_v57, 2  ;;  %v7607_v26 = vpack.i.bf16 %v3930_v57, %v3929_v24 }
 0x42f   : > { %7603 = vrot.lane.b32.xlu1 %v7592_v60, %s8024_s22  ;;  %v4128_v58 = vrot.slane %v3931_v41, 2  ;;  %v4046_v18 = vrot.slane %v3930_v57, 1  ;;  %v4048_v21 = vrot.slane %v3931_v41, 1 }
 0x430   : > { %v3728_v46 = vadd.f32 %v11172_v38, %v3567_v28  ;;  %v3570_v22 = vadd.f32 %v5974_v42, %v11404_v2  ;;  %v4127_v32 = vsel %vm584_vm3, %v4125_v62, %v4126_v37 }
 0x431   : > { %v4129_v51 = vsel %vm584_vm3, %v4126_v37, %v4128_v58  ;;  %v11620_v5 = vsel %vm503_vm2, %v4045_v0, %v4046_v18  ;;  %v11623_v30 = vsel %vm503_vm2, %v4046_v18, %v4048_v21 }
 0x432   : > { %v3806_v11 = vmax.f32 %v3728_v46, 0.0  ;;  %v3731_v1 = vadd.f32 %v11182_v39, %v3570_v22  ;;  %v5975_v15 = vpop.f32.mrb[52].mxu1  ;;  %7608 = vrot.lane.b32.xlu0 %v7607_v26, %s8024_s22  ;;  %v5045_v38 = vpack.c.bf16 %v4129_v51, %v4127_v32  ;;  %v7617_v39 = vpack.i.bf16 %v11623_v30, %v11620_v5 }
 0x433   : > { %v5976_v49 = vpop.f32.mrb[53].mxu1  ;;  %7613 = vrot.lane.b32.xlu1 %v7607_v26, %s8025_s8  ;;  %v3932_v53 = vld [vmem:[#allocation3 + $0xc0] sm:$0xff]  ;;  %v7622_v50 = vpack.i.bf16 %v4129_v51, %v4127_v32 }
 0x434   : > { %3892 = vst.msk [vmem:[#allocation3 + $0xd9] sm:$0xff] %vm1689_vm4, %v3806_v11  ;;  %v3807_v34 = vmax.f32 %v3731_v1, 0.0  ;;  %v5977_v13 = vadd.f32 %v5976_v49, %v5975_v15  ;;  %6252 = vmatmul.mubr.msk.bf16.gmra.mrb[88].mxu1 %vm1689_vm4, %v5045_v38  ;;  %v5978_v24 = vpop.f32.mrb[54].mxu1  ;;  %v4130_v60 = vrot.slane %v3932_v53, 2  ;;  %v4050_v29 = vrot.slane %v3932_v53, 1 }
 0x435   : > { %v5979_v55 = vpop.f32.mrb[55].mxu1  ;;  %v3933_v27 = vld [vmem:[#allocation3 + $0xc8] sm:$0xff]  ;;  %v3934_v16 = vld [vmem:[#allocation3 + $0xd0] sm:$0x3] }
 0x436   : > { %3893 = vst.msk [vmem:[#allocation3 + $0xe1] sm:$0xff] %vm1689_vm4, %v3807_v34  ;;  %v3575_v33 = vadd.f32 %v5977_v13, %v11404_v2  ;;  %v5980_v40 = vadd.f32 %v5979_v55, %v5978_v24  ;;  %7618 = vrot.lane.b32.xlu0 %v7617_v39, %s8025_s8  ;;  %v4131_v57 = vrot.slane %v3933_v27, 2  ;;  %v4133_v41 = vrot.slane %v3934_v16, 2 }
 0x437   : > { %7628 = vrot.lane.b32.xlu1 %v7617_v39, %s8023_s21  ;;  %v4051_v28 = vrot.slane %v3933_v27, 1  ;;  %v4053_v42 = vrot.slane %v3934_v16, 1 }
 0x438   : > { %v3736_v37 = vadd.f32 %v11164_v12, %v3575_v33  ;;  %v3578_v0 = vadd.f32 %v5980_v40, %v11404_v2  ;;  %v4132_v26 = vsel %vm584_vm3, %v4130_v60, %v4131_v57  ;;  %v4134_v58 = vsel %vm584_vm3, %v4131_v57, %v4133_v41 }
 0x439   : > { %v5048_v18 = vpack.c.bf16 %v4134_v58, %v4132_v26  ;;  %v7637_v12 = vpack.i.bf16 %v3933_v27, %v3932_v53  ;;  %v11651_v38 = vsel %vm503_vm2, %v4050_v29, %v4051_v28 }
 0x43a   : > { %v3808_v21 = vmax.f32 %v3736_v37, 0.0  ;;  %v3739_v46 = vadd.f32 %v11178_v20, %v3578_v0  ;;  %v5981_v22 = vpop.f32.mrb[56].mxu1  ;;  %7623 = vrot.lane.b32.xlu0 %v7622_v50, %s8023_s21  ;;  %v11654_v20 = vsel %vm503_vm2, %v4051_v28, %v4053_v42 }
 0x43b   : > { %v5982_v11 = vpop.f32.mrb[57].mxu1  ;;  %6255 = vmatprep.mubr.msk.bf16.mxu1 %vm1689_vm4, %v5048_v18  ;;  %7633 = vrot.lane.b32.xlu1 %v7622_v50, %s8024_s22  ;;  %v3935_v32 = vld [vmem:[#allocation3 + $0xd8] sm:$0xff]  ;;  %v7647_v16 = vpack.i.bf16 %v11654_v20, %v11651_v38 }
 0x43c   : > { %3894 = vst.msk [vmem:[#allocation3 + $0xf1] sm:$0xff] %vm1689_vm4, %v3808_v21  ;;  %v3809_v51 = vmax.f32 %v3739_v46, 0.0  ;;  %v5983_v1 = vadd.f32 %v5982_v11, %v5981_v22  ;;  %v5984_v15 = vpop.f32.mrb[58].mxu1  ;;  %v4135_v24 = vrot.slane %v3935_v32, 2  ;;  %v7652_v46 = vpack.i.bf16 %v4134_v58, %v4132_v26 }
 0x43d   : > { %v5985_v49 = vpop.f32.mrb[59].mxu1  ;;  %v3936_v34 = vld [vmem:[#allocation3 + $0xe0] sm:$0xff]  ;;  %v3937_v13 = vld [vmem:[#allocation3 + $0xe8] sm:$0x3] }
 0x43e   : > { %3895 = vst.msk [vmem:[#allocation3 + $0xf9] sm:$0xff] %vm1689_vm4, %v3809_v51  ;;  %v3583_v53 = vadd.f32 %v5983_v1, %v11404_v2  ;;  %v5986_v39 = vadd.f32 %v5985_v49, %v5984_v15  ;;  %7638 = vrot.lane.b32.xlu0 %v7637_v12, %s8024_s22  ;;  %v4136_v55 = vrot.slane %v3936_v34, 2  ;;  %v4138_v27 = vrot.slane %v3937_v13, 2 }
 0x43f   : > { %7643 = vrot.lane.b32.xlu1 %v7637_v12, %s8025_s8  ;;  %v4056_v22 = vrot.slane %v3936_v34, 1  ;;  %v4058_v51 = vrot.slane %v3937_v13, 1  ;;  %v7667_v58 = vpack.i.bf16 %v3936_v34, %v3935_v32 }
 0x440   : > { %v3744_v60 = vadd.f32 %v11250_v43, %v3583_v53  ;;  %v3586_v33 = vadd.f32 %v5986_v39, %v11404_v2  ;;  %v4137_v40 = vsel %vm584_vm3, %v4135_v24, %v4136_v55  ;;  %v4139_v57 = vsel %vm584_vm3, %v4136_v55, %v4138_v27 }
 0x441   : > { %v5051_v41 = vpack.c.bf16 %v4139_v57, %v4137_v40  ;;  %v4055_v24 = vrot.slane %v3935_v32, 1 }
 0x442   : > { %v3810_v50 = vmax.f32 %v3744_v60, 0.0  ;;  %v3747_v28 = vadd.f32 %v11263_v19, %v3586_v33  ;;  %v5987_v42 = vpop.f32.mrb[60].mxu1  ;;  %7648 = vrot.lane.b32.xlu0 %v7647_v16, %s8025_s8  ;;  %v11698_v60 = vsel %vm503_vm2, %v4056_v22, %v4058_v51  ;;  %v7682_v51 = vpack.i.bf16 %v4139_v57, %v4137_v40 }
 0x443   : > { %v5988_v37 = vpop.f32.mrb[61].mxu1  ;;  %6256 = vmatmul.mubr.msk.bf16.gmra.mrb[92].mxu1 %vm1689_vm4, %v5051_v41  ;;  %7658 = vrot.lane.b32.xlu1 %v7647_v16, %s8023_s21  ;;  %v11670_v0 = vld [vmem:[#allocation3 + $0xf0] sm:$0xff]  ;;  %v11695_v16 = vsel %vm503_vm2, %v4055_v24, %v4056_v22 }
 0x444   : > { %3896 = vst.msk [vmem:[#allocation3 + $0x109] sm:$0xff] %vm1689_vm4, %v3810_v50  ;;  %v3811_v43 = vmax.f32 %v3747_v28, 0.0  ;;  %v5989_v18 = vadd.f32 %v5988_v37, %v5987_v42  ;;  %v5990_v21 = vpop.f32.mrb[62].mxu1  ;;  %v4140_v12 = vrot.slane %v11670_v0, 2  ;;  %v7677_v37 = vpack.i.bf16 %v11698_v60, %v11695_v16 }
 0x445   : > { %v5991_v29 = vpop.f32.mrb[63].mxu1  ;;  %v11673_v11 = vld [vmem:[#allocation3 + $0xf8] sm:$0xff]  ;;  %v11675_v19 = vld [vmem:[#allocation3 + $0x100] sm:$0x3] }
 0x446   : > { %3897 = vst.msk [vmem:[#allocation3 + $0x111] sm:$0xff] %vm1689_vm4, %v3811_v43  ;;  %v3591_v1 = vadd.f32 %v5989_v18, %v11404_v2  ;;  %v5992_v15 = vadd.f32 %v5991_v29, %v5990_v21  ;;  %7653 = vrot.lane.b32.xlu0 %v7652_v46, %s8023_s21  ;;  %v4141_v49 = vrot.slane %v11673_v11, 2  ;;  %v4143_v26 = vrot.slane %v11675_v19, 2 }
 0x447   : > { %7663 = vrot.lane.b32.xlu1 %v7652_v46, %s8024_s22 }
 0x448   : > { %v3752_v53 = vadd.f32 %v11241_v63, %v3591_v1  ;;  %v3594_v39 = vadd.f32 %v5992_v15, %v11404_v2  ;;  %v11687_v13 = vsel %vm584_vm3, %v4140_v12, %v4141_v49  ;;  %v11690_v55 = vsel %vm584_vm3, %v4141_v49, %v4143_v26 }
 0x449   : > { %v5054_v27 = vpack.c.bf16 %v11690_v55, %v11687_v13  ;;  %v4061_v1 = vrot.slane %v11673_v11, 1  ;;  %v4063_v15 = vrot.slane %v11675_v19, 1 }
 0x44a   : > { %v3812_v32 = vmax.f32 %v3752_v53, 0.0  ;;  %v3755_v63 = vadd.f32 %v11258_v7, %v3594_v39  ;;  %v5993_v34 = vpop.f32.mrb[64].mxu1  ;;  %7668 = vrot.lane.b32.xlu0 %v7667_v58, %s8024_s22  ;;  %v7424_v39 = vpop.permute.xlu1 %7423 }
 0x44b   : > { %v5994_v33 = vpop.f32.mrb[65].mxu1  ;;  %6259 = vmatprep.mubr.msk.bf16.mxu1 %vm1689_vm4, %v5054_v27  ;;  %7673 = vrot.lane.b32.xlu1 %v7667_v58, %s8025_s8  ;;  %v11704_v41 = vld [vmem:[#allocation3 + $0x108] sm:$0xff] }
 0x44c   : > { %3898 = vst.msk [vmem:[#allocation3 + $0x121] sm:$0xff] %vm1689_vm4, %v3812_v32  ;;  %v3813_v50 = vmax.f32 %v3755_v63, 0.0  ;;  %v5995_v28 = vadd.f32 %v5994_v33, %v5993_v34  ;;  %v5996_v42 = vpop.f32.mrb[66].mxu1  ;;  %v4145_v21 = vrot.slane %v11704_v41, 2  ;;  %v7697_v32 = vpack.i.bf16 %v11673_v11, %v11670_v0 }
 0x44d   : > { %v5997_v43 = vpop.f32.mrb[67].mxu1  ;;  %v11709_v7 = vld [vmem:[#allocation3 + $0x110] sm:$0xff]  ;;  %v11711_v18 = vld [vmem:[#allocation3 + $0x118] sm:$0x3] }
 0x44e   : > { %3899 = vst.msk [vmem:[#allocation3 + $0x129] sm:$0xff] %vm1689_vm4, %v3813_v50  ;;  %v3599_v46 = vadd.f32 %v5995_v28, %v11404_v2  ;;  %v5998_v22 = vadd.f32 %v5997_v43, %v5996_v42  ;;  %7678 = vrot.lane.b32.xlu0 %v7677_v37, %s8025_s8  ;;  %v4146_v29 = vrot.slane %v11709_v7, 2  ;;  %v4148_v12 = vrot.slane %v11711_v18, 2 }
 0x44f   : > { %7688 = vrot.lane.b32.xlu1 %v7677_v37, %s8023_s21  ;;  %v11746_v28 = vsel %vm503_vm2, %v4061_v1, %v4063_v15 }
 0x450   : > { %v3760_v49 = vadd.f32 %v11319_v17, %v3599_v46  ;;  %v3602_v26 = vadd.f32 %v5998_v22, %v11404_v2  ;;  %v11725_v58 = vsel %vm584_vm3, %v4145_v21, %v4146_v29  ;;  %v11728_v24 = vsel %vm584_vm3, %v4146_v29, %v4148_v12  ;;  %v7429_v29 = vpop.permute.xlu1 %7428 }
 0x451   : > { %v5057_v53 = vpack.c.bf16 %v11728_v24, %v11725_v58  ;;  %v4060_v17 = vrot.slane %v11670_v0, 1 }
 0x452   : > { %v3814_v27 = vmax.f32 %v3760_v49, 0.0  ;;  %v3763_v40 = vadd.f32 %v11326_v47, %v3602_v26  ;;  %v5999_v57 = vpop.f32.mrb[68].mxu1  ;;  %7683 = vrot.lane.b32.xlu0 %v7682_v51, %s8023_s21  ;;  %v7426_v26 = vunpack.i.h.bf16 %v7424_v39 }
 0x453   : > { %v6000_v19 = vpop.f32.mrb[69].mxu1  ;;  %6260 = vmatmul.mubr.msk.bf16.gmra.mrb[96].mxu1 %vm1689_vm4, %v5057_v53  ;;  %7693 = vrot.lane.b32.xlu1 %v7682_v51, %s8024_s22  ;;  %v11739_v63 = vld [vmem:[#allocation3 + $0x120] sm:$0xff]  ;;  %v11743_v50 = vsel %vm503_vm2, %v4060_v17, %v4061_v1  ;;  %v7425_v53 = vunpack.i.l.bf16 %v7424_v39 }
 0x454   : > { %3900 = vst.msk [vmem:[#allocation3 + $0x139] sm:$0xff] %vm1689_vm4, %v3814_v27  ;;  %v3815_v34 = vmax.f32 %v3763_v40, 0.0  ;;  %v6001_v33 = vadd.f32 %v6000_v19, %v5999_v57  ;;  %v6002_v47 = vpop.f32.mrb[70].mxu1  ;;  %13077 = vst [vmem:[#allocation51_spill] sm:$0xff] %v11743_v50  ;;  %v4150_v0 = vrot.slane %v11739_v63, 2  ;;  %v7707_v12 = vpack.i.bf16 %v11746_v28, %v11743_v50 }
 0x455   : > { %v6003_v42 = vpop.f32.mrb[71].mxu1  ;;  %v11748_v37 = vld [vmem:[#allocation3 + $0x128] sm:$0xff]  ;;  %v11750_v43 = vld [vmem:[#allocation3 + $0x130] sm:$0x3]  ;;  %v7712_v19 = vpack.i.bf16 %v11690_v55, %v11687_v13 }
 0x456   : > { %3901 = vst.msk [vmem:[#allocation3 + $0x141] sm:$0xff] %vm1689_vm4, %v3815_v34  ;;  %v3607_v11 = vadd.f32 %v6001_v33, %v11404_v2  ;;  %v6004_v21 = vadd.f32 %v6003_v42, %v6002_v47  ;;  %7698 = vrot.lane.b32.xlu0 %v7697_v32, %s8024_s22  ;;  %v4151_v46 = vrot.slane %v11748_v37, 2  ;;  %v4153_v22 = vrot.slane %v11750_v43, 2  ;;  %v7971_v42 = vld [vmem:[#allocation3 + $0x8] sm:$0xff] }
 0x457   : > { %7703 = vrot.lane.b32.xlu1 %v7697_v32, %s8025_s8  ;;  %v4068_v47 = vrot.slane %v11711_v18, 1  ;;  %v7973_v18 = vld [vmem:[%s12577_s4] ss:$0 sm:$0xff] }
 0x458   : > { %v3768_v51 = vadd.f32 %v11312_v44, %v3607_v11  ;;  %v3610_v1 = vadd.f32 %v6004_v21, %v11404_v2  ;;  %v11764_v15 = vsel %vm584_vm3, %v4150_v0, %v4151_v46  ;;  %v11767_v49 = vsel %vm584_vm3, %v4151_v46, %v4153_v22  ;;  %v11775_v2 = vpop.permute.xlu0 %7433  ;;  %v7972_v11 = vld [vmem:[#allocation3] sm:$0xff] }
 0x459   : > { %v5060_v27 = vpack.c.bf16 %v11767_v49, %v11764_v15  ;;  %13078 = vst [vmem:[#allocation81_spill] sm:$0xff] %v11775_v2  ;;  %v4837_v0 = vsel %vm1689_vm4, %v7971_v42, %v7426_v26  ;;  %v4836_v21 = vsel %vm1689_vm4, %v7972_v11, %v7425_v53  ;;  %v7430_v46 = vunpack.i.l.bf16 %v7429_v29 }
 0x45a   : > { %v3816_v40 = vmax.f32 %v3768_v51, 0.0  ;;  %v3771_v57 = vadd.f32 %v11322_v10, %v3610_v1  ;;  %v6005_v17 = vpop.f32.mrb[72].mxu1  ;;  %7708 = vrot.lane.b32.xlu0 %v7707_v12, %s8025_s8  ;;  %v4066_v10 = vrot.slane %v11709_v7, 1  ;;  %v11786_v13 = vpop.permute.xlu1 %7438  ;;  %v7431_v51 = vunpack.i.h.bf16 %v7429_v29 }
 0x45b   : > { %v6006_v44 = vpop.f32.mrb[73].mxu1  ;;  %6263 = vmatprep.mubr.msk.bf16.mxu1 %vm1689_vm4, %v5060_v27  ;;  %7718 = vrot.lane.b32.xlu1 %v7707_v12, %s8023_s21  ;;  %v11780_v33 = vld [vmem:[#allocation3 + $0x138] sm:$0xff]  ;;  %v4065_v53 = vrot.slane %v11704_v41, 1  ;;  %v7727_v27 = vpack.i.bf16 %v11709_v7, %v11704_v41 }
 0x45c   : > { %3902 = vst.msk [vmem:[#allocation3 + $0x151] sm:$0xff] %vm1689_vm4, %v3816_v40  ;;  %v3817_v39 = vmax.f32 %v3771_v57, 0.0  ;;  %v6007_v32 = vadd.f32 %v6006_v44, %v6005_v17  ;;  %v6008_v34 = vpop.f32.mrb[74].mxu1  ;;  %v4155_v40 = vrot.slane %v11780_v33, 2 }
 0x45d   : > { %v6009_v22 = vpop.f32.mrb[75].mxu1  ;;  %v11788_v55 = vld [vmem:[#allocation3 + $0x140] sm:$0xff]  ;;  %v11790_v12 = vld [vmem:[#allocation3 + $0x148] sm:$0x3] }
 0x45e   : > { %3903 = vst.msk [vmem:[#allocation3 + $0x159] sm:$0xff] %vm1689_vm4, %v3817_v39  ;;  %v6010_v1 = vadd.f32 %v6009_v22, %v6008_v34  ;;  %7713 = vrot.lane.b32.xlu0 %v7712_v19, %s8023_s21  ;;  %v3615_v26 = vadd.f32 %v7973_v18, %v6007_v32  ;;  %v4156_v57 = vrot.slane %v11788_v55, 2  ;;  %v4158_v29 = vrot.slane %v11790_v12, 2  ;;  %v7444_v34 = vpop.permute.xlu0 %7443  ;;  %v11812_v42 = vpop.permute.xlu1 %7448 }
 0x45f   : > { %7723 = vrot.lane.b32.xlu1 %v7712_v19, %s8024_s22  ;;  %v11806_v39 = vsel %vm503_vm2, %v4065_v53, %v4066_v10  ;;  %v11809_v32 = vsel %vm503_vm2, %v4066_v10, %v4068_v47  ;;  %v4868_v19 = vsel %vm3059_vm14, %v4836_v21, %v7430_v46  ;;  %v7742_v10 = vpack.i.bf16 %v11728_v24, %v11725_v58 }
 0x460   : > { %v3776_v17 = vadd.f32 %v11445_v3, %v3615_v26  ;;  %v3618_v44 = vadd.f32 %v7973_v18, %v6010_v1  ;;  %13079 = vst [vmem:[#allocation30_spill] sm:$0xff] %v11806_v39  ;;  %13080 = vst [vmem:[#allocation19_spill] sm:$0xff] %v11809_v32  ;;  %v11815_v41 = vsel %vm584_vm3, %v4155_v40, %v4156_v57  ;;  %v4070_v24 = vrot.slane %v11739_v63, 1 }
 0x461   : > { %v11818_v7 = vsel %vm584_vm3, %v4156_v57, %v4158_v29  ;;  %v4869_v3 = vsel %vm3059_vm14, %v4837_v0, %v7431_v51  ;;  %v7737_v46 = vpack.i.bf16 %v11809_v32, %v11806_v39  ;;  %v7441_v0 = vunpack.i.h.bf16 %v11786_v13 }
 0x462   : > { %v3818_v11 = vmax.f32 %v3776_v17, 0.0  ;;  %v3779_v22 = vadd.f32 %v11453_v6, %v3618_v44  ;;  %7728 = vrot.lane.b32.xlu0 %v7727_v27, %s8024_s22  ;;  %v5063_v21 = vpack.c.bf16 %v11818_v7, %v11815_v41  ;;  %v11836_v58 = vpack.i.bf16 %v11748_v37, %v11739_v63 }
 0x463   : > { %v6011_v47 = vpop.f32.mrb[76].mxu1  ;;  %7733 = vrot.lane.b32.xlu1 %v7727_v27, %s8025_s8  ;;  %v11830_v1 = vld [vmem:[#allocation3 + $0x150] sm:$0xff]  ;;  %v7440_v26 = vunpack.i.l.bf16 %v11786_v13  ;;  %v7446_v53 = vunpack.i.h.bf16 %v7444_v34  ;;  %v7459_v57 = vpop.permute.xlu0 %7458  ;;  %v4071_v44 = vrot.slane %v11748_v37, 1  ;;  %v4901_v37 = vsel %vm3092_vm15, %v4869_v3, %v7441_v0 }
 0x464   : > { %3904 = vst.msk [vmem:[#allocation3 + $0x169] sm:$0xff] %vm1689_vm4, %v3818_v11  ;;  %v3819_v6 = vmax.f32 %v3779_v22, 0.0  ;;  %v6012_v51 = vpop.f32.mrb[77].mxu1  ;;  %6264 = vmatmul.mubr.msk.bf16.gmra.mrb[100].mxu1 %vm1689_vm4, %v5063_v21  ;;  %v7445_v11 = vunpack.i.l.bf16 %v7444_v34  ;;  %v11847_v22 = vpop.permute.xlu1 %7453  ;;  %v4160_v13 = vrot.slane %v11830_v1, 2  ;;  %v7461_v62 = vunpack.i.h.bf16 %v7459_v57 }
 0x465   : > { %v6013_v27 = vadd.f32 %v6012_v51, %v6011_v47  ;;  %v6014_v40 = vpop.f32.mrb[78].mxu1  ;;  %v11841_v29 = vld [vmem:[#allocation3 + $0x158] sm:$0xff]  ;;  %v11843_v17 = vld [vmem:[#allocation3 + $0x160] sm:$0x3]  ;;  %v7460_v2 = vunpack.i.l.bf16 %v7459_v57  ;;  %v4073_v32 = vrot.slane %v11750_v43, 1  ;;  %v4900_v50 = vsel %vm3092_vm15, %v4868_v19, %v7440_v26 }
 0x466   : > { %3905 = vst.msk [vmem:[#allocation3 + $0x171] sm:$0xff] %vm1689_vm4, %v3819_v6  ;;  %v6015_v63 = vpop.f32.mrb[79].mxu1  ;;  %7738 = vrot.lane.b32.xlu0 %v7737_v46, %s8025_s8  ;;  %v4161_v47 = vrot.slane %v11841_v29, 2  ;;  %v4163_v21 = vrot.slane %v11843_v17, 2  ;;  %v4932_v3 = vsel %vm1689_vm4, %v11466_v56, %v7445_v11 }
 0x467   : > { %v3623_v51 = vadd.f32 %v7973_v18, %v6013_v27  ;;  %v6016_v39 = vadd.f32 %v6015_v63, %v6014_v40  ;;  %7748 = vrot.lane.b32.xlu1 %v7737_v46, %s8023_s21  ;;  %v4933_v27 = vsel %vm1689_vm4, %v11469_v9, %v7446_v53  ;;  %v7469_v63 = vpop.permute.xlu0 %7468  ;;  %v4964_v26 = vsel %vm3059_vm14, %v4932_v3, %v7460_v2 }
 0x468   : > { %v11856_v34 = vsel %vm584_vm3, %v4160_v13, %v4161_v47  ;;  %v11859_v6 = vsel %vm584_vm3, %v4161_v47, %v4163_v21  ;;  %v7471_v46 = vunpack.i.h.bf16 %v7469_v63  ;;  %v7470_v0 = vunpack.i.l.bf16 %v7469_v63  ;;  %v11868_v13 = vpop.permute.xlu1 %7463 }
 0x469   : > { %v3784_v57 = vadd.f32 %v11439_v36, %v3623_v51  ;;  %v3626_v40 = vadd.f32 %v7973_v18, %v6016_v39  ;;  %v5066_v43 = vpack.c.bf16 %v11859_v6, %v11856_v34  ;;  %v4965_v9 = vsel %vm3059_vm14, %v4933_v27, %v7461_v62 }
 0x46a   : > { %7743 = vrot.lane.b32.xlu0 %v7742_v10, %s8023_s21  ;;  %v4996_v56 = vsel %vm3092_vm15, %v4964_v26, %v7470_v0  ;;  %v4997_v39 = vsel %vm3092_vm15, %v4965_v9, %v7471_v46  ;;  %v11883_v53 = vsel %vm503_vm2, %v4070_v24, %v4071_v44  ;;  %v11886_v11 = vsel %vm503_vm2, %v4071_v44, %v4073_v32 }
 0x46b   : > { %v3820_v19 = vmax.f32 %v3784_v57, 0.0  ;;  %v3787_v36 = vadd.f32 %v11451_v54, %v3626_v40  ;;  %7753 = vrot.lane.b32.xlu1 %v7742_v10, %s8024_s22  ;;  %v11877_v18 = vld [vmem:[#allocation3 + $0x168] sm:$0xff]  ;;  %6267 = vmatprep.mubr.msk.bf16.mxu1 %vm1689_vm4, %v5066_v43  ;;  %v7474_v54 = vpop.permute.xlu0 %7473  ;;  %v5029_v2 = vpack.c.bf16 %v4997_v39, %v4996_v56  ;;  %v5028_v21 = vpack.c.bf16 %v4901_v37, %v4900_v50  ;;  %v7975_v39 = vld [vmem:[#allocation3 + $0x18] sm:$0xff] }
 0x46c   : > { %v11893_v51 = vpop.permute.xlu1 %7478  ;;  %v4165_v24 = vrot.slane %v11877_v18, 2  ;;  %v7451_v27 = vunpack.i.h.bf16 %v11812_v42  ;;  %v7450_v57 = vunpack.i.l.bf16 %v11812_v42  ;;  %v7767_v50 = vpack.i.bf16 %v11886_v11, %v11883_v53 }
 0x46d   : > { %3906 = vst.msk [vmem:[#allocation3 + $0x181] sm:$0xff] %vm1689_vm4, %v3820_v19  ;;  %v3821_v62 = vmax.f32 %v3787_v36, 0.0  ;;  %v11889_v10 = vld [vmem:[#allocation3 + $0x170] sm:$0xff]  ;;  %v11891_v47 = vld [vmem:[#allocation3 + $0x178] sm:$0x3]  ;;  %5307 = vmatprep.mubr.bf16.mxu0 %v5029_v2  ;;  %v7456_v37 = vunpack.i.h.bf16 %v11847_v22  ;;  %v7455_v40 = vunpack.i.l.bf16 %v11847_v22  ;;  %v7466_v42 = vunpack.i.h.bf16 %v11868_v13  ;;  %v7974_v36 = vld [vmem:[#allocation3 + $0x20] sm:$0xff] }
 0x46e   : > { %7758 = vrot.lane.b32.xlu0 %v11836_v58, %s8024_s22  ;;  %v4166_v32 = vrot.slane %v11889_v10, 2  ;;  %v4168_v44 = vrot.slane %v11891_v47, 2  ;;  %5308 = vmatmul.mubr.bf16.vlgmr.msra.gmra.mrb[48].mxu0 %v5028_v21  ;;  %v7465_v46 = vunpack.i.l.bf16 %v11868_v13  ;;  %v7476_v19 = vunpack.i.h.bf16 %v7474_v54 }
 0x46f   : > { %3907 = vst.msk [vmem:[#allocation3 + $0x189] sm:$0xff] %vm1689_vm4, %v3821_v62  ;;  %7763 = vrot.lane.b32.xlu1 %v11836_v58, %s8025_s8  ;;  %v7475_v58 = vunpack.i.l.bf16 %v7474_v54  ;;  %v7489_v0 = vpop.permute.xlu0 %7488  ;;  %v7772_v22 = vpack.i.bf16 %v11767_v49, %v11764_v15  ;;  %v4839_v56 = vsel %vm1689_vm4, %v7974_v36, %v7451_v27  ;;  %v4838_v13 = vsel %vm1689_vm4, %v7975_v39, %v7450_v57 }
 0x470   : > { %v11910_v63 = vsel %vm584_vm3, %v4165_v24, %v4166_v32  ;;  %v11913_v3 = vsel %vm584_vm3, %v4166_v32, %v4168_v44  ;;  %v7490_v26 = vunpack.i.l.bf16 %v7489_v0  ;;  %v11919_v9 = vpop.permute.xlu1 %7483  ;;  %v7491_v62 = vunpack.i.h.bf16 %v7489_v0 }
 0x471   : > { %v5069_v43 = vpack.c.bf16 %v11913_v3, %v11910_v63  ;;  %v4075_v54 = vrot.slane %v11780_v33, 1  ;;  %v4870_v2 = vsel %vm3059_vm14, %v4838_v13, %v7455_v40  ;;  %v4871_v21 = vsel %vm3059_vm14, %v4839_v56, %v7456_v37 }
 0x472   : > { %7768 = vrot.lane.b32.xlu0 %v7767_v50, %s8025_s8  ;;  %v7787_v15 = vpack.i.bf16 %v11788_v55, %v11780_v33  ;;  %v4076_v24 = vrot.slane %v11788_v55, 1  ;;  %v4934_v32 = vsel %vm1689_vm4, %v11498_v61, %v7475_v58  ;;  %v4902_v27 = vsel %vm3092_vm15, %v4870_v2, %v7465_v46 }
 0x473   : > { %6268 = vmatmul.mubr.msk.bf16.gmra.mrb[104].mxu1 %vm1689_vm4, %v5069_v43  ;;  %7778 = vrot.lane.b32.xlu1 %v7767_v50, %s8023_s21  ;;  %v7499_v44 = vpop.permute.xlu0 %7498  ;;  %v4903_v57 = vsel %vm3092_vm15, %v4871_v21, %v7466_v42  ;;  %v4078_v50 = vrot.slane %v11790_v12, 1  ;;  %v4935_v37 = vsel %vm1689_vm4, %v11501_v31, %v7476_v19  ;;  %v4966_v40 = vsel %vm3059_vm14, %v4934_v32, %v7490_v26 }
 0x474   : > { %v11933_v49 = vld [vmem:[#allocation3 + $0x180] sm:$0xff]  ;;  %v7501_v33 = vunpack.i.h.bf16 %v7499_v44  ;;  %v7500_v0 = vunpack.i.l.bf16 %v7499_v44  ;;  %v11944_v43 = vpop.permute.xlu1 %7493  ;;  %v4967_v46 = vsel %vm3059_vm14, %v4935_v37, %v7491_v62  ;;  %v11959_v26 = vsel %vm503_vm2, %v4075_v54, %v4076_v24 }
 0x475   : > { %v4210_v12 = vrot.slane %v11933_v49, 2  ;;  %v5031_v62 = vpack.c.bf16 %v4903_v57, %v4902_v27  ;;  %v7481_v32 = vunpack.i.h.bf16 %v11893_v51  ;;  %v7480_v44 = vunpack.i.l.bf16 %v11893_v51 }
 0x476   : > { %7773 = vrot.lane.b32.xlu0 %v7772_v22, %s8023_s21  ;;  %v11947_v55 = vld [vmem:[#allocation3 + $0x188] sm:$0xff]  ;;  %v11949_v61 = vld [vmem:[#allocation3 + $0x190] sm:$0x3]  ;;  %v4998_v58 = vsel %vm3092_vm15, %v4966_v40, %v7500_v0  ;;  %v4999_v19 = vsel %vm3092_vm15, %v4967_v46, %v7501_v33  ;;  %v7486_v27 = vunpack.i.h.bf16 %v11919_v9  ;;  %v7485_v57 = vunpack.i.l.bf16 %v11919_v9 }
 0x477   : > { %7783 = vrot.lane.b32.xlu1 %v7772_v22, %s8024_s22  ;;  %v4211_v31 = vrot.slane %v11947_v55, 2  ;;  %v4213_v42 = vrot.slane %v11949_v61, 2  ;;  %v5032_v36 = vpack.c.bf16 %v4999_v19, %v4998_v58  ;;  %v11968_v22 = vsel %vm503_vm2, %v4076_v24, %v4078_v50  ;;  %v7504_v54 = vpop.permute.xlu0 %7503  ;;  %v7977_v58 = vld [vmem:[#allocation3 + $0x30] sm:$0xff] }
 0x478   : > { %v11970_v13 = vpop.permute.xlu1 %7508  ;;  %v7797_v21 = vpack.i.bf16 %v11968_v22, %v11959_v26  ;;  %v4081_v37 = vrot.slane %v11841_v29, 1  ;;  %v4083_v40 = vrot.slane %v11843_v17, 1  ;;  %v7506_v33 = vunpack.i.h.bf16 %v7504_v54 }
 0x479   : > { %v11962_v56 = vsel %vm584_vm3, %v4210_v12, %v4211_v31  ;;  %v11965_v39 = vsel %vm584_vm3, %v4211_v31, %v4213_v42  ;;  %5315 = vmatprep.mubr.bf16.mxu0 %v5032_v36  ;;  %v7505_v0 = vunpack.i.l.bf16 %v7504_v54  ;;  %v4080_v46 = vrot.slane %v11830_v1, 1 }
 0x47a   : > { %7788 = vrot.lane.b32.xlu0 %v7787_v15, %s8024_s22  ;;  %v5072_v2 = vpack.c.bf16 %v11965_v39, %v11962_v56  ;;  %5316 = vmatmul.mubr.bf16.gmra.mrb[52].mxu0 %v5031_v62  ;;  %v7496_v51 = vunpack.i.h.bf16 %v11944_v43  ;;  %v7495_v12 = vunpack.i.l.bf16 %v11944_v43  ;;  %v4840_v17 = vsel %vm1689_vm4, %v7977_v58, %v7480_v44 }
 0x47b   : > { %7793 = vrot.lane.b32.xlu1 %v7787_v15, %s8025_s8  ;;  %v7802_v15 = vpack.i.bf16 %v11818_v7, %v11815_v41  ;;  %v7976_v7 = vld [vmem:[#allocation3 + $0x38] sm:$0xff]  ;;  %v7817_v19 = vpack.i.bf16 %v11841_v29, %v11830_v1  ;;  %v4872_v36 = vsel %vm3059_vm14, %v4840_v17, %v7485_v57  ;;  %v12008_v54 = vsel %vm503_vm2, %v4081_v37, %v4083_v40 }
 0x47c   : > { %6271 = vmatprep.mubr.msk.bf16.mxu1 %vm1689_vm4, %v5072_v2  ;;  %v11979_v24 = vpop.permute.xlu1 %7513  ;;  %v4841_v9 = vsel %vm1689_vm4, %v7976_v7, %v7481_v32  ;;  %v12005_v2 = vsel %vm503_vm2, %v4080_v46, %v4081_v37  ;;  %v4936_v32 = vsel %vm1689_vm4, %v11517_v52, %v7505_v0  ;;  %v4904_v57 = vsel %vm3092_vm15, %v4872_v36, %v7495_v12 }
 0x47d   : > { %v4873_v43 = vsel %vm3059_vm14, %v4841_v9, %v7486_v27  ;;  %v7827_v40 = vpack.i.bf16 %v12008_v54, %v12005_v2  ;;  %v7511_v12 = vunpack.i.h.bf16 %v11970_v13  ;;  %v7515_v7 = vunpack.i.l.bf16 %v11979_v24 }
 0x47e   : > { %7798 = vrot.lane.b32.xlu0 %v7797_v21, %s8025_s8  ;;  %v4086_v58 = vrot.slane %v11889_v10, 1  ;;  %v4088_v17 = vrot.slane %v11891_v47, 1 }
 0x47f   : > { %7808 = vrot.lane.b32.xlu1 %v7797_v21, %s8023_s21  ;;  %v4937_v21 = vsel %vm1689_vm4, %v11520_v59, %v7506_v33 }
 0x480   : > { %v7519_v50 = vpop.permute.xlu0 %7518  ;;  %v11994_v41 = vpop.permute.xlu1 %7523 }
 0x481   : > { %v7521_v31 = vunpack.i.h.bf16 %v7519_v50  ;;  %v7520_v42 = vunpack.i.l.bf16 %v7519_v50  ;;  %v4905_v50 = vsel %vm3092_vm15, %v4873_v43, %v7496_v51  ;;  %v7510_v51 = vunpack.i.l.bf16 %v11970_v13 }
 0x482   : > { %7803 = vrot.lane.b32.xlu0 %v7802_v15, %s8023_s21  ;;  %v5034_v0 = vpack.c.bf16 %v4905_v50, %v4904_v57  ;;  %v4085_v43 = vrot.slane %v11877_v18, 1  ;;  %v7526_v13 = vunpack.i.h.bf16 %v11994_v41  ;;  %v12055_v50 = vsel %vm503_vm2, %v4086_v58, %v4088_v17 }
 0x483   : > { %7813 = vrot.lane.b32.xlu1 %v7802_v15, %s8024_s22  ;;  %v4968_v1 = vsel %vm3059_vm14, %v4936_v32, %v7520_v42  ;;  %v4969_v29 = vsel %vm3059_vm14, %v4937_v21, %v7521_v31  ;;  %v7832_v31 = vpack.i.bf16 %v11859_v6, %v11856_v34  ;;  %v7516_v42 = vunpack.i.h.bf16 %v11979_v24  ;;  %v7978_v6 = vld [vmem:[#allocation3 + $0x50] sm:$0xff] }
 0x484   : > { %v7529_v62 = vpop.permute.xlu0 %7528  ;;  %v12016_v27 = vpop.permute.xlu1 %7538  ;;  %v4843_v24 = vsel %vm1689_vm4, %v7978_v6, %v7511_v12  ;;  %v12052_v57 = vsel %vm503_vm2, %v4085_v43, %v4086_v58  ;;  %v7981_v43 = vld [vmem:[#allocation3 + $0x198] sm:$0xff] }
 0x485   : > { %v7531_v44 = vunpack.i.h.bf16 %v7529_v62  ;;  %v7530_v15 = vunpack.i.l.bf16 %v7529_v62  ;;  %v7525_v62 = vunpack.i.l.bf16 %v11994_v41  ;;  %v4875_v41 = vsel %vm3059_vm14, %v4843_v24, %v7516_v42 }
 0x486   : > { %7818 = vrot.lane.b32.xlu0 %v7817_v19, %s8024_s22  ;;  %v4907_v12 = vsel %vm3092_vm15, %v4875_v41, %v7526_v13  ;;  %v7541_v17 = vunpack.i.h.bf16 %v12016_v27  ;;  %v4223_v13 = vrot.slane %v7981_v43, 2  ;;  %v4173_v41 = vrot.slane %v11933_v49, 1 }
 0x487   : > { %7823 = vrot.lane.b32.xlu1 %v7817_v19, %s8025_s8  ;;  %v5000_v59 = vsel %vm3092_vm15, %v4968_v1, %v7530_v15  ;;  %v5001_v52 = vsel %vm3092_vm15, %v4969_v29, %v7531_v44  ;;  %v7979_v44 = vld [vmem:[#allocation3 + $0x48] sm:$0xff]  ;;  %v7847_v15 = vpack.i.bf16 %v11889_v10, %v11877_v18 }
 0x488   : > { %v7534_v37 = vpop.permute.xlu0 %7533  ;;  %v5035_v33 = vpack.c.bf16 %v5001_v52, %v5000_v59  ;;  %v4842_v47 = vsel %vm1689_vm4, %v7979_v44, %v7510_v51  ;;  %v4174_v44 = vrot.slane %v11947_v55, 1 }
 0x489   : > { %v12026_v46 = vpop.permute.xlu1 %7543  ;;  %v7536_v19 = vunpack.i.h.bf16 %v7534_v37  ;;  %v7535_v36 = vunpack.i.l.bf16 %v7534_v37  ;;  %v4874_v1 = vsel %vm3059_vm14, %v4842_v47, %v7515_v7  ;;  %v4176_v47 = vrot.slane %v11949_v61, 1 }
 0x48a   : > { %7828 = vrot.lane.b32.xlu0 %v7827_v40, %s8025_s8  ;;  %5323 = vmatprep.mubr.bf16.mxu0 %v5035_v33 }
 0x48b   : > { %7838 = vrot.lane.b32.xlu1 %v7827_v40, %s8023_s21  ;;  %5324 = vmatmul.mubr.bf16.gmra.mrb[56].mxu0 %v5034_v0  ;;  %v4939_v59 = vsel %vm1689_vm4, %v11548_v45, %v7536_v19  ;;  %v4938_v52 = vsel %vm1689_vm4, %v11545_v8, %v7535_v36  ;;  %v4906_v0 = vsel %vm3092_vm15, %v4874_v1, %v7525_v62  ;;  %v7540_v19 = vunpack.i.l.bf16 %v12016_v27 }
 0x48c   : > { %v7549_v9 = vpop.permute.xlu0 %7548  ;;  %v5037_v7 = vpack.c.bf16 %v4907_v12, %v4906_v0  ;;  %v7546_v62 = vunpack.i.h.bf16 %v12026_v46  ;;  %v12102_v0 = vsel %vm503_vm2, %v4174_v44, %v4176_v47 }
 0x48d   : > { %v7551_v21 = vunpack.i.h.bf16 %v7549_v9  ;;  %v7550_v32 = vunpack.i.l.bf16 %v7549_v9  ;;  %v12041_v34 = vpop.permute.xlu1 %7553  ;;  %v7980_v9 = vld [vmem:[#allocation3 + $0x1a0] sm:$0xff] }
 0x48e   : > { %7833 = vrot.lane.b32.xlu0 %v7832_v31, %s8023_s21  ;;  %v4224_v58 = vrot.slane %v7980_v9, 2  ;;  %v7556_v6 = vunpack.i.h.bf16 %v12041_v34  ;;  %v7555_v27 = vunpack.i.l.bf16 %v12041_v34 }
 0x48f   : > { %7843 = vrot.lane.b32.xlu1 %v7832_v31, %s8024_s22  ;;  %v4970_v18 = vsel %vm3059_vm14, %v4938_v52, %v7550_v32  ;;  %v4971_v10 = vsel %vm3059_vm14, %v4939_v59, %v7551_v21  ;;  %v7857_v31 = vpack.i.bf16 %v12055_v50, %v12052_v57  ;;  %v7545_v21 = vunpack.i.l.bf16 %v12026_v46  ;;  %v7982_v46 = vld [vmem:[#allocation3 + $0x68] sm:$0xff]  ;;  %v7983_v59 = vld [vmem:[#allocation3 + $0x60] sm:$0xff] }
 0x490   : > { %v7559_v29 = vpop.permute.xlu0 %7558  ;;  %v7862_v32 = vpack.i.bf16 %v11913_v3, %v11910_v63  ;;  %v4844_v52 = vsel %vm1689_vm4, %v7983_v59, %v7540_v19  ;;  %v4225_v9 = vsel %vm584_vm3, %v4223_v13, %v4224_v58 }
 0x491   : > { %v7561_v37 = vunpack.i.h.bf16 %v7559_v29  ;;  %v7560_v40 = vunpack.i.l.bf16 %v7559_v29  ;;  %v12063_v33 = vpop.permute.xlu1 %7568  ;;  %v4845_v29 = vsel %vm1689_vm4, %v7982_v46, %v7541_v17  ;;  %v4876_v34 = vsel %vm3059_vm14, %v4844_v52, %v7545_v21  ;;  %v7984_v17 = vld [vmem:[#allocation3 + $0x1a8] sm:$0x3] }
 0x492   : > { %7848 = vrot.lane.b32.xlu0 %v7847_v15, %s8024_s22  ;;  %v4877_v61 = vsel %vm3059_vm14, %v4845_v29, %v7546_v62  ;;  %v4908_v12 = vsel %vm3092_vm15, %v4876_v34, %v7555_v27  ;;  %v4226_v19 = vrot.slane %v7984_v17, 2  ;;  %v7986_v34 = vld [vmem:[#allocation3 + $0x78] sm:$0xff] }
 0x493   : > { %7853 = vrot.lane.b32.xlu1 %v7847_v15, %s8025_s8  ;;  %v5002_v45 = vsel %vm3092_vm15, %v4970_v18, %v7560_v40  ;;  %v5003_v8 = vsel %vm3092_vm15, %v4971_v10, %v7561_v37  ;;  %v7877_v40 = vpack.i.bf16 %v11947_v55, %v11933_v49  ;;  %v12099_v10 = vsel %vm503_vm2, %v4173_v41, %v4174_v44 }
 0x494   : > { %v7564_v51 = vpop.permute.xlu0 %7563  ;;  %v5038_v42 = vpack.c.bf16 %v5003_v8, %v5002_v45  ;;  %v4909_v45 = vsel %vm3092_vm15, %v4877_v61, %v7556_v6  ;;  %v7882_v62 = vpack.i.bf16 %v12102_v0, %v12099_v10  ;;  %v7570_v44 = vunpack.i.l.bf16 %v12063_v33 }
 0x495   : > { %v12075_v36 = vpop.permute.xlu1 %7573  ;;  %v7566_v15 = vunpack.i.h.bf16 %v7564_v51  ;;  %v7565_v1 = vunpack.i.l.bf16 %v7564_v51  ;;  %v5040_v6 = vpack.c.bf16 %v4909_v45, %v4908_v12 }
 0x496   : > { %7858 = vrot.lane.b32.xlu0 %v7857_v31, %s8025_s8  ;;  %5331 = vmatprep.mubr.bf16.mxu0 %v5038_v42  ;;  %v7576_v47 = vunpack.i.h.bf16 %v12075_v36  ;;  %v4846_v61 = vsel %vm1689_vm4, %v7986_v34, %v7570_v44 }
 0x497   : > { %7868 = vrot.lane.b32.xlu1 %v7857_v31, %s8023_s21  ;;  %5332 = vmatmul.mubr.bf16.gmra.mrb[60].mxu0 %v5037_v7  ;;  %v4941_v8 = vsel %vm1689_vm4, %v11568_v4, %v7566_v15  ;;  %v4940_v51 = vsel %vm1689_vm4, %v11565_v14, %v7565_v1  ;;  %v7575_v15 = vunpack.i.l.bf16 %v12075_v36 }
 0x498   : > { %v7579_v24 = vpop.permute.xlu0 %7578 }
 0x499   : > { %v7581_v63 = vunpack.i.h.bf16 %v7579_v24  ;;  %v7580_v3 = vunpack.i.l.bf16 %v7579_v24  ;;  %v12090_v37 = vpop.permute.xlu1 %7583  ;;  %v7571_v24 = vunpack.i.h.bf16 %v12063_v33 }
 0x49a   : > { %7863 = vrot.lane.b32.xlu0 %v7862_v32, %s8023_s21  ;;  %v7586_v29 = vunpack.i.h.bf16 %v12090_v37  ;;  %v7585_v59 = vunpack.i.l.bf16 %v12090_v37 }
 0x49b   : > { %7873 = vrot.lane.b32.xlu1 %v7862_v32, %s8024_s22  ;;  %v4972_v49 = vsel %vm3059_vm14, %v4940_v51, %v7580_v3  ;;  %v4973_v55 = vsel %vm3059_vm14, %v4941_v8, %v7581_v63  ;;  %v4227_v32 = vsel %vm584_vm3, %v4224_v58, %v4226_v19  ;;  %v7887_v58 = vpack.i.bf16 %v11965_v39, %v11962_v56  ;;  %v7985_v3 = vld [vmem:[#allocation3 + $0x80] sm:$0xff] }
 0x49c   : > { %v7589_v18 = vpop.permute.xlu0 %7588  ;;  %v5075_v13 = vpack.c.bf16 %v4227_v32, %v4225_v9  ;;  %v4847_v36 = vsel %vm1689_vm4, %v7985_v3, %v7571_v24  ;;  %v4878_v56 = vsel %vm3059_vm14, %v4846_v61, %v7575_v15  ;;  %v7987_v15 = vld [vmem:[#allocation3 + $0x98] sm:$0xff] }
 0x49d   : > { %v7591_v31 = vunpack.i.h.bf16 %v7589_v18  ;;  %v7590_v42 = vunpack.i.l.bf16 %v7589_v18  ;;  %v12112_v7 = vpop.permute.xlu1 %7598  ;;  %v4879_v39 = vsel %vm3059_vm14, %v4847_v36, %v7576_v47 }
 0x49e   : > { %7878 = vrot.lane.b32.xlu0 %v7877_v40, %s8024_s22  ;;  %6272 = vmatmul.mubr.msk.bf16.gmra.mrb[108].mxu1 %vm1689_vm4, %v5075_v13 }
 0x49f   : > { %7898 = vrot.lane.b32.xlu1 %v7877_v40, %s8025_s8  ;;  %v5004_v4 = vsel %vm3092_vm15, %v4972_v49, %v7590_v42  ;;  %v5005_v14 = vsel %vm3092_vm15, %v4973_v55, %v7591_v31  ;;  %v13081_v42 = vpack.i.bf16 %v11629_v23, %v11609_v35  ;;  %v4910_v49 = vsel %vm3092_vm15, %v4878_v56, %v7585_v59 }
 0x4a0   : > { %v7594_v43 = vpop.permute.xlu0 %7593  ;;  %v5041_v21 = vpack.c.bf16 %v5005_v14, %v5004_v4  ;;  %v7601_v14 = vunpack.i.h.bf16 %v12112_v7 }
 0x4a1   : > { %v12122_v27 = vpop.permute.xlu1 %7603  ;;  %v7596_v41 = vunpack.i.h.bf16 %v7594_v43  ;;  %v7595_v46 = vunpack.i.l.bf16 %v7594_v43  ;;  %v7600_v43 = vunpack.i.l.bf16 %v12112_v7 }
 0x4a2   : > { %7883 = vrot.lane.b32.xlu0 %v7882_v62, %s8025_s8  ;;  %5339 = vmatprep.mubr.bf16.mxu0 %v5041_v21  ;;  %v7606_v35 = vunpack.i.h.bf16 %v12122_v27  ;;  %v7605_v23 = vunpack.i.l.bf16 %v12122_v27 }
 0x4a3   : > { %5340 = vmatmul.mubr.bf16.gmra.mrb[64].mxu0 %v5040_v6  ;;  %v4943_v18 = vsel %vm1689_vm4, %v11595_v48, %v7596_v41  ;;  %v4942_v37 = vsel %vm1689_vm4, %v11592_v25, %v7595_v46  ;;  %v4911_v48 = vsel %vm3092_vm15, %v4879_v39, %v7586_v29 }
 0x4a4   : > { %v7609_v1 = vpop.permute.xlu0 %7608  ;;  %v5043_v19 = vpack.c.bf16 %v4911_v48, %v4910_v49 }
 0x4a5   : > { %v7611_v52 = vunpack.i.h.bf16 %v7609_v1  ;;  %v7610_v63 = vunpack.i.l.bf16 %v7609_v1  ;;  %v7614_v33 = vpop.permute.xlu1 %7613  ;;  %v4849_v1 = vsel %vm1689_vm4, %v7987_v15, %v7601_v14 }
 0x4a6   : > { %7888 = vrot.lane.b32.xlu0 %v7887_v58, %s8023_s21  ;;  %v7616_v6 = vunpack.i.h.bf16 %v7614_v33  ;;  %v7615_v13 = vunpack.i.l.bf16 %v7614_v33  ;;  %v7988_v58 = vld [vmem:[#allocation3 + $0x90] sm:$0xff]  ;;  %v4881_v46 = vsel %vm3059_vm14, %v4849_v1, %v7606_v35 }
 0x4a7   : > { %v4974_v8 = vsel %vm3059_vm14, %v4942_v37, %v7610_v63  ;;  %v4975_v51 = vsel %vm3059_vm14, %v4943_v18, %v7611_v52  ;;  %v4848_v41 = vsel %vm1689_vm4, %v7988_v58, %v7600_v43  ;;  %v7990_v43 = vld [vmem:[#allocation3 + $0xa8] sm:$0xff] }
 0x4a8   : > { %v7619_v40 = vpop.permute.xlu0 %7618  ;;  %v4880_v7 = vsel %vm3059_vm14, %v4848_v41, %v7605_v23  ;;  %v4913_v61 = vsel %vm3092_vm15, %v4881_v46, %v7616_v6 }
 0x4a9   : > { %v7621_v12 = vunpack.i.h.bf16 %v7619_v40  ;;  %v7620_v45 = vunpack.i.l.bf16 %v7619_v40  ;;  %v12145_v31 = vpop.permute.xlu1 %7628  ;;  %v4912_v34 = vsel %vm3092_vm15, %v4880_v7, %v7615_v13 }
 0x4aa   : > { %7893 = vrot.lane.b32.xlu0 %v13081_v42, %s8025_s8  ;;  %v5046_v18 = vpack.c.bf16 %v4913_v61, %v4912_v34  ;;  %v7631_v37 = vunpack.i.h.bf16 %v12145_v31  ;;  %s5885_s8 = sshll.u32 %s13151_s25, 4 }
 0x4ab   : > { %v5006_v55 = vsel %vm3092_vm15, %v4974_v8, %v7620_v45  ;;  %v5007_v25 = vsel %vm3092_vm15, %v4975_v51, %v7621_v12  ;;  %v7630_v12 = vunpack.i.l.bf16 %v12145_v31  ;;  %s278_s11 = scalar_lea.vmem %s12580_s7, %s5885_s8 }
 0x4ac   : > { %v7624_v9 = vpop.permute.xlu0 %7623  ;;  %v5044_v17 = vpack.c.bf16 %v5007_v25, %v5006_v55 }
 0x4ad   : > { %v7634_v4 = vpop.permute.xlu1 %7633  ;;  %v7626_v21 = vunpack.i.h.bf16 %v7624_v9  ;;  %v7625_v32 = vunpack.i.l.bf16 %v7624_v9  ;;  %v4850_v35 = vsel %vm1689_vm4, %v7990_v43, %v7630_v12 }
 0x4ae   : > { %5347 = vmatprep.mubr.bf16.mxu0 %v5044_v17  ;;  %v7636_v45 = vunpack.i.h.bf16 %v7634_v4  ;;  %v7635_v8 = vunpack.i.l.bf16 %v7634_v4 }
 0x4af   : > { %5348 = vmatmul.mubr.bf16.gmra.mrb[68].mxu0 %v5043_v19  ;;  %v4945_v27 = vsel %vm1689_vm4, %v11623_v30, %v7626_v21  ;;  %v4944_v59 = vsel %vm1689_vm4, %v11620_v5, %v7625_v32  ;;  %v7989_v19 = vld [vmem:[#allocation3 + $0xb0] sm:$0xff] }
 0x4b0   : > { %v7639_v62 = vpop.permute.xlu0 %7638  ;;  %v4851_v14 = vsel %vm1689_vm4, %v7989_v19, %v7631_v37  ;;  %v4882_v23 = vsel %vm3059_vm14, %v4850_v35, %v7635_v8 }
 0x4b1   : > { %v7641_v24 = vunpack.i.h.bf16 %v7639_v62  ;;  %v7640_v44 = vunpack.i.l.bf16 %v7639_v62  ;;  %v7644_v47 = vpop.permute.xlu1 %7643  ;;  %v4883_v31 = vsel %vm3059_vm14, %v4851_v14, %v7636_v45 }
 0x4b2   : > { %v7646_v48 = vunpack.i.h.bf16 %v7644_v47  ;;  %v7645_v55 = vunpack.i.l.bf16 %v7644_v47 }
 0x4b3   : > { %v4976_v33 = vsel %vm3059_vm14, %v4944_v59, %v7640_v44  ;;  %v4977_v3 = vsel %vm3059_vm14, %v4945_v27, %v7641_v24 }
 0x4b4   : > { %v7649_v29 = vpop.permute.xlu0 %7648  ;;  %v4914_v47 = vsel %vm3092_vm15, %v4882_v23, %v7645_v55  ;;  %v4915_v15 = vsel %vm3092_vm15, %v4883_v31, %v7646_v48 }
 0x4b5   : > { %v7651_v52 = vunpack.i.h.bf16 %v7649_v29  ;;  %v7650_v63 = vunpack.i.l.bf16 %v7649_v29  ;;  %v12169_v36 = vpop.permute.xlu1 %7658  ;;  %v5049_v7 = vpack.c.bf16 %v4915_v15, %v4914_v47 }
 0x4b6   : > { %v7661_v46 = vunpack.i.h.bf16 %v12169_v36  ;;  %v7660_v29 = vunpack.i.l.bf16 %v12169_v36 }
 0x4b7   : > { %v5008_v56 = vsel %vm3092_vm15, %v4976_v33, %v7650_v63  ;;  %v5009_v39 = vsel %vm3092_vm15, %v4977_v3, %v7651_v52 }
 0x4b8   : > { %v7654_v30 = vpop.permute.xlu0 %7653  ;;  %v5047_v40 = vpack.c.bf16 %v5009_v39, %v5008_v56 }
 0x4b9   : > { %v7664_v5 = vpop.permute.xlu1 %7663  ;;  %v7656_v42 = vunpack.i.h.bf16 %v7654_v30  ;;  %v7655_v49 = vunpack.i.l.bf16 %v7654_v30  ;;  %v7991_v30 = vld [vmem:[#allocation3 + $0xc8] sm:$0xff] }
 0x4ba   : > { %5355 = vmatprep.mubr.bf16.mxu0 %v5047_v40  ;;  %v7666_v27 = vunpack.i.h.bf16 %v7664_v5  ;;  %v7665_v59 = vunpack.i.l.bf16 %v7664_v5  ;;  %v4853_v40 = vsel %vm1689_vm4, %v7991_v30, %v7661_v46 }
 0x4bb   : > { %5356 = vmatmul.mubr.bf16.gmra.mrb[72].mxu0 %v5046_v18  ;;  %v4947_v4 = vsel %vm1689_vm4, %v11654_v20, %v7656_v42  ;;  %v4946_v21 = vsel %vm1689_vm4, %v11651_v38, %v7655_v49  ;;  %v7992_v18 = vld [vmem:[#allocation3 + $0xc0] sm:$0xff] }
 0x4bc   : > { %v7669_v51 = vpop.permute.xlu0 %7668  ;;  %v4852_v37 = vsel %vm1689_vm4, %v7992_v18, %v7660_v29  ;;  %v4885_v36 = vsel %vm3059_vm14, %v4853_v40, %v7666_v27  ;;  %v7994_v29 = vld [vmem:[#allocation3 + $0xd8] sm:$0xff] }
 0x4bd   : > { %v7671_v25 = vunpack.i.h.bf16 %v7669_v51  ;;  %v7670_v9 = vunpack.i.l.bf16 %v7669_v51  ;;  %v7674_v17 = vpop.permute.xlu1 %7673  ;;  %v4884_v12 = vsel %vm3059_vm14, %v4852_v37, %v7665_v59 }
 0x4be   : > { %v7676_v3 = vunpack.i.h.bf16 %v7674_v17  ;;  %v7675_v34 = vunpack.i.l.bf16 %v7674_v17 }
 0x4bf   : > { %v4978_v13 = vsel %vm3059_vm14, %v4946_v21, %v7670_v9  ;;  %v4979_v24 = vsel %vm3059_vm14, %v4947_v4, %v7671_v25 }
 0x4c0   : > { %v7679_v62 = vpop.permute.xlu0 %7678  ;;  %v4916_v25 = vsel %vm3092_vm15, %v4884_v12, %v7675_v34  ;;  %v4917_v9 = vsel %vm3092_vm15, %v4885_v36, %v7676_v3 }
 0x4c1   : > { %v7681_v32 = vunpack.i.h.bf16 %v7679_v62  ;;  %v7680_v6 = vunpack.i.l.bf16 %v7679_v62  ;;  %v12187_v44 = vpop.permute.xlu1 %7688 }
 0x4c2   : > { %v7691_v31 = vunpack.i.h.bf16 %v12187_v44  ;;  %v7690_v62 = vunpack.i.l.bf16 %v12187_v44 }
 0x4c3   : > { %v5010_v1 = vsel %vm3092_vm15, %v4978_v13, %v7680_v6  ;;  %v5011_v58 = vsel %vm3092_vm15, %v4979_v24, %v7681_v32 }
 0x4c4   : > { %v7684_v20 = vpop.permute.xlu0 %7683  ;;  %v5050_v41 = vpack.c.bf16 %v5011_v58, %v5010_v1  ;;  %v4854_v44 = vsel %vm1689_vm4, %v7994_v29, %v7690_v62  ;;  %v7996_v62 = vld [vmem:[#allocation3 + $0xf0] sm:$0xff] }
 0x4c5   : > { %v7694_v38 = vpop.permute.xlu1 %7693  ;;  %v7686_v63 = vunpack.i.h.bf16 %v7684_v20  ;;  %v7685_v33 = vunpack.i.l.bf16 %v7684_v20 }
 0x4c6   : > { %5363 = vmatprep.mubr.bf16.mxu0 %v5050_v41  ;;  %v7696_v21 = vunpack.i.h.bf16 %v7694_v38  ;;  %v7695_v32 = vunpack.i.l.bf16 %v7694_v38 }
 0x4c7   : > { %5364 = vmatmul.mubr.bf16.gmra.mrb[76].mxu0 %v5049_v7  ;;  %v4949_v5 = vsel %vm1689_vm4, %v11698_v60, %v7686_v63  ;;  %v4948_v8 = vsel %vm1689_vm4, %v11695_v16, %v7685_v33  ;;  %v5052_v16 = vpack.c.bf16 %v4917_v9, %v4916_v25  ;;  %v7993_v7 = vld [vmem:[#allocation3 + $0xe0] sm:$0xff]  ;;  %v13082_v63 = vld [vmem:[#allocation51_spill] sm:$0xff] }
 0x4c8   : > { %v7699_v52 = vpop.permute.xlu0 %7698  ;;  %v4855_v46 = vsel %vm1689_vm4, %v7993_v7, %v7691_v31  ;;  %v4886_v27 = vsel %vm3059_vm14, %v4854_v44, %v7695_v32 }
 0x4c9   : > { %v7701_v61 = vunpack.i.h.bf16 %v7699_v52  ;;  %v7700_v56 = vunpack.i.l.bf16 %v7699_v52  ;;  %v7704_v39 = vpop.permute.xlu1 %7703  ;;  %v4887_v38 = vsel %vm3059_vm14, %v4855_v46, %v7696_v21 }
 0x4ca   : > { %v7706_v15 = vunpack.i.h.bf16 %v7704_v39  ;;  %v7705_v1 = vunpack.i.l.bf16 %v7704_v39 }
 0x4cb   : > { %v4980_v49 = vsel %vm3059_vm14, %v4948_v8, %v7700_v56  ;;  %v4981_v48 = vsel %vm3059_vm14, %v4949_v5, %v7701_v61 }
 0x4cc   : > { %v7709_v45 = vpop.permute.xlu0 %7708  ;;  %v4918_v30 = vsel %vm3092_vm15, %v4886_v27, %v7705_v1  ;;  %v4919_v40 = vsel %vm3092_vm15, %v4887_v38, %v7706_v15 }
 0x4cd   : > { %v7711_v51 = vunpack.i.h.bf16 %v7709_v45  ;;  %v7710_v42 = vunpack.i.l.bf16 %v7709_v45  ;;  %v12205_v55 = vpop.permute.xlu1 %7718  ;;  %v5055_v36 = vpack.c.bf16 %v4919_v40, %v4918_v30 }
 0x4ce   : > { %v7721_v5 = vunpack.i.h.bf16 %v12205_v55  ;;  %v7720_v8 = vunpack.i.l.bf16 %v12205_v55 }
 0x4cf   : > { %v5012_v17 = vsel %vm3092_vm15, %v4980_v49, %v7710_v42  ;;  %v5013_v19 = vsel %vm3092_vm15, %v4981_v48, %v7711_v51  ;;  %v12211_v43 = vpop.f32.mrb[80].mxu1 }
 0x4d0   : > { %v7714_v60 = vpop.permute.xlu0 %7713  ;;  %v5053_v14 = vpack.c.bf16 %v5013_v19, %v5012_v17  ;;  %v12213_v23 = vpop.f32.mrb[81].mxu1  ;;  %v4856_v21 = vsel %vm1689_vm4, %v7996_v62, %v7720_v8 }
 0x4d1   : > { %v7724_v35 = vpop.permute.xlu1 %7723  ;;  %v12217_v4 = vpop.f32.mrb[82].mxu1  ;;  %v7716_v24 = vunpack.i.h.bf16 %v7714_v60  ;;  %v7715_v47 = vunpack.i.l.bf16 %v7714_v60 }
 0x4d2   : > { %5371 = vmatprep.mubr.bf16.mxu0 %v5053_v14  ;;  %v12219_v6 = vpop.f32.mrb[83].mxu1  ;;  %v7726_v51 = vunpack.i.h.bf16 %v7724_v35  ;;  %v7725_v42 = vunpack.i.l.bf16 %v7724_v35  ;;  %v13083_v35 = vld [vmem:[#allocation19_spill] sm:$0xff] }
 0x4d3   : > { %5372 = vmatmul.mubr.bf16.gmra.mrb[80].mxu0 %v5052_v16  ;;  %v4951_v52 = vsel %vm1689_vm4, %v11746_v28, %v7716_v24  ;;  %v4950_v33 = vsel %vm1689_vm4, %v13082_v63, %v7715_v47  ;;  %v7995_v16 = vld [vmem:[#allocation3 + $0xf8] sm:$0xff]  ;;  %v13084_v47 = vld [vmem:[#allocation30_spill] sm:$0xff] }
 0x4d4   : > { %v7729_v13 = vpop.permute.xlu0 %7728  ;;  %v4857_v31 = vsel %vm1689_vm4, %v7995_v16, %v7721_v5  ;;  %v4888_v32 = vsel %vm3059_vm14, %v4856_v21, %v7725_v42  ;;  %v7997_v42 = vld [vmem:[#allocation3 + $0x110] sm:$0xff] }
 0x4d5   : > { %v7731_v58 = vunpack.i.h.bf16 %v7729_v13  ;;  %v7730_v20 = vunpack.i.l.bf16 %v7729_v13  ;;  %v7734_v41 = vpop.permute.xlu1 %7733  ;;  %v4889_v55 = vsel %vm3059_vm14, %v4857_v31, %v7726_v51 }
 0x4d6   : > { %v7736_v9 = vunpack.i.h.bf16 %v7734_v41  ;;  %v7735_v17 = vunpack.i.l.bf16 %v7734_v41 }
 0x4d7   : > { %v4982_v61 = vsel %vm3059_vm14, %v4950_v33, %v7730_v20  ;;  %v4983_v56 = vsel %vm3059_vm14, %v4951_v52, %v7731_v58 }
 0x4d8   : > { %v7739_v59 = vpop.permute.xlu0 %7738  ;;  %v4920_v46 = vsel %vm3092_vm15, %v4888_v32, %v7735_v17  ;;  %v4921_v29 = vsel %vm3092_vm15, %v4889_v55, %v7736_v9 }
 0x4d9   : > { %v7741_v3 = vunpack.i.h.bf16 %v7739_v59  ;;  %v7740_v34 = vunpack.i.l.bf16 %v7739_v59  ;;  %v12231_v39 = vpop.permute.xlu1 %7748  ;;  %v5058_v52 = vpack.c.bf16 %v4921_v29, %v4920_v46 }
 0x4da   : > { %v7751_v33 = vunpack.i.h.bf16 %v12231_v39 }
 0x4db   : > { %v5014_v18 = vsel %vm3092_vm15, %v4982_v61, %v7740_v34  ;;  %v5015_v37 = vsel %vm3092_vm15, %v4983_v56, %v7741_v3  ;;  %v7750_v3 = vunpack.i.l.bf16 %v12231_v39 }
 0x4dc   : > { %v7744_v28 = vpop.permute.xlu0 %7743  ;;  %v5056_v12 = vpack.c.bf16 %v5015_v37, %v5014_v18  ;;  %v4859_v39 = vsel %vm1689_vm4, %v7997_v42, %v7751_v33  ;;  %v7999_v33 = vld [vmem:[#allocation3 + $0x128] sm:$0xff] }
 0x4dd   : > { %v7754_v45 = vpop.permute.xlu1 %7753  ;;  %v7746_v48 = vunpack.i.h.bf16 %v7744_v28  ;;  %v7745_v25 = vunpack.i.l.bf16 %v7744_v28 }
 0x4de   : > { %5379 = vmatprep.mubr.bf16.mxu0 %v5056_v12  ;;  %v7756_v34 = vunpack.i.h.bf16 %v7754_v45  ;;  %v7755_v61 = vunpack.i.l.bf16 %v7754_v45 }
 0x4df   : > { %5380 = vmatmul.mubr.bf16.gmra.mrb[84].mxu0 %v5055_v36  ;;  %v4953_v24 = vsel %vm1689_vm4, %v13083_v35, %v7746_v48  ;;  %v4952_v15 = vsel %vm1689_vm4, %v13084_v47, %v7745_v25 }
 0x4e0   : > { %v7759_v49 = vpop.permute.xlu0 %7758  ;;  %v4891_v9 = vsel %vm3059_vm14, %v4859_v39, %v7756_v34  ;;  %v8000_v34 = vld [vmem:[#allocation3 + $0x120] sm:$0xff] }
 0x4e1   : > { %v7761_v19 = vunpack.i.h.bf16 %v7759_v49  ;;  %v7760_v60 = vunpack.i.l.bf16 %v7759_v49  ;;  %v7764_v14 = vpop.permute.xlu1 %7763  ;;  %v7998_v49 = vld [vmem:[#allocation3 + $0x108] sm:$0xff] }
 0x4e2   : > { %v7766_v28 = vunpack.i.h.bf16 %v7764_v14  ;;  %v7765_v12 = vunpack.i.l.bf16 %v7764_v14  ;;  %v4858_v45 = vsel %vm1689_vm4, %v7998_v49, %v7750_v3 }
 0x4e3   : > { %v4984_v20 = vsel %vm3059_vm14, %v4952_v15, %v7760_v60  ;;  %v4985_v41 = vsel %vm3059_vm14, %v4953_v24, %v7761_v19  ;;  %v4890_v25 = vsel %vm3059_vm14, %v4858_v45, %v7755_v61 }
 0x4e4   : > { %v7769_v13 = vpop.permute.xlu0 %7768  ;;  %v4922_v32 = vsel %vm3092_vm15, %v4890_v25, %v7765_v12  ;;  %v4923_v55 = vsel %vm3092_vm15, %v4891_v9, %v7766_v28 }
 0x4e5   : > { %v7771_v1 = vunpack.i.h.bf16 %v7769_v13  ;;  %v7770_v58 = vunpack.i.l.bf16 %v7769_v13  ;;  %v12249_v7 = vpop.permute.xlu1 %7778  ;;  %v5061_v47 = vpack.c.bf16 %v4923_v55, %v4922_v32 }
 0x4e6   : > { %v7781_v15 = vunpack.i.h.bf16 %v12249_v7 }
 0x4e7   : > { %v5016_v44 = vsel %vm3092_vm15, %v4984_v20, %v7770_v58  ;;  %v5017_v27 = vsel %vm3092_vm15, %v4985_v41, %v7771_v1  ;;  %v7780_v1 = vunpack.i.l.bf16 %v12249_v7 }
 0x4e8   : > { %v7774_v38 = vpop.permute.xlu0 %7773  ;;  %v5059_v59 = vpack.c.bf16 %v5017_v27, %v5016_v44  ;;  %v4861_v3 = vsel %vm1689_vm4, %v7999_v33, %v7781_v15  ;;  %v8002_v15 = vld [vmem:[#allocation3 + $0x138] sm:$0xff] }
 0x4e9   : > { %v7784_v63 = vpop.permute.xlu1 %7783  ;;  %v7776_v40 = vunpack.i.h.bf16 %v7774_v38  ;;  %v7775_v18 = vunpack.i.l.bf16 %v7774_v38  ;;  %v4860_v61 = vsel %vm1689_vm4, %v8000_v34, %v7780_v1 }
 0x4ea   : > { %5387 = vmatprep.mubr.bf16.mxu0 %v5059_v59  ;;  %v7786_v58 = vunpack.i.h.bf16 %v7784_v63  ;;  %v7785_v20 = vunpack.i.l.bf16 %v7784_v63 }
 0x4eb   : > { %5388 = vmatmul.mubr.bf16.gmra.mrb[88].mxu0 %v5058_v52  ;;  %v4955_v19 = vsel %vm1689_vm4, %v11886_v11, %v7776_v40  ;;  %v4954_v60 = vsel %vm1689_vm4, %v11883_v53, %v7775_v18 }
 0x4ec   : > { %v12257_v56 = vpop.f32.mrb[84].mxu1  ;;  %v7789_v30 = vpop.permute.xlu0 %7788  ;;  %v4893_v7 = vsel %vm3059_vm14, %v4861_v3, %v7786_v58 }
 0x4ed   : > { %v12259_v37 = vpop.f32.mrb[85].mxu1  ;;  %v7791_v36 = vunpack.i.h.bf16 %v7789_v30  ;;  %v7790_v5 = vunpack.i.l.bf16 %v7789_v30  ;;  %v7794_v8 = vpop.permute.xlu1 %7793  ;;  %v4892_v30 = vsel %vm3059_vm14, %v4860_v61, %v7785_v20 }
 0x4ee   : > { %v12261_v51 = vpop.f32.mrb[86].mxu1  ;;  %v7796_v44 = vunpack.i.h.bf16 %v7794_v8  ;;  %v7795_v27 = vunpack.i.l.bf16 %v7794_v8 }
 0x4ef   : > { %v12265_v48 = vpop.f32.mrb[87].mxu1  ;;  %v4986_v31 = vsel %vm3059_vm14, %v4954_v60, %v7790_v5  ;;  %v4987_v62 = vsel %vm3059_vm14, %v4955_v19, %v7791_v36 }
 0x4f0   : > { %v7799_v17 = vpop.permute.xlu0 %7798  ;;  %v4924_v42 = vsel %vm3092_vm15, %v4892_v30, %v7795_v27  ;;  %v4925_v39 = vsel %vm3092_vm15, %v4893_v7, %v7796_v44 }
 0x4f1   : > { %v7801_v14 = vunpack.i.h.bf16 %v7799_v17  ;;  %v7800_v16 = vunpack.i.l.bf16 %v7799_v17  ;;  %v12275_v21 = vpop.permute.xlu1 %7808  ;;  %v5064_v9 = vpack.c.bf16 %v4925_v39, %v4924_v42 }
 0x4f2   : > { %v7811_v17 = vunpack.i.h.bf16 %v12275_v21  ;;  %v7810_v19 = vunpack.i.l.bf16 %v12275_v21 }
 0x4f3   : > { %v5018_v13 = vsel %vm3092_vm15, %v4986_v31, %v7800_v16  ;;  %v5019_v35 = vsel %vm3092_vm15, %v4987_v62, %v7801_v14 }
 0x4f4   : > { %v7804_v11 = vpop.permute.xlu0 %7803  ;;  %v5062_v24 = vpack.c.bf16 %v5019_v35, %v5018_v13  ;;  %v4862_v1 = vsel %vm1689_vm4, %v8002_v15, %v7810_v19 }
 0x4f5   : > { %v7814_v53 = vpop.permute.xlu1 %7813  ;;  %v7806_v46 = vunpack.i.h.bf16 %v7804_v11  ;;  %v7805_v29 = vunpack.i.l.bf16 %v7804_v11 }
 0x4f6   : > { %5395 = vmatprep.mubr.bf16.mxu0 %v5062_v24  ;;  %v7816_v60 = vunpack.i.h.bf16 %v7814_v53  ;;  %v7815_v14 = vunpack.i.l.bf16 %v7814_v53  ;;  %v8001_v24 = vld [vmem:[#allocation3 + $0x140] sm:$0xff] }
 0x4f7   : > { %5396 = vmatmul.mubr.bf16.gmra.mrb[92].mxu0 %v5061_v47  ;;  %v4957_v63 = vsel %vm1689_vm4, %v11968_v22, %v7806_v46  ;;  %v4956_v18 = vsel %vm1689_vm4, %v11959_v26, %v7805_v29  ;;  %v4863_v47 = vsel %vm1689_vm4, %v8001_v24, %v7811_v17 }
 0x4f8   : > { %v7819_v41 = vpop.permute.xlu0 %7818  ;;  %v4894_v21 = vsel %vm3059_vm14, %v4862_v1, %v7815_v14  ;;  %v4895_v53 = vsel %vm3059_vm14, %v4863_v47, %v7816_v60 }
 0x4f9   : > { %v7821_v38 = vunpack.i.h.bf16 %v7819_v41  ;;  %v7820_v59 = vunpack.i.l.bf16 %v7819_v41  ;;  %v7824_v52 = vpop.permute.xlu1 %7823 }
 0x4fa   : > { %v7826_v32 = vunpack.i.h.bf16 %v7824_v52  ;;  %v7825_v55 = vunpack.i.l.bf16 %v7824_v52 }
 0x4fb   : > { %v4988_v36 = vsel %vm3059_vm14, %v4956_v18, %v7820_v59  ;;  %v4989_v5 = vsel %vm3059_vm14, %v4957_v63, %v7821_v38 }
 0x4fc   : > { %v7829_v40 = vpop.permute.xlu0 %7828  ;;  %v4926_v3 = vsel %vm3092_vm15, %v4894_v21, %v7825_v55  ;;  %v4927_v34 = vsel %vm3092_vm15, %v4895_v53, %v7826_v32 }
 0x4fd   : > { %v7831_v28 = vunpack.i.h.bf16 %v7829_v40  ;;  %v7830_v12 = vunpack.i.l.bf16 %v7829_v40  ;;  %v12293_v8 = vpop.permute.xlu1 %7838  ;;  %v5067_v40 = vpack.c.bf16 %v4927_v34, %v4926_v3 }
 0x4fe   : > { %v7841_v63 = vunpack.i.h.bf16 %v12293_v8  ;;  %v7840_v18 = vunpack.i.l.bf16 %v12293_v8 }
 0x4ff   : > { %v5020_v49 = vsel %vm3092_vm15, %v4988_v36, %v7830_v12  ;;  %v5021_v45 = vsel %vm3092_vm15, %v4989_v5, %v7831_v28 }
 0x500   : > { %v7834_v22 = vpop.permute.xlu0 %7833  ;;  %v5065_v25 = vpack.c.bf16 %v5021_v45, %v5020_v49 }
 0x501   : > { %v7844_v26 = vpop.permute.xlu1 %7843  ;;  %v7836_v31 = vunpack.i.h.bf16 %v7834_v22  ;;  %v7835_v62 = vunpack.i.l.bf16 %v7834_v22  ;;  %v8003_v22 = vld [vmem:[#allocation3 + $0x158] sm:$0xff] }
 0x502   : > { %5403 = vmatprep.mubr.bf16.mxu0 %v5065_v25  ;;  %v7846_v28 = vunpack.i.h.bf16 %v7844_v26  ;;  %v7845_v12 = vunpack.i.l.bf16 %v7844_v26  ;;  %v4865_v25 = vsel %vm1689_vm4, %v8003_v22, %v7841_v63  ;;  %v8005_v63 = vld [vmem:[#allocation3 + $0x170] sm:$0xff] }
 0x503   : > { %5404 = vmatmul.mubr.bf16.gmra.mrb[96].mxu0 %v5064_v9  ;;  %v4959_v46 = vsel %vm1689_vm4, %v12008_v54, %v7836_v31  ;;  %v4958_v29 = vsel %vm1689_vm4, %v12005_v2, %v7835_v62  ;;  %v8004_v9 = vld [vmem:[#allocation3 + $0x150] sm:$0xff] }
 0x504   : > { %v7849_v16 = vpop.permute.xlu0 %7848  ;;  %v4864_v17 = vsel %vm1689_vm4, %v8004_v9, %v7840_v18  ;;  %v4897_v14 = vsel %vm3059_vm14, %v4865_v25, %v7846_v28  ;;  %v8006_v28 = vld [vmem:[#allocation3 + $0x168] sm:$0xff] }
 0x505   : > { %v7851_v13 = vunpack.i.h.bf16 %v7849_v16  ;;  %v7850_v35 = vunpack.i.l.bf16 %v7849_v16  ;;  %v7854_v11 = vpop.permute.xlu1 %7853  ;;  %v4896_v8 = vsel %vm3059_vm14, %v4864_v17, %v7845_v12 }
 0x506   : > { %v7856_v36 = vunpack.i.h.bf16 %v7854_v11  ;;  %v7855_v5 = vunpack.i.l.bf16 %v7854_v11 }
 0x507   : > { %v12303_v58 = vpop.f32.mrb[88].mxu1  ;;  %v4990_v59 = vsel %vm3059_vm14, %v4958_v29, %v7850_v35  ;;  %v4991_v52 = vsel %vm3059_vm14, %v4959_v46, %v7851_v13 }
 0x508   : > { %v12307_v20 = vpop.f32.mrb[89].mxu1  ;;  %v7859_v41 = vpop.permute.xlu0 %7858  ;;  %v4928_v16 = vsel %vm3092_vm15, %v4896_v8, %v7855_v5  ;;  %v4929_v31 = vsel %vm3092_vm15, %v4897_v14, %v7856_v36 }
 0x509   : > { %v12313_v44 = vpop.f32.mrb[90].mxu1  ;;  %v7861_v27 = vunpack.i.h.bf16 %v7859_v41  ;;  %v7860_v38 = vunpack.i.l.bf16 %v7859_v41  ;;  %v12321_v61 = vpop.permute.xlu1 %7868  ;;  %v5070_v29 = vpack.c.bf16 %v4929_v31, %v4928_v16 }
 0x50a   : > { %v12317_v33 = vpop.f32.mrb[91].mxu1  ;;  %v7870_v53 = vunpack.i.l.bf16 %v12321_v61 }
 0x50b   : > { %v5022_v54 = vsel %vm3092_vm15, %v4990_v59, %v7860_v38  ;;  %v5023_v2 = vsel %vm3092_vm15, %v4991_v52, %v7861_v27 }
 0x50c   : > { %v7864_v30 = vpop.permute.xlu0 %7863  ;;  %v5068_v7 = vpack.c.bf16 %v5023_v2, %v5022_v54  ;;  %v4866_v12 = vsel %vm1689_vm4, %v8006_v28, %v7870_v53  ;;  %v13088_v28 = vld [vmem:[#allocation9_spill] sm:$0xff] }
 0x50d   : > { %v7866_v39 = vunpack.i.h.bf16 %v7864_v30  ;;  %v7865_v49 = vunpack.i.l.bf16 %v7864_v30  ;;  %v7874_v45 = vpop.permute.xlu1 %7873  ;;  %v13085_v30 = vld [vmem:[#allocation81_spill] sm:$0xff] }
 0x50e   : > { %5411 = vmatprep.mubr.bf16.mxu0 %v5068_v7  ;;  %v7876_v27 = vunpack.i.h.bf16 %v7874_v45  ;;  %v7875_v38 = vunpack.i.l.bf16 %v7874_v45  ;;  %v7436_v7 = vunpack.i.h.bf16 %v13085_v30 }
 0x50f   : > { %5412 = vmatmul.mubr.bf16.gmra.mrb[100].mxu0 %v5067_v40  ;;  %v4961_v62 = vsel %vm1689_vm4, %v12055_v50, %v7866_v39  ;;  %v4960_v32 = vsel %vm1689_vm4, %v12052_v57, %v7865_v49  ;;  %v7871_v50 = vunpack.i.h.bf16 %v12321_v61  ;;  %v7435_v40 = vunpack.i.l.bf16 %v13085_v30  ;;  %v13086_v30 = vld [vmem:[#allocation16_spill] sm:$0xff] }
 0x510   : > { %v7879_v42 = vpop.permute.xlu0 %7878  ;;  %v4898_v5 = vsel %vm3059_vm14, %v4866_v12, %v7875_v38  ;;  %v13089_v12 = vmax.f32 %v13088_v28, 0.0 }
 0x511   : > { %v7881_v19 = vunpack.i.h.bf16 %v7879_v42  ;;  %v7880_v60 = vunpack.i.l.bf16 %v7879_v42  ;;  %v7899_v47 = vpop.permute.xlu1 %7898  ;;  %v4867_v18 = vsel %vm1689_vm4, %v8005_v63, %v7871_v50 }
 0x512   : > { %v7901_v34 = vunpack.i.h.bf16 %v7899_v47  ;;  %v7900_v54 = vunpack.i.l.bf16 %v7899_v47  ;;  %v4899_v42 = vsel %vm3059_vm14, %v4867_v18, %v7876_v27 }
 0x513   : > { %v4992_v35 = vsel %vm3059_vm14, %v4960_v32, %v7880_v60  ;;  %v4993_v11 = vsel %vm3059_vm14, %v4961_v62, %v7881_v19 }
 0x514   : > { %v7884_v26 = vpop.permute.xlu0 %7883  ;;  %v4930_v45 = vsel %vm3092_vm15, %v4898_v5, %v7900_v54  ;;  %v4931_v22 = vsel %vm3092_vm15, %v4899_v42, %v7901_v34 }
 0x515   : > { %v7886_v55 = vunpack.i.h.bf16 %v7884_v26  ;;  %v7885_v13 = vunpack.i.l.bf16 %v7884_v26  ;;  %v5073_v19 = vpack.c.bf16 %v4931_v22, %v4930_v45  ;;  %v13092_v22 = vld [vmem:[#allocation20_spill] sm:$0xff] }
 0x516   : > { %v12339_v24 = vpop.f32.mrb[92].mxu1 }
 0x517   : > { %v12341_v15 = vpop.f32.mrb[93].mxu1  ;;  %v5024_v1 = vsel %vm3092_vm15, %v4992_v35, %v7885_v13  ;;  %v5025_v21 = vsel %vm3092_vm15, %v4993_v11, %v7886_v55  ;;  %v12386_v13 = vld [vmem:[%s12579_s6] ss:$0 sm:$0xff] }
 0x518   : > { %v12347_v57 = vpop.f32.mrb[94].mxu1  ;;  %v7889_v41 = vpop.permute.xlu0 %7888  ;;  %v5071_v46 = vpack.c.bf16 %v5025_v21, %v5024_v1 }
 0x519   : > { %v7891_v59 = vunpack.i.h.bf16 %v7889_v41  ;;  %v7890_v52 = vunpack.i.l.bf16 %v7889_v41  ;;  %v12349_v3 = vpop.f32.mrb[95].mxu1 }
 0x51a   : > { %5419 = vmatprep.mubr.bf16.mxu0 %v5071_v46 }
 0x51b   : > { %v4963_v2 = vsel %vm1689_vm4, %v12102_v0, %v7891_v59  ;;  %v4962_v61 = vsel %vm1689_vm4, %v12099_v10, %v7890_v52  ;;  %5420 = vmatmul.mubr.bf16.gmra.mrb[104].mxu0 %v5070_v29 }
 0x51c   : > { %v7894_v36 = vpop.permute.xlu0 %7893  ;;  %v4994_v10 = vsel %vm3059_vm14, %v4962_v61, %v7435_v40  ;;  %v4995_v49 = vsel %vm3059_vm14, %v4963_v2, %v7436_v7  ;;  %v13087_v7 = vmax.f32 %v13086_v30, 0.0 }
 0x51d   : > { %v7896_v0 = vunpack.i.h.bf16 %v7894_v36  ;;  %v7895_v39 = vunpack.i.l.bf16 %v7894_v36 }
 0x51f   : > { %v5026_v25 = vsel %vm3092_vm15, %v4994_v10, %v7895_v39  ;;  %v5027_v9 = vsel %vm3092_vm15, %v4995_v49, %v7896_v0 }
 0x520   : > { %v5074_v17 = vpack.c.bf16 %v5027_v9, %v5026_v25  ;;  %v13093_v25 = vmax.f32 %v13092_v22, 0.0  ;;  %v13098_v22 = vld [vmem:[#allocation17_spill] sm:$0xff] }
 0x522   : > { %5427 = vmatprep.mubr.bf16.mxu0 %v5074_v17 }
 0x523   : > { %5428 = vmatmul.mubr.bf16.gmra.mrb[108].mxu0 %v5073_v19 }
 0x526   : > { %v12367_v60 = vpop.f32.mrb[96].mxu1 }
 0x527   : > { %v12369_v8 = vpop.f32.mrb[97].mxu1 }
 0x528   : > { %v12371_v14 = vpop.f32.mrb[98].mxu1 }
 0x529   : > { %v12373_v26 = vpop.f32.mrb[99].mxu1 }
 0x537   : > { %v12375_v16 = vpop.f32.mrb[100].mxu1 }
 0x538   : > { %v12377_v31 = vpop.f32.mrb[101].mxu1 }
 0x539   : > { %v12379_v62 = vpop.f32.mrb[102].mxu1 }
 0x53a   : > { %v12381_v32 = vpop.f32.mrb[103].mxu1 }
 0x541   : > { %v6051_v55 = vpop.f32.mrb[48].mxu0 }
 0x542   : > { %v6052_v35 = vpop.f32.mrb[49].mxu0 }
 0x543   : > { %v6053_v11 = vadd.f32 %v6052_v35, %v6051_v55  ;;  %v6054_v47 = vpop.f32.mrb[50].mxu0 }
 0x544   : > { %v6055_v1 = vpop.f32.mrb[51].mxu0 }
 0x545   : > { %v5310_v50 = vadd.f32 %v6053_v11, %v12386_v13  ;;  %v6056_v53 = vadd.f32 %v6055_v1, %v6054_v47 }
 0x546   : > { %v12388_v21 = vpop.f32.mrb[104].mxu1 }
 0x547   : > { %v12391_v41 = vpop.f32.mrb[105].mxu1  ;;  %v5471_v29 = vadd.f32 %v12213_v23, %v5310_v50  ;;  %v5313_v27 = vadd.f32 %v6056_v53, %v12386_v13 }
 0x548   : > { %v12393_v46 = vpop.f32.mrb[106].mxu1 }
 0x549   : > { %v12397_v38 = vpop.f32.mrb[107].mxu1  ;;  %v5474_v59 = vadd.f32 %v12219_v6, %v5313_v27  ;;  %v5597_v40 = vadd.f32 %v5471_v29, %v13087_v7  ;;  %v13090_v6 = vld [vmem:[#allocation13_spill] sm:$0xff] }
 0x54a   : > { %v13091_v0 = vmax.f32 %v13090_v6, 0.0 }
 0x54b   : > { %v5598_v23 = vadd.f32 %v5474_v59, %v13089_v12  ;;  %v5629_v42 = vmax.f32 %v5597_v40, 0.0  ;;  %v13096_v40 = vld [vmem:[#allocation11_spill] sm:$0xff] }
 0x54d   : > { %v6057_v52 = vpop.f32.mrb[52].mxu0  ;;  %v5630_v49 = vmax.f32 %v5598_v23, 0.0  ;;  %v5661_v17 = vsel %vm1689_vm4, %v5629_v42, 0.0 }
 0x54e   : > { %v6058_v34 = vpop.f32.mrb[53].mxu0 }
 0x54f   : > { %v6059_v54 = vadd.f32 %v6058_v34, %v6057_v52  ;;  %v6060_v2 = vpop.f32.mrb[54].mxu0 }
 0x550   : > { %v6061_v61 = vpop.f32.mrb[55].mxu0 }
 0x551   : > { %v5318_v63 = vadd.f32 %v6059_v54, %v12386_v13  ;;  %v6062_v18 = vadd.f32 %v6061_v61, %v6060_v2  ;;  %v13094_v54 = vld [vmem:[#allocation18_spill] sm:$0xff] }
 0x552   : > { %v13095_v2 = vmax.f32 %v13094_v54, 0.0 }
 0x553   : > { %v5479_v36 = vadd.f32 %v12211_v43, %v5318_v63  ;;  %v5321_v5 = vadd.f32 %v6062_v18, %v12386_v13  ;;  %v5692_v43 = vsel %vm1689_vm4, %v5630_v49, 0.0  ;;  %v13097_v63 = vmax.f32 %v13096_v40, 0.0  ;;  %v13102_v40 = vld [vmem:[#allocation15_spill] sm:$0xff] }
 0x555   : > { %v5599_v39 = vadd.f32 %v5479_v36, %v13091_v0  ;;  %v5482_v10 = vadd.f32 %v12217_v4, %v5321_v5 }
 0x557   : > { %v5631_v45 = vmax.f32 %v5599_v39, 0.0  ;;  %v5600_v9 = vadd.f32 %v5482_v10, %v13093_v25  ;;  %v13099_v25 = vmax.f32 %v13098_v22, 0.0 }
 0x559   : > { %v5662_v19 = vsel %vm1689_vm4, %v5631_v45, 0.0  ;;  %v5632_v55 = vmax.f32 %v5600_v9, 0.0 }
 0x55a   : > { %v5663_v35 = vadd.f32 %v5662_v19, %v5661_v17 }
 0x55b   : > { %v5693_v11 = vsel %vm1689_vm4, %v5632_v55, 0.0  ;;  %v13100_v55 = vld [vmem:[#allocation32_spill] sm:$0xff] }
 0x55c   : > { %v5694_v47 = vadd.f32 %v5693_v11, %v5692_v43 }
 0x55e   : > { %v6063_v1 = vpop.f32.mrb[56].mxu0 }
 0x55f   : > { %v6064_v50 = vpop.f32.mrb[57].mxu0 }
 0x560   : > { %v6065_v53 = vadd.f32 %v6064_v50, %v6063_v1  ;;  %v6066_v4 = vpop.f32.mrb[58].mxu0 }
 0x561   : > { %v6067_v29 = vpop.f32.mrb[59].mxu0 }
 0x562   : > { %v5326_v27 = vadd.f32 %v6065_v53, %v12386_v13  ;;  %v6068_v59 = vadd.f32 %v6067_v29, %v6066_v4 }
 0x564   : > { %v5487_v52 = vadd.f32 %v12259_v37, %v5326_v27  ;;  %v5329_v34 = vadd.f32 %v6068_v59, %v12386_v13 }
 0x566   : > { %v5601_v61 = vadd.f32 %v5487_v52, %v13095_v2  ;;  %v5490_v30 = vadd.f32 %v12265_v48, %v5329_v34 }
 0x568   : > { %v5633_v7 = vmax.f32 %v5601_v61, 0.0  ;;  %v5602_v18 = vadd.f32 %v5490_v30, %v13097_v63  ;;  %v13103_v63 = vmax.f32 %v13102_v40, 0.0 }
 0x56a   : > { %v5664_v28 = vsel %vm1689_vm4, %v5633_v7, 0.0  ;;  %v5634_v12 = vmax.f32 %v5602_v18, 0.0  ;;  %v6069_v23 = vpop.f32.mrb[60].mxu0 }
 0x56b   : > { %v5665_v36 = vadd.f32 %v5664_v28, %v5663_v35  ;;  %v6070_v5 = vpop.f32.mrb[61].mxu0  ;;  %v13101_v35 = vmax.f32 %v13100_v55, 0.0 }
 0x56c   : > { %v5695_v42 = vsel %vm1689_vm4, %v5634_v12, 0.0  ;;  %v6071_v37 = vadd.f32 %v6070_v5, %v6069_v23  ;;  %v6072_v6 = vpop.f32.mrb[62].mxu0  ;;  %v13104_v23 = vld [vmem:[#allocation6_spill] sm:$0xff] }
 0x56d   : > { %v5696_v0 = vadd.f32 %v5695_v42, %v5694_v47  ;;  %v6073_v39 = vpop.f32.mrb[63].mxu0 }
 0x56e   : > { %v5334_v10 = vadd.f32 %v6071_v37, %v12386_v13  ;;  %v6074_v49 = vadd.f32 %v6073_v39, %v6072_v6 }
 0x570   : > { %v5495_v48 = vadd.f32 %v12257_v56, %v5334_v10  ;;  %v5337_v45 = vadd.f32 %v6074_v49, %v12386_v13 }
 0x571   : > { %v12435_v4 = vpop.f32.mrb[108].mxu1 }
 0x572   : > { %v5603_v9 = vadd.f32 %v5495_v48, %v13099_v25  ;;  %v5498_v17 = vadd.f32 %v12261_v51, %v5337_v45  ;;  %v12438_v59 = vpop.f32.mrb[109].mxu1 }
 0x573   : > { %v12441_v2 = vpop.f32.mrb[110].mxu1 }
 0x574   : > { %v5635_v19 = vmax.f32 %v5603_v9, 0.0  ;;  %v5604_v43 = vadd.f32 %v5498_v17, %v13101_v35  ;;  %v12445_v7 = vpop.f32.mrb[111].mxu1  ;;  %v13106_v17 = vld [vmem:[#allocation34_spill] sm:$0xff] }
 0x576   : > { %v5666_v11 = vsel %vm1689_vm4, %v5635_v19, 0.0  ;;  %v5636_v47 = vmax.f32 %v5604_v43, 0.0  ;;  %v6075_v1 = vpop.f32.mrb[64].mxu0  ;;  %v13107_v19 = vmax.f32 %v13106_v17, 0.0 }
 0x577   : > { %v5667_v50 = vadd.f32 %v5666_v11, %v5665_v36  ;;  %v6076_v53 = vpop.f32.mrb[65].mxu0  ;;  %v13105_v36 = vmax.f32 %v13104_v23, 0.0  ;;  %v13108_v11 = vld [vmem:[#allocation14_spill] sm:$0xff] }
 0x578   : > { %v5697_v56 = vsel %vm1689_vm4, %v5636_v47, 0.0  ;;  %v6077_v29 = vadd.f32 %v6076_v53, %v6075_v1  ;;  %v6078_v27 = vpop.f32.mrb[66].mxu0  ;;  %v13109_v47 = vmax.f32 %v13108_v11, 0.0 }
 0x579   : > { %v5698_v52 = vadd.f32 %v5697_v56, %v5696_v0  ;;  %v6079_v51 = vpop.f32.mrb[67].mxu0 }
 0x57a   : > { %v5342_v34 = vadd.f32 %v6077_v29, %v12386_v13  ;;  %v6080_v54 = vadd.f32 %v6079_v51, %v6078_v27 }
 0x57c   : > { %v5503_v61 = vadd.f32 %v12307_v20, %v5342_v34  ;;  %v5345_v30 = vadd.f32 %v6080_v54, %v12386_v13 }
 0x57e   : > { %v5605_v18 = vadd.f32 %v5503_v61, %v13103_v63  ;;  %v5506_v28 = vadd.f32 %v12317_v33, %v5345_v30  ;;  %v13110_v63 = vld [vmem:[#allocation24_spill] sm:$0xff] }
 0x580   : > { %v5637_v12 = vmax.f32 %v5605_v18, 0.0  ;;  %v5606_v5 = vadd.f32 %v5506_v28, %v13105_v36  ;;  %v13111_v18 = vmax.f32 %v13110_v63, 0.0  ;;  %v13112_v36 = vld [vmem:[#allocation26_spill] sm:$0xff] }
 0x582   : > { %v5668_v42 = vsel %vm1689_vm4, %v5637_v12, 0.0  ;;  %v5638_v37 = vmax.f32 %v5606_v5, 0.0  ;;  %v6081_v6 = vpop.f32.mrb[68].mxu0  ;;  %v13113_v5 = vmax.f32 %v13112_v36, 0.0 }
 0x583   : > { %v5669_v0 = vadd.f32 %v5668_v42, %v5667_v50  ;;  %v6082_v39 = vpop.f32.mrb[69].mxu0 }
 0x584   : > { %v5699_v20 = vsel %vm1689_vm4, %v5638_v37, 0.0  ;;  %v6083_v10 = vadd.f32 %v6082_v39, %v6081_v6  ;;  %v6084_v49 = vpop.f32.mrb[70].mxu0 }
 0x585   : > { %v5700_v48 = vadd.f32 %v5699_v20, %v5698_v52  ;;  %v6085_v45 = vpop.f32.mrb[71].mxu0 }
 0x586   : > { %v5350_v22 = vadd.f32 %v6083_v10, %v12386_v13  ;;  %v6086_v25 = vadd.f32 %v6085_v45, %v6084_v49 }
 0x588   : > { %v5511_v33 = vadd.f32 %v12303_v58, %v5350_v22  ;;  %v5353_v9 = vadd.f32 %v6086_v25, %v12386_v13 }
 0x58a   : > { %v5607_v55 = vadd.f32 %v5511_v33, %v13107_v19  ;;  %v5514_v35 = vadd.f32 %v12313_v44, %v5353_v9  ;;  %v13114_v9 = vld [vmem:[#allocation23_spill] sm:$0xff] }
 0x58b   : > { %v13115_v17 = vmax.f32 %v13114_v9, 0.0  ;;  %v13124_v9 = vld [vmem:[#allocation37_spill] sm:$0xff] }
 0x58c   : > { %v5639_v43 = vmax.f32 %v5607_v55, 0.0  ;;  %v5608_v1 = vadd.f32 %v5514_v35, %v13109_v47 }
 0x58e   : > { %v5670_v50 = vsel %vm1689_vm4, %v5639_v43, 0.0  ;;  %v5640_v53 = vmax.f32 %v5608_v1, 0.0  ;;  %v6087_v56 = vpop.f32.mrb[72].mxu0  ;;  %v13116_v43 = vld [vmem:[#allocation36_spill] sm:$0xff] }
 0x58f   : > { %v5671_v29 = vadd.f32 %v5670_v50, %v5669_v0  ;;  %v6088_v27 = vpop.f32.mrb[73].mxu0  ;;  %v13117_v11 = vmax.f32 %v13116_v43, 0.0 }
 0x590   : > { %v5701_v52 = vsel %vm1689_vm4, %v5640_v53, 0.0  ;;  %v6089_v58 = vadd.f32 %v6088_v27, %v6087_v56  ;;  %v6090_v51 = vpop.f32.mrb[74].mxu0 }
 0x591   : > { %v5702_v34 = vadd.f32 %v5701_v52, %v5700_v48  ;;  %v6091_v54 = vpop.f32.mrb[75].mxu0 }
 0x592   : > { %v5358_v61 = vadd.f32 %v6089_v58, %v12386_v13  ;;  %v6092_v30 = vadd.f32 %v6091_v54, %v6090_v51 }
 0x594   : > { %v5519_v44 = vadd.f32 %v12341_v15, %v5358_v61  ;;  %v5361_v40 = vadd.f32 %v6092_v30, %v12386_v13  ;;  %v13118_v30 = vld [vmem:[#allocation8_spill] sm:$0xff] }
 0x596   : > { %v5609_v28 = vadd.f32 %v5519_v44, %v13111_v18  ;;  %v5522_v12 = vadd.f32 %v12349_v3, %v5361_v40  ;;  %v13119_v44 = vmax.f32 %v13118_v30, 0.0 }
 0x598   : > { %v5641_v23 = vmax.f32 %v5609_v28, 0.0  ;;  %v5610_v42 = vadd.f32 %v5522_v12, %v13113_v5  ;;  %v13120_v28 = vld [vmem:[#allocation38_spill] sm:$0xff] }
 0x599   : > { %v13121_v12 = vmax.f32 %v13120_v28, 0.0 }
 0x59a   : > { %v5672_v37 = vsel %vm1689_vm4, %v5641_v23, 0.0  ;;  %v5642_v6 = vmax.f32 %v5610_v42, 0.0  ;;  %v6093_v0 = vpop.f32.mrb[76].mxu0 }
 0x59b   : > { %v5673_v39 = vadd.f32 %v5672_v37, %v5671_v29  ;;  %v6094_v20 = vpop.f32.mrb[77].mxu0 }
 0x59c   : > { %v5703_v10 = vsel %vm1689_vm4, %v5642_v6, 0.0  ;;  %v6095_v15 = vadd.f32 %v6094_v20, %v6093_v0  ;;  %v6096_v49 = vpop.f32.mrb[78].mxu0 }
 0x59d   : > { %v5704_v48 = vadd.f32 %v5703_v10, %v5702_v34  ;;  %v6097_v45 = vpop.f32.mrb[79].mxu0 }
 0x59e   : > { %v5366_v22 = vadd.f32 %v6095_v15, %v12386_v13  ;;  %v6098_v25 = vadd.f32 %v6097_v45, %v6096_v49  ;;  %v13122_v45 = vld [vmem:[#allocation28_spill] sm:$0xff] }
 0x5a0   : > { %v5527_v3 = vadd.f32 %v12339_v24, %v5366_v22  ;;  %v5369_v33 = vadd.f32 %v6098_v25, %v12386_v13  ;;  %v13123_v22 = vmax.f32 %v13122_v45, 0.0 }
 0x5a2   : > { %v5611_v19 = vadd.f32 %v5527_v3, %v13115_v17  ;;  %v5530_v55 = vadd.f32 %v12347_v57, %v5369_v33  ;;  %v13125_v17 = vmax.f32 %v13124_v9, 0.0 }
 0x5a4   : > { %v5643_v35 = vmax.f32 %v5611_v19, 0.0  ;;  %v5612_v47 = vadd.f32 %v5530_v55, %v13117_v11 }
 0x5a6   : > { %v5674_v1 = vsel %vm1689_vm4, %v5643_v35, 0.0  ;;  %v5644_v50 = vmax.f32 %v5612_v47, 0.0  ;;  %v6099_v53 = vpop.f32.mrb[80].mxu0 }
 0x5a7   : > { %v5675_v56 = vadd.f32 %v5674_v1, %v5673_v39  ;;  %v6100_v29 = vpop.f32.mrb[81].mxu0 }
 0x5a8   : > { %v5705_v27 = vsel %vm1689_vm4, %v5644_v50, 0.0  ;;  %v6101_v24 = vadd.f32 %v6100_v29, %v6099_v53  ;;  %v6102_v52 = vpop.f32.mrb[82].mxu0 }
 0x5a9   : > { %v5706_v58 = vadd.f32 %v5705_v27, %v5704_v48  ;;  %v6103_v51 = vpop.f32.mrb[83].mxu0 }
 0x5aa   : > { %v5374_v34 = vadd.f32 %v6101_v24, %v12386_v13  ;;  %v6104_v54 = vadd.f32 %v6103_v51, %v6102_v52  ;;  %v13126_v52 = vld [vmem:[#allocation48_spill] sm:$0xff] }
 0x5ac   : > { %v5535_v57 = vadd.f32 %v12369_v8, %v5374_v34  ;;  %v5377_v61 = vadd.f32 %v6104_v54, %v12386_v13 }
 0x5ae   : > { %v5613_v40 = vadd.f32 %v5535_v57, %v13119_v44  ;;  %v5538_v63 = vadd.f32 %v12373_v26, %v5377_v61  ;;  %v13128_v57 = vld [vmem:[#allocation50_spill] sm:$0xff] }
 0x5af   : > { %v13129_v61 = vmax.f32 %v13128_v57, 0.0 }
 0x5b0   : > { %v5645_v18 = vmax.f32 %v5613_v40, 0.0  ;;  %v5614_v23 = vadd.f32 %v5538_v63, %v13121_v12 }
 0x5b2   : > { %v5676_v36 = vsel %vm1689_vm4, %v5645_v18, 0.0  ;;  %v5646_v5 = vmax.f32 %v5614_v23, 0.0  ;;  %v6105_v42 = vpop.f32.mrb[84].mxu0 }
 0x5b3   : > { %v5677_v37 = vadd.f32 %v5676_v36, %v5675_v56  ;;  %v6106_v6 = vpop.f32.mrb[85].mxu0 }
 0x5b4   : > { %v5707_v0 = vsel %vm1689_vm4, %v5646_v5, 0.0  ;;  %v6107_v8 = vadd.f32 %v6106_v6, %v6105_v42  ;;  %v6108_v39 = vpop.f32.mrb[86].mxu0 }
 0x5b5   : > { %v5708_v20 = vadd.f32 %v5707_v0, %v5706_v58  ;;  %v6109_v10 = vpop.f32.mrb[87].mxu0  ;;  %v13127_v58 = vmax.f32 %v13126_v52, 0.0  ;;  %v13130_v0 = vld [vmem:[#allocation47_spill] sm:$0xff] }
 0x5b6   : > { %v5382_v15 = vadd.f32 %v6107_v8, %v12386_v13  ;;  %v6110_v49 = vadd.f32 %v6109_v10, %v6108_v39  ;;  %v13131_v8 = vmax.f32 %v13130_v0, 0.0 }
 0x5b8   : > { %v5543_v26 = vadd.f32 %v12367_v60, %v5382_v15  ;;  %v5385_v48 = vadd.f32 %v6110_v49, %v12386_v13  ;;  %v13132_v15 = vld [vmem:[#allocation49_spill] sm:$0xff] }
 0x5b9   : > { %v13133_v49 = vmax.f32 %v13132_v15, 0.0 }
 0x5ba   : > { %v5615_v25 = vadd.f32 %v5543_v26, %v13123_v22  ;;  %v5546_v3 = vadd.f32 %v12371_v14, %v5385_v48 }
 0x5bc   : > { %v5647_v33 = vmax.f32 %v5615_v25, 0.0  ;;  %v5616_v19 = vadd.f32 %v5546_v3, %v13125_v17 }
 0x5be   : > { %v5678_v55 = vsel %vm1689_vm4, %v5647_v33, 0.0  ;;  %v5648_v35 = vmax.f32 %v5616_v19, 0.0  ;;  %v6111_v43 = vpop.f32.mrb[88].mxu0 }
 0x5bf   : > { %v5679_v11 = vadd.f32 %v5678_v55, %v5677_v37  ;;  %v6112_v47 = vpop.f32.mrb[89].mxu0 }
 0x5c0   : > { %v5709_v1 = vsel %vm1689_vm4, %v5648_v35, 0.0  ;;  %v6113_v60 = vadd.f32 %v6112_v47, %v6111_v43  ;;  %v6114_v50 = vpop.f32.mrb[90].mxu0 }
 0x5c1   : > { %v5710_v53 = vadd.f32 %v5709_v1, %v5708_v20  ;;  %v6115_v56 = vpop.f32.mrb[91].mxu0 }
 0x5c2   : > { %v5390_v29 = vadd.f32 %v6113_v60, %v12386_v13  ;;  %v6116_v27 = vadd.f32 %v6115_v56, %v6114_v50 }
 0x5c4   : > { %v5551_v14 = vadd.f32 %v12377_v31, %v5390_v29  ;;  %v5393_v24 = vadd.f32 %v6116_v27, %v12386_v13 }
 0x5c6   : > { %v5617_v51 = vadd.f32 %v5551_v14, %v13127_v58  ;;  %v5554_v34 = vadd.f32 %v12381_v32, %v5393_v24 }
 0x5c8   : > { %v5649_v54 = vmax.f32 %v5617_v51, 0.0  ;;  %v5618_v30 = vadd.f32 %v5554_v34, %v13129_v61 }
 0x5ca   : > { %v5680_v44 = vsel %vm1689_vm4, %v5649_v54, 0.0  ;;  %v5650_v40 = vmax.f32 %v5618_v30, 0.0  ;;  %v6117_v63 = vpop.f32.mrb[92].mxu0 }
 0x5cb   : > { %v5681_v18 = vadd.f32 %v5680_v44, %v5679_v11  ;;  %v6118_v28 = vpop.f32.mrb[93].mxu0  ;;  %v13134_v11 = vld [vmem:[#allocation62_spill] sm:$0xff] }
 0x5cc   : > { %v5711_v12 = vsel %vm1689_vm4, %v5650_v40, 0.0  ;;  %v6119_v31 = vadd.f32 %v6118_v28, %v6117_v63  ;;  %v6120_v23 = vpop.f32.mrb[94].mxu0  ;;  %v13135_v47 = vmax.f32 %v13134_v11, 0.0  ;;  %v13138_v40 = vld [vmem:[#allocation61_spill] sm:$0xff] }
 0x5cd   : > { %v5712_v36 = vadd.f32 %v5711_v12, %v5710_v53  ;;  %v6121_v5 = vpop.f32.mrb[95].mxu0  ;;  %v13136_v53 = vld [vmem:[#allocation64_spill] sm:$0xff]  ;;  %v13139_v63 = vmax.f32 %v13138_v40, 0.0 }
 0x5ce   : > { %v5398_v42 = vadd.f32 %v6119_v31, %v12386_v13  ;;  %v6122_v37 = vadd.f32 %v6121_v5, %v6120_v23  ;;  %v13137_v56 = vmax.f32 %v13136_v53, 0.0  ;;  %v13140_v31 = vld [vmem:[#allocation63_spill] sm:$0xff]  ;;  %v13146_v53 = vld [vmem:[#allocation74_spill] sm:$0xff] }
 0x5cf   : > { %v13141_v23 = vmax.f32 %v13140_v31, 0.0 }
 0x5d0   : > { %v5559_v32 = vadd.f32 %v12375_v16, %v5398_v42  ;;  %v5401_v6 = vadd.f32 %v6122_v37, %v12386_v13 }
 0x5d2   : > { %v5619_v39 = vadd.f32 %v5559_v32, %v13131_v8  ;;  %v5562_v20 = vadd.f32 %v12379_v62, %v5401_v6 }
 0x5d4   : > { %v5651_v10 = vmax.f32 %v5619_v39, 0.0  ;;  %v5620_v26 = vadd.f32 %v5562_v20, %v13133_v49 }
 0x5d6   : > { %v5682_v48 = vsel %vm1689_vm4, %v5651_v10, 0.0  ;;  %v5652_v45 = vmax.f32 %v5620_v26, 0.0  ;;  %v6123_v22 = vpop.f32.mrb[96].mxu0  ;;  %v13142_v26 = vld [vmem:[#allocation75_spill] sm:$0xff] }
 0x5d7   : > { %v5683_v25 = vadd.f32 %v5682_v48, %v5681_v18  ;;  %v6124_v3 = vpop.f32.mrb[97].mxu0  ;;  %v13143_v48 = vmax.f32 %v13142_v26, 0.0 }
 0x5d8   : > { %v5713_v33 = vsel %vm1689_vm4, %v5652_v45, 0.0  ;;  %v6125_v16 = vadd.f32 %v6124_v3, %v6123_v22  ;;  %v6126_v9 = vpop.f32.mrb[98].mxu0 }
 0x5d9   : > { %v5714_v17 = vadd.f32 %v5713_v33, %v5712_v36  ;;  %v6127_v19 = vpop.f32.mrb[99].mxu0 }
 0x5da   : > { %v5406_v55 = vadd.f32 %v6125_v16, %v12386_v13  ;;  %v6128_v35 = vadd.f32 %v6127_v19, %v6126_v9  ;;  %v13144_v16 = vld [vmem:[#allocation77_spill] sm:$0xff] }
 0x5db   : > { %v13145_v9 = vmax.f32 %v13144_v16, 0.0 }
 0x5dc   : > { %v5567_v62 = vadd.f32 %v12391_v41, %v5406_v55  ;;  %v5409_v43 = vadd.f32 %v6128_v35, %v12386_v13 }
 0x5de   : > { %v5621_v1 = vadd.f32 %v5567_v62, %v13135_v47  ;;  %v5570_v60 = vadd.f32 %v12397_v38, %v5409_v43 }
 0x5e0   : > { %v5653_v50 = vmax.f32 %v5621_v1, 0.0  ;;  %v5622_v29 = vadd.f32 %v5570_v60, %v13137_v56  ;;  %v13147_v56 = vmax.f32 %v13146_v53, 0.0 }
 0x5e2   : > { %v5684_v27 = vsel %vm1689_vm4, %v5653_v50, 0.0  ;;  %v5654_v14 = vmax.f32 %v5622_v29, 0.0  ;;  %v6129_v24 = vpop.f32.mrb[100].mxu0 }
 0x5e3   : > { %v6130_v52 = vpop.f32.mrb[101].mxu0  ;;  %v5685_v58 = vadd.f32 %v5684_v27, %v5683_v25 }
 0x5e4   : > { %v5715_v51 = vsel %vm1689_vm4, %v5654_v14, 0.0  ;;  %v6131_v41 = vadd.f32 %v6130_v52, %v6129_v24  ;;  %v6132_v34 = vpop.f32.mrb[102].mxu0  ;;  %v13148_v24 = vld [vmem:[#allocation76_spill] sm:$0xff] }
 0x5e5   : > { %v6133_v54 = vpop.f32.mrb[103].mxu0  ;;  %v5716_v57 = vadd.f32 %v5715_v51, %v5714_v17  ;;  %v13149_v52 = vmax.f32 %v13148_v24, 0.0 }
 0x5e6   : > { %v5414_v61 = vadd.f32 %v6131_v41, %v12386_v13  ;;  %v6134_v30 = vadd.f32 %v6133_v54, %v6132_v34 }
 0x5e8   : > { %v5575_v38 = vadd.f32 %v12388_v21, %v5414_v61  ;;  %v5417_v44 = vadd.f32 %v6134_v30, %v12386_v13 }
 0x5ea   : > { %v5623_v18 = vadd.f32 %v5575_v38, %v13139_v63  ;;  %v5578_v28 = vadd.f32 %v12393_v46, %v5417_v44 }
 0x5ec   : > { %v5655_v12 = vmax.f32 %v5623_v18, 0.0  ;;  %v5624_v36 = vadd.f32 %v5578_v28, %v13141_v23 }
 0x5ee   : > { %v5656_v5 = vmax.f32 %v5624_v36, 0.0  ;;  %v6135_v42 = vpop.f32.mrb[104].mxu0  ;;  %v5686_v37 = vsel %vm1689_vm4, %v5655_v12, 0.0 }
 0x5ef   : > { %v6136_v32 = vpop.f32.mrb[105].mxu0  ;;  %v5687_v6 = vadd.f32 %v5686_v37, %v5685_v58 }
 0x5f0   : > { %v6137_v0 = vadd.f32 %v6136_v32, %v6135_v42  ;;  %v6138_v8 = vpop.f32.mrb[106].mxu0  ;;  %v5717_v21 = vsel %vm1689_vm4, %v5656_v5, 0.0 }
 0x5f1   : > { %v6139_v39 = vpop.f32.mrb[107].mxu0  ;;  %v5718_v20 = vadd.f32 %v5717_v21, %v5716_v57 }
 0x5f2   : > { %v6140_v10 = vadd.f32 %v6139_v39, %v6138_v8  ;;  %v5422_v15 = vadd.f32 %v6137_v0, %v12386_v13 }
 0x5f4   : > { %v5583_v46 = vadd.f32 %v12438_v59, %v5422_v15  ;;  %v5425_v49 = vadd.f32 %v6140_v10, %v12386_v13 }
 0x5f6   : > { %v5625_v45 = vadd.f32 %v5583_v46, %v13143_v48  ;;  %v5586_v22 = vadd.f32 %v12445_v7, %v5425_v49  ;;  %v6141_v25 = vpop.f32.mrb[108].mxu0 }
 0x5f7   : > { %v6142_v3 = vpop.f32.mrb[109].mxu0 }
 0x5f8   : > { %v5657_v33 = vmax.f32 %v5625_v45, 0.0  ;;  %v5626_v17 = vadd.f32 %v5586_v22, %v13145_v9  ;;  %v6143_v19 = vadd.f32 %v6142_v3, %v6141_v25  ;;  %v6144_v55 = vpop.f32.mrb[110].mxu0 }
 0x5f9   : > { %v6145_v35 = vpop.f32.mrb[111].mxu0 }
 0x5fa   : > { %v5688_v62 = vsel %vm1689_vm4, %v5657_v33, 0.0  ;;  %v5658_v59 = vmax.f32 %v5626_v17, 0.0  ;;  %v5430_v43 = vadd.f32 %v6143_v19, %v12386_v13  ;;  %v6146_v11 = vadd.f32 %v6145_v35, %v6144_v55 }
 0x5fb   : > { %v5689_v47 = vadd.f32 %v5688_v62, %v5687_v6 }
 0x5fc   : > { %v5719_v1 = vsel %vm1689_vm4, %v5658_v59, 0.0  ;;  %v5591_v7 = vadd.f32 %v12435_v4, %v5430_v43  ;;  %v5433_v60 = vadd.f32 %v6146_v11, %v12386_v13 }
 0x5fd   : > { %v5720_v50 = vadd.f32 %v5719_v1, %v5718_v20 }
 0x5fe   : > { %v5627_v29 = vadd.f32 %v5591_v7, %v13147_v56  ;;  %v5594_v27 = vadd.f32 %v12441_v2, %v5433_v60 }
 0x600   : > { %v5659_v14 = vmax.f32 %v5627_v29, 0.0  ;;  %v5628_v58 = vadd.f32 %v5594_v27, %v13149_v52 }
 0x602   : > { %v5690_v51 = vsel %vm1689_vm4, %v5659_v14, 0.0  ;;  %v5660_v41 = vmax.f32 %v5628_v58, 0.0 }
 0x603   : > { %v5691_v34 = vadd.f32 %v5690_v51, %v5689_v47 }
 0x604   : > { %v5721_v13 = vsel %vm1689_vm4, %v5660_v41, 0.0 }
 0x605   : > { %v5724_v4 = vmul.f32 0.0625, %v5691_v34  ;;  %v5722_v54 = vadd.f32 %v5721_v13, %v5720_v50 }
 0x607   : > { %5726 = vst.msk [vmem:[%s278_s11] sm:$0xff] %vm1689_vm4, %v5724_v4  ;;  %v5725_v2 = vmul.f32 0.0625, %v5722_v54 }
 0x609   : > { %5727 = vst.msk [vmem:[%s278_s11 + $0x8] sm:$0xff] %vm1689_vm4, %v5725_v2 }
 0x60a PF: > { %s17_s24 = sadd.s32 1, %s8013_s24  }
 0x60b   : > { %p14_p4 = scmp.ge.s32.totalorder %s17_s24, 4  }
 0x60d   :  { %16 = sbr.rel (!%p14_p4) target bundleno = 1 (0x1), region = 80 }

</bundles_post_ra>
